<compile_context>
chip_gen: v6e
topology: v6e:2x2x1
jax: 0.10.0
libtpu: 0.0.40
codegen_flags: <defaults>
</compile_context>

<pallas_src>
import jax
import jax.numpy as jnp
from jax.experimental import pallas as pl
from jax.experimental.pallas import tpu as pltpu


def _round_up(x, m):
    return ((x + m - 1) // m) * m


def _pick_tk(kp):
    """K tile: single step when K is small, else largest aligned divisor."""
    if kp <= 2048:
        return kp
    for tk in (512, 384, 256, 128):
        if kp % tk == 0:
            return tk
    return 128


# ---------------------------- Pallas kernels ----------------------------

def _mm_epilogue(acc, sc_ref, sh_ref, res, relu):
    y = acc * sc_ref[...] + sh_ref[...]
    if res is not None:
        y = y + res
    if relu:
        y = jnp.maximum(y, 0.0)
    return y


def _make_conv_mm_kernel(relu, has_res):
    """MXU matmul with fused BN scale/shift (+residual) (+ReLU) epilogue."""
    if has_res:
        def kernel(a_ref, b_ref, sc_ref, sh_ref, r_ref, o_ref, acc_ref):
            k = pl.program_id(2)

            @pl.when(k == 0)
            def _():
                acc_ref[...] = jnp.zeros_like(acc_ref)

            acc_ref[...] += jnp.dot(a_ref[...], b_ref[...],
                                    preferred_element_type=jnp.float32)

            @pl.when(k == pl.num_programs(2) - 1)
            def _():
                o_ref[...] = _mm_epilogue(acc_ref[...], sc_ref, sh_ref,
                                          r_ref[...], relu).astype(o_ref.dtype)
    else:
        def kernel(a_ref, b_ref, sc_ref, sh_ref, o_ref, acc_ref):
            k = pl.program_id(2)

            @pl.when(k == 0)
            def _():
                acc_ref[...] = jnp.zeros_like(acc_ref)

            acc_ref[...] += jnp.dot(a_ref[...], b_ref[...],
                                    preferred_element_type=jnp.float32)

            @pl.when(k == pl.num_programs(2) - 1)
            def _():
                o_ref[...] = _mm_epilogue(acc_ref[...], sc_ref, sh_ref,
                                          None, relu).astype(o_ref.dtype)
    return kernel


def _max9_kernel(x_ref, o_ref):
    # x_ref: (9, tm, C) stacked 3x3 pooling taps -> elementwise max over taps.
    o_ref[...] = jnp.max(x_ref[...], axis=0)


def _pool_fc_kernel(x_ref, w_ref, b_ref, o_ref):
    # x_ref: (TB, H*W, C): adaptive_avg_pool2d((1,1)) + flatten + Linear.
    pooled = jnp.mean(x_ref[...], axis=1)                      # (TB, C)
    o_ref[...] = (jnp.dot(pooled, w_ref[...],
                          preferred_element_type=jnp.float32) + b_ref[...])


# --------------------- fused conv/matmul building block ------------------

_VMEM_LIMIT = 32 * 1024 * 1024   # safe on v5e/v6e/v7x; tiles use < 8 MiB


def _fused_matmul(a, b, scale, shift, residual, relu):
    """(M,K)bf16 @ (K,Cout)bf16 -> fp32, with fused BN(+res)(+ReLU) epilogue."""
    M, K = a.shape
    Cout = b.shape[1]

    tm = min(256, _round_up(M, 16))          # 16-sublane aligned for bf16 A
    Mp = _round_up(M, tm)
    Np = _round_up(Cout, 128)
    tn = 256 if Np % 256 == 0 else 128
    Kp = _round_up(K, 128)
    tk = _pick_tk(Kp)

    a_p = jnp.pad(a, ((0, Mp - M), (0, Kp - K)))
    b_p = jnp.pad(b, ((0, Kp - K), (0, Np - Cout)))
    sc_p = jnp.pad(scale, ((0, 0), (0, Np - Cout)))
    sh_p = jnp.pad(shift, ((0, 0), (0, Np - Cout)))

    inputs = [a_p, b_p, sc_p, sh_p]
    in_specs = [
        pl.BlockSpec((tm, tk), lambda i, j, k: (i, k)),
        pl.BlockSpec((tk, tn), lambda i, j, k: (k, j)),
        pl.BlockSpec((1, tn), lambda i, j, k: (0, j)),
        pl.BlockSpec((1, tn), lambda i, j, k: (0, j)),
    ]
    has_res = residual is not None
    if has_res:
        r_p = jnp.pad(residual, ((0, Mp - M), (0, Np - Cout)))
        inputs.append(r_p)
        in_specs.append(pl.BlockSpec((tm, tn), lambda i, j, k: (i, j)))

    out = pl.pallas_call(
        _make_conv_mm_kernel(relu, has_res),
        out_shape=jax.ShapeDtypeStruct((Mp, Np), jnp.float32),
        grid_spec=pltpu.PrefetchScalarGridSpec(
            num_scalar_prefetch=0,
            grid=(Mp // tm, Np // tn, Kp // tk),
            in_specs=in_specs,
            out_specs=pl.BlockSpec((tm, tn), lambda i, j, k: (i, j)),
            scratch_shapes=[pltpu.VMEM((tm, tn), jnp.float32)]),
        compiler_params=pltpu.CompilerParams(
            dimension_semantics=("parallel", "parallel", "arbitrary"),
            vmem_limit_bytes=_VMEM_LIMIT),
    )(*inputs)
    return out[:M, :Cout]


def conv_bn_act(x, w, scale, shift, *, stride, padding, relu, residual=None):
    """Conv2d (im2col->MXU) with fused BN(+residual)(+ReLU) epilogue. NHWC."""
    N, H, W, C = x.shape
    KH, KW, Cin, Cout = w.shape
    assert Cin == C
    Ho = (H + 2 * padding - KH) // stride + 1
    Wo = (W + 2 * padding - KW) // stride + 1

    xp = jnp.pad(x, ((0, 0), (padding, padding), (padding, padding), (0, 0)))
    xp = xp.astype(jnp.bfloat16)
    # TODO(synk): stream the KHxKW taps via shifted index_maps on the padded
    # input instead of materializing the im2col matrix in HBM.
    patches = []
    for kh in range(KH):
        for kw in range(KW):
            patches.append(xp[:,
                              kh:kh + stride * (Ho - 1) + 1:stride,
                              kw:kw + stride * (Wo - 1) + 1:stride, :])
    a = jnp.concatenate(patches, axis=-1).reshape(N * Ho * Wo, KH * KW * Cin)
    b = w.reshape(KH * KW * Cin, Cout).astype(jnp.bfloat16)
    res2d = None if residual is None else residual.reshape(N * Ho * Wo, Cout)

    out = _fused_matmul(a, b, scale, shift, res2d, relu)
    return out.reshape(N, Ho, Wo, Cout)


# ------------------------------ other layers -----------------------------

def maxpool_3x3_s2_p1(x):
    """nn.MaxPool2d(kernel_size=3, stride=2, padding=1) in NHWC (tiled)."""
    N, H, W, C = x.shape
    Ho = (H + 2 - 3) // 2 + 1
    Wo = (W + 2 - 3) // 2 + 1
    neg = jnp.finfo(x.dtype).min
    xp = jnp.pad(x, ((0, 0), (1, 1), (1, 1), (0, 0)), constant_values=neg)
    patches = [xp[:,
                  kh:kh + 2 * (Ho - 1) + 1:2,
                  kw:kw + 2 * (Wo - 1) + 1:2, :]
               for kh in range(3) for kw in range(3)]
    M = N * Ho * Wo
    stacked = jnp.stack(patches, axis=0).reshape(9, M, C)

    tm = min(512, _round_up(M, 8))
    Mp = _round_up(M, tm)
    stacked = jnp.pad(stacked, ((0, 0), (0, Mp - M), (0, 0)))

    out = pl.pallas_call(
        _max9_kernel,
        out_shape=jax.ShapeDtypeStruct((Mp, C), x.dtype),
        grid_spec=pltpu.PrefetchScalarGridSpec(
            num_scalar_prefetch=0,
            grid=(Mp // tm,),
            in_specs=[pl.BlockSpec((9, tm, C), lambda i: (0, i, 0))],
            out_specs=pl.BlockSpec((tm, C), lambda i: (i, 0))),
        compiler_params=pltpu.CompilerParams(
            dimension_semantics=("parallel",),
            vmem_limit_bytes=_VMEM_LIMIT),
    )(stacked)
    return out[:M].reshape(N, Ho, Wo, C)


def avgpool_linear(x, w, b):
    """adaptive_avg_pool2d((1,1)) + flatten + Linear, lane-dense output."""
    N, H, W, C = x.shape
    num_out = w.shape[1]
    Npad = _round_up(num_out, 128)
    TB = 8
    Nb = _round_up(N, TB)

    xr = jnp.pad(x.reshape(N, H * W, C), ((0, Nb - N), (0, 0), (0, 0)))
    wp = jnp.pad(w, ((0, 0), (0, Npad - num_out)))
    bp = jnp.pad(b, ((0, 0), (0, Npad - num_out)))

    out = pl.pallas_call(
        _pool_fc_kernel,
        out_shape=jax.ShapeDtypeStruct((Nb, Npad), jnp.float32),
        grid_spec=pltpu.PrefetchScalarGridSpec(
            num_scalar_prefetch=0,
            grid=(Nb // TB,),
            in_specs=[pl.BlockSpec((TB, H * W, C), lambda i: (i, 0, 0)),
                      pl.BlockSpec((C, Npad), lambda i: (0, 0)),
                      pl.BlockSpec((1, Npad), lambda i: (0, 0))],
            out_specs=pl.BlockSpec((TB, Npad), lambda i: (i, 0))),
        compiler_params=pltpu.CompilerParams(
            dimension_semantics=("parallel",),
            vmem_limit_bytes=_VMEM_LIMIT),
    )(xr, wp, bp)
    return out[:N, :num_out]


def basic_block(x, p, stride):
    """torchvision BasicBlock with BN/ReLU/residual fused into the convs."""
    if 'ds_w' in p:
        identity = conv_bn_act(x, p['ds_w'], p['ds_scale'], p['ds_shift'],
                               stride=stride, padding=0, relu=False)
    else:
        identity = x
    out = conv_bn_act(x, p['conv1_w'], p['bn1_scale'], p['bn1_shift'],
                      stride=stride, padding=1, relu=True)
    out = conv_bn_act(out, p['conv2_w'], p['bn2_scale'], p['bn2_shift'],
                      stride=1, padding=1, relu=True, residual=identity)
    return out


# ----------------------- deterministic parameters -----------------------

LAYER_DEFS = [(64, 64, 1), (64, 128, 2), (128, 256, 2), (256, 512, 2)]


def _make_conv(key, kh, kw, cin, cout):
    std = float(kh * kw * cin) ** -0.5
    return (std * jax.random.normal(key, (kh, kw, cin, cout))).astype(jnp.float32)


def _make_bn(key, c):
    """Eval-mode BN folded into per-channel scale/shift (running stats)."""
    k1, k2, k3, k4 = jax.random.split(key, 4)
    gamma = jax.random.uniform(k1, (c,), minval=0.5, maxval=1.5)
    beta = 0.1 * jax.random.normal(k2, (c,))
    mean = 0.1 * jax.random.normal(k3, (c,))
    var = jax.random.uniform(k4, (c,), minval=0.5, maxval=1.5)
    scale = gamma / jnp.sqrt(var + 1e-5)
    shift = beta - mean * scale
    return (scale.reshape(1, c).astype(jnp.float32),
            shift.reshape(1, c).astype(jnp.float32))


def init_params(key, in_channels, num_outputs):
    keys = iter(jax.random.split(key, 128))
    nk = lambda: next(keys)
    params = {'conv1_w': _make_conv(nk(), 7, 7, in_channels, 64)}
    params['bn1_scale'], params['bn1_shift'] = _make_bn(nk(), 64)
    layers = []
    for cin, cout, stride in LAYER_DEFS:
        blocks = []
        for b in range(2):
            s = stride if b == 0 else 1
            bin_ = cin if b == 0 else cout
            blk = {'conv1_w': _make_conv(nk(), 3, 3, bin_, cout)}
            blk['bn1_scale'], blk['bn1_shift'] = _make_bn(nk(), cout)
            blk['conv2_w'] = _make_conv(nk(), 3, 3, cout, cout)
            blk['bn2_scale'], blk['bn2_shift'] = _make_bn(nk(), cout)
            if s != 1 or bin_ != cout:
                blk['ds_w'] = _make_conv(nk(), 1, 1, bin_, cout)
                blk['ds_scale'], blk['ds_shift'] = _make_bn(nk(), cout)
            blocks.append(blk)
        layers.append(blocks)
    params['layers'] = layers
    std = 512.0 ** -0.5
    params['fc_w'] = (std * jax.random.normal(nk(), (512, num_outputs))).astype(jnp.float32)
    params['fc_b'] = (std * jax.random.normal(nk(), (1, num_outputs))).astype(jnp.float32)
    return params


# ------------------------------- forward --------------------------------

@jax.jit
def regressor_forward(x_nchw, params):
    x = jnp.transpose(x_nchw, (0, 2, 3, 1)).astype(jnp.float32)   # NCHW -> NHWC
    x = conv_bn_act(x, params['conv1_w'], params['bn1_scale'],
                    params['bn1_shift'], stride=2, padding=3, relu=True)
    x = maxpool_3x3_s2_p1(x)
    for li, blocks in enumerate(params['layers']):
        for bi, blk in enumerate(blocks):
            s = LAYER_DEFS[li][2] if bi == 0 else 1
            x = basic_block(x, blk, s)
    return avgpool_linear(x, params['fc_w'], params['fc_b'])


if __name__ == "__main__":
    in_channels, num_outputs = 4, 3
    x = jax.random.normal(jax.random.PRNGKey(0), (2, in_channels, 16, 16),
                          dtype=jnp.float32)
    params = init_params(jax.random.PRNGKey(1), in_channels, num_outputs)
    out = regressor_forward(x, params)
    jax.block_until_ready(out)
    assert out.shape == (2, num_outputs) and out.dtype == jnp.float32
    assert bool(jnp.all(jnp.isfinite(out)))
    print("KERNEL_OK")
</pallas_src>

<mosaic_0001>
module attributes {stable_mosaic.version = 11 : i64} {
  func.func @kernel(%arg0: i32, %arg1: i32, %arg2: i32, %arg3: memref<128x256xbf16, #tpu.memory_space<vmem>>, %arg4: memref<256x128xbf16, #tpu.memory_space<vmem>>, %arg5: memref<1x128xf32, #tpu.memory_space<vmem>>, %arg6: memref<1x128xf32, #tpu.memory_space<vmem>>, %arg7: memref<128x128xf32, #tpu.memory_space<vmem>>, %arg8: memref<128x128xf32, #tpu.memory_space<vmem>>) attributes {dimension_semantics = [#tpu.dimension_semantics<parallel>, #tpu.dimension_semantics<parallel>, #tpu.dimension_semantics<arbitrary>], iteration_bounds = array<i64: 1, 1, 1>, scalar_prefetch = 0 : i64, scratch_operands = 1 : i64, tpu.core_type = #tpu.core_type<tc>, window_params = [{transform_indices = @transform_0, window_bounds = array<i64: 128, 256>}, {transform_indices = @transform_1, window_bounds = array<i64: 256, 128>}, {transform_indices = @transform_2, window_bounds = array<i64: 1, 128>}, {transform_indices = @transform_3, window_bounds = array<i64: 1, 128>}, {transform_indices = @transform_4, window_bounds = array<i64: 128, 128>}]} {
    %c0_i32 = arith.constant 0 : i32
    %0 = arith.cmpi eq, %arg2, %c0_i32 : i32
    %1 = arith.extui %0 : i1 to i32
    %c0_i32_0 = arith.constant 0 : i32
    %2 = arith.cmpi ne, %1, %c0_i32_0 : i32
    scf.if %2 {
      %cst_10 = arith.constant 0.000000e+00 : f32
      %12 = vector.broadcast %cst_10 : f32 to vector<128x128xf32>
      %c0_11 = arith.constant 0 : index
      %c0_12 = arith.constant 0 : index
      %13 = vector.load %arg8[%c0_11, %c0_12] : memref<128x128xf32, #tpu.memory_space<vmem>>, vector<128x128xf32>
      tpu.vector_store %arg8[%c0_11, %c0_12], %12 {strides = array<i32>} : memref<128x128xf32, #tpu.memory_space<vmem>>, vector<128x128xf32>,
    } else {
    }
    %c0 = arith.constant 0 : index
    %c0_1 = arith.constant 0 : index
    %3 = vector.load %arg8[%c0, %c0_1] : memref<128x128xf32, #tpu.memory_space<vmem>>, vector<128x128xf32>
    %c0_2 = arith.constant 0 : index
    %c0_3 = arith.constant 0 : index
    %4 = vector.load %arg3[%c0_2, %c0_3] : memref<128x256xbf16, #tpu.memory_space<vmem>>, vector<128x256xbf16>
    %c0_4 = arith.constant 0 : index
    %c0_5 = arith.constant 0 : index
    %5 = vector.load %arg4[%c0_4, %c0_5] : memref<256x128xbf16, #tpu.memory_space<vmem>>, vector<256x128xbf16>
    %cst = arith.constant dense<0.000000e+00> : vector<128x128xf32>
    %6 = tpu.matmul %4, %5, %cst {dimension_numbers = #tpu.dot_dimension_numbers<[1], [0], [0], [1], [0, 0, 1, 1], [], []>} : vector<128x256xbf16>, vector<256x128xbf16>, vector<128x128xf32> -> vector<128x128xf32>
    %7 = arith.addf %3, %6 : vector<128x128xf32>
    %c0_6 = arith.constant 0 : index
    %c0_7 = arith.constant 0 : index
    %8 = vector.load %arg8[%c0_6, %c0_7] : memref<128x128xf32, #tpu.memory_space<vmem>>, vector<128x128xf32>
    tpu.vector_store %arg8[%c0_6, %c0_7], %7 {strides = array<i32>} : memref<128x128xf32, #tpu.memory_space<vmem>>, vector<128x128xf32>,
    %c0_i32_8 = arith.constant 0 : i32
    %9 = arith.cmpi eq, %arg2, %c0_i32_8 : i32
    %10 = arith.extui %9 : i1 to i32
    %c0_i32_9 = arith.constant 0 : i32
    %11 = arith.cmpi ne, %10, %c0_i32_9 : i32
    scf.if %11 {
      %c0_10 = arith.constant 0 : index
      %c0_11 = arith.constant 0 : index
      %12 = vector.load %arg8[%c0_10, %c0_11] : memref<128x128xf32, #tpu.memory_space<vmem>>, vector<128x128xf32>
      %c0_12 = arith.constant 0 : index
      %c0_13 = arith.constant 0 : index
      %13 = vector.load %arg5[%c0_12, %c0_13] : memref<1x128xf32, #tpu.memory_space<vmem>>, vector<1x128xf32>
      %14 = vector.broadcast %13 : vector<1x128xf32> to vector<128x128xf32>
      %15 = arith.mulf %12, %14 : vector<128x128xf32>
      %c0_14 = arith.constant 0 : index
      %c0_15 = arith.constant 0 : index
      %16 = vector.load %arg6[%c0_14, %c0_15] : memref<1x128xf32, #tpu.memory_space<vmem>>, vector<1x128xf32>
      %17 = vector.broadcast %16 : vector<1x128xf32> to vector<128x128xf32>
      %18 = arith.addf %15, %17 : vector<128x128xf32>
      %cst_16 = arith.constant 0.000000e+00 : f32
      %19 = vector.broadcast %cst_16 : f32 to vector<128x128xf32>
      %20 = arith.maximumf %18, %19 : vector<128x128xf32>
      %c0_17 = arith.constant 0 : index
      %c0_18 = arith.constant 0 : index
      %21 = vector.load %arg7[%c0_17, %c0_18] : memref<128x128xf32, #tpu.memory_space<vmem>>, vector<128x128xf32>
      tpu.vector_store %arg7[%c0_17, %c0_18], %20 {strides = array<i32>} : memref<128x128xf32, #tpu.memory_space<vmem>>, vector<128x128xf32>,
    } else {
    }
    return
  }
  func.func @transform_0(%arg0: i32, %arg1: i32, %arg2: i32) -> (i32, i32) {
    %c0_i32 = arith.constant 0 : i32
    return %arg0, %arg2 : i32, i32
  }
  func.func @transform_1(%arg0: i32, %arg1: i32, %arg2: i32) -> (i32, i32) {
    %c0_i32 = arith.constant 0 : i32
    return %arg2, %arg1 : i32, i32
  }
  func.func @transform_2(%arg0: i32, %arg1: i32, %arg2: i32) -> (i32, i32) {
    %c0_i32 = arith.constant 0 : i32
    %c0_i32_0 = arith.constant 0 : i32
    return %c0_i32, %arg1 : i32, i32
  }
  func.func @transform_3(%arg0: i32, %arg1: i32, %arg2: i32) -> (i32, i32) {
    %c0_i32 = arith.constant 0 : i32
    %c0_i32_0 = arith.constant 0 : i32
    return %c0_i32, %arg1 : i32, i32
  }
  func.func @transform_4(%arg0: i32, %arg1: i32, %arg2: i32) -> (i32, i32) {
    %c0_i32 = arith.constant 0 : i32
    return %arg0, %arg1 : i32, i32
  }
}

module attributes {stable_mosaic.version = 11 : i64} {
  func.func @_max9_kernel(%arg0: i32, %arg1: memref<9x32x64xf32, #tpu.memory_space<vmem>>, %arg2: memref<32x64xf32, #tpu.memory_space<vmem>>) attributes {dimension_semantics = [#tpu.dimension_semantics<parallel>], iteration_bounds = array<i64: 1>, scalar_prefetch = 0 : i64, scratch_operands = 0 : i64, tpu.core_type = #tpu.core_type<tc>, window_params = [{transform_indices = @transform_0, window_bounds = array<i64: 9, 32, 64>}, {transform_indices = @transform_1, window_bounds = array<i64: 32, 64>}]} {
    %c0 = arith.constant 0 : index
    %c0_0 = arith.constant 0 : index
    %c0_1 = arith.constant 0 : index
    %0 = vector.load %arg1[%c0, %c0_0, %c0_1] : memref<9x32x64xf32, #tpu.memory_space<vmem>>, vector<9x32x64xf32>
    %cst = arith.constant dense<0xFF800000> : vector<32x64xf32>
    %1 = vector.multi_reduction <maximumf>, %0, %cst [0] : vector<9x32x64xf32> to vector<32x64xf32>
    %c0_2 = arith.constant 0 : index
    %c0_3 = arith.constant 0 : index
    %2 = vector.load %arg2[%c0_2, %c0_3] : memref<32x64xf32, #tpu.memory_space<vmem>>, vector<32x64xf32>
    tpu.vector_store %arg2[%c0_2, %c0_3], %1 {strides = array<i32>} : memref<32x64xf32, #tpu.memory_space<vmem>>, vector<32x64xf32>,
    return
  }
  func.func @transform_0(%arg0: i32) -> (i32, i32, i32) {
    %c0_i32 = arith.constant 0 : i32
    %c0_i32_0 = arith.constant 0 : i32
    %c0_i32_1 = arith.constant 0 : i32
    return %c0_i32, %arg0, %c0_i32_0 : i32, i32, i32
  }
  func.func @transform_1(%arg0: i32) -> (i32, i32) {
    %c0_i32 = arith.constant 0 : i32
    %c0_i32_0 = arith.constant 0 : i32
    return %arg0, %c0_i32 : i32, i32
  }
}

module attributes {stable_mosaic.version = 11 : i64} {
  func.func @kernel(%arg0: i32, %arg1: i32, %arg2: i32, %arg3: memref<32x640xbf16, #tpu.memory_space<vmem>>, %arg4: memref<640x128xbf16, #tpu.memory_space<vmem>>, %arg5: memref<1x128xf32, #tpu.memory_space<vmem>>, %arg6: memref<1x128xf32, #tpu.memory_space<vmem>>, %arg7: memref<32x128xf32, #tpu.memory_space<vmem>>, %arg8: memref<32x128xf32, #tpu.memory_space<vmem>>) attributes {dimension_semantics = [#tpu.dimension_semantics<parallel>, #tpu.dimension_semantics<parallel>, #tpu.dimension_semantics<arbitrary>], iteration_bounds = array<i64: 1, 1, 1>, scalar_prefetch = 0 : i64, scratch_operands = 1 : i64, tpu.core_type = #tpu.core_type<tc>, window_params = [{transform_indices = @transform_0, window_bounds = array<i64: 32, 640>}, {transform_indices = @transform_1, window_bounds = array<i64: 640, 128>}, {transform_indices = @transform_2, window_bounds = array<i64: 1, 128>}, {transform_indices = @transform_3, window_bounds = array<i64: 1, 128>}, {transform_indices = @transform_4, window_bounds = array<i64: 32, 128>}]} {
    %c0_i32 = arith.constant 0 : i32
    %0 = arith.cmpi eq, %arg2, %c0_i32 : i32
    %1 = arith.extui %0 : i1 to i32
    %c0_i32_0 = arith.constant 0 : i32
    %2 = arith.cmpi ne, %1, %c0_i32_0 : i32
    scf.if %2 {
      %cst_10 = arith.constant 0.000000e+00 : f32
      %12 = vector.broadcast %cst_10 : f32 to vector<32x128xf32>
      %c0_11 = arith.constant 0 : index
      %c0_12 = arith.constant 0 : index
      %13 = vector.load %arg8[%c0_11, %c0_12] : memref<32x128xf32, #tpu.memory_space<vmem>>, vector<32x128xf32>
      tpu.vector_store %arg8[%c0_11, %c0_12], %12 {strides = array<i32>} : memref<32x128xf32, #tpu.memory_space<vmem>>, vector<32x128xf32>,
    } else {
    }
    %c0 = arith.constant 0 : index
    %c0_1 = arith.constant 0 : index
    %3 = vector.load %arg8[%c0, %c0_1] : memref<32x128xf32, #tpu.memory_space<vmem>>, vector<32x128xf32>
    %c0_2 = arith.constant 0 : index
    %c0_3 = arith.constant 0 : index
    %4 = vector.load %arg3[%c0_2, %c0_3] : memref<32x640xbf16, #tpu.memory_space<vmem>>, vector<32x640xbf16>
    %c0_4 = arith.constant 0 : index
    %c0_5 = arith.constant 0 : index
    %5 = vector.load %arg4[%c0_4, %c0_5] : memref<640x128xbf16, #tpu.memory_space<vmem>>, vector<640x128xbf16>
    %cst = arith.constant dense<0.000000e+00> : vector<32x128xf32>
    %6 = tpu.matmul %4, %5, %cst {dimension_numbers = #tpu.dot_dimension_numbers<[1], [0], [0], [1], [0, 0, 1, 1], [], []>} : vector<32x640xbf16>, vector<640x128xbf16>, vector<32x128xf32> -> vector<32x128xf32>
    %7 = arith.addf %3, %6 : vector<32x128xf32>
    %c0_6 = arith.constant 0 : index
    %c0_7 = arith.constant 0 : index
    %8 = vector.load %arg8[%c0_6, %c0_7] : memref<32x128xf32, #tpu.memory_space<vmem>>, vector<32x128xf32>
    tpu.vector_store %arg8[%c0_6, %c0_7], %7 {strides = array<i32>} : memref<32x128xf32, #tpu.memory_space<vmem>>, vector<32x128xf32>,
    %c0_i32_8 = arith.constant 0 : i32
    %9 = arith.cmpi eq, %arg2, %c0_i32_8 : i32
    %10 = arith.extui %9 : i1 to i32
    %c0_i32_9 = arith.constant 0 : i32
    %11 = arith.cmpi ne, %10, %c0_i32_9 : i32
    scf.if %11 {
      %c0_10 = arith.constant 0 : index
      %c0_11 = arith.constant 0 : index
      %12 = vector.load %arg8[%c0_10, %c0_11] : memref<32x128xf32, #tpu.memory_space<vmem>>, vector<32x128xf32>
      %c0_12 = arith.constant 0 : index
      %c0_13 = arith.constant 0 : index
      %13 = vector.load %arg5[%c0_12, %c0_13] : memref<1x128xf32, #tpu.memory_space<vmem>>, vector<1x128xf32>
      %14 = vector.broadcast %13 : vector<1x128xf32> to vector<32x128xf32>
      %15 = arith.mulf %12, %14 : vector<32x128xf32>
      %c0_14 = arith.constant 0 : index
      %c0_15 = arith.constant 0 : index
      %16 = vector.load %arg6[%c0_14, %c0_15] : memref<1x128xf32, #tpu.memory_space<vmem>>, vector<1x128xf32>
      %17 = vector.broadcast %16 : vector<1x128xf32> to vector<32x128xf32>
      %18 = arith.addf %15, %17 : vector<32x128xf32>
      %cst_16 = arith.constant 0.000000e+00 : f32
      %19 = vector.broadcast %cst_16 : f32 to vector<32x128xf32>
      %20 = arith.maximumf %18, %19 : vector<32x128xf32>
      %c0_17 = arith.constant 0 : index
      %c0_18 = arith.constant 0 : index
      %21 = vector.load %arg7[%c0_17, %c0_18] : memref<32x128xf32, #tpu.memory_space<vmem>>, vector<32x128xf32>
      tpu.vector_store %arg7[%c0_17, %c0_18], %20 {strides = array<i32>} : memref<32x128xf32, #tpu.memory_space<vmem>>, vector<32x128xf32>,
    } else {
    }
    return
  }
  func.func @transform_0(%arg0: i32, %arg1: i32, %arg2: i32) -> (i32, i32) {
    %c0_i32 = arith.constant 0 : i32
    return %arg0, %arg2 : i32, i32
  }
  func.func @transform_1(%arg0: i32, %arg1: i32, %arg2: i32) -> (i32, i32) {
    %c0_i32 = arith.constant 0 : i32
    return %arg2, %arg1 : i32, i32
  }
  func.func @transform_2(%arg0: i32, %arg1: i32, %arg2: i32) -> (i32, i32) {
    %c0_i32 = arith.constant 0 : i32
    %c0_i32_0 = arith.constant 0 : i32
    return %c0_i32, %arg1 : i32, i32
  }
  func.func @transform_3(%arg0: i32, %arg1: i32, %arg2: i32) -> (i32, i32) {
    %c0_i32 = arith.constant 0 : i32
    %c0_i32_0 = arith.constant 0 : i32
    return %c0_i32, %arg1 : i32, i32
  }
  func.func @transform_4(%arg0: i32, %arg1: i32, %arg2: i32) -> (i32, i32) {
    %c0_i32 = arith.constant 0 : i32
    return %arg0, %arg1 : i32, i32
  }
}

module attributes {stable_mosaic.version = 11 : i64} {
  func.func @kernel(%arg0: i32, %arg1: i32, %arg2: i32, %arg3: memref<32x640xbf16, #tpu.memory_space<vmem>>, %arg4: memref<640x128xbf16, #tpu.memory_space<vmem>>, %arg5: memref<1x128xf32, #tpu.memory_space<vmem>>, %arg6: memref<1x128xf32, #tpu.memory_space<vmem>>, %arg7: memref<32x128xf32, #tpu.memory_space<vmem>>, %arg8: memref<32x128xf32, #tpu.memory_space<vmem>>, %arg9: memref<32x128xf32, #tpu.memory_space<vmem>>) attributes {dimension_semantics = [#tpu.dimension_semantics<parallel>, #tpu.dimension_semantics<parallel>, #tpu.dimension_semantics<arbitrary>], iteration_bounds = array<i64: 1, 1, 1>, scalar_prefetch = 0 : i64, scratch_operands = 1 : i64, tpu.core_type = #tpu.core_type<tc>, window_params = [{transform_indices = @transform_0, window_bounds = array<i64: 32, 640>}, {transform_indices = @transform_1, window_bounds = array<i64: 640, 128>}, {transform_indices = @transform_2, window_bounds = array<i64: 1, 128>}, {transform_indices = @transform_3, window_bounds = array<i64: 1, 128>}, {transform_indices = @transform_4, window_bounds = array<i64: 32, 128>}, {transform_indices = @transform_5, window_bounds = array<i64: 32, 128>}]} {
    %c0_i32 = arith.constant 0 : i32
    %0 = arith.cmpi eq, %arg2, %c0_i32 : i32
    %1 = arith.extui %0 : i1 to i32
    %c0_i32_0 = arith.constant 0 : i32
    %2 = arith.cmpi ne, %1, %c0_i32_0 : i32
    scf.if %2 {
      %cst_10 = arith.constant 0.000000e+00 : f32
      %12 = vector.broadcast %cst_10 : f32 to vector<32x128xf32>
      %c0_11 = arith.constant 0 : index
      %c0_12 = arith.constant 0 : index
      %13 = vector.load %arg9[%c0_11, %c0_12] : memref<32x128xf32, #tpu.memory_space<vmem>>, vector<32x128xf32>
      tpu.vector_store %arg9[%c0_11, %c0_12], %12 {strides = array<i32>} : memref<32x128xf32, #tpu.memory_space<vmem>>, vector<32x128xf32>,
    } else {
    }
    %c0 = arith.constant 0 : index
    %c0_1 = arith.constant 0 : index
    %3 = vector.load %arg9[%c0, %c0_1] : memref<32x128xf32, #tpu.memory_space<vmem>>, vector<32x128xf32>
    %c0_2 = arith.constant 0 : index
    %c0_3 = arith.constant 0 : index
    %4 = vector.load %arg3[%c0_2, %c0_3] : memref<32x640xbf16, #tpu.memory_space<vmem>>, vector<32x640xbf16>
    %c0_4 = arith.constant 0 : index
    %c0_5 = arith.constant 0 : index
    %5 = vector.load %arg4[%c0_4, %c0_5] : memref<640x128xbf16, #tpu.memory_space<vmem>>, vector<640x128xbf16>
    %cst = arith.constant dense<0.000000e+00> : vector<32x128xf32>
    %6 = tpu.matmul %4, %5, %cst {dimension_numbers = #tpu.dot_dimension_numbers<[1], [0], [0], [1], [0, 0, 1, 1], [], []>} : vector<32x640xbf16>, vector<640x128xbf16>, vector<32x128xf32> -> vector<32x128xf32>
    %7 = arith.addf %3, %6 : vector<32x128xf32>
    %c0_6 = arith.constant 0 : index
    %c0_7 = arith.constant 0 : index
    %8 = vector.load %arg9[%c0_6, %c0_7] : memref<32x128xf32, #tpu.memory_space<vmem>>, vector<32x128xf32>
    tpu.vector_store %arg9[%c0_6, %c0_7], %7 {strides = array<i32>} : memref<32x128xf32, #tpu.memory_space<vmem>>, vector<32x128xf32>,
    %c0_i32_8 = arith.constant 0 : i32
    %9 = arith.cmpi eq, %arg2, %c0_i32_8 : i32
    %10 = arith.extui %9 : i1 to i32
    %c0_i32_9 = arith.constant 0 : i32
    %11 = arith.cmpi ne, %10, %c0_i32_9 : i32
    scf.if %11 {
      %c0_10 = arith.constant 0 : index
      %c0_11 = arith.constant 0 : index
      %12 = vector.load %arg9[%c0_10, %c0_11] : memref<32x128xf32, #tpu.memory_space<vmem>>, vector<32x128xf32>
      %c0_12 = arith.constant 0 : index
      %c0_13 = arith.constant 0 : index
      %13 = vector.load %arg7[%c0_12, %c0_13] : memref<32x128xf32, #tpu.memory_space<vmem>>, vector<32x128xf32>
      %c0_14 = arith.constant 0 : index
      %c0_15 = arith.constant 0 : index
      %14 = vector.load %arg5[%c0_14, %c0_15] : memref<1x128xf32, #tpu.memory_space<vmem>>, vector<1x128xf32>
      %15 = vector.broadcast %14 : vector<1x128xf32> to vector<32x128xf32>
      %16 = arith.mulf %12, %15 : vector<32x128xf32>
      %c0_16 = arith.constant 0 : index
      %c0_17 = arith.constant 0 : index
      %17 = vector.load %arg6[%c0_16, %c0_17] : memref<1x128xf32, #tpu.memory_space<vmem>>, vector<1x128xf32>
      %18 = vector.broadcast %17 : vector<1x128xf32> to vector<32x128xf32>
      %19 = arith.addf %16, %18 : vector<32x128xf32>
      %20 = arith.addf %19, %13 : vector<32x128xf32>
      %cst_18 = arith.constant 0.000000e+00 : f32
      %21 = vector.broadcast %cst_18 : f32 to vector<32x128xf32>
      %22 = arith.maximumf %20, %21 : vector<32x128xf32>
      %c0_19 = arith.constant 0 : index
      %c0_20 = arith.constant 0 : index
      %23 = vector.load %arg8[%c0_19, %c0_20] : memref<32x128xf32, #tpu.memory_space<vmem>>, vector<32x128xf32>
      tpu.vector_store %arg8[%c0_19, %c0_20], %22 {strides = array<i32>} : memref<32x128xf32, #tpu.memory_space<vmem>>, vector<32x128xf32>,
    } else {
    }
    return
  }
  func.func @transform_0(%arg0: i32, %arg1: i32, %arg2: i32) -> (i32, i32) {
    %c0_i32 = arith.constant 0 : i32
    return %arg0, %arg2 : i32, i32
  }
  func.func @transform_1(%arg0: i32, %arg1: i32, %arg2: i32) -> (i32, i32) {
    %c0_i32 = arith.constant 0 : i32
    return %arg2, %arg1 : i32, i32
  }
  func.func @transform_2(%arg0: i32, %arg1: i32, %arg2: i32) -> (i32, i32) {
    %c0_i32 = arith.constant 0 : i32
    %c0_i32_0 = arith.constant 0 : i32
    return %c0_i32, %arg1 : i32, i32
  }
  func.func @transform_3(%arg0: i32, %arg1: i32, %arg2: i32) -> (i32, i32) {
    %c0_i32 = arith.constant 0 : i32
    %c0_i32_0 = arith.constant 0 : i32
    return %c0_i32, %arg1 : i32, i32
  }
  func.func @transform_4(%arg0: i32, %arg1: i32, %arg2: i32) -> (i32, i32) {
    %c0_i32 = arith.constant 0 : i32
    return %arg0, %arg1 : i32, i32
  }
  func.func @transform_5(%arg0: i32, %arg1: i32, %arg2: i32) -> (i32, i32) {
    %c0_i32 = arith.constant 0 : i32
    return %arg0, %arg1 : i32, i32
  }
}

module attributes {stable_mosaic.version = 11 : i64} {
  func.func @kernel(%arg0: i32, %arg1: i32, %arg2: i32, %arg3: memref<16x640xbf16, #tpu.memory_space<vmem>>, %arg4: memref<640x128xbf16, #tpu.memory_space<vmem>>, %arg5: memref<1x128xf32, #tpu.memory_space<vmem>>, %arg6: memref<1x128xf32, #tpu.memory_space<vmem>>, %arg7: memref<16x128xf32, #tpu.memory_space<vmem>>, %arg8: memref<16x128xf32, #tpu.memory_space<vmem>>) attributes {dimension_semantics = [#tpu.dimension_semantics<parallel>, #tpu.dimension_semantics<parallel>, #tpu.dimension_semantics<arbitrary>], iteration_bounds = array<i64: 1, 1, 1>, scalar_prefetch = 0 : i64, scratch_operands = 1 : i64, tpu.core_type = #tpu.core_type<tc>, window_params = [{transform_indices = @transform_0, window_bounds = array<i64: 16, 640>}, {transform_indices = @transform_1, window_bounds = array<i64: 640, 128>}, {transform_indices = @transform_2, window_bounds = array<i64: 1, 128>}, {transform_indices = @transform_3, window_bounds = array<i64: 1, 128>}, {transform_indices = @transform_4, window_bounds = array<i64: 16, 128>}]} {
    %c0_i32 = arith.constant 0 : i32
    %0 = arith.cmpi eq, %arg2, %c0_i32 : i32
    %1 = arith.extui %0 : i1 to i32
    %c0_i32_0 = arith.constant 0 : i32
    %2 = arith.cmpi ne, %1, %c0_i32_0 : i32
    scf.if %2 {
      %cst_10 = arith.constant 0.000000e+00 : f32
      %12 = vector.broadcast %cst_10 : f32 to vector<16x128xf32>
      %c0_11 = arith.constant 0 : index
      %c0_12 = arith.constant 0 : index
      %13 = vector.load %arg8[%c0_11, %c0_12] : memref<16x128xf32, #tpu.memory_space<vmem>>, vector<16x128xf32>
      tpu.vector_store %arg8[%c0_11, %c0_12], %12 {strides = array<i32>} : memref<16x128xf32, #tpu.memory_space<vmem>>, vector<16x128xf32>,
    } else {
    }
    %c0 = arith.constant 0 : index
    %c0_1 = arith.constant 0 : index
    %3 = vector.load %arg8[%c0, %c0_1] : memref<16x128xf32, #tpu.memory_space<vmem>>, vector<16x128xf32>
    %c0_2 = arith.constant 0 : index
    %c0_3 = arith.constant 0 : index
    %4 = vector.load %arg3[%c0_2, %c0_3] : memref<16x640xbf16, #tpu.memory_space<vmem>>, vector<16x640xbf16>
    %c0_4 = arith.constant 0 : index
    %c0_5 = arith.constant 0 : index
    %5 = vector.load %arg4[%c0_4, %c0_5] : memref<640x128xbf16, #tpu.memory_space<vmem>>, vector<640x128xbf16>
    %cst = arith.constant dense<0.000000e+00> : vector<16x128xf32>
    %6 = tpu.matmul %4, %5, %cst {dimension_numbers = #tpu.dot_dimension_numbers<[1], [0], [0], [1], [0, 0, 1, 1], [], []>} : vector<16x640xbf16>, vector<640x128xbf16>, vector<16x128xf32> -> vector<16x128xf32>
    %7 = arith.addf %3, %6 : vector<16x128xf32>
    %c0_6 = arith.constant 0 : index
    %c0_7 = arith.constant 0 : index
    %8 = vector.load %arg8[%c0_6, %c0_7] : memref<16x128xf32, #tpu.memory_space<vmem>>, vector<16x128xf32>
    tpu.vector_store %arg8[%c0_6, %c0_7], %7 {strides = array<i32>} : memref<16x128xf32, #tpu.memory_space<vmem>>, vector<16x128xf32>,
    %c0_i32_8 = arith.constant 0 : i32
    %9 = arith.cmpi eq, %arg2, %c0_i32_8 : i32
    %10 = arith.extui %9 : i1 to i32
    %c0_i32_9 = arith.constant 0 : i32
    %11 = arith.cmpi ne, %10, %c0_i32_9 : i32
    scf.if %11 {
      %c0_10 = arith.constant 0 : index
      %c0_11 = arith.constant 0 : index
      %12 = vector.load %arg8[%c0_10, %c0_11] : memref<16x128xf32, #tpu.memory_space<vmem>>, vector<16x128xf32>
      %c0_12 = arith.constant 0 : index
      %c0_13 = arith.constant 0 : index
      %13 = vector.load %arg5[%c0_12, %c0_13] : memref<1x128xf32, #tpu.memory_space<vmem>>, vector<1x128xf32>
      %14 = vector.broadcast %13 : vector<1x128xf32> to vector<16x128xf32>
      %15 = arith.mulf %12, %14 : vector<16x128xf32>
      %c0_14 = arith.constant 0 : index
      %c0_15 = arith.constant 0 : index
      %16 = vector.load %arg6[%c0_14, %c0_15] : memref<1x128xf32, #tpu.memory_space<vmem>>, vector<1x128xf32>
      %17 = vector.broadcast %16 : vector<1x128xf32> to vector<16x128xf32>
      %18 = arith.addf %15, %17 : vector<16x128xf32>
      %cst_16 = arith.constant 0.000000e+00 : f32
      %19 = vector.broadcast %cst_16 : f32 to vector<16x128xf32>
      %20 = arith.maximumf %18, %19 : vector<16x128xf32>
      %c0_17 = arith.constant 0 : index
      %c0_18 = arith.constant 0 : index
      %21 = vector.load %arg7[%c0_17, %c0_18] : memref<16x128xf32, #tpu.memory_space<vmem>>, vector<16x128xf32>
      tpu.vector_store %arg7[%c0_17, %c0_18], %20 {strides = array<i32>} : memref<16x128xf32, #tpu.memory_space<vmem>>, vector<16x128xf32>,
    } else {
    }
    return
  }
  func.func @transform_0(%arg0: i32, %arg1: i32, %arg2: i32) -> (i32, i32) {
    %c0_i32 = arith.constant 0 : i32
    return %arg0, %arg2 : i32, i32
  }
  func.func @transform_1(%arg0: i32, %arg1: i32, %arg2: i32) -> (i32, i32) {
    %c0_i32 = arith.constant 0 : i32
    return %arg2, %arg1 : i32, i32
  }
  func.func @transform_2(%arg0: i32, %arg1: i32, %arg2: i32) -> (i32, i32) {
    %c0_i32 = arith.constant 0 : i32
    %c0_i32_0 = arith.constant 0 : i32
    return %c0_i32, %arg1 : i32, i32
  }
  func.func @transform_3(%arg0: i32, %arg1: i32, %arg2: i32) -> (i32, i32) {
    %c0_i32 = arith.constant 0 : i32
    %c0_i32_0 = arith.constant 0 : i32
    return %c0_i32, %arg1 : i32, i32
  }
  func.func @transform_4(%arg0: i32, %arg1: i32, %arg2: i32) -> (i32, i32) {
    %c0_i32 = arith.constant 0 : i32
    return %arg0, %arg1 : i32, i32
  }
}

module attributes {stable_mosaic.version = 11 : i64} {
  func.func @kernel(%arg0: i32, %arg1: i32, %arg2: i32, %arg3: memref<16x128xbf16, #tpu.memory_space<vmem>>, %arg4: memref<128x128xbf16, #tpu.memory_space<vmem>>, %arg5: memref<1x128xf32, #tpu.memory_space<vmem>>, %arg6: memref<1x128xf32, #tpu.memory_space<vmem>>, %arg7: memref<16x128xf32, #tpu.memory_space<vmem>>, %arg8: memref<16x128xf32, #tpu.memory_space<vmem>>) attributes {dimension_semantics = [#tpu.dimension_semantics<parallel>, #tpu.dimension_semantics<parallel>, #tpu.dimension_semantics<arbitrary>], iteration_bounds = array<i64: 1, 1, 1>, scalar_prefetch = 0 : i64, scratch_operands = 1 : i64, tpu.core_type = #tpu.core_type<tc>, window_params = [{transform_indices = @transform_0, window_bounds = array<i64: 16, 128>}, {transform_indices = @transform_1, window_bounds = array<i64: 128, 128>}, {transform_indices = @transform_2, window_bounds = array<i64: 1, 128>}, {transform_indices = @transform_3, window_bounds = array<i64: 1, 128>}, {transform_indices = @transform_4, window_bounds = array<i64: 16, 128>}]} {
    %c0_i32 = arith.constant 0 : i32
    %0 = arith.cmpi eq, %arg2, %c0_i32 : i32
    %1 = arith.extui %0 : i1 to i32
    %c0_i32_0 = arith.constant 0 : i32
    %2 = arith.cmpi ne, %1, %c0_i32_0 : i32
    scf.if %2 {
      %cst_10 = arith.constant 0.000000e+00 : f32
      %12 = vector.broadcast %cst_10 : f32 to vector<16x128xf32>
      %c0_11 = arith.constant 0 : index
      %c0_12 = arith.constant 0 : index
      %13 = vector.load %arg8[%c0_11, %c0_12] : memref<16x128xf32, #tpu.memory_space<vmem>>, vector<16x128xf32>
      tpu.vector_store %arg8[%c0_11, %c0_12], %12 {strides = array<i32>} : memref<16x128xf32, #tpu.memory_space<vmem>>, vector<16x128xf32>,
    } else {
    }
    %c0 = arith.constant 0 : index
    %c0_1 = arith.constant 0 : index
    %3 = vector.load %arg8[%c0, %c0_1] : memref<16x128xf32, #tpu.memory_space<vmem>>, vector<16x128xf32>
    %c0_2 = arith.constant 0 : index
    %c0_3 = arith.constant 0 : index
    %4 = vector.load %arg3[%c0_2, %c0_3] : memref<16x128xbf16, #tpu.memory_space<vmem>>, vector<16x128xbf16>
    %c0_4 = arith.constant 0 : index
    %c0_5 = arith.constant 0 : index
    %5 = vector.load %arg4[%c0_4, %c0_5] : memref<128x128xbf16, #tpu.memory_space<vmem>>, vector<128x128xbf16>
    %cst = arith.constant dense<0.000000e+00> : vector<16x128xf32>
    %6 = tpu.matmul %4, %5, %cst {dimension_numbers = #tpu.dot_dimension_numbers<[1], [0], [0], [1], [0, 0, 1, 1], [], []>} : vector<16x128xbf16>, vector<128x128xbf16>, vector<16x128xf32> -> vector<16x128xf32>
    %7 = arith.addf %3, %6 : vector<16x128xf32>
    %c0_6 = arith.constant 0 : index
    %c0_7 = arith.constant 0 : index
    %8 = vector.load %arg8[%c0_6, %c0_7] : memref<16x128xf32, #tpu.memory_space<vmem>>, vector<16x128xf32>
    tpu.vector_store %arg8[%c0_6, %c0_7], %7 {strides = array<i32>} : memref<16x128xf32, #tpu.memory_space<vmem>>, vector<16x128xf32>,
    %c0_i32_8 = arith.constant 0 : i32
    %9 = arith.cmpi eq, %arg2, %c0_i32_8 : i32
    %10 = arith.extui %9 : i1 to i32
    %c0_i32_9 = arith.constant 0 : i32
    %11 = arith.cmpi ne, %10, %c0_i32_9 : i32
    scf.if %11 {
      %c0_10 = arith.constant 0 : index
      %c0_11 = arith.constant 0 : index
      %12 = vector.load %arg8[%c0_10, %c0_11] : memref<16x128xf32, #tpu.memory_space<vmem>>, vector<16x128xf32>
      %c0_12 = arith.constant 0 : index
      %c0_13 = arith.constant 0 : index
      %13 = vector.load %arg5[%c0_12, %c0_13] : memref<1x128xf32, #tpu.memory_space<vmem>>, vector<1x128xf32>
      %14 = vector.broadcast %13 : vector<1x128xf32> to vector<16x128xf32>
      %15 = arith.mulf %12, %14 : vector<16x128xf32>
      %c0_14 = arith.constant 0 : index
      %c0_15 = arith.constant 0 : index
      %16 = vector.load %arg6[%c0_14, %c0_15] : memref<1x128xf32, #tpu.memory_space<vmem>>, vector<1x128xf32>
      %17 = vector.broadcast %16 : vector<1x128xf32> to vector<16x128xf32>
      %18 = arith.addf %15, %17 : vector<16x128xf32>
      %c0_16 = arith.constant 0 : index
      %c0_17 = arith.constant 0 : index
      %19 = vector.load %arg7[%c0_16, %c0_17] : memref<16x128xf32, #tpu.memory_space<vmem>>, vector<16x128xf32>
      tpu.vector_store %arg7[%c0_16, %c0_17], %18 {strides = array<i32>} : memref<16x128xf32, #tpu.memory_space<vmem>>, vector<16x128xf32>,
    } else {
    }
    return
  }
  func.func @transform_0(%arg0: i32, %arg1: i32, %arg2: i32) -> (i32, i32) {
    %c0_i32 = arith.constant 0 : i32
    return %arg0, %arg2 : i32, i32
  }
  func.func @transform_1(%arg0: i32, %arg1: i32, %arg2: i32) -> (i32, i32) {
    %c0_i32 = arith.constant 0 : i32
    return %arg2, %arg1 : i32, i32
  }
  func.func @transform_2(%arg0: i32, %arg1: i32, %arg2: i32) -> (i32, i32) {
    %c0_i32 = arith.constant 0 : i32
    %c0_i32_0 = arith.constant 0 : i32
    return %c0_i32, %arg1 : i32, i32
  }
  func.func @transform_3(%arg0: i32, %arg1: i32, %arg2: i32) -> (i32, i32) {
    %c0_i32 = arith.constant 0 : i32
    %c0_i32_0 = arith.constant 0 : i32
    return %c0_i32, %arg1 : i32, i32
  }
  func.func @transform_4(%arg0: i32, %arg1: i32, %arg2: i32) -> (i32, i32) {
    %c0_i32 = arith.constant 0 : i32
    return %arg0, %arg1 : i32, i32
  }
}

module attributes {stable_mosaic.version = 11 : i64} {
  func.func @kernel(%arg0: i32, %arg1: i32, %arg2: i32, %arg3: memref<16x1152xbf16, #tpu.memory_space<vmem>>, %arg4: memref<1152x128xbf16, #tpu.memory_space<vmem>>, %arg5: memref<1x128xf32, #tpu.memory_space<vmem>>, %arg6: memref<1x128xf32, #tpu.memory_space<vmem>>, %arg7: memref<16x128xf32, #tpu.memory_space<vmem>>, %arg8: memref<16x128xf32, #tpu.memory_space<vmem>>, %arg9: memref<16x128xf32, #tpu.memory_space<vmem>>) attributes {dimension_semantics = [#tpu.dimension_semantics<parallel>, #tpu.dimension_semantics<parallel>, #tpu.dimension_semantics<arbitrary>], iteration_bounds = array<i64: 1, 1, 1>, scalar_prefetch = 0 : i64, scratch_operands = 1 : i64, tpu.core_type = #tpu.core_type<tc>, window_params = [{transform_indices = @transform_0, window_bounds = array<i64: 16, 1152>}, {transform_indices = @transform_1, window_bounds = array<i64: 1152, 128>}, {transform_indices = @transform_2, window_bounds = array<i64: 1, 128>}, {transform_indices = @transform_3, window_bounds = array<i64: 1, 128>}, {transform_indices = @transform_4, window_bounds = array<i64: 16, 128>}, {transform_indices = @transform_5, window_bounds = array<i64: 16, 128>}]} {
    %c0_i32 = arith.constant 0 : i32
    %0 = arith.cmpi eq, %arg2, %c0_i32 : i32
    %1 = arith.extui %0 : i1 to i32
    %c0_i32_0 = arith.constant 0 : i32
    %2 = arith.cmpi ne, %1, %c0_i32_0 : i32
    scf.if %2 {
      %cst_10 = arith.constant 0.000000e+00 : f32
      %12 = vector.broadcast %cst_10 : f32 to vector<16x128xf32>
      %c0_11 = arith.constant 0 : index
      %c0_12 = arith.constant 0 : index
      %13 = vector.load %arg9[%c0_11, %c0_12] : memref<16x128xf32, #tpu.memory_space<vmem>>, vector<16x128xf32>
      tpu.vector_store %arg9[%c0_11, %c0_12], %12 {strides = array<i32>} : memref<16x128xf32, #tpu.memory_space<vmem>>, vector<16x128xf32>,
    } else {
    }
    %c0 = arith.constant 0 : index
    %c0_1 = arith.constant 0 : index
    %3 = vector.load %arg9[%c0, %c0_1] : memref<16x128xf32, #tpu.memory_space<vmem>>, vector<16x128xf32>
    %c0_2 = arith.constant 0 : index
    %c0_3 = arith.constant 0 : index
    %4 = vector.load %arg3[%c0_2, %c0_3] : memref<16x1152xbf16, #tpu.memory_space<vmem>>, vector<16x1152xbf16>
    %c0_4 = arith.constant 0 : index
    %c0_5 = arith.constant 0 : index
    %5 = vector.load %arg4[%c0_4, %c0_5] : memref<1152x128xbf16, #tpu.memory_space<vmem>>, vector<1152x128xbf16>
    %cst = arith.constant dense<0.000000e+00> : vector<16x128xf32>
    %6 = tpu.matmul %4, %5, %cst {dimension_numbers = #tpu.dot_dimension_numbers<[1], [0], [0], [1], [0, 0, 1, 1], [], []>} : vector<16x1152xbf16>, vector<1152x128xbf16>, vector<16x128xf32> -> vector<16x128xf32>
    %7 = arith.addf %3, %6 : vector<16x128xf32>
    %c0_6 = arith.constant 0 : index
    %c0_7 = arith.constant 0 : index
    %8 = vector.load %arg9[%c0_6, %c0_7] : memref<16x128xf32, #tpu.memory_space<vmem>>, vector<16x128xf32>
    tpu.vector_store %arg9[%c0_6, %c0_7], %7 {strides = array<i32>} : memref<16x128xf32, #tpu.memory_space<vmem>>, vector<16x128xf32>,
    %c0_i32_8 = arith.constant 0 : i32
    %9 = arith.cmpi eq, %arg2, %c0_i32_8 : i32
    %10 = arith.extui %9 : i1 to i32
    %c0_i32_9 = arith.constant 0 : i32
    %11 = arith.cmpi ne, %10, %c0_i32_9 : i32
    scf.if %11 {
      %c0_10 = arith.constant 0 : index
      %c0_11 = arith.constant 0 : index
      %12 = vector.load %arg9[%c0_10, %c0_11] : memref<16x128xf32, #tpu.memory_space<vmem>>, vector<16x128xf32>
      %c0_12 = arith.constant 0 : index
      %c0_13 = arith.constant 0 : index
      %13 = vector.load %arg7[%c0_12, %c0_13] : memref<16x128xf32, #tpu.memory_space<vmem>>, vector<16x128xf32>
      %c0_14 = arith.constant 0 : index
      %c0_15 = arith.constant 0 : index
      %14 = vector.load %arg5[%c0_14, %c0_15] : memref<1x128xf32, #tpu.memory_space<vmem>>, vector<1x128xf32>
      %15 = vector.broadcast %14 : vector<1x128xf32> to vector<16x128xf32>
      %16 = arith.mulf %12, %15 : vector<16x128xf32>
      %c0_16 = arith.constant 0 : index
      %c0_17 = arith.constant 0 : index
      %17 = vector.load %arg6[%c0_16, %c0_17] : memref<1x128xf32, #tpu.memory_space<vmem>>, vector<1x128xf32>
      %18 = vector.broadcast %17 : vector<1x128xf32> to vector<16x128xf32>
      %19 = arith.addf %16, %18 : vector<16x128xf32>
      %20 = arith.addf %19, %13 : vector<16x128xf32>
      %cst_18 = arith.constant 0.000000e+00 : f32
      %21 = vector.broadcast %cst_18 : f32 to vector<16x128xf32>
      %22 = arith.maximumf %20, %21 : vector<16x128xf32>
      %c0_19 = arith.constant 0 : index
      %c0_20 = arith.constant 0 : index
      %23 = vector.load %arg8[%c0_19, %c0_20] : memref<16x128xf32, #tpu.memory_space<vmem>>, vector<16x128xf32>
      tpu.vector_store %arg8[%c0_19, %c0_20], %22 {strides = array<i32>} : memref<16x128xf32, #tpu.memory_space<vmem>>, vector<16x128xf32>,
    } else {
    }
    return
  }
  func.func @transform_0(%arg0: i32, %arg1: i32, %arg2: i32) -> (i32, i32) {
    %c0_i32 = arith.constant 0 : i32
    return %arg0, %arg2 : i32, i32
  }
  func.func @transform_1(%arg0: i32, %arg1: i32, %arg2: i32) -> (i32, i32) {
    %c0_i32 = arith.constant 0 : i32
    return %arg2, %arg1 : i32, i32
  }
  func.func @transform_2(%arg0: i32, %arg1: i32, %arg2: i32) -> (i32, i32) {
    %c0_i32 = arith.constant 0 : i32
    %c0_i32_0 = arith.constant 0 : i32
    return %c0_i32, %arg1 : i32, i32
  }
  func.func @transform_3(%arg0: i32, %arg1: i32, %arg2: i32) -> (i32, i32) {
    %c0_i32 = arith.constant 0 : i32
    %c0_i32_0 = arith.constant 0 : i32
    return %c0_i32, %arg1 : i32, i32
  }
  func.func @transform_4(%arg0: i32, %arg1: i32, %arg2: i32) -> (i32, i32) {
    %c0_i32 = arith.constant 0 : i32
    return %arg0, %arg1 : i32, i32
  }
  func.func @transform_5(%arg0: i32, %arg1: i32, %arg2: i32) -> (i32, i32) {
    %c0_i32 = arith.constant 0 : i32
    return %arg0, %arg1 : i32, i32
  }
}

module attributes {stable_mosaic.version = 11 : i64} {
  func.func @kernel(%arg0: i32, %arg1: i32, %arg2: i32, %arg3: memref<16x1152xbf16, #tpu.memory_space<vmem>>, %arg4: memref<1152x128xbf16, #tpu.memory_space<vmem>>, %arg5: memref<1x128xf32, #tpu.memory_space<vmem>>, %arg6: memref<1x128xf32, #tpu.memory_space<vmem>>, %arg7: memref<16x128xf32, #tpu.memory_space<vmem>>, %arg8: memref<16x128xf32, #tpu.memory_space<vmem>>) attributes {dimension_semantics = [#tpu.dimension_semantics<parallel>, #tpu.dimension_semantics<parallel>, #tpu.dimension_semantics<arbitrary>], iteration_bounds = array<i64: 1, 1, 1>, scalar_prefetch = 0 : i64, scratch_operands = 1 : i64, tpu.core_type = #tpu.core_type<tc>, window_params = [{transform_indices = @transform_0, window_bounds = array<i64: 16, 1152>}, {transform_indices = @transform_1, window_bounds = array<i64: 1152, 128>}, {transform_indices = @transform_2, window_bounds = array<i64: 1, 128>}, {transform_indices = @transform_3, window_bounds = array<i64: 1, 128>}, {transform_indices = @transform_4, window_bounds = array<i64: 16, 128>}]} {
    %c0_i32 = arith.constant 0 : i32
    %0 = arith.cmpi eq, %arg2, %c0_i32 : i32
    %1 = arith.extui %0 : i1 to i32
    %c0_i32_0 = arith.constant 0 : i32
    %2 = arith.cmpi ne, %1, %c0_i32_0 : i32
    scf.if %2 {
      %cst_10 = arith.constant 0.000000e+00 : f32
      %12 = vector.broadcast %cst_10 : f32 to vector<16x128xf32>
      %c0_11 = arith.constant 0 : index
      %c0_12 = arith.constant 0 : index
      %13 = vector.load %arg8[%c0_11, %c0_12] : memref<16x128xf32, #tpu.memory_space<vmem>>, vector<16x128xf32>
      tpu.vector_store %arg8[%c0_11, %c0_12], %12 {strides = array<i32>} : memref<16x128xf32, #tpu.memory_space<vmem>>, vector<16x128xf32>,
    } else {
    }
    %c0 = arith.constant 0 : index
    %c0_1 = arith.constant 0 : index
    %3 = vector.load %arg8[%c0, %c0_1] : memref<16x128xf32, #tpu.memory_space<vmem>>, vector<16x128xf32>
    %c0_2 = arith.constant 0 : index
    %c0_3 = arith.constant 0 : index
    %4 = vector.load %arg3[%c0_2, %c0_3] : memref<16x1152xbf16, #tpu.memory_space<vmem>>, vector<16x1152xbf16>
    %c0_4 = arith.constant 0 : index
    %c0_5 = arith.constant 0 : index
    %5 = vector.load %arg4[%c0_4, %c0_5] : memref<1152x128xbf16, #tpu.memory_space<vmem>>, vector<1152x128xbf16>
    %cst = arith.constant dense<0.000000e+00> : vector<16x128xf32>
    %6 = tpu.matmul %4, %5, %cst {dimension_numbers = #tpu.dot_dimension_numbers<[1], [0], [0], [1], [0, 0, 1, 1], [], []>} : vector<16x1152xbf16>, vector<1152x128xbf16>, vector<16x128xf32> -> vector<16x128xf32>
    %7 = arith.addf %3, %6 : vector<16x128xf32>
    %c0_6 = arith.constant 0 : index
    %c0_7 = arith.constant 0 : index
    %8 = vector.load %arg8[%c0_6, %c0_7] : memref<16x128xf32, #tpu.memory_space<vmem>>, vector<16x128xf32>
    tpu.vector_store %arg8[%c0_6, %c0_7], %7 {strides = array<i32>} : memref<16x128xf32, #tpu.memory_space<vmem>>, vector<16x128xf32>,
    %c0_i32_8 = arith.constant 0 : i32
    %9 = arith.cmpi eq, %arg2, %c0_i32_8 : i32
    %10 = arith.extui %9 : i1 to i32
    %c0_i32_9 = arith.constant 0 : i32
    %11 = arith.cmpi ne, %10, %c0_i32_9 : i32
    scf.if %11 {
      %c0_10 = arith.constant 0 : index
      %c0_11 = arith.constant 0 : index
      %12 = vector.load %arg8[%c0_10, %c0_11] : memref<16x128xf32, #tpu.memory_space<vmem>>, vector<16x128xf32>
      %c0_12 = arith.constant 0 : index
      %c0_13 = arith.constant 0 : index
      %13 = vector.load %arg5[%c0_12, %c0_13] : memref<1x128xf32, #tpu.memory_space<vmem>>, vector<1x128xf32>
      %14 = vector.broadcast %13 : vector<1x128xf32> to vector<16x128xf32>
      %15 = arith.mulf %12, %14 : vector<16x128xf32>
      %c0_14 = arith.constant 0 : index
      %c0_15 = arith.constant 0 : index
      %16 = vector.load %arg6[%c0_14, %c0_15] : memref<1x128xf32, #tpu.memory_space<vmem>>, vector<1x128xf32>
      %17 = vector.broadcast %16 : vector<1x128xf32> to vector<16x128xf32>
      %18 = arith.addf %15, %17 : vector<16x128xf32>
      %cst_16 = arith.constant 0.000000e+00 : f32
      %19 = vector.broadcast %cst_16 : f32 to vector<16x128xf32>
      %20 = arith.maximumf %18, %19 : vector<16x128xf32>
      %c0_17 = arith.constant 0 : index
      %c0_18 = arith.constant 0 : index
      %21 = vector.load %arg7[%c0_17, %c0_18] : memref<16x128xf32, #tpu.memory_space<vmem>>, vector<16x128xf32>
      tpu.vector_store %arg7[%c0_17, %c0_18], %20 {strides = array<i32>} : memref<16x128xf32, #tpu.memory_space<vmem>>, vector<16x128xf32>,
    } else {
    }
    return
  }
  func.func @transform_0(%arg0: i32, %arg1: i32, %arg2: i32) -> (i32, i32) {
    %c0_i32 = arith.constant 0 : i32
    return %arg0, %arg2 : i32, i32
  }
  func.func @transform_1(%arg0: i32, %arg1: i32, %arg2: i32) -> (i32, i32) {
    %c0_i32 = arith.constant 0 : i32
    return %arg2, %arg1 : i32, i32
  }
  func.func @transform_2(%arg0: i32, %arg1: i32, %arg2: i32) -> (i32, i32) {
    %c0_i32 = arith.constant 0 : i32
    %c0_i32_0 = arith.constant 0 : i32
    return %c0_i32, %arg1 : i32, i32
  }
  func.func @transform_3(%arg0: i32, %arg1: i32, %arg2: i32) -> (i32, i32) {
    %c0_i32 = arith.constant 0 : i32
    %c0_i32_0 = arith.constant 0 : i32
    return %c0_i32, %arg1 : i32, i32
  }
  func.func @transform_4(%arg0: i32, %arg1: i32, %arg2: i32) -> (i32, i32) {
    %c0_i32 = arith.constant 0 : i32
    return %arg0, %arg1 : i32, i32
  }
}

module attributes {stable_mosaic.version = 11 : i64} {
  func.func @kernel(%arg0: i32, %arg1: i32, %arg2: i32, %arg3: memref<16x1152xbf16, #tpu.memory_space<vmem>>, %arg4: memref<1152x256xbf16, #tpu.memory_space<vmem>>, %arg5: memref<1x256xf32, #tpu.memory_space<vmem>>, %arg6: memref<1x256xf32, #tpu.memory_space<vmem>>, %arg7: memref<16x256xf32, #tpu.memory_space<vmem>>, %arg8: memref<16x256xf32, #tpu.memory_space<vmem>>) attributes {dimension_semantics = [#tpu.dimension_semantics<parallel>, #tpu.dimension_semantics<parallel>, #tpu.dimension_semantics<arbitrary>], iteration_bounds = array<i64: 1, 1, 1>, scalar_prefetch = 0 : i64, scratch_operands = 1 : i64, tpu.core_type = #tpu.core_type<tc>, window_params = [{transform_indices = @transform_0, window_bounds = array<i64: 16, 1152>}, {transform_indices = @transform_1, window_bounds = array<i64: 1152, 256>}, {transform_indices = @transform_2, window_bounds = array<i64: 1, 256>}, {transform_indices = @transform_3, window_bounds = array<i64: 1, 256>}, {transform_indices = @transform_4, window_bounds = array<i64: 16, 256>}]} {
    %c0_i32 = arith.constant 0 : i32
    %0 = arith.cmpi eq, %arg2, %c0_i32 : i32
    %1 = arith.extui %0 : i1 to i32
    %c0_i32_0 = arith.constant 0 : i32
    %2 = arith.cmpi ne, %1, %c0_i32_0 : i32
    scf.if %2 {
      %cst_10 = arith.constant 0.000000e+00 : f32
      %12 = vector.broadcast %cst_10 : f32 to vector<16x256xf32>
      %c0_11 = arith.constant 0 : index
      %c0_12 = arith.constant 0 : index
      %13 = vector.load %arg8[%c0_11, %c0_12] : memref<16x256xf32, #tpu.memory_space<vmem>>, vector<16x256xf32>
      tpu.vector_store %arg8[%c0_11, %c0_12], %12 {strides = array<i32>} : memref<16x256xf32, #tpu.memory_space<vmem>>, vector<16x256xf32>,
    } else {
    }
    %c0 = arith.constant 0 : index
    %c0_1 = arith.constant 0 : index
    %3 = vector.load %arg8[%c0, %c0_1] : memref<16x256xf32, #tpu.memory_space<vmem>>, vector<16x256xf32>
    %c0_2 = arith.constant 0 : index
    %c0_3 = arith.constant 0 : index
    %4 = vector.load %arg3[%c0_2, %c0_3] : memref<16x1152xbf16, #tpu.memory_space<vmem>>, vector<16x1152xbf16>
    %c0_4 = arith.constant 0 : index
    %c0_5 = arith.constant 0 : index
    %5 = vector.load %arg4[%c0_4, %c0_5] : memref<1152x256xbf16, #tpu.memory_space<vmem>>, vector<1152x256xbf16>
    %cst = arith.constant dense<0.000000e+00> : vector<16x256xf32>
    %6 = tpu.matmul %4, %5, %cst {dimension_numbers = #tpu.dot_dimension_numbers<[1], [0], [0], [1], [0, 0, 1, 1], [], []>} : vector<16x1152xbf16>, vector<1152x256xbf16>, vector<16x256xf32> -> vector<16x256xf32>
    %7 = arith.addf %3, %6 : vector<16x256xf32>
    %c0_6 = arith.constant 0 : index
    %c0_7 = arith.constant 0 : index
    %8 = vector.load %arg8[%c0_6, %c0_7] : memref<16x256xf32, #tpu.memory_space<vmem>>, vector<16x256xf32>
    tpu.vector_store %arg8[%c0_6, %c0_7], %7 {strides = array<i32>} : memref<16x256xf32, #tpu.memory_space<vmem>>, vector<16x256xf32>,
    %c0_i32_8 = arith.constant 0 : i32
    %9 = arith.cmpi eq, %arg2, %c0_i32_8 : i32
    %10 = arith.extui %9 : i1 to i32
    %c0_i32_9 = arith.constant 0 : i32
    %11 = arith.cmpi ne, %10, %c0_i32_9 : i32
    scf.if %11 {
      %c0_10 = arith.constant 0 : index
      %c0_11 = arith.constant 0 : index
      %12 = vector.load %arg8[%c0_10, %c0_11] : memref<16x256xf32, #tpu.memory_space<vmem>>, vector<16x256xf32>
      %c0_12 = arith.constant 0 : index
      %c0_13 = arith.constant 0 : index
      %13 = vector.load %arg5[%c0_12, %c0_13] : memref<1x256xf32, #tpu.memory_space<vmem>>, vector<1x256xf32>
      %14 = vector.broadcast %13 : vector<1x256xf32> to vector<16x256xf32>
      %15 = arith.mulf %12, %14 : vector<16x256xf32>
      %c0_14 = arith.constant 0 : index
      %c0_15 = arith.constant 0 : index
      %16 = vector.load %arg6[%c0_14, %c0_15] : memref<1x256xf32, #tpu.memory_space<vmem>>, vector<1x256xf32>
      %17 = vector.broadcast %16 : vector<1x256xf32> to vector<16x256xf32>
      %18 = arith.addf %15, %17 : vector<16x256xf32>
      %cst_16 = arith.constant 0.000000e+00 : f32
      %19 = vector.broadcast %cst_16 : f32 to vector<16x256xf32>
      %20 = arith.maximumf %18, %19 : vector<16x256xf32>
      %c0_17 = arith.constant 0 : index
      %c0_18 = arith.constant 0 : index
      %21 = vector.load %arg7[%c0_17, %c0_18] : memref<16x256xf32, #tpu.memory_space<vmem>>, vector<16x256xf32>
      tpu.vector_store %arg7[%c0_17, %c0_18], %20 {strides = array<i32>} : memref<16x256xf32, #tpu.memory_space<vmem>>, vector<16x256xf32>,
    } else {
    }
    return
  }
  func.func @transform_0(%arg0: i32, %arg1: i32, %arg2: i32) -> (i32, i32) {
    %c0_i32 = arith.constant 0 : i32
    return %arg0, %arg2 : i32, i32
  }
  func.func @transform_1(%arg0: i32, %arg1: i32, %arg2: i32) -> (i32, i32) {
    %c0_i32 = arith.constant 0 : i32
    return %arg2, %arg1 : i32, i32
  }
  func.func @transform_2(%arg0: i32, %arg1: i32, %arg2: i32) -> (i32, i32) {
    %c0_i32 = arith.constant 0 : i32
    %c0_i32_0 = arith.constant 0 : i32
    return %c0_i32, %arg1 : i32, i32
  }
  func.func @transform_3(%arg0: i32, %arg1: i32, %arg2: i32) -> (i32, i32) {
    %c0_i32 = arith.constant 0 : i32
    %c0_i32_0 = arith.constant 0 : i32
    return %c0_i32, %arg1 : i32, i32
  }
  func.func @transform_4(%arg0: i32, %arg1: i32, %arg2: i32) -> (i32, i32) {
    %c0_i32 = arith.constant 0 : i32
    return %arg0, %arg1 : i32, i32
  }
}

module attributes {stable_mosaic.version = 11 : i64} {
  func.func @kernel(%arg0: i32, %arg1: i32, %arg2: i32, %arg3: memref<16x384xbf16, #tpu.memory_space<vmem>>, %arg4: memref<384x256xbf16, #tpu.memory_space<vmem>>, %arg5: memref<1x256xf32, #tpu.memory_space<vmem>>, %arg6: memref<1x256xf32, #tpu.memory_space<vmem>>, %arg7: memref<16x256xf32, #tpu.memory_space<vmem>>, %arg8: memref<16x256xf32, #tpu.memory_space<vmem>>, %arg9: memref<16x256xf32, #tpu.memory_space<vmem>>) attributes {dimension_semantics = [#tpu.dimension_semantics<parallel>, #tpu.dimension_semantics<parallel>, #tpu.dimension_semantics<arbitrary>], iteration_bounds = array<i64: 1, 1, 6>, scalar_prefetch = 0 : i64, scratch_operands = 1 : i64, tpu.core_type = #tpu.core_type<tc>, window_params = [{transform_indices = @transform_0, window_bounds = array<i64: 16, 384>}, {transform_indices = @transform_1, window_bounds = array<i64: 384, 256>}, {transform_indices = @transform_2, window_bounds = array<i64: 1, 256>}, {transform_indices = @transform_3, window_bounds = array<i64: 1, 256>}, {transform_indices = @transform_4, window_bounds = array<i64: 16, 256>}, {transform_indices = @transform_5, window_bounds = array<i64: 16, 256>}]} {
    %c0_i32 = arith.constant 0 : i32
    %0 = arith.cmpi eq, %arg2, %c0_i32 : i32
    %1 = arith.extui %0 : i1 to i32
    %c0_i32_0 = arith.constant 0 : i32
    %2 = arith.cmpi ne, %1, %c0_i32_0 : i32
    scf.if %2 {
      %cst_9 = arith.constant 0.000000e+00 : f32
      %12 = vector.broadcast %cst_9 : f32 to vector<16x256xf32>
      %c0_10 = arith.constant 0 : index
      %c0_11 = arith.constant 0 : index
      %13 = vector.load %arg9[%c0_10, %c0_11] : memref<16x256xf32, #tpu.memory_space<vmem>>, vector<16x256xf32>
      tpu.vector_store %arg9[%c0_10, %c0_11], %12 {strides = array<i32>} : memref<16x256xf32, #tpu.memory_space<vmem>>, vector<16x256xf32>,
    } else {
    }
    %c0 = arith.constant 0 : index
    %c0_1 = arith.constant 0 : index
    %3 = vector.load %arg9[%c0, %c0_1] : memref<16x256xf32, #tpu.memory_space<vmem>>, vector<16x256xf32>
    %c0_2 = arith.constant 0 : index
    %c0_3 = arith.constant 0 : index
    %4 = vector.load %arg3[%c0_2, %c0_3] : memref<16x384xbf16, #tpu.memory_space<vmem>>, vector<16x384xbf16>
    %c0_4 = arith.constant 0 : index
    %c0_5 = arith.constant 0 : index
    %5 = vector.load %arg4[%c0_4, %c0_5] : memref<384x256xbf16, #tpu.memory_space<vmem>>, vector<384x256xbf16>
    %cst = arith.constant dense<0.000000e+00> : vector<16x256xf32>
    %6 = tpu.matmul %4, %5, %cst {dimension_numbers = #tpu.dot_dimension_numbers<[1], [0], [0], [1], [0, 0, 1, 1], [], []>} : vector<16x384xbf16>, vector<384x256xbf16>, vector<16x256xf32> -> vector<16x256xf32>
    %7 = arith.addf %3, %6 : vector<16x256xf32>
    %c0_6 = arith.constant 0 : index
    %c0_7 = arith.constant 0 : index
    %8 = vector.load %arg9[%c0_6, %c0_7] : memref<16x256xf32, #tpu.memory_space<vmem>>, vector<16x256xf32>
    tpu.vector_store %arg9[%c0_6, %c0_7], %7 {strides = array<i32>} : memref<16x256xf32, #tpu.memory_space<vmem>>, vector<16x256xf32>,
    %c5_i32 = arith.constant 5 : i32
    %9 = arith.cmpi eq, %arg2, %c5_i32 : i32
    %10 = arith.extui %9 : i1 to i32
    %c0_i32_8 = arith.constant 0 : i32
    %11 = arith.cmpi ne, %10, %c0_i32_8 : i32
    scf.if %11 {
      %c0_9 = arith.constant 0 : index
      %c0_10 = arith.constant 0 : index
      %12 = vector.load %arg9[%c0_9, %c0_10] : memref<16x256xf32, #tpu.memory_space<vmem>>, vector<16x256xf32>
      %c0_11 = arith.constant 0 : index
      %c0_12 = arith.constant 0 : index
      %13 = vector.load %arg7[%c0_11, %c0_12] : memref<16x256xf32, #tpu.memory_space<vmem>>, vector<16x256xf32>
      %c0_13 = arith.constant 0 : index
      %c0_14 = arith.constant 0 : index
      %14 = vector.load %arg5[%c0_13, %c0_14] : memref<1x256xf32, #tpu.memory_space<vmem>>, vector<1x256xf32>
      %15 = vector.broadcast %14 : vector<1x256xf32> to vector<16x256xf32>
      %16 = arith.mulf %12, %15 : vector<16x256xf32>
      %c0_15 = arith.constant 0 : index
      %c0_16 = arith.constant 0 : index
      %17 = vector.load %arg6[%c0_15, %c0_16] : memref<1x256xf32, #tpu.memory_space<vmem>>, vector<1x256xf32>
      %18 = vector.broadcast %17 : vector<1x256xf32> to vector<16x256xf32>
      %19 = arith.addf %16, %18 : vector<16x256xf32>
      %20 = arith.addf %19, %13 : vector<16x256xf32>
      %cst_17 = arith.constant 0.000000e+00 : f32
      %21 = vector.broadcast %cst_17 : f32 to vector<16x256xf32>
      %22 = arith.maximumf %20, %21 : vector<16x256xf32>
      %c0_18 = arith.constant 0 : index
      %c0_19 = arith.constant 0 : index
      %23 = vector.load %arg8[%c0_18, %c0_19] : memref<16x256xf32, #tpu.memory_space<vmem>>, vector<16x256xf32>
      tpu.vector_store %arg8[%c0_18, %c0_19], %22 {strides = array<i32>} : memref<16x256xf32, #tpu.memory_space<vmem>>, vector<16x256xf32>,
    } else {
    }
    return
  }
  func.func @transform_0(%arg0: i32, %arg1: i32, %arg2: i32) -> (i32, i32) {
    %c0_i32 = arith.constant 0 : i32
    return %arg0, %arg2 : i32, i32
  }
  func.func @transform_1(%arg0: i32, %arg1: i32, %arg2: i32) -> (i32, i32) {
    %c0_i32 = arith.constant 0 : i32
    return %arg2, %arg1 : i32, i32
  }
  func.func @transform_2(%arg0: i32, %arg1: i32, %arg2: i32) -> (i32, i32) {
    %c0_i32 = arith.constant 0 : i32
    %c0_i32_0 = arith.constant 0 : i32
    return %c0_i32, %arg1 : i32, i32
  }
  func.func @transform_3(%arg0: i32, %arg1: i32, %arg2: i32) -> (i32, i32) {
    %c0_i32 = arith.constant 0 : i32
    %c0_i32_0 = arith.constant 0 : i32
    return %c0_i32, %arg1 : i32, i32
  }
  func.func @transform_4(%arg0: i32, %arg1: i32, %arg2: i32) -> (i32, i32) {
    %c0_i32 = arith.constant 0 : i32
    return %arg0, %arg1 : i32, i32
  }
  func.func @transform_5(%arg0: i32, %arg1: i32, %arg2: i32) -> (i32, i32) {
    %c0_i32 = arith.constant 0 : i32
    return %arg0, %arg1 : i32, i32
  }
}

module attributes {stable_mosaic.version = 11 : i64} {
  func.func @kernel(%arg0: i32, %arg1: i32, %arg2: i32, %arg3: memref<16x128xbf16, #tpu.memory_space<vmem>>, %arg4: memref<128x256xbf16, #tpu.memory_space<vmem>>, %arg5: memref<1x256xf32, #tpu.memory_space<vmem>>, %arg6: memref<1x256xf32, #tpu.memory_space<vmem>>, %arg7: memref<16x256xf32, #tpu.memory_space<vmem>>, %arg8: memref<16x256xf32, #tpu.memory_space<vmem>>) attributes {dimension_semantics = [#tpu.dimension_semantics<parallel>, #tpu.dimension_semantics<parallel>, #tpu.dimension_semantics<arbitrary>], iteration_bounds = array<i64: 1, 1, 1>, scalar_prefetch = 0 : i64, scratch_operands = 1 : i64, tpu.core_type = #tpu.core_type<tc>, window_params = [{transform_indices = @transform_0, window_bounds = array<i64: 16, 128>}, {transform_indices = @transform_1, window_bounds = array<i64: 128, 256>}, {transform_indices = @transform_2, window_bounds = array<i64: 1, 256>}, {transform_indices = @transform_3, window_bounds = array<i64: 1, 256>}, {transform_indices = @transform_4, window_bounds = array<i64: 16, 256>}]} {
    %c0_i32 = arith.constant 0 : i32
    %0 = arith.cmpi eq, %arg2, %c0_i32 : i32
    %1 = arith.extui %0 : i1 to i32
    %c0_i32_0 = arith.constant 0 : i32
    %2 = arith.cmpi ne, %1, %c0_i32_0 : i32
    scf.if %2 {
      %cst_10 = arith.constant 0.000000e+00 : f32
      %12 = vector.broadcast %cst_10 : f32 to vector<16x256xf32>
      %c0_11 = arith.constant 0 : index
      %c0_12 = arith.constant 0 : index
      %13 = vector.load %arg8[%c0_11, %c0_12] : memref<16x256xf32, #tpu.memory_space<vmem>>, vector<16x256xf32>
      tpu.vector_store %arg8[%c0_11, %c0_12], %12 {strides = array<i32>} : memref<16x256xf32, #tpu.memory_space<vmem>>, vector<16x256xf32>,
    } else {
    }
    %c0 = arith.constant 0 : index
    %c0_1 = arith.constant 0 : index
    %3 = vector.load %arg8[%c0, %c0_1] : memref<16x256xf32, #tpu.memory_space<vmem>>, vector<16x256xf32>
    %c0_2 = arith.constant 0 : index
    %c0_3 = arith.constant 0 : index
    %4 = vector.load %arg3[%c0_2, %c0_3] : memref<16x128xbf16, #tpu.memory_space<vmem>>, vector<16x128xbf16>
    %c0_4 = arith.constant 0 : index
    %c0_5 = arith.constant 0 : index
    %5 = vector.load %arg4[%c0_4, %c0_5] : memref<128x256xbf16, #tpu.memory_space<vmem>>, vector<128x256xbf16>
    %cst = arith.constant dense<0.000000e+00> : vector<16x256xf32>
    %6 = tpu.matmul %4, %5, %cst {dimension_numbers = #tpu.dot_dimension_numbers<[1], [0], [0], [1], [0, 0, 1, 1], [], []>} : vector<16x128xbf16>, vector<128x256xbf16>, vector<16x256xf32> -> vector<16x256xf32>
    %7 = arith.addf %3, %6 : vector<16x256xf32>
    %c0_6 = arith.constant 0 : index
    %c0_7 = arith.constant 0 : index
    %8 = vector.load %arg8[%c0_6, %c0_7] : memref<16x256xf32, #tpu.memory_space<vmem>>, vector<16x256xf32>
    tpu.vector_store %arg8[%c0_6, %c0_7], %7 {strides = array<i32>} : memref<16x256xf32, #tpu.memory_space<vmem>>, vector<16x256xf32>,
    %c0_i32_8 = arith.constant 0 : i32
    %9 = arith.cmpi eq, %arg2, %c0_i32_8 : i32
    %10 = arith.extui %9 : i1 to i32
    %c0_i32_9 = arith.constant 0 : i32
    %11 = arith.cmpi ne, %10, %c0_i32_9 : i32
    scf.if %11 {
      %c0_10 = arith.constant 0 : index
      %c0_11 = arith.constant 0 : index
      %12 = vector.load %arg8[%c0_10, %c0_11] : memref<16x256xf32, #tpu.memory_space<vmem>>, vector<16x256xf32>
      %c0_12 = arith.constant 0 : index
      %c0_13 = arith.constant 0 : index
      %13 = vector.load %arg5[%c0_12, %c0_13] : memref<1x256xf32, #tpu.memory_space<vmem>>, vector<1x256xf32>
      %14 = vector.broadcast %13 : vector<1x256xf32> to vector<16x256xf32>
      %15 = arith.mulf %12, %14 : vector<16x256xf32>
      %c0_14 = arith.constant 0 : index
      %c0_15 = arith.constant 0 : index
      %16 = vector.load %arg6[%c0_14, %c0_15] : memref<1x256xf32, #tpu.memory_space<vmem>>, vector<1x256xf32>
      %17 = vector.broadcast %16 : vector<1x256xf32> to vector<16x256xf32>
      %18 = arith.addf %15, %17 : vector<16x256xf32>
      %c0_16 = arith.constant 0 : index
      %c0_17 = arith.constant 0 : index
      %19 = vector.load %arg7[%c0_16, %c0_17] : memref<16x256xf32, #tpu.memory_space<vmem>>, vector<16x256xf32>
      tpu.vector_store %arg7[%c0_16, %c0_17], %18 {strides = array<i32>} : memref<16x256xf32, #tpu.memory_space<vmem>>, vector<16x256xf32>,
    } else {
    }
    return
  }
  func.func @transform_0(%arg0: i32, %arg1: i32, %arg2: i32) -> (i32, i32) {
    %c0_i32 = arith.constant 0 : i32
    return %arg0, %arg2 : i32, i32
  }
  func.func @transform_1(%arg0: i32, %arg1: i32, %arg2: i32) -> (i32, i32) {
    %c0_i32 = arith.constant 0 : i32
    return %arg2, %arg1 : i32, i32
  }
  func.func @transform_2(%arg0: i32, %arg1: i32, %arg2: i32) -> (i32, i32) {
    %c0_i32 = arith.constant 0 : i32
    %c0_i32_0 = arith.constant 0 : i32
    return %c0_i32, %arg1 : i32, i32
  }
  func.func @transform_3(%arg0: i32, %arg1: i32, %arg2: i32) -> (i32, i32) {
    %c0_i32 = arith.constant 0 : i32
    %c0_i32_0 = arith.constant 0 : i32
    return %c0_i32, %arg1 : i32, i32
  }
  func.func @transform_4(%arg0: i32, %arg1: i32, %arg2: i32) -> (i32, i32) {
    %c0_i32 = arith.constant 0 : i32
    return %arg0, %arg1 : i32, i32
  }
}

module attributes {stable_mosaic.version = 11 : i64} {
  func.func @kernel(%arg0: i32, %arg1: i32, %arg2: i32, %arg3: memref<16x384xbf16, #tpu.memory_space<vmem>>, %arg4: memref<384x256xbf16, #tpu.memory_space<vmem>>, %arg5: memref<1x256xf32, #tpu.memory_space<vmem>>, %arg6: memref<1x256xf32, #tpu.memory_space<vmem>>, %arg7: memref<16x256xf32, #tpu.memory_space<vmem>>, %arg8: memref<16x256xf32, #tpu.memory_space<vmem>>) attributes {dimension_semantics = [#tpu.dimension_semantics<parallel>, #tpu.dimension_semantics<parallel>, #tpu.dimension_semantics<arbitrary>], iteration_bounds = array<i64: 1, 1, 6>, scalar_prefetch = 0 : i64, scratch_operands = 1 : i64, tpu.core_type = #tpu.core_type<tc>, window_params = [{transform_indices = @transform_0, window_bounds = array<i64: 16, 384>}, {transform_indices = @transform_1, window_bounds = array<i64: 384, 256>}, {transform_indices = @transform_2, window_bounds = array<i64: 1, 256>}, {transform_indices = @transform_3, window_bounds = array<i64: 1, 256>}, {transform_indices = @transform_4, window_bounds = array<i64: 16, 256>}]} {
    %c0_i32 = arith.constant 0 : i32
    %0 = arith.cmpi eq, %arg2, %c0_i32 : i32
    %1 = arith.extui %0 : i1 to i32
    %c0_i32_0 = arith.constant 0 : i32
    %2 = arith.cmpi ne, %1, %c0_i32_0 : i32
    scf.if %2 {
      %cst_9 = arith.constant 0.000000e+00 : f32
      %12 = vector.broadcast %cst_9 : f32 to vector<16x256xf32>
      %c0_10 = arith.constant 0 : index
      %c0_11 = arith.constant 0 : index
      %13 = vector.load %arg8[%c0_10, %c0_11] : memref<16x256xf32, #tpu.memory_space<vmem>>, vector<16x256xf32>
      tpu.vector_store %arg8[%c0_10, %c0_11], %12 {strides = array<i32>} : memref<16x256xf32, #tpu.memory_space<vmem>>, vector<16x256xf32>,
    } else {
    }
    %c0 = arith.constant 0 : index
    %c0_1 = arith.constant 0 : index
    %3 = vector.load %arg8[%c0, %c0_1] : memref<16x256xf32, #tpu.memory_space<vmem>>, vector<16x256xf32>
    %c0_2 = arith.constant 0 : index
    %c0_3 = arith.constant 0 : index
    %4 = vector.load %arg3[%c0_2, %c0_3] : memref<16x384xbf16, #tpu.memory_space<vmem>>, vector<16x384xbf16>
    %c0_4 = arith.constant 0 : index
    %c0_5 = arith.constant 0 : index
    %5 = vector.load %arg4[%c0_4, %c0_5] : memref<384x256xbf16, #tpu.memory_space<vmem>>, vector<384x256xbf16>
    %cst = arith.constant dense<0.000000e+00> : vector<16x256xf32>
    %6 = tpu.matmul %4, %5, %cst {dimension_numbers = #tpu.dot_dimension_numbers<[1], [0], [0], [1], [0, 0, 1, 1], [], []>} : vector<16x384xbf16>, vector<384x256xbf16>, vector<16x256xf32> -> vector<16x256xf32>
    %7 = arith.addf %3, %6 : vector<16x256xf32>
    %c0_6 = arith.constant 0 : index
    %c0_7 = arith.constant 0 : index
    %8 = vector.load %arg8[%c0_6, %c0_7] : memref<16x256xf32, #tpu.memory_space<vmem>>, vector<16x256xf32>
    tpu.vector_store %arg8[%c0_6, %c0_7], %7 {strides = array<i32>} : memref<16x256xf32, #tpu.memory_space<vmem>>, vector<16x256xf32>,
    %c5_i32 = arith.constant 5 : i32
    %9 = arith.cmpi eq, %arg2, %c5_i32 : i32
    %10 = arith.extui %9 : i1 to i32
    %c0_i32_8 = arith.constant 0 : i32
    %11 = arith.cmpi ne, %10, %c0_i32_8 : i32
    scf.if %11 {
      %c0_9 = arith.constant 0 : index
      %c0_10 = arith.constant 0 : index
      %12 = vector.load %arg8[%c0_9, %c0_10] : memref<16x256xf32, #tpu.memory_space<vmem>>, vector<16x256xf32>
      %c0_11 = arith.constant 0 : index
      %c0_12 = arith.constant 0 : index
      %13 = vector.load %arg5[%c0_11, %c0_12] : memref<1x256xf32, #tpu.memory_space<vmem>>, vector<1x256xf32>
      %14 = vector.broadcast %13 : vector<1x256xf32> to vector<16x256xf32>
      %15 = arith.mulf %12, %14 : vector<16x256xf32>
      %c0_13 = arith.constant 0 : index
      %c0_14 = arith.constant 0 : index
      %16 = vector.load %arg6[%c0_13, %c0_14] : memref<1x256xf32, #tpu.memory_space<vmem>>, vector<1x256xf32>
      %17 = vector.broadcast %16 : vector<1x256xf32> to vector<16x256xf32>
      %18 = arith.addf %15, %17 : vector<16x256xf32>
      %cst_15 = arith.constant 0.000000e+00 : f32
      %19 = vector.broadcast %cst_15 : f32 to vector<16x256xf32>
      %20 = arith.maximumf %18, %19 : vector<16x256xf32>
      %c0_16 = arith.constant 0 : index
      %c0_17 = arith.constant 0 : index
      %21 = vector.load %arg7[%c0_16, %c0_17] : memref<16x256xf32, #tpu.memory_space<vmem>>, vector<16x256xf32>
      tpu.vector_store %arg7[%c0_16, %c0_17], %20 {strides = array<i32>} : memref<16x256xf32, #tpu.memory_space<vmem>>, vector<16x256xf32>,
    } else {
    }
    return
  }
  func.func @transform_0(%arg0: i32, %arg1: i32, %arg2: i32) -> (i32, i32) {
    %c0_i32 = arith.constant 0 : i32
    return %arg0, %arg2 : i32, i32
  }
  func.func @transform_1(%arg0: i32, %arg1: i32, %arg2: i32) -> (i32, i32) {
    %c0_i32 = arith.constant 0 : i32
    return %arg2, %arg1 : i32, i32
  }
  func.func @transform_2(%arg0: i32, %arg1: i32, %arg2: i32) -> (i32, i32) {
    %c0_i32 = arith.constant 0 : i32
    %c0_i32_0 = arith.constant 0 : i32
    return %c0_i32, %arg1 : i32, i32
  }
  func.func @transform_3(%arg0: i32, %arg1: i32, %arg2: i32) -> (i32, i32) {
    %c0_i32 = arith.constant 0 : i32
    %c0_i32_0 = arith.constant 0 : i32
    return %c0_i32, %arg1 : i32, i32
  }
  func.func @transform_4(%arg0: i32, %arg1: i32, %arg2: i32) -> (i32, i32) {
    %c0_i32 = arith.constant 0 : i32
    return %arg0, %arg1 : i32, i32
  }
}

module attributes {stable_mosaic.version = 11 : i64} {
  func.func @kernel(%arg0: i32, %arg1: i32, %arg2: i32, %arg3: memref<16x384xbf16, #tpu.memory_space<vmem>>, %arg4: memref<384x256xbf16, #tpu.memory_space<vmem>>, %arg5: memref<1x256xf32, #tpu.memory_space<vmem>>, %arg6: memref<1x256xf32, #tpu.memory_space<vmem>>, %arg7: memref<16x256xf32, #tpu.memory_space<vmem>>, %arg8: memref<16x256xf32, #tpu.memory_space<vmem>>) attributes {dimension_semantics = [#tpu.dimension_semantics<parallel>, #tpu.dimension_semantics<parallel>, #tpu.dimension_semantics<arbitrary>], iteration_bounds = array<i64: 1, 2, 6>, scalar_prefetch = 0 : i64, scratch_operands = 1 : i64, tpu.core_type = #tpu.core_type<tc>, window_params = [{transform_indices = @transform_0, window_bounds = array<i64: 16, 384>}, {transform_indices = @transform_1, window_bounds = array<i64: 384, 256>}, {transform_indices = @transform_2, window_bounds = array<i64: 1, 256>}, {transform_indices = @transform_3, window_bounds = array<i64: 1, 256>}, {transform_indices = @transform_4, window_bounds = array<i64: 16, 256>}]} {
    %c0_i32 = arith.constant 0 : i32
    %0 = arith.cmpi eq, %arg2, %c0_i32 : i32
    %1 = arith.extui %0 : i1 to i32
    %c0_i32_0 = arith.constant 0 : i32
    %2 = arith.cmpi ne, %1, %c0_i32_0 : i32
    scf.if %2 {
      %cst_9 = arith.constant 0.000000e+00 : f32
      %12 = vector.broadcast %cst_9 : f32 to vector<16x256xf32>
      %c0_10 = arith.constant 0 : index
      %c0_11 = arith.constant 0 : index
      %13 = vector.load %arg8[%c0_10, %c0_11] : memref<16x256xf32, #tpu.memory_space<vmem>>, vector<16x256xf32>
      tpu.vector_store %arg8[%c0_10, %c0_11], %12 {strides = array<i32>} : memref<16x256xf32, #tpu.memory_space<vmem>>, vector<16x256xf32>,
    } else {
    }
    %c0 = arith.constant 0 : index
    %c0_1 = arith.constant 0 : index
    %3 = vector.load %arg8[%c0, %c0_1] : memref<16x256xf32, #tpu.memory_space<vmem>>, vector<16x256xf32>
    %c0_2 = arith.constant 0 : index
    %c0_3 = arith.constant 0 : index
    %4 = vector.load %arg3[%c0_2, %c0_3] : memref<16x384xbf16, #tpu.memory_space<vmem>>, vector<16x384xbf16>
    %c0_4 = arith.constant 0 : index
    %c0_5 = arith.constant 0 : index
    %5 = vector.load %arg4[%c0_4, %c0_5] : memref<384x256xbf16, #tpu.memory_space<vmem>>, vector<384x256xbf16>
    %cst = arith.constant dense<0.000000e+00> : vector<16x256xf32>
    %6 = tpu.matmul %4, %5, %cst {dimension_numbers = #tpu.dot_dimension_numbers<[1], [0], [0], [1], [0, 0, 1, 1], [], []>} : vector<16x384xbf16>, vector<384x256xbf16>, vector<16x256xf32> -> vector<16x256xf32>
    %7 = arith.addf %3, %6 : vector<16x256xf32>
    %c0_6 = arith.constant 0 : index
    %c0_7 = arith.constant 0 : index
    %8 = vector.load %arg8[%c0_6, %c0_7] : memref<16x256xf32, #tpu.memory_space<vmem>>, vector<16x256xf32>
    tpu.vector_store %arg8[%c0_6, %c0_7], %7 {strides = array<i32>} : memref<16x256xf32, #tpu.memory_space<vmem>>, vector<16x256xf32>,
    %c5_i32 = arith.constant 5 : i32
    %9 = arith.cmpi eq, %arg2, %c5_i32 : i32
    %10 = arith.extui %9 : i1 to i32
    %c0_i32_8 = arith.constant 0 : i32
    %11 = arith.cmpi ne, %10, %c0_i32_8 : i32
    scf.if %11 {
      %c0_9 = arith.constant 0 : index
      %c0_10 = arith.constant 0 : index
      %12 = vector.load %arg8[%c0_9, %c0_10] : memref<16x256xf32, #tpu.memory_space<vmem>>, vector<16x256xf32>
      %c0_11 = arith.constant 0 : index
      %c0_12 = arith.constant 0 : index
      %13 = vector.load %arg5[%c0_11, %c0_12] : memref<1x256xf32, #tpu.memory_space<vmem>>, vector<1x256xf32>
      %14 = vector.broadcast %13 : vector<1x256xf32> to vector<16x256xf32>
      %15 = arith.mulf %12, %14 : vector<16x256xf32>
      %c0_13 = arith.constant 0 : index
      %c0_14 = arith.constant 0 : index
      %16 = vector.load %arg6[%c0_13, %c0_14] : memref<1x256xf32, #tpu.memory_space<vmem>>, vector<1x256xf32>
      %17 = vector.broadcast %16 : vector<1x256xf32> to vector<16x256xf32>
      %18 = arith.addf %15, %17 : vector<16x256xf32>
      %cst_15 = arith.constant 0.000000e+00 : f32
      %19 = vector.broadcast %cst_15 : f32 to vector<16x256xf32>
      %20 = arith.maximumf %18, %19 : vector<16x256xf32>
      %c0_16 = arith.constant 0 : index
      %c0_17 = arith.constant 0 : index
      %21 = vector.load %arg7[%c0_16, %c0_17] : memref<16x256xf32, #tpu.memory_space<vmem>>, vector<16x256xf32>
      tpu.vector_store %arg7[%c0_16, %c0_17], %20 {strides = array<i32>} : memref<16x256xf32, #tpu.memory_space<vmem>>, vector<16x256xf32>,
    } else {
    }
    return
  }
  func.func @transform_0(%arg0: i32, %arg1: i32, %arg2: i32) -> (i32, i32) {
    %c0_i32 = arith.constant 0 : i32
    return %arg0, %arg2 : i32, i32
  }
  func.func @transform_1(%arg0: i32, %arg1: i32, %arg2: i32) -> (i32, i32) {
    %c0_i32 = arith.constant 0 : i32
    return %arg2, %arg1 : i32, i32
  }
  func.func @transform_2(%arg0: i32, %arg1: i32, %arg2: i32) -> (i32, i32) {
    %c0_i32 = arith.constant 0 : i32
    %c0_i32_0 = arith.constant 0 : i32
    return %c0_i32, %arg1 : i32, i32
  }
  func.func @transform_3(%arg0: i32, %arg1: i32, %arg2: i32) -> (i32, i32) {
    %c0_i32 = arith.constant 0 : i32
    %c0_i32_0 = arith.constant 0 : i32
    return %c0_i32, %arg1 : i32, i32
  }
  func.func @transform_4(%arg0: i32, %arg1: i32, %arg2: i32) -> (i32, i32) {
    %c0_i32 = arith.constant 0 : i32
    return %arg0, %arg1 : i32, i32
  }
}

module attributes {stable_mosaic.version = 11 : i64} {
  func.func @kernel(%arg0: i32, %arg1: i32, %arg2: i32, %arg3: memref<16x256xbf16, #tpu.memory_space<vmem>>, %arg4: memref<256x256xbf16, #tpu.memory_space<vmem>>, %arg5: memref<1x256xf32, #tpu.memory_space<vmem>>, %arg6: memref<1x256xf32, #tpu.memory_space<vmem>>, %arg7: memref<16x256xf32, #tpu.memory_space<vmem>>, %arg8: memref<16x256xf32, #tpu.memory_space<vmem>>) attributes {dimension_semantics = [#tpu.dimension_semantics<parallel>, #tpu.dimension_semantics<parallel>, #tpu.dimension_semantics<arbitrary>], iteration_bounds = array<i64: 1, 2, 1>, scalar_prefetch = 0 : i64, scratch_operands = 1 : i64, tpu.core_type = #tpu.core_type<tc>, window_params = [{transform_indices = @transform_0, window_bounds = array<i64: 16, 256>}, {transform_indices = @transform_1, window_bounds = array<i64: 256, 256>}, {transform_indices = @transform_2, window_bounds = array<i64: 1, 256>}, {transform_indices = @transform_3, window_bounds = array<i64: 1, 256>}, {transform_indices = @transform_4, window_bounds = array<i64: 16, 256>}]} {
    %c0_i32 = arith.constant 0 : i32
    %0 = arith.cmpi eq, %arg2, %c0_i32 : i32
    %1 = arith.extui %0 : i1 to i32
    %c0_i32_0 = arith.constant 0 : i32
    %2 = arith.cmpi ne, %1, %c0_i32_0 : i32
    scf.if %2 {
      %cst_10 = arith.constant 0.000000e+00 : f32
      %12 = vector.broadcast %cst_10 : f32 to vector<16x256xf32>
      %c0_11 = arith.constant 0 : index
      %c0_12 = arith.constant 0 : index
      %13 = vector.load %arg8[%c0_11, %c0_12] : memref<16x256xf32, #tpu.memory_space<vmem>>, vector<16x256xf32>
      tpu.vector_store %arg8[%c0_11, %c0_12], %12 {strides = array<i32>} : memref<16x256xf32, #tpu.memory_space<vmem>>, vector<16x256xf32>,
    } else {
    }
    %c0 = arith.constant 0 : index
    %c0_1 = arith.constant 0 : index
    %3 = vector.load %arg8[%c0, %c0_1] : memref<16x256xf32, #tpu.memory_space<vmem>>, vector<16x256xf32>
    %c0_2 = arith.constant 0 : index
    %c0_3 = arith.constant 0 : index
    %4 = vector.load %arg3[%c0_2, %c0_3] : memref<16x256xbf16, #tpu.memory_space<vmem>>, vector<16x256xbf16>
    %c0_4 = arith.constant 0 : index
    %c0_5 = arith.constant 0 : index
    %5 = vector.load %arg4[%c0_4, %c0_5] : memref<256x256xbf16, #tpu.memory_space<vmem>>, vector<256x256xbf16>
    %cst = arith.constant dense<0.000000e+00> : vector<16x256xf32>
    %6 = tpu.matmul %4, %5, %cst {dimension_numbers = #tpu.dot_dimension_numbers<[1], [0], [0], [1], [0, 0, 1, 1], [], []>} : vector<16x256xbf16>, vector<256x256xbf16>, vector<16x256xf32> -> vector<16x256xf32>
    %7 = arith.addf %3, %6 : vector<16x256xf32>
    %c0_6 = arith.constant 0 : index
    %c0_7 = arith.constant 0 : index
    %8 = vector.load %arg8[%c0_6, %c0_7] : memref<16x256xf32, #tpu.memory_space<vmem>>, vector<16x256xf32>
    tpu.vector_store %arg8[%c0_6, %c0_7], %7 {strides = array<i32>} : memref<16x256xf32, #tpu.memory_space<vmem>>, vector<16x256xf32>,
    %c0_i32_8 = arith.constant 0 : i32
    %9 = arith.cmpi eq, %arg2, %c0_i32_8 : i32
    %10 = arith.extui %9 : i1 to i32
    %c0_i32_9 = arith.constant 0 : i32
    %11 = arith.cmpi ne, %10, %c0_i32_9 : i32
    scf.if %11 {
      %c0_10 = arith.constant 0 : index
      %c0_11 = arith.constant 0 : index
      %12 = vector.load %arg8[%c0_10, %c0_11] : memref<16x256xf32, #tpu.memory_space<vmem>>, vector<16x256xf32>
      %c0_12 = arith.constant 0 : index
      %c0_13 = arith.constant 0 : index
      %13 = vector.load %arg5[%c0_12, %c0_13] : memref<1x256xf32, #tpu.memory_space<vmem>>, vector<1x256xf32>
      %14 = vector.broadcast %13 : vector<1x256xf32> to vector<16x256xf32>
      %15 = arith.mulf %12, %14 : vector<16x256xf32>
      %c0_14 = arith.constant 0 : index
      %c0_15 = arith.constant 0 : index
      %16 = vector.load %arg6[%c0_14, %c0_15] : memref<1x256xf32, #tpu.memory_space<vmem>>, vector<1x256xf32>
      %17 = vector.broadcast %16 : vector<1x256xf32> to vector<16x256xf32>
      %18 = arith.addf %15, %17 : vector<16x256xf32>
      %c0_16 = arith.constant 0 : index
      %c0_17 = arith.constant 0 : index
      %19 = vector.load %arg7[%c0_16, %c0_17] : memref<16x256xf32, #tpu.memory_space<vmem>>, vector<16x256xf32>
      tpu.vector_store %arg7[%c0_16, %c0_17], %18 {strides = array<i32>} : memref<16x256xf32, #tpu.memory_space<vmem>>, vector<16x256xf32>,
    } else {
    }
    return
  }
  func.func @transform_0(%arg0: i32, %arg1: i32, %arg2: i32) -> (i32, i32) {
    %c0_i32 = arith.constant 0 : i32
    return %arg0, %arg2 : i32, i32
  }
  func.func @transform_1(%arg0: i32, %arg1: i32, %arg2: i32) -> (i32, i32) {
    %c0_i32 = arith.constant 0 : i32
    return %arg2, %arg1 : i32, i32
  }
  func.func @transform_2(%arg0: i32, %arg1: i32, %arg2: i32) -> (i32, i32) {
    %c0_i32 = arith.constant 0 : i32
    %c0_i32_0 = arith.constant 0 : i32
    return %c0_i32, %arg1 : i32, i32
  }
  func.func @transform_3(%arg0: i32, %arg1: i32, %arg2: i32) -> (i32, i32) {
    %c0_i32 = arith.constant 0 : i32
    %c0_i32_0 = arith.constant 0 : i32
    return %c0_i32, %arg1 : i32, i32
  }
  func.func @transform_4(%arg0: i32, %arg1: i32, %arg2: i32) -> (i32, i32) {
    %c0_i32 = arith.constant 0 : i32
    return %arg0, %arg1 : i32, i32
  }
}

module attributes {stable_mosaic.version = 11 : i64} {
  func.func @kernel(%arg0: i32, %arg1: i32, %arg2: i32, %arg3: memref<16x512xbf16, #tpu.memory_space<vmem>>, %arg4: memref<512x256xbf16, #tpu.memory_space<vmem>>, %arg5: memref<1x256xf32, #tpu.memory_space<vmem>>, %arg6: memref<1x256xf32, #tpu.memory_space<vmem>>, %arg7: memref<16x256xf32, #tpu.memory_space<vmem>>, %arg8: memref<16x256xf32, #tpu.memory_space<vmem>>, %arg9: memref<16x256xf32, #tpu.memory_space<vmem>>) attributes {dimension_semantics = [#tpu.dimension_semantics<parallel>, #tpu.dimension_semantics<parallel>, #tpu.dimension_semantics<arbitrary>], iteration_bounds = array<i64: 1, 2, 9>, scalar_prefetch = 0 : i64, scratch_operands = 1 : i64, tpu.core_type = #tpu.core_type<tc>, window_params = [{transform_indices = @transform_0, window_bounds = array<i64: 16, 512>}, {transform_indices = @transform_1, window_bounds = array<i64: 512, 256>}, {transform_indices = @transform_2, window_bounds = array<i64: 1, 256>}, {transform_indices = @transform_3, window_bounds = array<i64: 1, 256>}, {transform_indices = @transform_4, window_bounds = array<i64: 16, 256>}, {transform_indices = @transform_5, window_bounds = array<i64: 16, 256>}]} {
    %c0_i32 = arith.constant 0 : i32
    %0 = arith.cmpi eq, %arg2, %c0_i32 : i32
    %1 = arith.extui %0 : i1 to i32
    %c0_i32_0 = arith.constant 0 : i32
    %2 = arith.cmpi ne, %1, %c0_i32_0 : i32
    scf.if %2 {
      %cst_9 = arith.constant 0.000000e+00 : f32
      %12 = vector.broadcast %cst_9 : f32 to vector<16x256xf32>
      %c0_10 = arith.constant 0 : index
      %c0_11 = arith.constant 0 : index
      %13 = vector.load %arg9[%c0_10, %c0_11] : memref<16x256xf32, #tpu.memory_space<vmem>>, vector<16x256xf32>
      tpu.vector_store %arg9[%c0_10, %c0_11], %12 {strides = array<i32>} : memref<16x256xf32, #tpu.memory_space<vmem>>, vector<16x256xf32>,
    } else {
    }
    %c0 = arith.constant 0 : index
    %c0_1 = arith.constant 0 : index
    %3 = vector.load %arg9[%c0, %c0_1] : memref<16x256xf32, #tpu.memory_space<vmem>>, vector<16x256xf32>
    %c0_2 = arith.constant 0 : index
    %c0_3 = arith.constant 0 : index
    %4 = vector.load %arg3[%c0_2, %c0_3] : memref<16x512xbf16, #tpu.memory_space<vmem>>, vector<16x512xbf16>
    %c0_4 = arith.constant 0 : index
    %c0_5 = arith.constant 0 : index
    %5 = vector.load %arg4[%c0_4, %c0_5] : memref<512x256xbf16, #tpu.memory_space<vmem>>, vector<512x256xbf16>
    %cst = arith.constant dense<0.000000e+00> : vector<16x256xf32>
    %6 = tpu.matmul %4, %5, %cst {dimension_numbers = #tpu.dot_dimension_numbers<[1], [0], [0], [1], [0, 0, 1, 1], [], []>} : vector<16x512xbf16>, vector<512x256xbf16>, vector<16x256xf32> -> vector<16x256xf32>
    %7 = arith.addf %3, %6 : vector<16x256xf32>
    %c0_6 = arith.constant 0 : index
    %c0_7 = arith.constant 0 : index
    %8 = vector.load %arg9[%c0_6, %c0_7] : memref<16x256xf32, #tpu.memory_space<vmem>>, vector<16x256xf32>
    tpu.vector_store %arg9[%c0_6, %c0_7], %7 {strides = array<i32>} : memref<16x256xf32, #tpu.memory_space<vmem>>, vector<16x256xf32>,
    %c8_i32 = arith.constant 8 : i32
    %9 = arith.cmpi eq, %arg2, %c8_i32 : i32
    %10 = arith.extui %9 : i1 to i32
    %c0_i32_8 = arith.constant 0 : i32
    %11 = arith.cmpi ne, %10, %c0_i32_8 : i32
    scf.if %11 {
      %c0_9 = arith.constant 0 : index
      %c0_10 = arith.constant 0 : index
      %12 = vector.load %arg9[%c0_9, %c0_10] : memref<16x256xf32, #tpu.memory_space<vmem>>, vector<16x256xf32>
      %c0_11 = arith.constant 0 : index
      %c0_12 = arith.constant 0 : index
      %13 = vector.load %arg7[%c0_11, %c0_12] : memref<16x256xf32, #tpu.memory_space<vmem>>, vector<16x256xf32>
      %c0_13 = arith.constant 0 : index
      %c0_14 = arith.constant 0 : index
      %14 = vector.load %arg5[%c0_13, %c0_14] : memref<1x256xf32, #tpu.memory_space<vmem>>, vector<1x256xf32>
      %15 = vector.broadcast %14 : vector<1x256xf32> to vector<16x256xf32>
      %16 = arith.mulf %12, %15 : vector<16x256xf32>
      %c0_15 = arith.constant 0 : index
      %c0_16 = arith.constant 0 : index
      %17 = vector.load %arg6[%c0_15, %c0_16] : memref<1x256xf32, #tpu.memory_space<vmem>>, vector<1x256xf32>
      %18 = vector.broadcast %17 : vector<1x256xf32> to vector<16x256xf32>
      %19 = arith.addf %16, %18 : vector<16x256xf32>
      %20 = arith.addf %19, %13 : vector<16x256xf32>
      %cst_17 = arith.constant 0.000000e+00 : f32
      %21 = vector.broadcast %cst_17 : f32 to vector<16x256xf32>
      %22 = arith.maximumf %20, %21 : vector<16x256xf32>
      %c0_18 = arith.constant 0 : index
      %c0_19 = arith.constant 0 : index
      %23 = vector.load %arg8[%c0_18, %c0_19] : memref<16x256xf32, #tpu.memory_space<vmem>>, vector<16x256xf32>
      tpu.vector_store %arg8[%c0_18, %c0_19], %22 {strides = array<i32>} : memref<16x256xf32, #tpu.memory_space<vmem>>, vector<16x256xf32>,
    } else {
    }
    return
  }
  func.func @transform_0(%arg0: i32, %arg1: i32, %arg2: i32) -> (i32, i32) {
    %c0_i32 = arith.constant 0 : i32
    return %arg0, %arg2 : i32, i32
  }
  func.func @transform_1(%arg0: i32, %arg1: i32, %arg2: i32) -> (i32, i32) {
    %c0_i32 = arith.constant 0 : i32
    return %arg2, %arg1 : i32, i32
  }
  func.func @transform_2(%arg0: i32, %arg1: i32, %arg2: i32) -> (i32, i32) {
    %c0_i32 = arith.constant 0 : i32
    %c0_i32_0 = arith.constant 0 : i32
    return %c0_i32, %arg1 : i32, i32
  }
  func.func @transform_3(%arg0: i32, %arg1: i32, %arg2: i32) -> (i32, i32) {
    %c0_i32 = arith.constant 0 : i32
    %c0_i32_0 = arith.constant 0 : i32
    return %c0_i32, %arg1 : i32, i32
  }
  func.func @transform_4(%arg0: i32, %arg1: i32, %arg2: i32) -> (i32, i32) {
    %c0_i32 = arith.constant 0 : i32
    return %arg0, %arg1 : i32, i32
  }
  func.func @transform_5(%arg0: i32, %arg1: i32, %arg2: i32) -> (i32, i32) {
    %c0_i32 = arith.constant 0 : i32
    return %arg0, %arg1 : i32, i32
  }
}

module attributes {stable_mosaic.version = 11 : i64} {
  func.func @kernel(%arg0: i32, %arg1: i32, %arg2: i32, %arg3: memref<16x512xbf16, #tpu.memory_space<vmem>>, %arg4: memref<512x256xbf16, #tpu.memory_space<vmem>>, %arg5: memref<1x256xf32, #tpu.memory_space<vmem>>, %arg6: memref<1x256xf32, #tpu.memory_space<vmem>>, %arg7: memref<16x256xf32, #tpu.memory_space<vmem>>, %arg8: memref<16x256xf32, #tpu.memory_space<vmem>>) attributes {dimension_semantics = [#tpu.dimension_semantics<parallel>, #tpu.dimension_semantics<parallel>, #tpu.dimension_semantics<arbitrary>], iteration_bounds = array<i64: 1, 2, 9>, scalar_prefetch = 0 : i64, scratch_operands = 1 : i64, tpu.core_type = #tpu.core_type<tc>, window_params = [{transform_indices = @transform_0, window_bounds = array<i64: 16, 512>}, {transform_indices = @transform_1, window_bounds = array<i64: 512, 256>}, {transform_indices = @transform_2, window_bounds = array<i64: 1, 256>}, {transform_indices = @transform_3, window_bounds = array<i64: 1, 256>}, {transform_indices = @transform_4, window_bounds = array<i64: 16, 256>}]} {
    %c0_i32 = arith.constant 0 : i32
    %0 = arith.cmpi eq, %arg2, %c0_i32 : i32
    %1 = arith.extui %0 : i1 to i32
    %c0_i32_0 = arith.constant 0 : i32
    %2 = arith.cmpi ne, %1, %c0_i32_0 : i32
    scf.if %2 {
      %cst_9 = arith.constant 0.000000e+00 : f32
      %12 = vector.broadcast %cst_9 : f32 to vector<16x256xf32>
      %c0_10 = arith.constant 0 : index
      %c0_11 = arith.constant 0 : index
      %13 = vector.load %arg8[%c0_10, %c0_11] : memref<16x256xf32, #tpu.memory_space<vmem>>, vector<16x256xf32>
      tpu.vector_store %arg8[%c0_10, %c0_11], %12 {strides = array<i32>} : memref<16x256xf32, #tpu.memory_space<vmem>>, vector<16x256xf32>,
    } else {
    }
    %c0 = arith.constant 0 : index
    %c0_1 = arith.constant 0 : index
    %3 = vector.load %arg8[%c0, %c0_1] : memref<16x256xf32, #tpu.memory_space<vmem>>, vector<16x256xf32>
    %c0_2 = arith.constant 0 : index
    %c0_3 = arith.constant 0 : index
    %4 = vector.load %arg3[%c0_2, %c0_3] : memref<16x512xbf16, #tpu.memory_space<vmem>>, vector<16x512xbf16>
    %c0_4 = arith.constant 0 : index
    %c0_5 = arith.constant 0 : index
    %5 = vector.load %arg4[%c0_4, %c0_5] : memref<512x256xbf16, #tpu.memory_space<vmem>>, vector<512x256xbf16>
    %cst = arith.constant dense<0.000000e+00> : vector<16x256xf32>
    %6 = tpu.matmul %4, %5, %cst {dimension_numbers = #tpu.dot_dimension_numbers<[1], [0], [0], [1], [0, 0, 1, 1], [], []>} : vector<16x512xbf16>, vector<512x256xbf16>, vector<16x256xf32> -> vector<16x256xf32>
    %7 = arith.addf %3, %6 : vector<16x256xf32>
    %c0_6 = arith.constant 0 : index
    %c0_7 = arith.constant 0 : index
    %8 = vector.load %arg8[%c0_6, %c0_7] : memref<16x256xf32, #tpu.memory_space<vmem>>, vector<16x256xf32>
    tpu.vector_store %arg8[%c0_6, %c0_7], %7 {strides = array<i32>} : memref<16x256xf32, #tpu.memory_space<vmem>>, vector<16x256xf32>,
    %c8_i32 = arith.constant 8 : i32
    %9 = arith.cmpi eq, %arg2, %c8_i32 : i32
    %10 = arith.extui %9 : i1 to i32
    %c0_i32_8 = arith.constant 0 : i32
    %11 = arith.cmpi ne, %10, %c0_i32_8 : i32
    scf.if %11 {
      %c0_9 = arith.constant 0 : index
      %c0_10 = arith.constant 0 : index
      %12 = vector.load %arg8[%c0_9, %c0_10] : memref<16x256xf32, #tpu.memory_space<vmem>>, vector<16x256xf32>
      %c0_11 = arith.constant 0 : index
      %c0_12 = arith.constant 0 : index
      %13 = vector.load %arg5[%c0_11, %c0_12] : memref<1x256xf32, #tpu.memory_space<vmem>>, vector<1x256xf32>
      %14 = vector.broadcast %13 : vector<1x256xf32> to vector<16x256xf32>
      %15 = arith.mulf %12, %14 : vector<16x256xf32>
      %c0_13 = arith.constant 0 : index
      %c0_14 = arith.constant 0 : index
      %16 = vector.load %arg6[%c0_13, %c0_14] : memref<1x256xf32, #tpu.memory_space<vmem>>, vector<1x256xf32>
      %17 = vector.broadcast %16 : vector<1x256xf32> to vector<16x256xf32>
      %18 = arith.addf %15, %17 : vector<16x256xf32>
      %cst_15 = arith.constant 0.000000e+00 : f32
      %19 = vector.broadcast %cst_15 : f32 to vector<16x256xf32>
      %20 = arith.maximumf %18, %19 : vector<16x256xf32>
      %c0_16 = arith.constant 0 : index
      %c0_17 = arith.constant 0 : index
      %21 = vector.load %arg7[%c0_16, %c0_17] : memref<16x256xf32, #tpu.memory_space<vmem>>, vector<16x256xf32>
      tpu.vector_store %arg7[%c0_16, %c0_17], %20 {strides = array<i32>} : memref<16x256xf32, #tpu.memory_space<vmem>>, vector<16x256xf32>,
    } else {
    }
    return
  }
  func.func @transform_0(%arg0: i32, %arg1: i32, %arg2: i32) -> (i32, i32) {
    %c0_i32 = arith.constant 0 : i32
    return %arg0, %arg2 : i32, i32
  }
  func.func @transform_1(%arg0: i32, %arg1: i32, %arg2: i32) -> (i32, i32) {
    %c0_i32 = arith.constant 0 : i32
    return %arg2, %arg1 : i32, i32
  }
  func.func @transform_2(%arg0: i32, %arg1: i32, %arg2: i32) -> (i32, i32) {
    %c0_i32 = arith.constant 0 : i32
    %c0_i32_0 = arith.constant 0 : i32
    return %c0_i32, %arg1 : i32, i32
  }
  func.func @transform_3(%arg0: i32, %arg1: i32, %arg2: i32) -> (i32, i32) {
    %c0_i32 = arith.constant 0 : i32
    %c0_i32_0 = arith.constant 0 : i32
    return %c0_i32, %arg1 : i32, i32
  }
  func.func @transform_4(%arg0: i32, %arg1: i32, %arg2: i32) -> (i32, i32) {
    %c0_i32 = arith.constant 0 : i32
    return %arg0, %arg1 : i32, i32
  }
}

module attributes {stable_mosaic.version = 11 : i64} {
  func.func @_pool_fc_kernel(%arg0: i32, %arg1: memref<8x1x512xf32, #tpu.memory_space<vmem>>, %arg2: memref<512x128xf32, #tpu.memory_space<vmem>>, %arg3: memref<1x128xf32, #tpu.memory_space<vmem>>, %arg4: memref<8x128xf32, #tpu.memory_space<vmem>>) attributes {dimension_semantics = [#tpu.dimension_semantics<parallel>], iteration_bounds = array<i64: 1>, scalar_prefetch = 0 : i64, scratch_operands = 0 : i64, tpu.core_type = #tpu.core_type<tc>, window_params = [{transform_indices = @transform_0, window_bounds = array<i64: 8, 1, 512>}, {pipeline_mode = #tpu.pipeline_mode<synchronous>, transform_indices = @transform_1, window_bounds = array<i64: 512, 128>}, {pipeline_mode = #tpu.pipeline_mode<synchronous>, transform_indices = @transform_2, window_bounds = array<i64: 1, 128>}, {transform_indices = @transform_3, window_bounds = array<i64: 8, 128>}]} {
    %c0 = arith.constant 0 : index
    %c0_0 = arith.constant 0 : index
    %c0_1 = arith.constant 0 : index
    %0 = vector.load %arg1[%c0, %c0_0, %c0_1] : memref<8x1x512xf32, #tpu.memory_space<vmem>>, vector<8x1x512xf32>
    %cst = arith.constant dense<0.000000e+00> : vector<8x512xf32>
    %1 = vector.multi_reduction <add>, %0, %cst [1] : vector<8x1x512xf32> to vector<8x512xf32>
    %cst_2 = arith.constant 1.000000e+00 : f32
    %2 = vector.broadcast %cst_2 : f32 to vector<8x512xf32>
    %3 = arith.divf %1, %2 : vector<8x512xf32>
    %c0_3 = arith.constant 0 : index
    %c0_4 = arith.constant 0 : index
    %4 = vector.load %arg2[%c0_3, %c0_4] : memref<512x128xf32, #tpu.memory_space<vmem>>, vector<512x128xf32>
    %cst_5 = arith.constant dense<0.000000e+00> : vector<8x128xf32>
    %5 = tpu.matmul %3, %4, %cst_5 {dimension_numbers = #tpu.dot_dimension_numbers<[1], [0], [0], [1], [0, 0, 1, 1], [], []>} : vector<8x512xf32>, vector<512x128xf32>, vector<8x128xf32> -> vector<8x128xf32>
    %c0_6 = arith.constant 0 : index
    %c0_7 = arith.constant 0 : index
    %6 = vector.load %arg3[%c0_6, %c0_7] : memref<1x128xf32, #tpu.memory_space<vmem>>, vector<1x128xf32>
    %7 = vector.broadcast %6 : vector<1x128xf32> to vector<8x128xf32>
    %8 = arith.addf %5, %7 : vector<8x128xf32>
    %c0_8 = arith.constant 0 : index
    %c0_9 = arith.constant 0 : index
    %9 = vector.load %arg4[%c0_8, %c0_9] : memref<8x128xf32, #tpu.memory_space<vmem>>, vector<8x128xf32>
    tpu.vector_store %arg4[%c0_8, %c0_9], %8 {strides = array<i32>} : memref<8x128xf32, #tpu.memory_space<vmem>>, vector<8x128xf32>,
    return
  }
  func.func @transform_0(%arg0: i32) -> (i32, i32, i32) {
    %c0_i32 = arith.constant 0 : i32
    %c0_i32_0 = arith.constant 0 : i32
    %c0_i32_1 = arith.constant 0 : i32
    return %arg0, %c0_i32, %c0_i32_0 : i32, i32, i32
  }
  func.func @transform_1(%arg0: i32) -> (i32, i32) {
    %c0_i32 = arith.constant 0 : i32
    %c0_i32_0 = arith.constant 0 : i32
    %c0_i32_1 = arith.constant 0 : i32
    return %c0_i32, %c0_i32_0 : i32, i32
  }
  func.func @transform_2(%arg0: i32) -> (i32, i32) {
    %c0_i32 = arith.constant 0 : i32
    %c0_i32_0 = arith.constant 0 : i32
    %c0_i32_1 = arith.constant 0 : i32
    return %c0_i32, %c0_i32_0 : i32, i32
  }
  func.func @transform_3(%arg0: i32) -> (i32, i32) {
    %c0_i32 = arith.constant 0 : i32
    %c0_i32_0 = arith.constant 0 : i32
    return %arg0, %c0_i32 : i32, i32
  }
}

</mosaic_0001>

<bundles_post_ra>
// kernel: regressor_forward.22
= control target key start
LH: loop header
LB: loop body
LE: loop exit
PB: predicated region body
PF: predicated region fallthrough
CT: control target
= control target key end

     0   :  { %s873_s1 = inlined_call_operand.vmem [shape: bf16[256,128], index: 1, kind: input, shape index: {}]   ;;  %s874_s0 = inlined_call_operand.vmem [shape: bf16[128,256], index: 0, kind: input, shape index: {}]   ;;  %s875_s2 = inlined_call_operand.vmem [shape: f32[1,128], index: 2, kind: input, shape index: {}]   ;;  %s876_s3 = inlined_call_operand.vmem [shape: f32[1,128], index: 3, kind: input, shape index: {}]   ;;  %s877_s4 = inlined_call_operand.vmem [shape: f32[128,128], index: 4, kind: output, shape index: {}]  }
   0x1   :  { %v622_v0 = vld [vmem:[%s873_s1 + $0x78] sm:$0xff]   ;;  %v624_v2 = vld [vmem:[%s873_s1 + $0x70] sm:$0xff]   ;;  %v626_v4 = vld [vmem:[%s873_s1 + $0x68] sm:$0xff]  }
   0x2   :  { %v623_v1 = vld [vmem:[%s873_s1 + $0x38] sm:$0xff]   ;;  %542 = vmatprep.subr.bf16.mxu0 %v622_v0  ;;  %606 = vmatprep.subr.bf16.mxu1 %v622_v0  ;;  %v625_v3 = vld [vmem:[%s873_s1 + $0x30] sm:$0xff]   ;;  %v627_v5 = vld [vmem:[%s873_s1 + $0x28] sm:$0xff]  }
   0x3   :  { %543 = vmatpush3.bf16.msra.mxu0 %v623_v1  ;;  %614 = vmatpush3.bf16.msra.mxu1 %v623_v1  ;;  %v628_v6 = vld [vmem:[%s873_s1 + $0x60] sm:$0xff]   ;;  %v630_v8 = vld [vmem:[%s873_s1 + $0x58] sm:$0xff]   ;;  %v632_v10 = vld [vmem:[%s873_s1 + $0x50] sm:$0xff]  }
   0x4   :  { %544 = vmatprep.subr.bf16.mxu0 %v624_v2  ;;  %607 = vmatprep.subr.bf16.mxu1 %v624_v2  ;;  %v629_v7 = vld [vmem:[%s873_s1 + $0x20] sm:$0xff]   ;;  %v631_v9 = vld [vmem:[%s873_s1 + $0x18] sm:$0xff]   ;;  %v633_v13 = vld [vmem:[%s873_s1 + $0x10] sm:$0xff]  }
   0x5   :  { %v640_v11 = vld [vmem:[%s874_s0 + $0x4] ss:$8 sps:$4 sm:$0xff]   ;;  %v638_v18 = vld [vmem:[%s874_s0] ss:$8 sps:$4 sm:$0xff]   ;;  %v644_v20 = vld [vmem:[%s874_s0 + $0x14] ss:$8 sps:$4 sm:$0xff]  }
   0x6   :  { %v643_v12 = vld [vmem:[%s874_s0 + $0x44] ss:$8 sps:$4 sm:$0xff]   ;;  %310 = vmatprep.mubr.bf16.mxu0 %v640_v11  ;;  %v641_v19 = vld [vmem:[%s874_s0 + $0x40] ss:$8 sps:$4 sm:$0xff]   ;;  %v646_v21 = vld [vmem:[%s874_s0 + $0x54] ss:$8 sps:$4 sm:$0xff]  }
   0x7   :  { %545 = vmatpush3.bf16.msra.mxu0 %v625_v3  ;;  %615 = vmatpush3.bf16.msra.mxu1 %v625_v3  ;;  %v634_v14 = vld [vmem:[%s873_s1 + $0x48] sm:$0xff]   ;;  %v636_v16 = vld [vmem:[%s873_s1 + $0x40] sm:$0xff]   ;;  %v648_v22 = vld [vmem:[%s874_s0 + $0x10] ss:$8 sps:$4 sm:$0xff]  }
   0x8   :  { %546 = vmatprep.subr.bf16.mxu0 %v626_v4  ;;  %608 = vmatprep.subr.bf16.mxu1 %v626_v4  ;;  %v635_v15 = vld [vmem:[%s873_s1 + $0x8] sm:$0xff]   ;;  %v637_v17 = vld [vmem:[%s873_s1] sm:$0xff]   ;;  %v649_v23 = vld [vmem:[%s874_s0 + $0x50] ss:$8 sps:$4 sm:$0xff]  }
   0x9   :  { %342 = vmatprep.mubr.bf16.mxu1 %v643_v12  ;;  %v650_v24 = vld [vmem:[%s874_s0 + $0x24] ss:$8 sps:$4 sm:$0xff]   ;;  %v654_v26 = vld [vmem:[%s874_s0 + $0x20] ss:$8 sps:$4 sm:$0xff]   ;;  %v656_v28 = vld [vmem:[%s874_s0 + $0x34] ss:$8 sps:$4 sm:$0xff]  }
   0xa   :  { %v652_v25 = vld [vmem:[%s874_s0 + $0x64] ss:$8 sps:$4 sm:$0xff]   ;;  %v655_v27 = vld [vmem:[%s874_s0 + $0x60] ss:$8 sps:$4 sm:$0xff]   ;;  %v658_v29 = vld [vmem:[%s874_s0 + $0x74] ss:$8 sps:$4 sm:$0xff]  }
   0xb   :  { %547 = vmatpush3.bf16.msra.mxu0 %v627_v5  ;;  %616 = vmatpush3.bf16.msra.mxu1 %v627_v5  ;;  %v660_v30 = vld [vmem:[%s874_s0 + $0x30] ss:$8 sps:$4 sm:$0xff]   ;;  %v786_v35 = vld [vmem:[%s875_s2] ss:$0 sm:$0xff] }
   0xc   :  { %548 = vmatprep.subr.bf16.mxu0 %v628_v6  ;;  %609 = vmatprep.subr.bf16.mxu1 %v628_v6  ;;  %v661_v31 = vld [vmem:[%s874_s0 + $0x70] ss:$8 sps:$4 sm:$0xff]   ;;  %v791_v39 = vld [vmem:[%s876_s3] ss:$0 sm:$0xff] }
   0xf   :  { %549 = vmatpush3.bf16.msra.mxu0 %v629_v7  ;;  %617 = vmatpush3.bf16.msra.mxu1 %v629_v7 }
  0x10   :  { %550 = vmatprep.subr.bf16.mxu0 %v630_v8  ;;  %610 = vmatprep.subr.bf16.mxu1 %v630_v8 }
  0x13   :  { %551 = vmatpush3.bf16.msra.mxu0 %v631_v9  ;;  %618 = vmatpush3.bf16.msra.mxu1 %v631_v9 }
  0x14   :  { %552 = vmatprep.subr.bf16.mxu0 %v632_v10  ;;  %611 = vmatprep.subr.bf16.mxu1 %v632_v10 }
  0x17   :  { %553 = vmatpush3.bf16.msra.mxu0 %v633_v13  ;;  %619 = vmatpush3.bf16.msra.mxu1 %v633_v13 }
  0x18   :  { %554 = vmatprep.subr.bf16.mxu0 %v634_v14  ;;  %612 = vmatprep.subr.bf16.mxu1 %v634_v14 }
  0x1b   :  { %555 = vmatpush3.bf16.msra.mxu0 %v635_v15  ;;  %620 = vmatpush3.bf16.msra.mxu1 %v635_v15 }
  0x1c   :  { %556 = vmatprep.subr.bf16.mxu0 %v636_v16  ;;  %613 = vmatprep.subr.bf16.mxu1 %v636_v16 }
  0x1f   :  { %557 = vmatpush3.bf16.msra.mxu0 %v637_v17  ;;  %621 = vmatpush3.bf16.msra.mxu1 %v637_v17 }
  0x22   :  { %311 = vmatmul.mubr.bf16.vlgmr.msra.gmra.mxu0 %v638_v18  ;;  %343 = vmatmul.mubr.bf16.vlgmr.msra.gmra.mxu1 %v641_v19 }
  0x23   :  { %318 = vmatprep.mubr.bf16.mxu0 %v644_v20  ;;  %350 = vmatprep.mubr.bf16.mxu1 %v646_v21 }
  0x2a   :  { %319 = vmatmul.mubr.bf16.gmra.mxu0 %v648_v22  ;;  %351 = vmatmul.mubr.bf16.gmra.mxu1 %v649_v23 }
  0x2b   :  { %326 = vmatprep.mubr.bf16.mxu0 %v650_v24  ;;  %358 = vmatprep.mubr.bf16.mxu1 %v652_v25 }
  0x32   :  { %327 = vmatmul.mubr.bf16.gmra.mxu0 %v654_v26  ;;  %359 = vmatmul.mubr.bf16.gmra.mxu1 %v655_v27 }
  0x33   :  { %334 = vmatprep.mubr.bf16.mxu0 %v656_v28  ;;  %366 = vmatprep.mubr.bf16.mxu1 %v658_v29 }
  0x3a   :  { %335 = vmatmul.mubr.bf16.gmra.mxu0 %v660_v30  ;;  %367 = vmatmul.mubr.bf16.gmra.mxu1 %v661_v31 }
  0xe2   :  { %v558_v32 = vpop.f32.mrf.mxu0  ;;  %v582_v33 = vpop.f32.mrf.mxu1 }
  0xe4   :  { %v559_v34 = vpop.f32.mrf.mxu0  ;;  %v583_v36 = vpop.f32.mrf.mxu1 }
  0xe5   :  { %v560_v37 = vadd.f32 %v559_v34, %v558_v32  ;;  %v584_v38 = vadd.f32 %v583_v36, %v582_v33 }
  0xe6   :  { %v561_v40 = vpop.f32.mrf.mxu0  ;;  %v585_v41 = vpop.f32.mrf.mxu1 }
  0xe7   :  { %v433_v42 = vmul.f32 %v560_v37, %v786_v35  ;;  %v441_v43 = vmul.f32 %v584_v38, %v786_v35 }
  0xe8   :  { %v562_v44 = vpop.f32.mrf.mxu0  ;;  %v586_v45 = vpop.f32.mrf.mxu1 }
  0xe9   :  { %v456_v46 = vadd.f32 %v791_v39, %v433_v42  ;;  %v464_v47 = vadd.f32 %v791_v39, %v441_v43  ;;  %v563_v48 = vadd.f32 %v562_v44, %v561_v40  ;;  %v587_v49 = vadd.f32 %v586_v45, %v585_v41 }
  0xea   :  { %v564_v50 = vpop.f32.mrf.mxu0  ;;  %v588_v51 = vpop.f32.mrf.mxu1 }
  0xeb   :  { %v472_v52 = vmax.f32 %v456_v46, 0.0  ;;  %v480_v53 = vmax.f32 %v464_v47, 0.0  ;;  %v434_v54 = vmul.f32 %v563_v48, %v786_v35  ;;  %v442_v55 = vmul.f32 %v587_v49, %v786_v35 }
  0xec   :  { %v565_v56 = vpop.f32.mrf.mxu0  ;;  %v589_v57 = vpop.f32.mrf.mxu1 }
  0xed   :  { %488 = vst [vmem:[%s877_s4] sm:$0xff] %v472_v52  ;;  %496 = vst [vmem:[%s877_s4 + $0x40] sm:$0xff] %v480_v53  ;;  %v457_v58 = vadd.f32 %v791_v39, %v434_v54  ;;  %v465_v59 = vadd.f32 %v791_v39, %v442_v55  ;;  %v566_v60 = vadd.f32 %v565_v56, %v564_v50 }
  0xee   :  { %v590_v61 = vadd.f32 %v589_v57, %v588_v51  ;;  %v567_v62 = vpop.f32.mrf.mxu0  ;;  %v591_v63 = vpop.f32.mrf.mxu1 }
  0xef   :  { %v473_v0 = vmax.f32 %v457_v58, 0.0  ;;  %v481_v1 = vmax.f32 %v465_v59, 0.0  ;;  %v435_v2 = vmul.f32 %v566_v60, %v786_v35 }
  0xf0   :  { %v443_v3 = vmul.f32 %v590_v61, %v786_v35  ;;  %v568_v4 = vpop.f32.mrf.mxu0  ;;  %v592_v5 = vpop.f32.mrf.mxu1 }
  0xf1   :  { %489 = vst [vmem:[%s877_s4 + $0x8] sm:$0xff] %v473_v0  ;;  %497 = vst [vmem:[%s877_s4 + $0x48] sm:$0xff] %v481_v1  ;;  %v458_v6 = vadd.f32 %v791_v39, %v435_v2  ;;  %v569_v8 = vadd.f32 %v568_v4, %v567_v62  ;;  %v593_v9 = vadd.f32 %v592_v5, %v591_v63 }
  0xf2   :  { %v466_v7 = vadd.f32 %v791_v39, %v443_v3  ;;  %v570_v10 = vpop.f32.mrf.mxu0  ;;  %v594_v11 = vpop.f32.mrf.mxu1 }
  0xf3   :  { %v474_v12 = vmax.f32 %v458_v6, 0.0  ;;  %v436_v14 = vmul.f32 %v569_v8, %v786_v35  ;;  %v444_v15 = vmul.f32 %v593_v9, %v786_v35 }
  0xf4   :  { %v482_v13 = vmax.f32 %v466_v7, 0.0  ;;  %v571_v16 = vpop.f32.mrf.mxu0  ;;  %v595_v17 = vpop.f32.mrf.mxu1 }
  0xf5   :  { %490 = vst [vmem:[%s877_s4 + $0x10] sm:$0xff] %v474_v12  ;;  %v459_v18 = vadd.f32 %v791_v39, %v436_v14  ;;  %v467_v19 = vadd.f32 %v791_v39, %v444_v15  ;;  %v572_v20 = vadd.f32 %v571_v16, %v570_v10  ;;  %v596_v21 = vadd.f32 %v595_v17, %v594_v11 }
  0xf6   :  { %498 = vst [vmem:[%s877_s4 + $0x50] sm:$0xff] %v482_v13  ;;  %v573_v22 = vpop.f32.mrf.mxu0  ;;  %v597_v23 = vpop.f32.mrf.mxu1 }
  0xf7   :  { %v475_v24 = vmax.f32 %v459_v18, 0.0  ;;  %v483_v25 = vmax.f32 %v467_v19, 0.0  ;;  %v437_v26 = vmul.f32 %v572_v20, %v786_v35  ;;  %v445_v27 = vmul.f32 %v596_v21, %v786_v35 }
  0xf8   :  { %v574_v28 = vpop.f32.mrf.mxu0  ;;  %v598_v29 = vpop.f32.mrf.mxu1 }
  0xf9   :  { %491 = vst [vmem:[%s877_s4 + $0x18] sm:$0xff] %v475_v24  ;;  %499 = vst [vmem:[%s877_s4 + $0x58] sm:$0xff] %v483_v25  ;;  %v460_v30 = vadd.f32 %v791_v39, %v437_v26  ;;  %v468_v31 = vadd.f32 %v791_v39, %v445_v27  ;;  %v575_v32 = vadd.f32 %v574_v28, %v573_v22 }
  0xfa   :  { %v599_v33 = vadd.f32 %v598_v29, %v597_v23  ;;  %v576_v34 = vpop.f32.mrf.mxu0  ;;  %v600_v36 = vpop.f32.mrf.mxu1 }
  0xfb   :  { %v476_v37 = vmax.f32 %v460_v30, 0.0  ;;  %v484_v38 = vmax.f32 %v468_v31, 0.0  ;;  %v438_v40 = vmul.f32 %v575_v32, %v786_v35 }
  0xfc   :  { %v446_v41 = vmul.f32 %v599_v33, %v786_v35  ;;  %v577_v42 = vpop.f32.mrf.mxu0  ;;  %v601_v43 = vpop.f32.mrf.mxu1 }
  0xfd   :  { %492 = vst [vmem:[%s877_s4 + $0x20] sm:$0xff] %v476_v37  ;;  %500 = vst [vmem:[%s877_s4 + $0x60] sm:$0xff] %v484_v38  ;;  %v461_v44 = vadd.f32 %v791_v39, %v438_v40  ;;  %v578_v46 = vadd.f32 %v577_v42, %v576_v34  ;;  %v602_v47 = vadd.f32 %v601_v43, %v600_v36 }
  0xfe   :  { %v469_v45 = vadd.f32 %v791_v39, %v446_v41  ;;  %v579_v48 = vpop.f32.mrf.mxu0  ;;  %v603_v49 = vpop.f32.mrf.mxu1 }
  0xff   :  { %v477_v50 = vmax.f32 %v461_v44, 0.0  ;;  %v439_v52 = vmul.f32 %v578_v46, %v786_v35  ;;  %v447_v53 = vmul.f32 %v602_v47, %v786_v35 }
 0x100   :  { %v485_v51 = vmax.f32 %v469_v45, 0.0  ;;  %v580_v54 = vpop.f32.mrf.mxu0  ;;  %v604_v55 = vpop.f32.mrf.mxu1 }
 0x101   :  { %493 = vst [vmem:[%s877_s4 + $0x28] sm:$0xff] %v477_v50  ;;  %v462_v56 = vadd.f32 %v791_v39, %v439_v52  ;;  %v470_v57 = vadd.f32 %v791_v39, %v447_v53  ;;  %v581_v58 = vadd.f32 %v580_v54, %v579_v48  ;;  %v605_v59 = vadd.f32 %v604_v55, %v603_v49 }
 0x102   :  { %501 = vst [vmem:[%s877_s4 + $0x68] sm:$0xff] %v485_v51 }
 0x103   :  { %v478_v60 = vmax.f32 %v462_v56, 0.0  ;;  %v486_v61 = vmax.f32 %v470_v57, 0.0  ;;  %v440_v62 = vmul.f32 %v581_v58, %v786_v35  ;;  %v448_v63 = vmul.f32 %v605_v59, %v786_v35 }
 0x105   :  { %494 = vst [vmem:[%s877_s4 + $0x30] sm:$0xff] %v478_v60  ;;  %502 = vst [vmem:[%s877_s4 + $0x70] sm:$0xff] %v486_v61  ;;  %v463_v0 = vadd.f32 %v791_v39, %v440_v62  ;;  %v471_v1 = vadd.f32 %v791_v39, %v448_v63 }
 0x107   :  { %v479_v2 = vmax.f32 %v463_v0, 0.0  ;;  %v487_v3 = vmax.f32 %v471_v1, 0.0 }
 0x109   :  { %495 = vst [vmem:[%s877_s4 + $0x38] sm:$0xff] %v479_v2  ;;  %503 = vst [vmem:[%s877_s4 + $0x78] sm:$0xff] %v487_v3 }

// kernel: regressor_forward.23
= control target key start
LH: loop header
LB: loop body
LE: loop exit
PB: predicated region body
PF: predicated region fallthrough
CT: control target
= control target key end

     0   :  { %vm44_vm0 = vcmask 523264   ;;  %s291_s0 = inlined_call_operand.vmem [shape: f32[9,32,64], index: 0, kind: input, shape index: {}]   ;;  %s292_s1 = inlined_call_operand.vmem [shape: f32[32,64], index: 1, kind: output, shape index: {}]  }
   0x1   :  { %v8_v0 = vld [vmem:[%s291_s0] sm:$0xff]  ;;  %v9_v11 = vld [vmem:[%s291_s0 + $0x8] sm:$0xff]  ;;  %v10_v27 = vld [vmem:[%s291_s0 + $0x10] sm:$0xff] }
   0x2   :  { %v12_v1 = vld [vmem:[%s291_s0 + $0x20] sm:$0xff]  ;;  %v45_v4 = vsel %vm44_vm0, %v8_v0, -inf  ;;  %v13_v12 = vld [vmem:[%s291_s0 + $0x28] sm:$0xff]  ;;  %v62_v16 = vsel %vm44_vm0, %v9_v11, -inf  ;;  %v14_v28 = vld [vmem:[%s291_s0 + $0x30] sm:$0xff]  ;;  %v79_v33 = vsel %vm44_vm0, %v10_v27, -inf }
   0x3   :  { %v16_v2 = vld [vmem:[%s291_s0 + $0x40] sm:$0xff]  ;;  %v46_v5 = vsel %vm44_vm0, %v12_v1, -inf  ;;  %v17_v13 = vld [vmem:[%s291_s0 + $0x48] sm:$0xff]  ;;  %v63_v17 = vsel %vm44_vm0, %v13_v12, -inf  ;;  %v18_v29 = vld [vmem:[%s291_s0 + $0x50] sm:$0xff]  ;;  %v80_v34 = vsel %vm44_vm0, %v14_v28, -inf }
   0x4   :  { %v20_v3 = vld [vmem:[%s291_s0 + $0x60] sm:$0xff]  ;;  %v48_v6 = vsel %vm44_vm0, %v16_v2, -inf  ;;  %v47_v9 = vmax.f32 %v45_v4, %v46_v5  ;;  %v21_v15 = vld [vmem:[%s291_s0 + $0x68] sm:$0xff]  ;;  %v65_v18 = vsel %vm44_vm0, %v17_v13, -inf  ;;  %v64_v23 = vmax.f32 %v62_v16, %v63_v17  ;;  %v22_v32 = vld [vmem:[%s291_s0 + $0x70] sm:$0xff] }
   0x5   :  { %v24_v7 = vld [vmem:[%s291_s0 + $0x80] sm:$0xff]  ;;  %v50_v10 = vsel %vm44_vm0, %v20_v3, -inf  ;;  %v25_v22 = vld [vmem:[%s291_s0 + $0x88] sm:$0xff]  ;;  %v67_v26 = vsel %vm44_vm0, %v21_v15, -inf  ;;  %v82_v35 = vsel %vm44_vm0, %v18_v29, -inf  ;;  %v26_v39 = vld [vmem:[%s291_s0 + $0x90] sm:$0xff]  ;;  %v81_v40 = vmax.f32 %v79_v33, %v80_v34 }
   0x6   :  { %v28_v8 = vld [vmem:[%s291_s0 + $0xa0] sm:$0xff]  ;;  %v49_v14 = vmax.f32 %v47_v9, %v48_v6  ;;  %v52_v21 = vsel %vm44_vm0, %v24_v7, -inf  ;;  %v29_v30 = vld [vmem:[%s291_s0 + $0xa8] sm:$0xff]  ;;  %v66_v31 = vmax.f32 %v64_v23, %v65_v18  ;;  %v69_v38 = vsel %vm44_vm0, %v25_v22, -inf  ;;  %v11_v45 = vld [vmem:[%s291_s0 + $0x18] sm:$0xff] }
   0x7   :  { %v32_v19 = vld [vmem:[%s291_s0 + $0xc0] sm:$0xff]  ;;  %v54_v25 = vsel %vm44_vm0, %v28_v8, -inf  ;;  %v33_v37 = vld [vmem:[%s291_s0 + $0xc8] sm:$0xff]  ;;  %v84_v44 = vsel %vm44_vm0, %v22_v32, -inf  ;;  %v15_v46 = vld [vmem:[%s291_s0 + $0x38] sm:$0xff]  ;;  %v71_v50 = vsel %vm44_vm0, %v29_v30, -inf  ;;  %v83_v52 = vmax.f32 %v81_v40, %v82_v35 }
   0x8   :  { %v36_v20 = vld [vmem:[%s291_s0 + $0xe0] sm:$0xff]  ;;  %v51_v24 = vmax.f32 %v49_v14, %v50_v10  ;;  %v56_v41 = vsel %vm44_vm0, %v32_v19, -inf  ;;  %v68_v43 = vmax.f32 %v66_v31, %v67_v26  ;;  %v19_v47 = vld [vmem:[%s291_s0 + $0x58] sm:$0xff]  ;;  %v30_v51 = vld [vmem:[%s291_s0 + $0xb0] sm:$0xff]  ;;  %v96_v54 = vsel %vm44_vm0, %v11_v45, -inf }
   0x9   :  { %v58_v42 = vsel %vm44_vm0, %v36_v20, -inf  ;;  %v40_v48 = vld [vmem:[%s291_s0 + $0x100] sm:$0xff]  ;;  %v23_v53 = vld [vmem:[%s291_s0 + $0x78] sm:$0xff]  ;;  %v37_v55 = vld [vmem:[%s291_s0 + $0xe8] sm:$0xff]  ;;  %v86_v57 = vsel %vm44_vm0, %v26_v39, -inf  ;;  %v97_v58 = vsel %vm44_vm0, %v15_v46, -inf  ;;  %v85_v63 = vmax.f32 %v83_v52, %v84_v44 }
   0xa   :  { %v53_v36 = vmax.f32 %v51_v24, %v52_v21  ;;  %v70_v56 = vmax.f32 %v68_v43, %v69_v38  ;;  %v99_v59 = vsel %vm44_vm0, %v19_v47, -inf  ;;  %v73_v61 = vsel %vm44_vm0, %v33_v37, -inf  ;;  %v34_v62 = vld [vmem:[%s291_s0 + $0xd0] sm:$0xff]  ;;  %v27_v0 = vld [vmem:[%s291_s0 + $0x98] sm:$0xff]  ;;  %v41_v3 = vld [vmem:[%s291_s0 + $0x108] sm:$0xff] }
   0xb   :  { %v98_v1 = vmax.f32 %v96_v54, %v97_v58  ;;  %v60_v2 = vsel %vm44_vm0, %v40_v48, -inf  ;;  %v88_v5 = vsel %vm44_vm0, %v30_v51, -inf  ;;  %v101_v6 = vsel %vm44_vm0, %v23_v53, -inf  ;;  %v38_v9 = vld [vmem:[%s291_s0 + $0xf0] sm:$0xff]  ;;  %v31_v11 = vld [vmem:[%s291_s0 + $0xb8] sm:$0xff] }
   0xc   :  { %v55_v49 = vmax.f32 %v53_v36, %v54_v25  ;;  %v72_v4 = vmax.f32 %v70_v56, %v71_v50  ;;  %v75_v8 = vsel %vm44_vm0, %v37_v55, -inf  ;;  %v87_v10 = vmax.f32 %v85_v63, %v86_v57  ;;  %v42_v18 = vld [vmem:[%s291_s0 + $0x110] sm:$0xff]  ;;  %v35_v20 = vld [vmem:[%s291_s0 + $0xd8] sm:$0xff] }
   0xd   :  { %v100_v12 = vmax.f32 %v98_v1, %v99_v59  ;;  %v90_v14 = vsel %vm44_vm0, %v34_v62, -inf  ;;  %v103_v15 = vsel %vm44_vm0, %v27_v0, -inf  ;;  %v77_v17 = vsel %vm44_vm0, %v41_v3, -inf  ;;  %v39_v26 = vld [vmem:[%s291_s0 + $0xf8] sm:$0xff] }
   0xe   :  { %v57_v60 = vmax.f32 %v55_v49, %v56_v41  ;;  %v74_v13 = vmax.f32 %v72_v4, %v73_v61  ;;  %v89_v19 = vmax.f32 %v87_v10, %v88_v5  ;;  %v92_v23 = vsel %vm44_vm0, %v38_v9, -inf  ;;  %v43_v32 = vld [vmem:[%s291_s0 + $0x118] sm:$0xff] }
   0xf   :  { %v102_v21 = vmax.f32 %v100_v12, %v101_v6  ;;  %v105_v24 = vsel %vm44_vm0, %v31_v11, -inf  ;;  %v94_v29 = vsel %vm44_vm0, %v42_v18, -inf  ;;  %v107_v30 = vsel %vm44_vm0, %v35_v20, -inf }
  0x10   :  { %v59_v7 = vmax.f32 %v57_v60, %v58_v42  ;;  %v76_v22 = vmax.f32 %v74_v13, %v75_v8  ;;  %v91_v25 = vmax.f32 %v89_v19, %v90_v14  ;;  %v109_v34 = vsel %vm44_vm0, %v39_v26, -inf }
  0x11   :  { %v104_v27 = vmax.f32 %v102_v21, %v103_v15  ;;  %v111_v37 = vsel %vm44_vm0, %v43_v32, -inf }
  0x12   :  { %v61_v16 = vmax.f32 %v59_v7, %v60_v2  ;;  %v78_v28 = vmax.f32 %v76_v22, %v77_v17  ;;  %v93_v31 = vmax.f32 %v91_v25, %v92_v23 }
  0x13   :  { %v106_v33 = vmax.f32 %v104_v27, %v105_v24 }
  0x14   :  { %113 = vst.msk [vmem:[%s292_s1] sm:$0xff] %vm44_vm0, %v61_v16  ;;  %114 = vst.msk [vmem:[%s292_s1 + $0x8] sm:$0xff] %vm44_vm0, %v78_v28  ;;  %v95_v35 = vmax.f32 %v93_v31, %v94_v29 }
  0x15   :  { %v108_v36 = vmax.f32 %v106_v33, %v107_v30 }
  0x16   :  { %115 = vst.msk [vmem:[%s292_s1 + $0x10] sm:$0xff] %vm44_vm0, %v95_v35 }
  0x17   :  { %v110_v38 = vmax.f32 %v108_v36, %v109_v34 }
  0x19   :  { %v112_v39 = vmax.f32 %v110_v38, %v111_v37 }
  0x1b   :  { %116 = vst.msk [vmem:[%s292_s1 + $0x18] sm:$0xff] %vm44_vm0, %v112_v39 }

// kernel: regressor_forward.24
= control target key start
LH: loop header
LB: loop body
LE: loop exit
PB: predicated region body
PF: predicated region fallthrough
CT: control target
= control target key end

     0   :  { %s995_s1 = inlined_call_operand.vmem [shape: bf16[640,128], index: 1, kind: input, shape index: {}]   ;;  %s996_s0 = inlined_call_operand.vmem [shape: bf16[32,640], index: 0, kind: input, shape index: {}]   ;;  %s997_s2 = inlined_call_operand.vmem [shape: f32[1,128], index: 2, kind: input, shape index: {}]   ;;  %s998_s3 = inlined_call_operand.vmem [shape: f32[1,128], index: 3, kind: input, shape index: {}]   ;;  %s999_s4 = inlined_call_operand.vmem [shape: f32[32,128], index: 4, kind: output, shape index: {}]  }
   0x1   :  { %v748_v0 = vld [vmem:[%s995_s1 + $0x78] sm:$0xff]   ;;  %v752_v4 = vld [vmem:[%s995_s1 + $0x70] sm:$0xff]   ;;  %v756_v8 = vld [vmem:[%s995_s1 + $0x68] sm:$0xff]  }
   0x2   :  { %v749_v1 = vld [vmem:[%s995_s1 + $0xf8] sm:$0xff]   ;;  %662 = vmatprep.subr.bf16.mxu0 %v748_v0  ;;  %v753_v5 = vld [vmem:[%s995_s1 + $0xf0] sm:$0xff]   ;;  %v757_v9 = vld [vmem:[%s995_s1 + $0xe8] sm:$0xff]  }
   0x3   :  { %v750_v2 = vld [vmem:[%s995_s1 + $0x38] sm:$0xff]   ;;  %690 = vmatprep.subr.bf16.mxu1 %v749_v1  ;;  %v754_v6 = vld [vmem:[%s995_s1 + $0x30] sm:$0xff]   ;;  %v758_v10 = vld [vmem:[%s995_s1 + $0x28] sm:$0xff]  }
   0x4   :  { %v751_v3 = vld [vmem:[%s995_s1 + $0xb8] sm:$0xff]   ;;  %663 = vmatpush3.bf16.msra.mxu0 %v750_v2  ;;  %v755_v7 = vld [vmem:[%s995_s1 + $0xb0] sm:$0xff]   ;;  %v759_v11 = vld [vmem:[%s995_s1 + $0xa8] sm:$0xff]  }
   0x5   :  { %691 = vmatpush3.bf16.msra.mxu1 %v751_v3  ;;  %664 = vmatprep.subr.bf16.mxu0 %v752_v4  ;;  %v760_v12 = vld [vmem:[%s995_s1 + $0x60] sm:$0xff]   ;;  %v764_v16 = vld [vmem:[%s995_s1 + $0x58] sm:$0xff]   ;;  %v768_v20 = vld [vmem:[%s995_s1 + $0x50] sm:$0xff]  }
   0x6   :  { %692 = vmatprep.subr.bf16.mxu1 %v753_v5  ;;  %v761_v13 = vld [vmem:[%s995_s1 + $0xe0] sm:$0xff]   ;;  %v765_v17 = vld [vmem:[%s995_s1 + $0xd8] sm:$0xff]   ;;  %v769_v21 = vld [vmem:[%s995_s1 + $0xd0] sm:$0xff]  }
   0x7   :  { %v762_v14 = vld [vmem:[%s995_s1 + $0x20] sm:$0xff]   ;;  %v766_v18 = vld [vmem:[%s995_s1 + $0x18] sm:$0xff]   ;;  %v770_v22 = vld [vmem:[%s995_s1 + $0x10] sm:$0xff]  }
   0x8   :  { %665 = vmatpush3.bf16.msra.mxu0 %v754_v6  ;;  %v763_v15 = vld [vmem:[%s995_s1 + $0xa0] sm:$0xff]   ;;  %v767_v19 = vld [vmem:[%s995_s1 + $0x98] sm:$0xff]   ;;  %v771_v23 = vld [vmem:[%s995_s1 + $0x90] sm:$0xff]  }
   0x9   :  { %693 = vmatpush3.bf16.msra.mxu1 %v755_v7  ;;  %666 = vmatprep.subr.bf16.mxu0 %v756_v8  ;;  %v772_v24 = vld [vmem:[%s995_s1 + $0x48] sm:$0xff]   ;;  %v776_v28 = vld [vmem:[%s995_s1 + $0x40] sm:$0xff]   ;;  %v786_v36 = vld [vmem:[%s995_s1 + $0x138] sm:$0xff]  }
   0xa   :  { %694 = vmatprep.subr.bf16.mxu1 %v757_v9  ;;  %v773_v25 = vld [vmem:[%s995_s1 + $0xc8] sm:$0xff]   ;;  %v777_v29 = vld [vmem:[%s995_s1 + $0xc0] sm:$0xff]   ;;  %v787_v37 = vld [vmem:[%s995_s1 + $0x130] sm:$0xff]  }
   0xb   :  { %v774_v26 = vld [vmem:[%s995_s1 + $0x8] sm:$0xff]   ;;  %v778_v30 = vld [vmem:[%s995_s1] sm:$0xff]   ;;  %v790_v45 = vld [vmem:[%s995_s1 + $0x118] sm:$0xff]  }
   0xc   :  { %667 = vmatpush3.bf16.msra.mxu0 %v758_v10  ;;  %v775_v27 = vld [vmem:[%s995_s1 + $0x88] sm:$0xff]   ;;  %v779_v31 = vld [vmem:[%s995_s1 + $0x80] sm:$0xff]   ;;  %v797_v46 = vld [vmem:[%s995_s1 + $0x110] sm:$0xff]  }
   0xd   :  { %695 = vmatpush3.bf16.msra.mxu1 %v759_v11  ;;  %668 = vmatprep.subr.bf16.mxu0 %v760_v12  ;;  %v780_v32 = vld [vmem:[%s996_s0] ss:$20 sps:$4 sm:$0xff]   ;;  %v782_v33 = vld [vmem:[%s996_s0 + $0x4] ss:$20 sps:$4 sm:$0xff]   ;;  %v783_v34 = vld [vmem:[%s996_s0 + $0x8] ss:$20 sps:$4 sm:$0xff]  }
   0xe   :  { %696 = vmatprep.subr.bf16.mxu1 %v761_v13  ;;  %v785_v35 = vld [vmem:[%s996_s0 + $0xc] ss:$20 sps:$4 sm:$0xff]   ;;  %446 = vmatprep.mubr.bf16.mxu0 %v782_v33  ;;  %v793_v40 = vld [vmem:[%s996_s0 + $0x34] ss:$20 sps:$4 sm:$0xff]   ;;  %v796_v42 = vld [vmem:[%s996_s0 + $0x30] ss:$20 sps:$4 sm:$0xff]  }
   0xf   :  { %495 = vmatprep.mubr.bf16.mxu1 %v785_v35  ;;  %v788_v38 = vld [vmem:[%s995_s1 + $0x128] sm:$0xff]   ;;  %v789_v43 = vld [vmem:[%s995_s1 + $0x120] sm:$0xff]  }
  0x10   :  { %669 = vmatpush3.bf16.msra.mxu0 %v762_v14  ;;  %v791_v39 = vld [vmem:[%s996_s0 + $0x2c] ss:$20 sps:$4 sm:$0xff]   ;;  %v795_v41 = vld [vmem:[%s996_s0 + $0x28] ss:$20 sps:$4 sm:$0xff]   ;;  %v800_v44 = vld [vmem:[%s996_s0 + $0x10] ss:$20 sps:$4 sm:$0xff]  }
  0x11   :  { %697 = vmatpush3.bf16.msra.mxu1 %v763_v15  ;;  %670 = vmatprep.subr.bf16.mxu0 %v764_v16  ;;  %v798_v47 = vld [vmem:[%s995_s1 + $0x108] sm:$0xff]   ;;  %v799_v48 = vld [vmem:[%s995_s1 + $0x100] sm:$0xff]  }
  0x12   :  { %698 = vmatprep.subr.bf16.mxu1 %v765_v17  ;;  %v801_v49 = vld [vmem:[%s996_s0 + $0x38] ss:$20 sps:$4 sm:$0xff]   ;;  %v660_v10 = vld [vmem:[%s997_s2] ss:$0 sm:$0xff] }
  0x13   :  { %v661_v15 = vld [vmem:[%s998_s3] ss:$0 sm:$0xff] }
  0x14   :  { %671 = vmatpush3.bf16.msra.mxu0 %v766_v18 }
  0x15   :  { %699 = vmatpush3.bf16.msra.mxu1 %v767_v19  ;;  %672 = vmatprep.subr.bf16.mxu0 %v768_v20 }
  0x16   :  { %700 = vmatprep.subr.bf16.mxu1 %v769_v21 }
  0x18   :  { %673 = vmatpush3.bf16.msra.mxu0 %v770_v22 }
  0x19   :  { %701 = vmatpush3.bf16.msra.mxu1 %v771_v23  ;;  %674 = vmatprep.subr.bf16.mxu0 %v772_v24 }
  0x1a   :  { %702 = vmatprep.subr.bf16.mxu1 %v773_v25 }
  0x1c   :  { %675 = vmatpush3.bf16.msra.mxu0 %v774_v26 }
  0x1d   :  { %703 = vmatpush3.bf16.msra.mxu1 %v775_v27  ;;  %676 = vmatprep.subr.bf16.mxu0 %v776_v28 }
  0x1e   :  { %704 = vmatprep.subr.bf16.mxu1 %v777_v29 }
  0x20   :  { %677 = vmatpush3.bf16.msra.mxu0 %v778_v30 }
  0x21   :  { %705 = vmatpush3.bf16.msra.mxu1 %v779_v31  ;;  %728 = vmatprep.subr.bf16.mxu0 %v786_v36 }
  0x23   :  { %447 = vmatmul.mubr.bf16.vlgmr.msra.gmra.mxu0 %v780_v32 }
  0x24   :  { %496 = vmatmul.mubr.bf16.vlgmr.msra.gmra.mxu1 %v783_v34  ;;  %729 = vmatpush3.bf16.msra.mxu0 %v786_v36 }
  0x25   :  { %730 = vmatprep.subr.bf16.mxu0 %v787_v37  ;;  %454 = vmatprep.mubr.bf16.mxu0 %v791_v39 }
  0x26   :  { %503 = vmatprep.mubr.bf16.mxu1 %v793_v40 }
  0x28   :  { %731 = vmatpush3.bf16.msra.mxu0 %v787_v37 }
  0x29   :  { %732 = vmatprep.subr.bf16.mxu0 %v788_v38 }
  0x2b   :  { %455 = vmatmul.mubr.bf16.gmra.mxu0 %v795_v41 }
  0x2c   :  { %504 = vmatmul.mubr.bf16.gmra.mxu1 %v796_v42  ;;  %733 = vmatpush3.bf16.msra.mxu0 %v788_v38 }
  0x2d   :  { %734 = vmatprep.subr.bf16.mxu0 %v789_v43  ;;  %744 = vmatprep.mubr.bf16.mxu0 %v800_v44 }
  0x30   :  { %735 = vmatpush3.bf16.msra.mxu0 %v789_v43 }
  0x31   :  { %736 = vmatprep.subr.bf16.mxu0 %v790_v45 }
  0x34   :  { %737 = vmatpush3.bf16.msra.mxu0 %v790_v45 }
  0x35   :  { %738 = vmatprep.subr.bf16.mxu0 %v797_v46 }
  0x38   :  { %739 = vmatpush3.bf16.msra.mxu0 %v797_v46 }
  0x39   :  { %740 = vmatprep.subr.bf16.mxu0 %v798_v47 }
  0x3c   :  { %741 = vmatpush3.bf16.msra.mxu0 %v798_v47 }
  0x3d   :  { %742 = vmatprep.subr.bf16.mxu0 %v799_v48 }
  0x40   :  { %743 = vmatpush3.bf16.msra.mxu0 %v799_v48 }
  0x43   :  { %745 = vmatmul.mubr.bf16.vlgmr.msra.gmra.mxu0 %v801_v49 }
  0xe3   :  { %v678_v50 = vpop.f32.mrf.mxu0 }
  0xe4   :  { %v706_v51 = vpop.f32.mrf.mxu1 }
  0xe5   :  { %v679_v52 = vpop.f32.mrf.mxu0 }
  0xe6   :  { %v707_v53 = vpop.f32.mrf.mxu1  ;;  %v680_v4 = vadd.f32 %v679_v52, %v678_v50 }
  0xe7   :  { %v681_v54 = vpop.f32.mrf.mxu0  ;;  %v708_v5 = vadd.f32 %v707_v53, %v706_v51 }
  0xe8   :  { %v709_v55 = vpop.f32.mrf.mxu1 }
  0xe9   :  { %v682_v56 = vpop.f32.mrf.mxu0  ;;  %v498_v14 = vadd.f32 %v708_v5, %v680_v4 }
  0xea   :  { %v710_v57 = vpop.f32.mrf.mxu1  ;;  %v683_v11 = vadd.f32 %v682_v56, %v681_v54 }
  0xeb   :  { %v684_v58 = vpop.f32.mrf.mxu0  ;;  %v711_v12 = vadd.f32 %v710_v57, %v709_v55 }
  0xec   :  { %v712_v59 = vpop.f32.mrf.mxu1 }
  0xed   :  { %v685_v60 = vpop.f32.mrf.mxu0  ;;  %v501_v24 = vadd.f32 %v711_v12, %v683_v11 }
  0xee   :  { %v713_v61 = vpop.f32.mrf.mxu1  ;;  %v686_v0 = vadd.f32 %v685_v60, %v684_v58 }
  0xef   :  { %v687_v62 = vpop.f32.mrf.mxu0  ;;  %v714_v1 = vadd.f32 %v713_v61, %v712_v59 }
  0xf0   :  { %v715_v63 = vpop.f32.mrf.mxu1 }
  0xf1   :  { %v688_v2 = vpop.f32.mrf.mxu0  ;;  %v506_v8 = vadd.f32 %v714_v1, %v686_v0 }
  0xf2   :  { %v716_v3 = vpop.f32.mrf.mxu1  ;;  %v689_v6 = vadd.f32 %v688_v2, %v687_v62 }
  0xf3   :  { %v717_v7 = vadd.f32 %v716_v3, %v715_v63 }
  0xf5   :  { %v509_v19 = vadd.f32 %v717_v7, %v689_v6 }
 0x103   :  { %v746_v9 = vpop.f32.mrf.mxu0 }
 0x104   :  { %v555_v13 = vadd.f32 %v746_v9, %v506_v8 }
 0x105   :  { %v546_v16 = vpop.f32.mrf.mxu0 }
 0x106   :  { %v585_v17 = vmul.f32 %v660_v10, %v555_v13  ;;  %v547_v18 = vadd.f32 %v546_v16, %v498_v14 }
 0x107   :  { %v747_v20 = vpop.f32.mrf.mxu0 }
 0x108   :  { %v596_v21 = vadd.f32 %v661_v15, %v585_v17  ;;  %v583_v22 = vmul.f32 %v660_v10, %v547_v18  ;;  %v558_v23 = vadd.f32 %v747_v20, %v509_v19 }
 0x109   :  { %v549_v25 = vpop.f32.mrf.mxu0 }
 0x10a   :  { %v600_v26 = vmax.f32 %v596_v21, 0.0  ;;  %v594_v27 = vadd.f32 %v661_v15, %v583_v22  ;;  %v586_v28 = vmul.f32 %v660_v10, %v558_v23  ;;  %v550_v29 = vadd.f32 %v549_v25, %v501_v24 }
 0x10c   :  { %604 = vst [vmem:[%s999_s4 + $0x10] sm:$0xff] %v600_v26  ;;  %v598_v30 = vmax.f32 %v594_v27, 0.0  ;;  %v597_v31 = vadd.f32 %v661_v15, %v586_v28  ;;  %v584_v32 = vmul.f32 %v660_v10, %v550_v29 }
 0x10e   :  { %602 = vst [vmem:[%s999_s4] sm:$0xff] %v598_v30  ;;  %v601_v33 = vmax.f32 %v597_v31, 0.0  ;;  %v595_v34 = vadd.f32 %v661_v15, %v584_v32 }
 0x110   :  { %605 = vst [vmem:[%s999_s4 + $0x18] sm:$0xff] %v601_v33  ;;  %v599_v35 = vmax.f32 %v595_v34, 0.0 }
 0x112   :  { %603 = vst [vmem:[%s999_s4 + $0x8] sm:$0xff] %v599_v35 }

// kernel: regressor_forward.25
= control target key start
LH: loop header
LB: loop body
LE: loop exit
PB: predicated region body
PF: predicated region fallthrough
CT: control target
= control target key end

     0   :  { %s1023_s1 = inlined_call_operand.vmem [shape: bf16[640,128], index: 1, kind: input, shape index: {}]   ;;  %s1024_s0 = inlined_call_operand.vmem [shape: bf16[32,640], index: 0, kind: input, shape index: {}]   ;;  %s1025_s2 = inlined_call_operand.vmem [shape: f32[1,128], index: 2, kind: input, shape index: {}]   ;;  %s1026_s3 = inlined_call_operand.vmem [shape: f32[1,128], index: 3, kind: input, shape index: {}]   ;;  %s1027_s4 = inlined_call_operand.vmem [shape: f32[32,128], index: 4, kind: input, shape index: {}]   ;;  %s1028_s5 = inlined_call_operand.vmem [shape: f32[32,128], index: 5, kind: output, shape index: {}]  }
   0x1   :  { %v759_v0 = vld [vmem:[%s1023_s1 + $0x78] sm:$0xff]   ;;  %v763_v4 = vld [vmem:[%s1023_s1 + $0x70] sm:$0xff]   ;;  %v767_v8 = vld [vmem:[%s1023_s1 + $0x68] sm:$0xff]  }
   0x2   :  { %v760_v1 = vld [vmem:[%s1023_s1 + $0xf8] sm:$0xff]   ;;  %673 = vmatprep.subr.bf16.mxu0 %v759_v0  ;;  %v764_v5 = vld [vmem:[%s1023_s1 + $0xf0] sm:$0xff]   ;;  %v768_v9 = vld [vmem:[%s1023_s1 + $0xe8] sm:$0xff]  }
   0x3   :  { %v761_v2 = vld [vmem:[%s1023_s1 + $0x38] sm:$0xff]   ;;  %701 = vmatprep.subr.bf16.mxu1 %v760_v1  ;;  %v765_v6 = vld [vmem:[%s1023_s1 + $0x30] sm:$0xff]   ;;  %v769_v10 = vld [vmem:[%s1023_s1 + $0x28] sm:$0xff]  }
   0x4   :  { %v762_v3 = vld [vmem:[%s1023_s1 + $0xb8] sm:$0xff]   ;;  %674 = vmatpush3.bf16.msra.mxu0 %v761_v2  ;;  %v766_v7 = vld [vmem:[%s1023_s1 + $0xb0] sm:$0xff]   ;;  %v770_v11 = vld [vmem:[%s1023_s1 + $0xa8] sm:$0xff]  }
   0x5   :  { %702 = vmatpush3.bf16.msra.mxu1 %v762_v3  ;;  %675 = vmatprep.subr.bf16.mxu0 %v763_v4  ;;  %v771_v12 = vld [vmem:[%s1023_s1 + $0x60] sm:$0xff]   ;;  %v775_v16 = vld [vmem:[%s1023_s1 + $0x58] sm:$0xff]   ;;  %v779_v20 = vld [vmem:[%s1023_s1 + $0x50] sm:$0xff]  }
   0x6   :  { %703 = vmatprep.subr.bf16.mxu1 %v764_v5  ;;  %v772_v13 = vld [vmem:[%s1023_s1 + $0xe0] sm:$0xff]   ;;  %v776_v17 = vld [vmem:[%s1023_s1 + $0xd8] sm:$0xff]   ;;  %v780_v21 = vld [vmem:[%s1023_s1 + $0xd0] sm:$0xff]  }
   0x7   :  { %v773_v14 = vld [vmem:[%s1023_s1 + $0x20] sm:$0xff]   ;;  %v777_v18 = vld [vmem:[%s1023_s1 + $0x18] sm:$0xff]   ;;  %v781_v22 = vld [vmem:[%s1023_s1 + $0x10] sm:$0xff]  }
   0x8   :  { %676 = vmatpush3.bf16.msra.mxu0 %v765_v6  ;;  %v774_v15 = vld [vmem:[%s1023_s1 + $0xa0] sm:$0xff]   ;;  %v778_v19 = vld [vmem:[%s1023_s1 + $0x98] sm:$0xff]   ;;  %v782_v23 = vld [vmem:[%s1023_s1 + $0x90] sm:$0xff]  }
   0x9   :  { %704 = vmatpush3.bf16.msra.mxu1 %v766_v7  ;;  %677 = vmatprep.subr.bf16.mxu0 %v767_v8  ;;  %v783_v24 = vld [vmem:[%s1023_s1 + $0x48] sm:$0xff]   ;;  %v787_v28 = vld [vmem:[%s1023_s1 + $0x40] sm:$0xff]   ;;  %v797_v36 = vld [vmem:[%s1023_s1 + $0x138] sm:$0xff]  }
   0xa   :  { %705 = vmatprep.subr.bf16.mxu1 %v768_v9  ;;  %v784_v25 = vld [vmem:[%s1023_s1 + $0xc8] sm:$0xff]   ;;  %v788_v29 = vld [vmem:[%s1023_s1 + $0xc0] sm:$0xff]   ;;  %v798_v37 = vld [vmem:[%s1023_s1 + $0x130] sm:$0xff]  }
   0xb   :  { %v785_v26 = vld [vmem:[%s1023_s1 + $0x8] sm:$0xff]   ;;  %v789_v30 = vld [vmem:[%s1023_s1] sm:$0xff]   ;;  %v801_v45 = vld [vmem:[%s1023_s1 + $0x118] sm:$0xff]  }
   0xc   :  { %678 = vmatpush3.bf16.msra.mxu0 %v769_v10  ;;  %v786_v27 = vld [vmem:[%s1023_s1 + $0x88] sm:$0xff]   ;;  %v790_v31 = vld [vmem:[%s1023_s1 + $0x80] sm:$0xff]   ;;  %v808_v46 = vld [vmem:[%s1023_s1 + $0x110] sm:$0xff]  }
   0xd   :  { %706 = vmatpush3.bf16.msra.mxu1 %v770_v11  ;;  %679 = vmatprep.subr.bf16.mxu0 %v771_v12  ;;  %v791_v32 = vld [vmem:[%s1024_s0] ss:$20 sps:$4 sm:$0xff]   ;;  %v793_v33 = vld [vmem:[%s1024_s0 + $0x4] ss:$20 sps:$4 sm:$0xff]   ;;  %v794_v34 = vld [vmem:[%s1024_s0 + $0x8] ss:$20 sps:$4 sm:$0xff]  }
   0xe   :  { %707 = vmatprep.subr.bf16.mxu1 %v772_v13  ;;  %v796_v35 = vld [vmem:[%s1024_s0 + $0xc] ss:$20 sps:$4 sm:$0xff]   ;;  %449 = vmatprep.mubr.bf16.mxu0 %v793_v33  ;;  %v804_v40 = vld [vmem:[%s1024_s0 + $0x34] ss:$20 sps:$4 sm:$0xff]   ;;  %v807_v42 = vld [vmem:[%s1024_s0 + $0x30] ss:$20 sps:$4 sm:$0xff]  }
   0xf   :  { %498 = vmatprep.mubr.bf16.mxu1 %v796_v35  ;;  %v799_v38 = vld [vmem:[%s1023_s1 + $0x128] sm:$0xff]   ;;  %v800_v43 = vld [vmem:[%s1023_s1 + $0x120] sm:$0xff]  }
  0x10   :  { %680 = vmatpush3.bf16.msra.mxu0 %v773_v14  ;;  %v802_v39 = vld [vmem:[%s1024_s0 + $0x2c] ss:$20 sps:$4 sm:$0xff]   ;;  %v806_v41 = vld [vmem:[%s1024_s0 + $0x28] ss:$20 sps:$4 sm:$0xff]   ;;  %v811_v44 = vld [vmem:[%s1024_s0 + $0x10] ss:$20 sps:$4 sm:$0xff]  }
  0x11   :  { %708 = vmatpush3.bf16.msra.mxu1 %v774_v15  ;;  %681 = vmatprep.subr.bf16.mxu0 %v775_v16  ;;  %v809_v47 = vld [vmem:[%s1023_s1 + $0x108] sm:$0xff]   ;;  %v810_v48 = vld [vmem:[%s1023_s1 + $0x100] sm:$0xff]  }
  0x12   :  { %709 = vmatprep.subr.bf16.mxu1 %v776_v17  ;;  %v812_v49 = vld [vmem:[%s1024_s0 + $0x38] ss:$20 sps:$4 sm:$0xff]   ;;  %v671_v10 = vld [vmem:[%s1025_s2] ss:$0 sm:$0xff] }
  0x13   :  { %v672_v15 = vld [vmem:[%s1026_s3] ss:$0 sm:$0xff] }
  0x14   :  { %682 = vmatpush3.bf16.msra.mxu0 %v777_v18 }
  0x15   :  { %710 = vmatpush3.bf16.msra.mxu1 %v778_v19  ;;  %683 = vmatprep.subr.bf16.mxu0 %v779_v20  ;;  %v581_v20 = vld [vmem:[%s1027_s4 + $0x10] sm:$0xff] }
  0x16   :  { %711 = vmatprep.subr.bf16.mxu1 %v780_v21 }
  0x18   :  { %684 = vmatpush3.bf16.msra.mxu0 %v781_v22 }
  0x19   :  { %712 = vmatpush3.bf16.msra.mxu1 %v782_v23  ;;  %685 = vmatprep.subr.bf16.mxu0 %v783_v24 }
  0x1a   :  { %713 = vmatprep.subr.bf16.mxu1 %v784_v25 }
  0x1c   :  { %686 = vmatpush3.bf16.msra.mxu0 %v785_v26  ;;  %v579_v26 = vld [vmem:[%s1027_s4] sm:$0xff] }
  0x1d   :  { %714 = vmatpush3.bf16.msra.mxu1 %v786_v27  ;;  %687 = vmatprep.subr.bf16.mxu0 %v787_v28 }
  0x1e   :  { %715 = vmatprep.subr.bf16.mxu1 %v788_v29 }
  0x20   :  { %688 = vmatpush3.bf16.msra.mxu0 %v789_v30 }
  0x21   :  { %716 = vmatpush3.bf16.msra.mxu1 %v790_v31  ;;  %739 = vmatprep.subr.bf16.mxu0 %v797_v36 }
  0x23   :  { %450 = vmatmul.mubr.bf16.vlgmr.msra.gmra.mxu0 %v791_v32  ;;  %v582_v32 = vld [vmem:[%s1027_s4 + $0x18] sm:$0xff] }
  0x24   :  { %499 = vmatmul.mubr.bf16.vlgmr.msra.gmra.mxu1 %v794_v34  ;;  %740 = vmatpush3.bf16.msra.mxu0 %v797_v36 }
  0x25   :  { %741 = vmatprep.subr.bf16.mxu0 %v798_v37  ;;  %457 = vmatprep.mubr.bf16.mxu0 %v802_v39 }
  0x26   :  { %506 = vmatprep.mubr.bf16.mxu1 %v804_v40 }
  0x28   :  { %742 = vmatpush3.bf16.msra.mxu0 %v798_v37  ;;  %v580_v37 = vld [vmem:[%s1027_s4 + $0x8] sm:$0xff] }
  0x29   :  { %743 = vmatprep.subr.bf16.mxu0 %v799_v38 }
  0x2b   :  { %458 = vmatmul.mubr.bf16.gmra.mxu0 %v806_v41 }
  0x2c   :  { %507 = vmatmul.mubr.bf16.gmra.mxu1 %v807_v42  ;;  %744 = vmatpush3.bf16.msra.mxu0 %v799_v38 }
  0x2d   :  { %745 = vmatprep.subr.bf16.mxu0 %v800_v43  ;;  %755 = vmatprep.mubr.bf16.mxu0 %v811_v44 }
  0x30   :  { %746 = vmatpush3.bf16.msra.mxu0 %v800_v43 }
  0x31   :  { %747 = vmatprep.subr.bf16.mxu0 %v801_v45 }
  0x34   :  { %748 = vmatpush3.bf16.msra.mxu0 %v801_v45 }
  0x35   :  { %749 = vmatprep.subr.bf16.mxu0 %v808_v46 }
  0x38   :  { %750 = vmatpush3.bf16.msra.mxu0 %v808_v46 }
  0x39   :  { %751 = vmatprep.subr.bf16.mxu0 %v809_v47 }
  0x3c   :  { %752 = vmatpush3.bf16.msra.mxu0 %v809_v47 }
  0x3d   :  { %753 = vmatprep.subr.bf16.mxu0 %v810_v48 }
  0x40   :  { %754 = vmatpush3.bf16.msra.mxu0 %v810_v48 }
  0x43   :  { %756 = vmatmul.mubr.bf16.vlgmr.msra.gmra.mxu0 %v812_v49 }
  0xe3   :  { %v689_v50 = vpop.f32.mrf.mxu0 }
  0xe4   :  { %v717_v51 = vpop.f32.mrf.mxu1 }
  0xe5   :  { %v690_v52 = vpop.f32.mrf.mxu0 }
  0xe6   :  { %v718_v53 = vpop.f32.mrf.mxu1  ;;  %v691_v4 = vadd.f32 %v690_v52, %v689_v50 }
  0xe7   :  { %v692_v54 = vpop.f32.mrf.mxu0  ;;  %v719_v5 = vadd.f32 %v718_v53, %v717_v51 }
  0xe8   :  { %v720_v55 = vpop.f32.mrf.mxu1 }
  0xe9   :  { %v693_v56 = vpop.f32.mrf.mxu0  ;;  %v501_v14 = vadd.f32 %v719_v5, %v691_v4 }
  0xea   :  { %v721_v57 = vpop.f32.mrf.mxu1  ;;  %v694_v11 = vadd.f32 %v693_v56, %v692_v54 }
  0xeb   :  { %v695_v58 = vpop.f32.mrf.mxu0  ;;  %v722_v12 = vadd.f32 %v721_v57, %v720_v55 }
  0xec   :  { %v723_v59 = vpop.f32.mrf.mxu1 }
  0xed   :  { %v696_v60 = vpop.f32.mrf.mxu0  ;;  %v504_v25 = vadd.f32 %v722_v12, %v694_v11 }
  0xee   :  { %v724_v61 = vpop.f32.mrf.mxu1  ;;  %v697_v0 = vadd.f32 %v696_v60, %v695_v58 }
  0xef   :  { %v698_v62 = vpop.f32.mrf.mxu0  ;;  %v725_v1 = vadd.f32 %v724_v61, %v723_v59 }
  0xf0   :  { %v726_v63 = vpop.f32.mrf.mxu1 }
  0xf1   :  { %v699_v2 = vpop.f32.mrf.mxu0  ;;  %v509_v8 = vadd.f32 %v725_v1, %v697_v0 }
  0xf2   :  { %v727_v3 = vpop.f32.mrf.mxu1  ;;  %v700_v6 = vadd.f32 %v699_v2, %v698_v62 }
  0xf3   :  { %v728_v7 = vadd.f32 %v727_v3, %v726_v63 }
  0xf5   :  { %v512_v19 = vadd.f32 %v728_v7, %v700_v6 }
 0x103   :  { %v757_v9 = vpop.f32.mrf.mxu0 }
 0x104   :  { %v558_v13 = vadd.f32 %v757_v9, %v509_v8 }
 0x105   :  { %v549_v16 = vpop.f32.mrf.mxu0 }
 0x106   :  { %v592_v17 = vmul.f32 %v671_v10, %v558_v13  ;;  %v550_v18 = vadd.f32 %v549_v16, %v501_v14 }
 0x107   :  { %v758_v21 = vpop.f32.mrf.mxu0 }
 0x108   :  { %v603_v22 = vadd.f32 %v672_v15, %v592_v17  ;;  %v590_v23 = vmul.f32 %v671_v10, %v550_v18  ;;  %v561_v24 = vadd.f32 %v758_v21, %v512_v19 }
 0x109   :  { %v552_v27 = vpop.f32.mrf.mxu0 }
 0x10a   :  { %v607_v28 = vadd.f32 %v603_v22, %v581_v20  ;;  %v601_v29 = vadd.f32 %v672_v15, %v590_v23  ;;  %v593_v30 = vmul.f32 %v671_v10, %v561_v24  ;;  %v553_v31 = vadd.f32 %v552_v27, %v504_v25 }
 0x10c   :  { %v611_v33 = vmax.f32 %v607_v28, 0.0  ;;  %v605_v34 = vadd.f32 %v601_v29, %v579_v26  ;;  %v604_v35 = vadd.f32 %v672_v15, %v593_v30  ;;  %v591_v36 = vmul.f32 %v671_v10, %v553_v31 }
 0x10e   :  { %615 = vst [vmem:[%s1028_s5 + $0x10] sm:$0xff] %v611_v33  ;;  %v609_v38 = vmax.f32 %v605_v34, 0.0  ;;  %v608_v39 = vadd.f32 %v604_v35, %v582_v32  ;;  %v602_v40 = vadd.f32 %v672_v15, %v591_v36 }
 0x110   :  { %613 = vst [vmem:[%s1028_s5] sm:$0xff] %v609_v38  ;;  %v612_v41 = vmax.f32 %v608_v39, 0.0  ;;  %v606_v42 = vadd.f32 %v602_v40, %v580_v37 }
 0x112   :  { %616 = vst [vmem:[%s1028_s5 + $0x18] sm:$0xff] %v612_v41  ;;  %v610_v43 = vmax.f32 %v606_v42, 0.0 }
 0x114   :  { %614 = vst [vmem:[%s1028_s5 + $0x8] sm:$0xff] %v610_v43 }

// kernel: regressor_forward.28
= control target key start
LH: loop header
LB: loop body
LE: loop exit
PB: predicated region body
PF: predicated region fallthrough
CT: control target
= control target key end

     0   :  { %v223_v0 = vmov 0.0   ;;  %vm224_vm0 = vmmov 0   ;;  %s289_s1 = inlined_call_operand.vmem [shape: bf16[128,128], index: 1, kind: input, shape index: {}]   ;;  %s290_s0 = inlined_call_operand.vmem [shape: bf16[16,128], index: 0, kind: input, shape index: {}]   ;;  %s291_s2 = inlined_call_operand.vmem [shape: f32[1,128], index: 2, kind: input, shape index: {}]   ;;  %s292_s3 = inlined_call_operand.vmem [shape: f32[1,128], index: 3, kind: input, shape index: {}]   ;;  %s293_s4 = inlined_call_operand.vmem [shape: f32[16,128], index: 4, kind: output, shape index: {}]  }
   0x1   :  { %192 = vmatprep.subr.bf16.mxu0 %v223_v0  ;;  %v214_v1 = vld [vmem:[%s289_s1 + $0x38] sm:$0xff]   ;;  %208 = vmatprep.mubr.msk.bf16.mxu0 %vm224_vm0, %v223_v0  ;;  %v215_v2 = vld [vmem:[%s289_s1 + $0x30] sm:$0xff]   ;;  %v216_v3 = vld [vmem:[%s289_s1 + $0x28] sm:$0xff]  }
   0x2   :  { %193 = vmatpush3.bf16.msra.mxu0 %v214_v1  ;;  %v217_v4 = vld [vmem:[%s289_s1 + $0x20] sm:$0xff]   ;;  %v218_v5 = vld [vmem:[%s289_s1 + $0x18] sm:$0xff]   ;;  %v219_v6 = vld [vmem:[%s289_s1 + $0x10] sm:$0xff]  }
   0x3   :  { %194 = vmatprep.subr.bf16.mxu0 %v223_v0  ;;  %v220_v7 = vld [vmem:[%s289_s1 + $0x8] sm:$0xff]   ;;  %v221_v8 = vld [vmem:[%s289_s1] sm:$0xff]  }
   0x4   :  { %v222_v9 = vld [vmem:[%s290_s0] sm:$0xff]  }
   0x5   :  { %v181_v10 = vld [vmem:[%s291_s2] ss:$0 sm:$0xff] }
   0x6   :  { %195 = vmatpush3.bf16.msra.mxu0 %v215_v2  ;;  %v182_v12 = vld [vmem:[%s292_s3] ss:$0 sm:$0xff] }
   0x7   :  { %196 = vmatprep.subr.bf16.mxu0 %v223_v0 }
   0xa   :  { %197 = vmatpush3.bf16.msra.mxu0 %v216_v3 }
   0xb   :  { %198 = vmatprep.subr.bf16.mxu0 %v223_v0 }
   0xe   :  { %199 = vmatpush3.bf16.msra.mxu0 %v217_v4 }
   0xf   :  { %200 = vmatprep.subr.bf16.mxu0 %v223_v0 }
  0x12   :  { %201 = vmatpush3.bf16.msra.mxu0 %v218_v5 }
  0x13   :  { %202 = vmatprep.subr.bf16.mxu0 %v223_v0 }
  0x16   :  { %203 = vmatpush3.bf16.msra.mxu0 %v219_v6 }
  0x17   :  { %204 = vmatprep.subr.bf16.mxu0 %v223_v0 }
  0x1a   :  { %205 = vmatpush3.bf16.msra.mxu0 %v220_v7 }
  0x1b   :  { %206 = vmatprep.subr.bf16.mxu0 %v223_v0 }
  0x1e   :  { %207 = vmatpush3.bf16.msra.mxu0 %v221_v8 }
  0x21   :  { %209 = vmatmul.mubr.bf16.vlgmr.msra.gmra.mxu0 %v222_v9 }
  0xe1   :  { %v132_v11 = vpop.f32.mrf.mxu0 }
  0xe2   :  { %v155_v13 = vmul.f32 %v181_v10, %v132_v11 }
  0xe3   :  { %v210_v14 = vpop.f32.mrf.mxu0 }
  0xe4   :  { %v164_v15 = vadd.f32 %v182_v12, %v155_v13 }
  0xe5   :  { %v135_v16 = vpop.f32.mrf.mxu0 }
  0xe6   :  { %166 = vst [vmem:[%s293_s4] sm:$0xff] %v164_v15  ;;  %v156_v17 = vmul.f32 %v181_v10, %v135_v16 }
  0xe7   :  { %v211_v18 = vpop.f32.mrf.mxu0 }
  0xe8   :  { %v165_v19 = vadd.f32 %v182_v12, %v156_v17 }
  0xea   :  { %167 = vst [vmem:[%s293_s4 + $0x8] sm:$0xff] %v165_v19 }

// kernel: regressor_forward.29
= control target key start
LH: loop header
LB: loop body
LE: loop exit
PB: predicated region body
PF: predicated region fallthrough
CT: control target
= control target key end

     0   :  { %v705_v34 = vmov 0.0   ;;  %vm706_vm0 = vmmov 0   ;;  %s879_s1 = inlined_call_operand.vmem [shape: bf16[640,128], index: 1, kind: input, shape index: {}]   ;;  %s880_s0 = inlined_call_operand.vmem [shape: bf16[16,640], index: 0, kind: input, shape index: {}]   ;;  %s881_s2 = inlined_call_operand.vmem [shape: f32[1,128], index: 2, kind: input, shape index: {}]   ;;  %s882_s3 = inlined_call_operand.vmem [shape: f32[1,128], index: 3, kind: input, shape index: {}]   ;;  %s883_s4 = inlined_call_operand.vmem [shape: f32[16,128], index: 4, kind: output, shape index: {}]  }
   0x1   :  { %v658_v0 = vld [vmem:[%s879_s1 + $0x78] sm:$0xff]   ;;  %v662_v4 = vld [vmem:[%s879_s1 + $0x70] sm:$0xff]   ;;  %v666_v8 = vld [vmem:[%s879_s1 + $0x68] sm:$0xff]  }
   0x2   :  { %v659_v1 = vld [vmem:[%s879_s1 + $0xf8] sm:$0xff]   ;;  %583 = vmatprep.subr.bf16.mxu0 %v658_v0  ;;  %v663_v5 = vld [vmem:[%s879_s1 + $0xf0] sm:$0xff]   ;;  %v667_v9 = vld [vmem:[%s879_s1 + $0xe8] sm:$0xff]  }
   0x3   :  { %v660_v2 = vld [vmem:[%s879_s1 + $0x38] sm:$0xff]   ;;  %605 = vmatprep.subr.bf16.mxu1 %v659_v1  ;;  %v664_v6 = vld [vmem:[%s879_s1 + $0x30] sm:$0xff]   ;;  %v668_v10 = vld [vmem:[%s879_s1 + $0x28] sm:$0xff]  }
   0x4   :  { %v661_v3 = vld [vmem:[%s879_s1 + $0xb8] sm:$0xff]   ;;  %584 = vmatpush3.bf16.msra.mxu0 %v660_v2  ;;  %v665_v7 = vld [vmem:[%s879_s1 + $0xb0] sm:$0xff]   ;;  %v669_v11 = vld [vmem:[%s879_s1 + $0xa8] sm:$0xff]  }
   0x5   :  { %606 = vmatpush3.bf16.msra.mxu1 %v661_v3  ;;  %585 = vmatprep.subr.bf16.mxu0 %v662_v4  ;;  %v670_v12 = vld [vmem:[%s879_s1 + $0x60] sm:$0xff]   ;;  %v674_v16 = vld [vmem:[%s879_s1 + $0x58] sm:$0xff]   ;;  %v678_v20 = vld [vmem:[%s879_s1 + $0x50] sm:$0xff]  }
   0x6   :  { %607 = vmatprep.subr.bf16.mxu1 %v663_v5  ;;  %v671_v13 = vld [vmem:[%s879_s1 + $0xe0] sm:$0xff]   ;;  %v675_v17 = vld [vmem:[%s879_s1 + $0xd8] sm:$0xff]   ;;  %v679_v21 = vld [vmem:[%s879_s1 + $0xd0] sm:$0xff]  }
   0x7   :  { %v672_v14 = vld [vmem:[%s879_s1 + $0x20] sm:$0xff]   ;;  %v676_v18 = vld [vmem:[%s879_s1 + $0x18] sm:$0xff]   ;;  %v680_v22 = vld [vmem:[%s879_s1 + $0x10] sm:$0xff]  }
   0x8   :  { %586 = vmatpush3.bf16.msra.mxu0 %v664_v6  ;;  %v673_v15 = vld [vmem:[%s879_s1 + $0xa0] sm:$0xff]   ;;  %v677_v19 = vld [vmem:[%s879_s1 + $0x98] sm:$0xff]   ;;  %v681_v23 = vld [vmem:[%s879_s1 + $0x90] sm:$0xff]  }
   0x9   :  { %608 = vmatpush3.bf16.msra.mxu1 %v665_v7  ;;  %587 = vmatprep.subr.bf16.mxu0 %v666_v8  ;;  %v682_v24 = vld [vmem:[%s879_s1 + $0x48] sm:$0xff]   ;;  %v686_v28 = vld [vmem:[%s879_s1 + $0x40] sm:$0xff]   ;;  %v696_v37 = vld [vmem:[%s879_s1 + $0x138] sm:$0xff]  }
   0xa   :  { %609 = vmatprep.subr.bf16.mxu1 %v667_v9  ;;  %v683_v25 = vld [vmem:[%s879_s1 + $0xc8] sm:$0xff]   ;;  %v687_v29 = vld [vmem:[%s879_s1 + $0xc0] sm:$0xff]   ;;  %v697_v38 = vld [vmem:[%s879_s1 + $0x130] sm:$0xff]  }
   0xb   :  { %v684_v26 = vld [vmem:[%s879_s1 + $0x8] sm:$0xff]   ;;  %v688_v30 = vld [vmem:[%s879_s1] sm:$0xff]   ;;  %v700_v41 = vld [vmem:[%s879_s1 + $0x118] sm:$0xff]  }
   0xc   :  { %588 = vmatpush3.bf16.msra.mxu0 %v668_v10  ;;  %v685_v27 = vld [vmem:[%s879_s1 + $0x88] sm:$0xff]   ;;  %v689_v31 = vld [vmem:[%s879_s1 + $0x80] sm:$0xff]   ;;  %v701_v42 = vld [vmem:[%s879_s1 + $0x110] sm:$0xff]  }
   0xd   :  { %610 = vmatpush3.bf16.msra.mxu1 %v669_v11  ;;  %589 = vmatprep.subr.bf16.mxu0 %v670_v12  ;;  %v690_v32 = vld [vmem:[%s880_s0] ss:$20 sps:$4 sm:$0xff]   ;;  %v692_v33 = vld [vmem:[%s880_s0 + $0x4] ss:$20 sps:$4 sm:$0xff]   ;;  %v693_v35 = vld [vmem:[%s880_s0 + $0x8] ss:$20 sps:$4 sm:$0xff]  }
   0xe   :  { %611 = vmatprep.subr.bf16.mxu1 %v671_v13  ;;  %v695_v36 = vld [vmem:[%s880_s0 + $0xc] ss:$20 sps:$4 sm:$0xff]   ;;  %410 = vmatprep.mubr.bf16.mxu0 %v692_v33  ;;  %v704_v45 = vld [vmem:[%s880_s0 + $0x10] ss:$20 sps:$4 sm:$0xff]  }
   0xf   :  { %451 = vmatprep.mubr.bf16.mxu1 %v695_v36  ;;  %v698_v39 = vld [vmem:[%s879_s1 + $0x128] sm:$0xff]   ;;  %v699_v40 = vld [vmem:[%s879_s1 + $0x120] sm:$0xff]  }
  0x10   :  { %590 = vmatpush3.bf16.msra.mxu0 %v672_v14  ;;  %v702_v43 = vld [vmem:[%s879_s1 + $0x108] sm:$0xff]   ;;  %v703_v44 = vld [vmem:[%s879_s1 + $0x100] sm:$0xff]  }
  0x11   :  { %612 = vmatpush3.bf16.msra.mxu1 %v673_v15  ;;  %591 = vmatprep.subr.bf16.mxu0 %v674_v16  ;;  %v581_v60 = vld [vmem:[%s881_s2] ss:$0 sm:$0xff] }
  0x12   :  { %613 = vmatprep.subr.bf16.mxu1 %v675_v17  ;;  %v582_v62 = vld [vmem:[%s882_s3] ss:$0 sm:$0xff] }
  0x14   :  { %592 = vmatpush3.bf16.msra.mxu0 %v676_v18 }
  0x15   :  { %614 = vmatpush3.bf16.msra.mxu1 %v677_v19  ;;  %593 = vmatprep.subr.bf16.mxu0 %v678_v20 }
  0x16   :  { %615 = vmatprep.subr.bf16.mxu1 %v679_v21 }
  0x18   :  { %594 = vmatpush3.bf16.msra.mxu0 %v680_v22 }
  0x19   :  { %616 = vmatpush3.bf16.msra.mxu1 %v681_v23  ;;  %595 = vmatprep.subr.bf16.mxu0 %v682_v24 }
  0x1a   :  { %617 = vmatprep.subr.bf16.mxu1 %v683_v25 }
  0x1c   :  { %596 = vmatpush3.bf16.msra.mxu0 %v684_v26 }
  0x1d   :  { %618 = vmatpush3.bf16.msra.mxu1 %v685_v27  ;;  %597 = vmatprep.subr.bf16.mxu0 %v686_v28 }
  0x1e   :  { %619 = vmatprep.subr.bf16.mxu1 %v687_v29 }
  0x20   :  { %598 = vmatpush3.bf16.msra.mxu0 %v688_v30 }
  0x21   :  { %620 = vmatpush3.bf16.msra.mxu1 %v689_v31  ;;  %636 = vmatprep.subr.bf16.mxu0 %v705_v34 }
  0x23   :  { %411 = vmatmul.mubr.bf16.vlgmr.msra.gmra.mxu0 %v690_v32 }
  0x24   :  { %452 = vmatmul.mubr.bf16.vlgmr.msra.gmra.mxu1 %v693_v35  ;;  %637 = vmatpush3.bf16.msra.mxu0 %v696_v37 }
  0x25   :  { %638 = vmatprep.subr.bf16.mxu0 %v705_v34  ;;  %652 = vmatprep.mubr.msk.bf16.mxu0 %vm706_vm0, %v705_v34 }
  0x28   :  { %639 = vmatpush3.bf16.msra.mxu0 %v697_v38 }
  0x29   :  { %640 = vmatprep.subr.bf16.mxu0 %v705_v34 }
  0x2c   :  { %641 = vmatpush3.bf16.msra.mxu0 %v698_v39 }
  0x2d   :  { %642 = vmatprep.subr.bf16.mxu0 %v705_v34 }
  0x30   :  { %643 = vmatpush3.bf16.msra.mxu0 %v699_v40 }
  0x31   :  { %644 = vmatprep.subr.bf16.mxu0 %v705_v34 }
  0x34   :  { %645 = vmatpush3.bf16.msra.mxu0 %v700_v41 }
  0x35   :  { %646 = vmatprep.subr.bf16.mxu0 %v705_v34 }
  0x38   :  { %647 = vmatpush3.bf16.msra.mxu0 %v701_v42 }
  0x39   :  { %648 = vmatprep.subr.bf16.mxu0 %v705_v34 }
  0x3c   :  { %649 = vmatpush3.bf16.msra.mxu0 %v702_v43 }
  0x3d   :  { %650 = vmatprep.subr.bf16.mxu0 %v705_v34 }
  0x40   :  { %651 = vmatpush3.bf16.msra.mxu0 %v703_v44 }
  0x43   :  { %653 = vmatmul.mubr.bf16.vlgmr.msra.gmra.mxu0 %v704_v45 }
  0xe3   :  { %v599_v46 = vpop.f32.mrf.mxu0 }
  0xe4   :  { %v621_v47 = vpop.f32.mrf.mxu1 }
  0xe5   :  { %v600_v48 = vpop.f32.mrf.mxu0 }
  0xe6   :  { %v622_v49 = vpop.f32.mrf.mxu1  ;;  %v601_v52 = vadd.f32 %v600_v48, %v599_v46 }
  0xe7   :  { %v602_v50 = vpop.f32.mrf.mxu0  ;;  %v623_v53 = vadd.f32 %v622_v49, %v621_v47 }
  0xe8   :  { %v624_v51 = vpop.f32.mrf.mxu1 }
  0xe9   :  { %v603_v54 = vpop.f32.mrf.mxu0  ;;  %v454_v58 = vadd.f32 %v623_v53, %v601_v52 }
  0xea   :  { %v625_v55 = vpop.f32.mrf.mxu1  ;;  %v604_v56 = vadd.f32 %v603_v54, %v602_v50 }
  0xeb   :  { %v626_v57 = vadd.f32 %v625_v55, %v624_v51 }
  0xed   :  { %v457_v1 = vadd.f32 %v626_v57, %v604_v56 }
 0x103   :  { %v494_v59 = vpop.f32.mrf.mxu0 }
 0x104   :  { %v495_v61 = vadd.f32 %v494_v59, %v454_v58 }
 0x105   :  { %v654_v63 = vpop.f32.mrf.mxu0 }
 0x106   :  { %v517_v0 = vmul.f32 %v581_v60, %v495_v61 }
 0x107   :  { %v497_v2 = vpop.f32.mrf.mxu0 }
 0x108   :  { %v526_v3 = vadd.f32 %v582_v62, %v517_v0  ;;  %v498_v4 = vadd.f32 %v497_v2, %v457_v1 }
 0x109   :  { %v655_v5 = vpop.f32.mrf.mxu0 }
 0x10a   :  { %v528_v6 = vmax.f32 %v526_v3, 0.0  ;;  %v518_v7 = vmul.f32 %v581_v60, %v498_v4 }
 0x10c   :  { %530 = vst [vmem:[%s883_s4] sm:$0xff] %v528_v6  ;;  %v527_v8 = vadd.f32 %v582_v62, %v518_v7 }
 0x10e   :  { %v529_v9 = vmax.f32 %v527_v8, 0.0 }
 0x110   :  { %531 = vst [vmem:[%s883_s4 + $0x8] sm:$0xff] %v529_v9 }

// kernel: regressor_forward.30
= control target key start
LH: loop header
LB: loop body
LE: loop exit
PB: predicated region body
PF: predicated region fallthrough
CT: control target
= control target key end

     0   :  { %vm1193_vm0 = vmmov 0   ;;  %s1485_s1 = inlined_call_operand.vmem [shape: bf16[1152,128], index: 1, kind: input, shape index: {}]   ;;  %s1486_s0 = inlined_call_operand.vmem [shape: bf16[16,1152], index: 0, kind: input, shape index: {}]   ;;  %s1487_s2 = inlined_call_operand.vmem [shape: f32[1,128], index: 2, kind: input, shape index: {}]   ;;  %s1488_s3 = inlined_call_operand.vmem [shape: f32[1,128], index: 3, kind: input, shape index: {}]   ;;  %s1489_s4 = inlined_call_operand.vmem [shape: f32[16,128], index: 4, kind: input, shape index: {}]   ;;  %s1490_s5 = inlined_call_operand.vmem [shape: f32[16,128], index: 5, kind: output, shape index: {}]  }
   0x1   :  { %v1107_v0 = vld [vmem:[%s1485_s1 + $0x78] sm:$0xff]   ;;  %v1111_v4 = vld [vmem:[%s1485_s1 + $0x70] sm:$0xff]   ;;  %v1115_v8 = vld [vmem:[%s1485_s1 + $0x68] sm:$0xff]  }
   0x2   :  { %v1108_v1 = vld [vmem:[%s1485_s1 + $0xf8] sm:$0xff]   ;;  %988 = vmatprep.subr.bf16.mxu0 %v1107_v0  ;;  %v1112_v5 = vld [vmem:[%s1485_s1 + $0xf0] sm:$0xff]   ;;  %v1116_v9 = vld [vmem:[%s1485_s1 + $0xe8] sm:$0xff]  }
   0x3   :  { %v1109_v2 = vld [vmem:[%s1485_s1 + $0x38] sm:$0xff]   ;;  %1010 = vmatprep.subr.bf16.mxu1 %v1108_v1  ;;  %v1113_v6 = vld [vmem:[%s1485_s1 + $0x30] sm:$0xff]   ;;  %v1117_v10 = vld [vmem:[%s1485_s1 + $0x28] sm:$0xff]  }
   0x4   :  { %v1110_v3 = vld [vmem:[%s1485_s1 + $0xb8] sm:$0xff]   ;;  %989 = vmatpush3.bf16.msra.mxu0 %v1109_v2  ;;  %v1114_v7 = vld [vmem:[%s1485_s1 + $0xb0] sm:$0xff]   ;;  %v1118_v11 = vld [vmem:[%s1485_s1 + $0xa8] sm:$0xff]  }
   0x5   :  { %1011 = vmatpush3.bf16.msra.mxu1 %v1110_v3  ;;  %990 = vmatprep.subr.bf16.mxu0 %v1111_v4  ;;  %v1119_v12 = vld [vmem:[%s1485_s1 + $0x60] sm:$0xff]   ;;  %v1123_v16 = vld [vmem:[%s1485_s1 + $0x58] sm:$0xff]   ;;  %v1127_v20 = vld [vmem:[%s1485_s1 + $0x50] sm:$0xff]  }
   0x6   :  { %1012 = vmatprep.subr.bf16.mxu1 %v1112_v5  ;;  %v1120_v13 = vld [vmem:[%s1485_s1 + $0xe0] sm:$0xff]   ;;  %v1124_v17 = vld [vmem:[%s1485_s1 + $0xd8] sm:$0xff]   ;;  %v1128_v21 = vld [vmem:[%s1485_s1 + $0xd0] sm:$0xff]  }
   0x7   :  { %v1121_v14 = vld [vmem:[%s1485_s1 + $0x20] sm:$0xff]   ;;  %v1125_v18 = vld [vmem:[%s1485_s1 + $0x18] sm:$0xff]   ;;  %v1129_v22 = vld [vmem:[%s1485_s1 + $0x10] sm:$0xff]  }
   0x8   :  { %991 = vmatpush3.bf16.msra.mxu0 %v1113_v6  ;;  %v1122_v15 = vld [vmem:[%s1485_s1 + $0xa0] sm:$0xff]   ;;  %v1126_v19 = vld [vmem:[%s1485_s1 + $0x98] sm:$0xff]   ;;  %v1130_v23 = vld [vmem:[%s1485_s1 + $0x90] sm:$0xff]   ;;  %v1192_v6 = vmov 0.0  }
   0x9   :  { %1013 = vmatpush3.bf16.msra.mxu1 %v1114_v7  ;;  %992 = vmatprep.subr.bf16.mxu0 %v1115_v8  ;;  %v1131_v24 = vld [vmem:[%s1485_s1 + $0x48] sm:$0xff]   ;;  %v1135_v28 = vld [vmem:[%s1485_s1 + $0x40] sm:$0xff]   ;;  %v1145_v36 = vld [vmem:[%s1485_s1 + $0x178] sm:$0xff]  }
   0xa   :  { %1014 = vmatprep.subr.bf16.mxu1 %v1116_v9  ;;  %v1132_v25 = vld [vmem:[%s1485_s1 + $0xc8] sm:$0xff]   ;;  %v1136_v29 = vld [vmem:[%s1485_s1 + $0xc0] sm:$0xff]   ;;  %v1146_v37 = vld [vmem:[%s1485_s1 + $0x138] sm:$0xff]  }
   0xb   :  { %v1133_v26 = vld [vmem:[%s1485_s1 + $0x8] sm:$0xff]   ;;  %v1137_v30 = vld [vmem:[%s1485_s1] sm:$0xff]   ;;  %v1147_v38 = vld [vmem:[%s1485_s1 + $0x1f8] sm:$0xff]  }
   0xc   :  { %993 = vmatpush3.bf16.msra.mxu0 %v1117_v10  ;;  %v1134_v27 = vld [vmem:[%s1485_s1 + $0x88] sm:$0xff]   ;;  %v1138_v31 = vld [vmem:[%s1485_s1 + $0x80] sm:$0xff]   ;;  %v1148_v39 = vld [vmem:[%s1485_s1 + $0x1b8] sm:$0xff]  }
   0xd   :  { %1015 = vmatpush3.bf16.msra.mxu1 %v1118_v11  ;;  %994 = vmatprep.subr.bf16.mxu0 %v1119_v12  ;;  %v1139_v32 = vld [vmem:[%s1486_s0] ss:$36 sps:$4 sm:$0xff]   ;;  %v1142_v34 = vld [vmem:[%s1486_s0 + $0x8] ss:$36 sps:$4 sm:$0xff]   ;;  %v1149_v40 = vld [vmem:[%s1485_s1 + $0x170] sm:$0xff]  }
   0xe   :  { %1016 = vmatprep.subr.bf16.mxu1 %v1120_v13  ;;  %v1141_v33 = vld [vmem:[%s1486_s0 + $0x4] ss:$36 sps:$4 sm:$0xff]   ;;  %v1144_v35 = vld [vmem:[%s1486_s0 + $0xc] ss:$36 sps:$4 sm:$0xff]   ;;  %v1161_v52 = vld [vmem:[%s1485_s1 + $0x158] sm:$0xff]  }
   0xf   :  { %693 = vmatprep.mubr.bf16.mxu0 %v1141_v33  ;;  %734 = vmatprep.mubr.bf16.mxu1 %v1144_v35  ;;  %v1150_v41 = vld [vmem:[%s1485_s1 + $0x130] sm:$0xff]   ;;  %v1153_v44 = vld [vmem:[%s1485_s1 + $0x168] sm:$0xff]   ;;  %v1157_v48 = vld [vmem:[%s1485_s1 + $0x160] sm:$0xff]  }
  0x10   :  { %995 = vmatpush3.bf16.msra.mxu0 %v1121_v14  ;;  %v1151_v42 = vld [vmem:[%s1485_s1 + $0x1f0] sm:$0xff]   ;;  %v1154_v45 = vld [vmem:[%s1485_s1 + $0x128] sm:$0xff]   ;;  %v1158_v49 = vld [vmem:[%s1485_s1 + $0x120] sm:$0xff]  }
  0x11   :  { %1017 = vmatpush3.bf16.msra.mxu1 %v1122_v15  ;;  %996 = vmatprep.subr.bf16.mxu0 %v1123_v16  ;;  %v1152_v43 = vld [vmem:[%s1485_s1 + $0x1b0] sm:$0xff]   ;;  %v1155_v46 = vld [vmem:[%s1485_s1 + $0x1e8] sm:$0xff]   ;;  %v1159_v50 = vld [vmem:[%s1485_s1 + $0x1e0] sm:$0xff]  }
  0x12   :  { %1018 = vmatprep.subr.bf16.mxu1 %v1124_v17  ;;  %v1156_v47 = vld [vmem:[%s1485_s1 + $0x1a8] sm:$0xff]   ;;  %v1160_v51 = vld [vmem:[%s1485_s1 + $0x1a0] sm:$0xff]   ;;  %v1162_v53 = vld [vmem:[%s1485_s1 + $0x118] sm:$0xff]  }
  0x13   :  { %v1163_v54 = vld [vmem:[%s1485_s1 + $0x1d8] sm:$0xff]   ;;  %v1165_v56 = vld [vmem:[%s1485_s1 + $0x150] sm:$0xff]   ;;  %v1169_v60 = vld [vmem:[%s1485_s1 + $0x148] sm:$0xff]  }
  0x14   :  { %997 = vmatpush3.bf16.msra.mxu0 %v1125_v18  ;;  %v1164_v55 = vld [vmem:[%s1485_s1 + $0x198] sm:$0xff]   ;;  %v1166_v57 = vld [vmem:[%s1485_s1 + $0x110] sm:$0xff]   ;;  %v1170_v61 = vld [vmem:[%s1485_s1 + $0x108] sm:$0xff]  }
  0x15   :  { %1019 = vmatpush3.bf16.msra.mxu1 %v1126_v19  ;;  %998 = vmatprep.subr.bf16.mxu0 %v1127_v20  ;;  %v1167_v58 = vld [vmem:[%s1485_s1 + $0x1d0] sm:$0xff]   ;;  %v1171_v62 = vld [vmem:[%s1485_s1 + $0x1c8] sm:$0xff]   ;;  %v1173_v0 = vld [vmem:[%s1485_s1 + $0x140] sm:$0xff]  }
  0x16   :  { %1020 = vmatprep.subr.bf16.mxu1 %v1128_v21  ;;  %v1168_v59 = vld [vmem:[%s1485_s1 + $0x190] sm:$0xff]   ;;  %v1172_v63 = vld [vmem:[%s1485_s1 + $0x188] sm:$0xff]   ;;  %v1174_v1 = vld [vmem:[%s1485_s1 + $0x100] sm:$0xff]  }
  0x17   :  { %v1175_v2 = vld [vmem:[%s1485_s1 + $0x1c0] sm:$0xff]   ;;  %v1176_v3 = vld [vmem:[%s1486_s0 + $0x10] ss:$36 sps:$4 sm:$0xff]   ;;  %v1180_v7 = vld [vmem:[%s1486_s0 + $0x18] ss:$36 sps:$4 sm:$0xff]  }
  0x18   :  { %999 = vmatpush3.bf16.msra.mxu0 %v1129_v22  ;;  %v1178_v4 = vld [vmem:[%s1486_s0 + $0x14] ss:$36 sps:$4 sm:$0xff]   ;;  %v1179_v5 = vld [vmem:[%s1485_s1 + $0x180] sm:$0xff]   ;;  %v1185_v11 = vld [vmem:[%s1485_s1 + $0x228] sm:$0xff]  }
  0x19   :  { %1021 = vmatpush3.bf16.msra.mxu1 %v1130_v23  ;;  %1000 = vmatprep.subr.bf16.mxu0 %v1131_v24  ;;  %v1182_v8 = vld [vmem:[%s1486_s0 + $0x1c] ss:$36 sps:$4 sm:$0xff]   ;;  %v1184_v10 = vld [vmem:[%s1485_s1 + $0x230] sm:$0xff]   ;;  %v1189_v15 = vld [vmem:[%s1485_s1 + $0x208] sm:$0xff]  }
  0x1a   :  { %1022 = vmatprep.subr.bf16.mxu1 %v1132_v25  ;;  %v1183_v9 = vld [vmem:[%s1485_s1 + $0x238] sm:$0xff]   ;;  %v1186_v12 = vld [vmem:[%s1485_s1 + $0x220] sm:$0xff]   ;;  %v1188_v14 = vld [vmem:[%s1485_s1 + $0x210] sm:$0xff]  }
  0x1b   :  { %v1187_v13 = vld [vmem:[%s1485_s1 + $0x218] sm:$0xff]   ;;  %v1190_v16 = vld [vmem:[%s1485_s1 + $0x200] sm:$0xff]  }
  0x1c   :  { %1001 = vmatpush3.bf16.msra.mxu0 %v1133_v26  ;;  %v1191_v17 = vld [vmem:[%s1486_s0 + $0x20] ss:$36 sps:$4 sm:$0xff]  }
  0x1d   :  { %1023 = vmatpush3.bf16.msra.mxu1 %v1134_v27  ;;  %1002 = vmatprep.subr.bf16.mxu0 %v1135_v28 }
  0x1e   :  { %1024 = vmatprep.subr.bf16.mxu1 %v1136_v29 }
  0x20   :  { %1003 = vmatpush3.bf16.msra.mxu0 %v1137_v30 }
  0x21   :  { %1025 = vmatpush3.bf16.msra.mxu1 %v1138_v31  ;;  %1032 = vmatprep.subr.bf16.mxu0 %v1145_v36 }
  0x22   :  { %1054 = vmatprep.subr.bf16.mxu1 %v1147_v38 }
  0x23   :  { %694 = vmatmul.mubr.bf16.vlgmr.msra.gmra.mxu0 %v1139_v32 }
  0x24   :  { %735 = vmatmul.mubr.bf16.vlgmr.msra.gmra.mxu1 %v1142_v34  ;;  %1033 = vmatpush3.bf16.msra.mxu0 %v1146_v37 }
  0x25   :  { %1055 = vmatpush3.bf16.msra.mxu1 %v1148_v39  ;;  %1034 = vmatprep.subr.bf16.mxu0 %v1149_v40 }
  0x26   :  { %1056 = vmatprep.subr.bf16.mxu1 %v1151_v42  ;;  %775 = vmatprep.mubr.bf16.mxu0 %v1178_v4 }
  0x27   :  { %816 = vmatprep.mubr.bf16.mxu1 %v1182_v8 }
  0x28   :  { %1035 = vmatpush3.bf16.msra.mxu0 %v1150_v41 }
  0x29   :  { %1057 = vmatpush3.bf16.msra.mxu1 %v1152_v43  ;;  %1036 = vmatprep.subr.bf16.mxu0 %v1153_v44 }
  0x2a   :  { %1058 = vmatprep.subr.bf16.mxu1 %v1155_v46 }
  0x2c   :  { %1037 = vmatpush3.bf16.msra.mxu0 %v1154_v45 }
  0x2d   :  { %1059 = vmatpush3.bf16.msra.mxu1 %v1156_v47  ;;  %1038 = vmatprep.subr.bf16.mxu0 %v1157_v48  ;;  %v986_v48 = vld [vmem:[%s1487_s2] ss:$0 sm:$0xff] }
  0x2e   :  { %1060 = vmatprep.subr.bf16.mxu1 %v1159_v50  ;;  %v987_v50 = vld [vmem:[%s1488_s3] ss:$0 sm:$0xff] }
  0x30   :  { %1039 = vmatpush3.bf16.msra.mxu0 %v1158_v49 }
  0x31   :  { %1061 = vmatpush3.bf16.msra.mxu1 %v1160_v51  ;;  %1040 = vmatprep.subr.bf16.mxu0 %v1161_v52 }
  0x32   :  { %1062 = vmatprep.subr.bf16.mxu1 %v1163_v54  ;;  %v875_v54 = vld [vmem:[%s1489_s4] sm:$0xff] }
  0x34   :  { %1041 = vmatpush3.bf16.msra.mxu0 %v1162_v53 }
  0x35   :  { %1063 = vmatpush3.bf16.msra.mxu1 %v1164_v55  ;;  %1042 = vmatprep.subr.bf16.mxu0 %v1165_v56 }
  0x36   :  { %1064 = vmatprep.subr.bf16.mxu1 %v1167_v58 }
  0x38   :  { %1043 = vmatpush3.bf16.msra.mxu0 %v1166_v57 }
  0x39   :  { %1065 = vmatpush3.bf16.msra.mxu1 %v1168_v59  ;;  %1044 = vmatprep.subr.bf16.mxu0 %v1169_v60 }
  0x3a   :  { %1066 = vmatprep.subr.bf16.mxu1 %v1171_v62 }
  0x3c   :  { %1045 = vmatpush3.bf16.msra.mxu0 %v1170_v61  ;;  %v876_v61 = vld [vmem:[%s1489_s4 + $0x8] sm:$0xff] }
  0x3d   :  { %1067 = vmatpush3.bf16.msra.mxu1 %v1172_v63  ;;  %1046 = vmatprep.subr.bf16.mxu0 %v1173_v0 }
  0x3e   :  { %1068 = vmatprep.subr.bf16.mxu1 %v1175_v2 }
  0x40   :  { %1047 = vmatpush3.bf16.msra.mxu0 %v1174_v1 }
  0x41   :  { %1085 = vmatprep.subr.bf16.mxu0 %v1192_v6  ;;  %1069 = vmatpush3.bf16.msra.mxu1 %v1179_v5 }
  0x43   :  { %776 = vmatmul.mubr.bf16.vlgmr.msra.gmra.mxu0 %v1176_v3 }
  0x44   :  { %1101 = vmatprep.mubr.msk.bf16.mxu0 %vm1193_vm0, %v1192_v6  ;;  %1086 = vmatpush3.bf16.msra.mxu0 %v1183_v9 }
  0x45   :  { %817 = vmatmul.mubr.bf16.vlgmr.msra.gmra.mxu1 %v1180_v7  ;;  %1087 = vmatprep.subr.bf16.mxu0 %v1192_v6 }
  0x48   :  { %1088 = vmatpush3.bf16.msra.mxu0 %v1184_v10 }
  0x49   :  { %1089 = vmatprep.subr.bf16.mxu0 %v1192_v6 }
  0x4c   :  { %1090 = vmatpush3.bf16.msra.mxu0 %v1185_v11 }
  0x4d   :  { %1091 = vmatprep.subr.bf16.mxu0 %v1192_v6 }
  0x50   :  { %1092 = vmatpush3.bf16.msra.mxu0 %v1186_v12 }
  0x51   :  { %1093 = vmatprep.subr.bf16.mxu0 %v1192_v6 }
  0x54   :  { %1094 = vmatpush3.bf16.msra.mxu0 %v1187_v13 }
  0x55   :  { %1095 = vmatprep.subr.bf16.mxu0 %v1192_v6 }
  0x58   :  { %1096 = vmatpush3.bf16.msra.mxu0 %v1188_v14 }
  0x59   :  { %1097 = vmatprep.subr.bf16.mxu0 %v1192_v6 }
  0x5c   :  { %1098 = vmatpush3.bf16.msra.mxu0 %v1189_v15 }
  0x5d   :  { %1099 = vmatprep.subr.bf16.mxu0 %v1192_v6 }
  0x60   :  { %1100 = vmatpush3.bf16.msra.mxu0 %v1190_v16 }
  0x63   :  { %1102 = vmatmul.mubr.bf16.vlgmr.msra.gmra.mxu0 %v1191_v17 }
  0xe3   :  { %v1004_v18 = vpop.f32.mrf.mxu0 }
  0xe4   :  { %v1026_v19 = vpop.f32.mrf.mxu1 }
  0xe5   :  { %v1005_v20 = vpop.f32.mrf.mxu0 }
  0xe6   :  { %v1027_v21 = vpop.f32.mrf.mxu1  ;;  %v1006_v31 = vadd.f32 %v1005_v20, %v1004_v18 }
  0xe7   :  { %v1007_v22 = vpop.f32.mrf.mxu0  ;;  %v1028_v32 = vadd.f32 %v1027_v21, %v1026_v19 }
  0xe8   :  { %v1029_v23 = vpop.f32.mrf.mxu1 }
  0xe9   :  { %v1008_v24 = vpop.f32.mrf.mxu0  ;;  %v737_v36 = vadd.f32 %v1028_v32, %v1006_v31 }
  0xea   :  { %v1030_v26 = vpop.f32.mrf.mxu1  ;;  %v1009_v37 = vadd.f32 %v1008_v24, %v1007_v22 }
  0xeb   :  { %v1031_v38 = vadd.f32 %v1030_v26, %v1029_v23 }
  0xed   :  { %v740_v43 = vadd.f32 %v1031_v38, %v1009_v37 }
 0x103   :  { %v1048_v25 = vpop.f32.mrf.mxu0 }
 0x105   :  { %v1049_v27 = vpop.f32.mrf.mxu0  ;;  %v1070_v28 = vpop.f32.mrf.mxu1 }
 0x106   :  { %v1050_v33 = vadd.f32 %v1049_v27, %v1048_v25 }
 0x107   :  { %v1051_v29 = vpop.f32.mrf.mxu0  ;;  %v1071_v30 = vpop.f32.mrf.mxu1 }
 0x108   :  { %v778_v39 = vadd.f32 %v1050_v33, %v737_v36  ;;  %v1072_v40 = vadd.f32 %v1071_v30, %v1070_v28 }
 0x109   :  { %v1052_v34 = vpop.f32.mrf.mxu0  ;;  %v1073_v35 = vpop.f32.mrf.mxu1 }
 0x10a   :  { %v1053_v41 = vadd.f32 %v1052_v34, %v1051_v29  ;;  %v819_v46 = vadd.f32 %v1072_v40, %v778_v39 }
 0x10b   :  { %v1074_v42 = vpop.f32.mrf.mxu1 }
 0x10c   :  { %v781_v44 = vadd.f32 %v1053_v41, %v740_v43  ;;  %v1075_v45 = vadd.f32 %v1074_v42, %v1073_v35 }
 0x10e   :  { %v822_v53 = vadd.f32 %v1075_v45, %v781_v44 }
 0x123   :  { %v859_v47 = vpop.f32.mrf.mxu0 }
 0x124   :  { %v860_v49 = vadd.f32 %v859_v47, %v819_v46 }
 0x125   :  { %v1103_v51 = vpop.f32.mrf.mxu0 }
 0x126   :  { %v884_v52 = vmul.f32 %v986_v48, %v860_v49 }
 0x127   :  { %v862_v55 = vpop.f32.mrf.mxu0 }
 0x128   :  { %v893_v56 = vadd.f32 %v987_v50, %v884_v52  ;;  %v863_v57 = vadd.f32 %v862_v55, %v822_v53 }
 0x129   :  { %v1104_v58 = vpop.f32.mrf.mxu0 }
 0x12a   :  { %v895_v59 = vadd.f32 %v893_v56, %v875_v54  ;;  %v885_v60 = vmul.f32 %v986_v48, %v863_v57 }
 0x12c   :  { %v897_v62 = vmax.f32 %v895_v59, 0.0  ;;  %v894_v63 = vadd.f32 %v987_v50, %v885_v60 }
 0x12e   :  { %899 = vst [vmem:[%s1490_s5] sm:$0xff] %v897_v62  ;;  %v896_v0 = vadd.f32 %v894_v63, %v876_v61 }
 0x130   :  { %v898_v1 = vmax.f32 %v896_v0, 0.0 }
 0x132   :  { %900 = vst [vmem:[%s1490_s5 + $0x8] sm:$0xff] %v898_v1 }

// kernel: regressor_forward.31
= control target key start
LH: loop header
LB: loop body
LE: loop exit
PB: predicated region body
PF: predicated region fallthrough
CT: control target
= control target key end

     0   :  { %vm1186_vm0 = vmmov 0   ;;  %s1467_s1 = inlined_call_operand.vmem [shape: bf16[1152,128], index: 1, kind: input, shape index: {}]   ;;  %s1468_s0 = inlined_call_operand.vmem [shape: bf16[16,1152], index: 0, kind: input, shape index: {}]   ;;  %s1469_s2 = inlined_call_operand.vmem [shape: f32[1,128], index: 2, kind: input, shape index: {}]   ;;  %s1470_s3 = inlined_call_operand.vmem [shape: f32[1,128], index: 3, kind: input, shape index: {}]   ;;  %s1471_s4 = inlined_call_operand.vmem [shape: f32[16,128], index: 4, kind: output, shape index: {}]  }
   0x1   :  { %v1100_v0 = vld [vmem:[%s1467_s1 + $0x78] sm:$0xff]   ;;  %v1104_v4 = vld [vmem:[%s1467_s1 + $0x70] sm:$0xff]   ;;  %v1108_v8 = vld [vmem:[%s1467_s1 + $0x68] sm:$0xff]  }
   0x2   :  { %v1101_v1 = vld [vmem:[%s1467_s1 + $0xf8] sm:$0xff]   ;;  %981 = vmatprep.subr.bf16.mxu0 %v1100_v0  ;;  %v1105_v5 = vld [vmem:[%s1467_s1 + $0xf0] sm:$0xff]   ;;  %v1109_v9 = vld [vmem:[%s1467_s1 + $0xe8] sm:$0xff]  }
   0x3   :  { %v1102_v2 = vld [vmem:[%s1467_s1 + $0x38] sm:$0xff]   ;;  %1003 = vmatprep.subr.bf16.mxu1 %v1101_v1  ;;  %v1106_v6 = vld [vmem:[%s1467_s1 + $0x30] sm:$0xff]   ;;  %v1110_v10 = vld [vmem:[%s1467_s1 + $0x28] sm:$0xff]  }
   0x4   :  { %v1103_v3 = vld [vmem:[%s1467_s1 + $0xb8] sm:$0xff]   ;;  %982 = vmatpush3.bf16.msra.mxu0 %v1102_v2  ;;  %v1107_v7 = vld [vmem:[%s1467_s1 + $0xb0] sm:$0xff]   ;;  %v1111_v11 = vld [vmem:[%s1467_s1 + $0xa8] sm:$0xff]  }
   0x5   :  { %1004 = vmatpush3.bf16.msra.mxu1 %v1103_v3  ;;  %983 = vmatprep.subr.bf16.mxu0 %v1104_v4  ;;  %v1112_v12 = vld [vmem:[%s1467_s1 + $0x60] sm:$0xff]   ;;  %v1116_v16 = vld [vmem:[%s1467_s1 + $0x58] sm:$0xff]   ;;  %v1120_v20 = vld [vmem:[%s1467_s1 + $0x50] sm:$0xff]  }
   0x6   :  { %1005 = vmatprep.subr.bf16.mxu1 %v1105_v5  ;;  %v1113_v13 = vld [vmem:[%s1467_s1 + $0xe0] sm:$0xff]   ;;  %v1117_v17 = vld [vmem:[%s1467_s1 + $0xd8] sm:$0xff]   ;;  %v1121_v21 = vld [vmem:[%s1467_s1 + $0xd0] sm:$0xff]  }
   0x7   :  { %v1114_v14 = vld [vmem:[%s1467_s1 + $0x20] sm:$0xff]   ;;  %v1118_v18 = vld [vmem:[%s1467_s1 + $0x18] sm:$0xff]   ;;  %v1122_v22 = vld [vmem:[%s1467_s1 + $0x10] sm:$0xff]  }
   0x8   :  { %984 = vmatpush3.bf16.msra.mxu0 %v1106_v6  ;;  %v1115_v15 = vld [vmem:[%s1467_s1 + $0xa0] sm:$0xff]   ;;  %v1119_v19 = vld [vmem:[%s1467_s1 + $0x98] sm:$0xff]   ;;  %v1123_v23 = vld [vmem:[%s1467_s1 + $0x90] sm:$0xff]   ;;  %v1185_v6 = vmov 0.0  }
   0x9   :  { %1006 = vmatpush3.bf16.msra.mxu1 %v1107_v7  ;;  %985 = vmatprep.subr.bf16.mxu0 %v1108_v8  ;;  %v1124_v24 = vld [vmem:[%s1467_s1 + $0x48] sm:$0xff]   ;;  %v1128_v28 = vld [vmem:[%s1467_s1 + $0x40] sm:$0xff]   ;;  %v1138_v36 = vld [vmem:[%s1467_s1 + $0x178] sm:$0xff]  }
   0xa   :  { %1007 = vmatprep.subr.bf16.mxu1 %v1109_v9  ;;  %v1125_v25 = vld [vmem:[%s1467_s1 + $0xc8] sm:$0xff]   ;;  %v1129_v29 = vld [vmem:[%s1467_s1 + $0xc0] sm:$0xff]   ;;  %v1139_v37 = vld [vmem:[%s1467_s1 + $0x138] sm:$0xff]  }
   0xb   :  { %v1126_v26 = vld [vmem:[%s1467_s1 + $0x8] sm:$0xff]   ;;  %v1130_v30 = vld [vmem:[%s1467_s1] sm:$0xff]   ;;  %v1140_v38 = vld [vmem:[%s1467_s1 + $0x1f8] sm:$0xff]  }
   0xc   :  { %986 = vmatpush3.bf16.msra.mxu0 %v1110_v10  ;;  %v1127_v27 = vld [vmem:[%s1467_s1 + $0x88] sm:$0xff]   ;;  %v1131_v31 = vld [vmem:[%s1467_s1 + $0x80] sm:$0xff]   ;;  %v1141_v39 = vld [vmem:[%s1467_s1 + $0x1b8] sm:$0xff]  }
   0xd   :  { %1008 = vmatpush3.bf16.msra.mxu1 %v1111_v11  ;;  %987 = vmatprep.subr.bf16.mxu0 %v1112_v12  ;;  %v1132_v32 = vld [vmem:[%s1468_s0] ss:$36 sps:$4 sm:$0xff]   ;;  %v1135_v34 = vld [vmem:[%s1468_s0 + $0x8] ss:$36 sps:$4 sm:$0xff]   ;;  %v1142_v40 = vld [vmem:[%s1467_s1 + $0x170] sm:$0xff]  }
   0xe   :  { %1009 = vmatprep.subr.bf16.mxu1 %v1113_v13  ;;  %v1134_v33 = vld [vmem:[%s1468_s0 + $0x4] ss:$36 sps:$4 sm:$0xff]   ;;  %v1137_v35 = vld [vmem:[%s1468_s0 + $0xc] ss:$36 sps:$4 sm:$0xff]   ;;  %v1154_v52 = vld [vmem:[%s1467_s1 + $0x158] sm:$0xff]  }
   0xf   :  { %690 = vmatprep.mubr.bf16.mxu0 %v1134_v33  ;;  %731 = vmatprep.mubr.bf16.mxu1 %v1137_v35  ;;  %v1143_v41 = vld [vmem:[%s1467_s1 + $0x130] sm:$0xff]   ;;  %v1146_v44 = vld [vmem:[%s1467_s1 + $0x168] sm:$0xff]   ;;  %v1150_v48 = vld [vmem:[%s1467_s1 + $0x160] sm:$0xff]  }
  0x10   :  { %988 = vmatpush3.bf16.msra.mxu0 %v1114_v14  ;;  %v1144_v42 = vld [vmem:[%s1467_s1 + $0x1f0] sm:$0xff]   ;;  %v1147_v45 = vld [vmem:[%s1467_s1 + $0x128] sm:$0xff]   ;;  %v1151_v49 = vld [vmem:[%s1467_s1 + $0x120] sm:$0xff]  }
  0x11   :  { %1010 = vmatpush3.bf16.msra.mxu1 %v1115_v15  ;;  %989 = vmatprep.subr.bf16.mxu0 %v1116_v16  ;;  %v1145_v43 = vld [vmem:[%s1467_s1 + $0x1b0] sm:$0xff]   ;;  %v1148_v46 = vld [vmem:[%s1467_s1 + $0x1e8] sm:$0xff]   ;;  %v1152_v50 = vld [vmem:[%s1467_s1 + $0x1e0] sm:$0xff]  }
  0x12   :  { %1011 = vmatprep.subr.bf16.mxu1 %v1117_v17  ;;  %v1149_v47 = vld [vmem:[%s1467_s1 + $0x1a8] sm:$0xff]   ;;  %v1153_v51 = vld [vmem:[%s1467_s1 + $0x1a0] sm:$0xff]   ;;  %v1155_v53 = vld [vmem:[%s1467_s1 + $0x118] sm:$0xff]  }
  0x13   :  { %v1156_v54 = vld [vmem:[%s1467_s1 + $0x1d8] sm:$0xff]   ;;  %v1158_v56 = vld [vmem:[%s1467_s1 + $0x150] sm:$0xff]   ;;  %v1162_v60 = vld [vmem:[%s1467_s1 + $0x148] sm:$0xff]  }
  0x14   :  { %990 = vmatpush3.bf16.msra.mxu0 %v1118_v18  ;;  %v1157_v55 = vld [vmem:[%s1467_s1 + $0x198] sm:$0xff]   ;;  %v1159_v57 = vld [vmem:[%s1467_s1 + $0x110] sm:$0xff]   ;;  %v1163_v61 = vld [vmem:[%s1467_s1 + $0x108] sm:$0xff]  }
  0x15   :  { %1012 = vmatpush3.bf16.msra.mxu1 %v1119_v19  ;;  %991 = vmatprep.subr.bf16.mxu0 %v1120_v20  ;;  %v1160_v58 = vld [vmem:[%s1467_s1 + $0x1d0] sm:$0xff]   ;;  %v1164_v62 = vld [vmem:[%s1467_s1 + $0x1c8] sm:$0xff]   ;;  %v1166_v0 = vld [vmem:[%s1467_s1 + $0x140] sm:$0xff]  }
  0x16   :  { %1013 = vmatprep.subr.bf16.mxu1 %v1121_v21  ;;  %v1161_v59 = vld [vmem:[%s1467_s1 + $0x190] sm:$0xff]   ;;  %v1165_v63 = vld [vmem:[%s1467_s1 + $0x188] sm:$0xff]   ;;  %v1167_v1 = vld [vmem:[%s1467_s1 + $0x100] sm:$0xff]  }
  0x17   :  { %v1168_v2 = vld [vmem:[%s1467_s1 + $0x1c0] sm:$0xff]   ;;  %v1169_v3 = vld [vmem:[%s1468_s0 + $0x10] ss:$36 sps:$4 sm:$0xff]   ;;  %v1173_v7 = vld [vmem:[%s1468_s0 + $0x18] ss:$36 sps:$4 sm:$0xff]  }
  0x18   :  { %992 = vmatpush3.bf16.msra.mxu0 %v1122_v22  ;;  %v1171_v4 = vld [vmem:[%s1468_s0 + $0x14] ss:$36 sps:$4 sm:$0xff]   ;;  %v1172_v5 = vld [vmem:[%s1467_s1 + $0x180] sm:$0xff]   ;;  %v1178_v11 = vld [vmem:[%s1467_s1 + $0x228] sm:$0xff]  }
  0x19   :  { %1014 = vmatpush3.bf16.msra.mxu1 %v1123_v23  ;;  %993 = vmatprep.subr.bf16.mxu0 %v1124_v24  ;;  %v1175_v8 = vld [vmem:[%s1468_s0 + $0x1c] ss:$36 sps:$4 sm:$0xff]   ;;  %v1177_v10 = vld [vmem:[%s1467_s1 + $0x230] sm:$0xff]   ;;  %v1182_v15 = vld [vmem:[%s1467_s1 + $0x208] sm:$0xff]  }
  0x1a   :  { %1015 = vmatprep.subr.bf16.mxu1 %v1125_v25  ;;  %v1176_v9 = vld [vmem:[%s1467_s1 + $0x238] sm:$0xff]   ;;  %v1179_v12 = vld [vmem:[%s1467_s1 + $0x220] sm:$0xff]   ;;  %v1181_v14 = vld [vmem:[%s1467_s1 + $0x210] sm:$0xff]  }
  0x1b   :  { %v1180_v13 = vld [vmem:[%s1467_s1 + $0x218] sm:$0xff]   ;;  %v1183_v16 = vld [vmem:[%s1467_s1 + $0x200] sm:$0xff]  }
  0x1c   :  { %994 = vmatpush3.bf16.msra.mxu0 %v1126_v26  ;;  %v1184_v17 = vld [vmem:[%s1468_s0 + $0x20] ss:$36 sps:$4 sm:$0xff]  }
  0x1d   :  { %1016 = vmatpush3.bf16.msra.mxu1 %v1127_v27  ;;  %995 = vmatprep.subr.bf16.mxu0 %v1128_v28 }
  0x1e   :  { %1017 = vmatprep.subr.bf16.mxu1 %v1129_v29 }
  0x20   :  { %996 = vmatpush3.bf16.msra.mxu0 %v1130_v30 }
  0x21   :  { %1018 = vmatpush3.bf16.msra.mxu1 %v1131_v31  ;;  %1025 = vmatprep.subr.bf16.mxu0 %v1138_v36 }
  0x22   :  { %1047 = vmatprep.subr.bf16.mxu1 %v1140_v38 }
  0x23   :  { %691 = vmatmul.mubr.bf16.vlgmr.msra.gmra.mxu0 %v1132_v32 }
  0x24   :  { %732 = vmatmul.mubr.bf16.vlgmr.msra.gmra.mxu1 %v1135_v34  ;;  %1026 = vmatpush3.bf16.msra.mxu0 %v1139_v37 }
  0x25   :  { %1048 = vmatpush3.bf16.msra.mxu1 %v1141_v39  ;;  %1027 = vmatprep.subr.bf16.mxu0 %v1142_v40 }
  0x26   :  { %1049 = vmatprep.subr.bf16.mxu1 %v1144_v42  ;;  %772 = vmatprep.mubr.bf16.mxu0 %v1171_v4 }
  0x27   :  { %813 = vmatprep.mubr.bf16.mxu1 %v1175_v8 }
  0x28   :  { %1028 = vmatpush3.bf16.msra.mxu0 %v1143_v41 }
  0x29   :  { %1050 = vmatpush3.bf16.msra.mxu1 %v1145_v43  ;;  %1029 = vmatprep.subr.bf16.mxu0 %v1146_v44 }
  0x2a   :  { %1051 = vmatprep.subr.bf16.mxu1 %v1148_v46 }
  0x2c   :  { %1030 = vmatpush3.bf16.msra.mxu0 %v1147_v45 }
  0x2d   :  { %1052 = vmatpush3.bf16.msra.mxu1 %v1149_v47  ;;  %1031 = vmatprep.subr.bf16.mxu0 %v1150_v48  ;;  %v979_v48 = vld [vmem:[%s1469_s2] ss:$0 sm:$0xff] }
  0x2e   :  { %1053 = vmatprep.subr.bf16.mxu1 %v1152_v50  ;;  %v980_v50 = vld [vmem:[%s1470_s3] ss:$0 sm:$0xff] }
  0x30   :  { %1032 = vmatpush3.bf16.msra.mxu0 %v1151_v49 }
  0x31   :  { %1054 = vmatpush3.bf16.msra.mxu1 %v1153_v51  ;;  %1033 = vmatprep.subr.bf16.mxu0 %v1154_v52 }
  0x32   :  { %1055 = vmatprep.subr.bf16.mxu1 %v1156_v54 }
  0x34   :  { %1034 = vmatpush3.bf16.msra.mxu0 %v1155_v53 }
  0x35   :  { %1056 = vmatpush3.bf16.msra.mxu1 %v1157_v55  ;;  %1035 = vmatprep.subr.bf16.mxu0 %v1158_v56 }
  0x36   :  { %1057 = vmatprep.subr.bf16.mxu1 %v1160_v58 }
  0x38   :  { %1036 = vmatpush3.bf16.msra.mxu0 %v1159_v57 }
  0x39   :  { %1058 = vmatpush3.bf16.msra.mxu1 %v1161_v59  ;;  %1037 = vmatprep.subr.bf16.mxu0 %v1162_v60 }
  0x3a   :  { %1059 = vmatprep.subr.bf16.mxu1 %v1164_v62 }
  0x3c   :  { %1038 = vmatpush3.bf16.msra.mxu0 %v1163_v61 }
  0x3d   :  { %1060 = vmatpush3.bf16.msra.mxu1 %v1165_v63  ;;  %1039 = vmatprep.subr.bf16.mxu0 %v1166_v0 }
  0x3e   :  { %1061 = vmatprep.subr.bf16.mxu1 %v1168_v2 }
  0x40   :  { %1040 = vmatpush3.bf16.msra.mxu0 %v1167_v1 }
  0x41   :  { %1078 = vmatprep.subr.bf16.mxu0 %v1185_v6  ;;  %1062 = vmatpush3.bf16.msra.mxu1 %v1172_v5 }
  0x43   :  { %773 = vmatmul.mubr.bf16.vlgmr.msra.gmra.mxu0 %v1169_v3 }
  0x44   :  { %1094 = vmatprep.mubr.msk.bf16.mxu0 %vm1186_vm0, %v1185_v6  ;;  %1079 = vmatpush3.bf16.msra.mxu0 %v1176_v9 }
  0x45   :  { %814 = vmatmul.mubr.bf16.vlgmr.msra.gmra.mxu1 %v1173_v7  ;;  %1080 = vmatprep.subr.bf16.mxu0 %v1185_v6 }
  0x48   :  { %1081 = vmatpush3.bf16.msra.mxu0 %v1177_v10 }
  0x49   :  { %1082 = vmatprep.subr.bf16.mxu0 %v1185_v6 }
  0x4c   :  { %1083 = vmatpush3.bf16.msra.mxu0 %v1178_v11 }
  0x4d   :  { %1084 = vmatprep.subr.bf16.mxu0 %v1185_v6 }
  0x50   :  { %1085 = vmatpush3.bf16.msra.mxu0 %v1179_v12 }
  0x51   :  { %1086 = vmatprep.subr.bf16.mxu0 %v1185_v6 }
  0x54   :  { %1087 = vmatpush3.bf16.msra.mxu0 %v1180_v13 }
  0x55   :  { %1088 = vmatprep.subr.bf16.mxu0 %v1185_v6 }
  0x58   :  { %1089 = vmatpush3.bf16.msra.mxu0 %v1181_v14 }
  0x59   :  { %1090 = vmatprep.subr.bf16.mxu0 %v1185_v6 }
  0x5c   :  { %1091 = vmatpush3.bf16.msra.mxu0 %v1182_v15 }
  0x5d   :  { %1092 = vmatprep.subr.bf16.mxu0 %v1185_v6 }
  0x60   :  { %1093 = vmatpush3.bf16.msra.mxu0 %v1183_v16 }
  0x63   :  { %1095 = vmatmul.mubr.bf16.vlgmr.msra.gmra.mxu0 %v1184_v17 }
  0xe3   :  { %v997_v18 = vpop.f32.mrf.mxu0 }
  0xe4   :  { %v1019_v19 = vpop.f32.mrf.mxu1 }
  0xe5   :  { %v998_v20 = vpop.f32.mrf.mxu0 }
  0xe6   :  { %v1020_v21 = vpop.f32.mrf.mxu1  ;;  %v999_v31 = vadd.f32 %v998_v20, %v997_v18 }
  0xe7   :  { %v1000_v22 = vpop.f32.mrf.mxu0  ;;  %v1021_v32 = vadd.f32 %v1020_v21, %v1019_v19 }
  0xe8   :  { %v1022_v23 = vpop.f32.mrf.mxu1 }
  0xe9   :  { %v1001_v24 = vpop.f32.mrf.mxu0  ;;  %v734_v36 = vadd.f32 %v1021_v32, %v999_v31 }
  0xea   :  { %v1023_v26 = vpop.f32.mrf.mxu1  ;;  %v1002_v37 = vadd.f32 %v1001_v24, %v1000_v22 }
  0xeb   :  { %v1024_v38 = vadd.f32 %v1023_v26, %v1022_v23 }
  0xed   :  { %v737_v43 = vadd.f32 %v1024_v38, %v1002_v37 }
 0x103   :  { %v1041_v25 = vpop.f32.mrf.mxu0 }
 0x105   :  { %v1042_v27 = vpop.f32.mrf.mxu0  ;;  %v1063_v28 = vpop.f32.mrf.mxu1 }
 0x106   :  { %v1043_v33 = vadd.f32 %v1042_v27, %v1041_v25 }
 0x107   :  { %v1044_v29 = vpop.f32.mrf.mxu0  ;;  %v1064_v30 = vpop.f32.mrf.mxu1 }
 0x108   :  { %v775_v39 = vadd.f32 %v1043_v33, %v734_v36  ;;  %v1065_v40 = vadd.f32 %v1064_v30, %v1063_v28 }
 0x109   :  { %v1045_v34 = vpop.f32.mrf.mxu0  ;;  %v1066_v35 = vpop.f32.mrf.mxu1 }
 0x10a   :  { %v1046_v41 = vadd.f32 %v1045_v34, %v1044_v29  ;;  %v816_v46 = vadd.f32 %v1065_v40, %v775_v39 }
 0x10b   :  { %v1067_v42 = vpop.f32.mrf.mxu1 }
 0x10c   :  { %v778_v44 = vadd.f32 %v1046_v41, %v737_v43  ;;  %v1068_v45 = vadd.f32 %v1067_v42, %v1066_v35 }
 0x10e   :  { %v819_v53 = vadd.f32 %v1068_v45, %v778_v44 }
 0x123   :  { %v856_v47 = vpop.f32.mrf.mxu0 }
 0x124   :  { %v857_v49 = vadd.f32 %v856_v47, %v816_v46 }
 0x125   :  { %v1096_v51 = vpop.f32.mrf.mxu0 }
 0x126   :  { %v879_v52 = vmul.f32 %v979_v48, %v857_v49 }
 0x127   :  { %v859_v54 = vpop.f32.mrf.mxu0 }
 0x128   :  { %v888_v55 = vadd.f32 %v980_v50, %v879_v52  ;;  %v860_v56 = vadd.f32 %v859_v54, %v819_v53 }
 0x129   :  { %v1097_v57 = vpop.f32.mrf.mxu0 }
 0x12a   :  { %v890_v58 = vmax.f32 %v888_v55, 0.0  ;;  %v880_v59 = vmul.f32 %v979_v48, %v860_v56 }
 0x12c   :  { %892 = vst [vmem:[%s1471_s4] sm:$0xff] %v890_v58  ;;  %v889_v60 = vadd.f32 %v980_v50, %v880_v59 }
 0x12e   :  { %v891_v61 = vmax.f32 %v889_v60, 0.0 }
 0x130   :  { %893 = vst [vmem:[%s1471_s4 + $0x8] sm:$0xff] %v891_v61 }

// kernel: regressor_forward.34
= control target key start
LH: loop header
LB: loop body
LE: loop exit
PB: predicated region body
PF: predicated region fallthrough
CT: control target
= control target key end

     0   :  { %s2110_s1 = inlined_call_operand.vmem [shape: bf16[1152,256], index: 1, kind: input, shape index: {}]   ;;  %s2111_s0 = inlined_call_operand.vmem [shape: bf16[16,1152], index: 0, kind: input, shape index: {}]   ;;  %s2112_s2 = inlined_call_operand.vmem [shape: f32[1,256], index: 2, kind: input, shape index: {}]   ;;  %s2113_s3 = inlined_call_operand.vmem [shape: f32[1,256], index: 3, kind: input, shape index: {}]   ;;  %s2114_s4 = inlined_call_operand.vmem [shape: f32[16,256], index: 4, kind: output, shape index: {}]  }
   0x1   :  { %v1378_v0 = vld [vmem:[%s2110_s1 + $0x74] ss:$8 sps:$4 sm:$0xff]   ;;  %v1382_v2 = vld [vmem:[%s2110_s1 + $0x70] ss:$8 sps:$4 sm:$0xff]   ;;  %v1384_v4 = vld [vmem:[%s2110_s1 + $0x64] ss:$8 sps:$4 sm:$0xff]  }
   0x2   :  { %v1380_v1 = vld [vmem:[%s2110_s1 + $0x174] ss:$8 sps:$4 sm:$0xff]   ;;  %950 = vmatprep.subr.bf16.mxu0 %v1378_v0  ;;  %v1383_v3 = vld [vmem:[%s2110_s1 + $0x170] ss:$8 sps:$4 sm:$0xff]   ;;  %v1386_v5 = vld [vmem:[%s2110_s1 + $0x164] ss:$8 sps:$4 sm:$0xff]  }
   0x3   :  { %993 = vmatprep.subr.bf16.mxu1 %v1380_v1  ;;  %951 = vmatpush1.bf16.msra.mxu0 %v1382_v2  ;;  %v1388_v6 = vld [vmem:[%s2110_s1 + $0x60] ss:$8 sps:$4 sm:$0xff]   ;;  %v1390_v8 = vld [vmem:[%s2110_s1 + $0x54] ss:$8 sps:$4 sm:$0xff]   ;;  %v1394_v10 = vld [vmem:[%s2110_s1 + $0x50] ss:$8 sps:$4 sm:$0xff]  }
   0x4   :  { %994 = vmatpush1.bf16.msra.mxu1 %v1383_v3  ;;  %952 = vmatprep.subr.bf16.mxu0 %v1384_v4  ;;  %v1389_v7 = vld [vmem:[%s2110_s1 + $0x160] ss:$8 sps:$4 sm:$0xff]   ;;  %v1392_v9 = vld [vmem:[%s2110_s1 + $0x154] ss:$8 sps:$4 sm:$0xff]   ;;  %v1395_v11 = vld [vmem:[%s2110_s1 + $0x150] ss:$8 sps:$4 sm:$0xff]  }
   0x5   :  { %995 = vmatprep.subr.bf16.mxu1 %v1386_v5  ;;  %v1396_v12 = vld [vmem:[%s2110_s1 + $0x44] ss:$8 sps:$4 sm:$0xff]   ;;  %v1400_v14 = vld [vmem:[%s2110_s1 + $0x40] ss:$8 sps:$4 sm:$0xff]   ;;  %v1402_v16 = vld [vmem:[%s2110_s1 + $0x34] ss:$8 sps:$4 sm:$0xff]  }
   0x6   :  { %v1398_v13 = vld [vmem:[%s2110_s1 + $0x144] ss:$8 sps:$4 sm:$0xff]   ;;  %v1401_v15 = vld [vmem:[%s2110_s1 + $0x140] ss:$8 sps:$4 sm:$0xff]   ;;  %v1404_v17 = vld [vmem:[%s2110_s1 + $0x134] ss:$8 sps:$4 sm:$0xff]  }
   0x7   :  { %953 = vmatpush1.bf16.msra.mxu0 %v1388_v6  ;;  %v1406_v18 = vld [vmem:[%s2110_s1 + $0x30] ss:$8 sps:$4 sm:$0xff]   ;;  %v1408_v20 = vld [vmem:[%s2110_s1 + $0x24] ss:$8 sps:$4 sm:$0xff]   ;;  %v1412_v22 = vld [vmem:[%s2110_s1 + $0x20] ss:$8 sps:$4 sm:$0xff]  }
   0x8   :  { %996 = vmatpush1.bf16.msra.mxu1 %v1389_v7  ;;  %954 = vmatprep.subr.bf16.mxu0 %v1390_v8  ;;  %v1407_v19 = vld [vmem:[%s2110_s1 + $0x130] ss:$8 sps:$4 sm:$0xff]   ;;  %v1410_v21 = vld [vmem:[%s2110_s1 + $0x124] ss:$8 sps:$4 sm:$0xff]   ;;  %v1413_v23 = vld [vmem:[%s2110_s1 + $0x120] ss:$8 sps:$4 sm:$0xff]  }
   0x9   :  { %997 = vmatprep.subr.bf16.mxu1 %v1392_v9  ;;  %v1414_v24 = vld [vmem:[%s2110_s1 + $0x14] ss:$8 sps:$4 sm:$0xff]   ;;  %v1418_v26 = vld [vmem:[%s2110_s1 + $0x10] ss:$8 sps:$4 sm:$0xff]   ;;  %v1420_v28 = vld [vmem:[%s2110_s1 + $0x4] ss:$8 sps:$4 sm:$0xff]  }
   0xa   :  { %v1416_v25 = vld [vmem:[%s2110_s1 + $0x114] ss:$8 sps:$4 sm:$0xff]   ;;  %v1419_v27 = vld [vmem:[%s2110_s1 + $0x110] ss:$8 sps:$4 sm:$0xff]   ;;  %v1422_v29 = vld [vmem:[%s2110_s1 + $0x104] ss:$8 sps:$4 sm:$0xff]  }
   0xb   :  { %955 = vmatpush1.bf16.msra.mxu0 %v1394_v10  ;;  %v1424_v30 = vld [vmem:[%s2110_s1] ss:$8 sps:$4 sm:$0xff]   ;;  %v1426_v32 = vld [vmem:[%s2110_s1 + $0xf4] ss:$8 sps:$4 sm:$0xff]   ;;  %v1430_v34 = vld [vmem:[%s2110_s1 + $0xf0] ss:$8 sps:$4 sm:$0xff]  }
   0xc   :  { %998 = vmatpush1.bf16.msra.mxu1 %v1395_v11  ;;  %956 = vmatprep.subr.bf16.mxu0 %v1396_v12  ;;  %v1425_v31 = vld [vmem:[%s2110_s1 + $0x100] ss:$8 sps:$4 sm:$0xff]   ;;  %v1428_v33 = vld [vmem:[%s2110_s1 + $0x1f4] ss:$8 sps:$4 sm:$0xff]   ;;  %v1431_v35 = vld [vmem:[%s2110_s1 + $0x1f0] ss:$8 sps:$4 sm:$0xff]  }
   0xd   :  { %999 = vmatprep.subr.bf16.mxu1 %v1398_v13  ;;  %v1432_v36 = vld [vmem:[%s2110_s1 + $0xe4] ss:$8 sps:$4 sm:$0xff]   ;;  %v1436_v38 = vld [vmem:[%s2110_s1 + $0xe0] ss:$8 sps:$4 sm:$0xff]   ;;  %v1438_v40 = vld [vmem:[%s2110_s1 + $0xd4] ss:$8 sps:$4 sm:$0xff]  }
   0xe   :  { %v1434_v37 = vld [vmem:[%s2110_s1 + $0x1e4] ss:$8 sps:$4 sm:$0xff]   ;;  %v1437_v39 = vld [vmem:[%s2110_s1 + $0x1e0] ss:$8 sps:$4 sm:$0xff]   ;;  %v1440_v41 = vld [vmem:[%s2110_s1 + $0x1d4] ss:$8 sps:$4 sm:$0xff]  }
   0xf   :  { %957 = vmatpush1.bf16.msra.mxu0 %v1400_v14  ;;  %v1442_v42 = vld [vmem:[%s2110_s1 + $0xd0] ss:$8 sps:$4 sm:$0xff]   ;;  %v1444_v44 = vld [vmem:[%s2110_s1 + $0xc4] ss:$8 sps:$4 sm:$0xff]   ;;  %v1448_v46 = vld [vmem:[%s2110_s1 + $0xc0] ss:$8 sps:$4 sm:$0xff]  }
  0x10   :  { %1000 = vmatpush1.bf16.msra.mxu1 %v1401_v15  ;;  %958 = vmatprep.subr.bf16.mxu0 %v1402_v16  ;;  %v1443_v43 = vld [vmem:[%s2110_s1 + $0x1d0] ss:$8 sps:$4 sm:$0xff]   ;;  %v1446_v45 = vld [vmem:[%s2110_s1 + $0x1c4] ss:$8 sps:$4 sm:$0xff]   ;;  %v1449_v47 = vld [vmem:[%s2110_s1 + $0x1c0] ss:$8 sps:$4 sm:$0xff]  }
  0x11   :  { %1001 = vmatprep.subr.bf16.mxu1 %v1404_v17  ;;  %v1450_v48 = vld [vmem:[%s2110_s1 + $0xb4] ss:$8 sps:$4 sm:$0xff]   ;;  %v1476_v49 = vld [vmem:[%s2111_s0 + $0x4] ss:$36 sps:$4 sm:$0xff]   ;;  %v1479_v51 = vld [vmem:[%s2111_s0 + $0xc] ss:$36 sps:$4 sm:$0xff]  }
  0x12   :  { %v1452_v50 = vld [vmem:[%s2110_s1 + $0x1b4] ss:$8 sps:$4 sm:$0xff]   ;;  %982 = vmatprep.mubr.bf16.mxu0 %v1476_v49  ;;  %v1454_v52 = vld [vmem:[%s2110_s1 + $0xb0] ss:$8 sps:$4 sm:$0xff]   ;;  %1025 = vmatprep.mubr.bf16.mxu1 %v1479_v51  ;;  %v1456_v54 = vld [vmem:[%s2110_s1 + $0xa4] ss:$8 sps:$4 sm:$0xff]  }
  0x13   :  { %959 = vmatpush1.bf16.msra.mxu0 %v1406_v18  ;;  %v1455_v53 = vld [vmem:[%s2110_s1 + $0x1b0] ss:$8 sps:$4 sm:$0xff]   ;;  %v1458_v55 = vld [vmem:[%s2110_s1 + $0x1a4] ss:$8 sps:$4 sm:$0xff]   ;;  %v1460_v56 = vld [vmem:[%s2110_s1 + $0xa0] ss:$8 sps:$4 sm:$0xff]  }
  0x14   :  { %1002 = vmatpush1.bf16.msra.mxu1 %v1407_v19  ;;  %960 = vmatprep.subr.bf16.mxu0 %v1408_v20  ;;  %v1461_v57 = vld [vmem:[%s2110_s1 + $0x1a0] ss:$8 sps:$4 sm:$0xff]   ;;  %v1462_v58 = vld [vmem:[%s2110_s1 + $0x94] ss:$8 sps:$4 sm:$0xff]   ;;  %v1466_v60 = vld [vmem:[%s2110_s1 + $0x90] ss:$8 sps:$4 sm:$0xff]  }
  0x15   :  { %1003 = vmatprep.subr.bf16.mxu1 %v1410_v21  ;;  %v1464_v59 = vld [vmem:[%s2110_s1 + $0x194] ss:$8 sps:$4 sm:$0xff]   ;;  %v1467_v61 = vld [vmem:[%s2110_s1 + $0x190] ss:$8 sps:$4 sm:$0xff]   ;;  %v1468_v62 = vld [vmem:[%s2110_s1 + $0x84] ss:$8 sps:$4 sm:$0xff]  }
  0x16   :  { %v1470_v63 = vld [vmem:[%s2110_s1 + $0x184] ss:$8 sps:$4 sm:$0xff]   ;;  %v1472_v0 = vld [vmem:[%s2110_s1 + $0x80] ss:$8 sps:$4 sm:$0xff]   ;;  %v1482_v2 = vld [vmem:[%s2110_s1 + $0x274] ss:$8 sps:$4 sm:$0xff]  }
  0x17   :  { %961 = vmatpush1.bf16.msra.mxu0 %v1412_v22  ;;  %v1473_v1 = vld [vmem:[%s2110_s1 + $0x180] ss:$8 sps:$4 sm:$0xff]   ;;  %v1485_v3 = vld [vmem:[%s2110_s1 + $0x374] ss:$8 sps:$4 sm:$0xff]   ;;  %v1480_v6 = vld [vmem:[%s2110_s1 + $0x270] ss:$8 sps:$4 sm:$0xff]  }
  0x18   :  { %1004 = vmatpush1.bf16.msra.mxu1 %v1413_v23  ;;  %962 = vmatprep.subr.bf16.mxu0 %v1414_v24  ;;  %v1474_v4 = vld [vmem:[%s2111_s0] ss:$36 sps:$4 sm:$0xff]   ;;  %v1477_v5 = vld [vmem:[%s2111_s0 + $0x8] ss:$36 sps:$4 sm:$0xff]   ;;  %v1483_v7 = vld [vmem:[%s2110_s1 + $0x370] ss:$8 sps:$4 sm:$0xff]  }
  0x19   :  { %1005 = vmatprep.subr.bf16.mxu1 %v1416_v25  ;;  %v1488_v8 = vld [vmem:[%s2110_s1 + $0x264] ss:$8 sps:$4 sm:$0xff]   ;;  %v1486_v10 = vld [vmem:[%s2110_s1 + $0x260] ss:$8 sps:$4 sm:$0xff]   ;;  %v1494_v12 = vld [vmem:[%s2110_s1 + $0x254] ss:$8 sps:$4 sm:$0xff]  }
  0x1a   :  { %v1491_v9 = vld [vmem:[%s2110_s1 + $0x364] ss:$8 sps:$4 sm:$0xff]   ;;  %v1489_v11 = vld [vmem:[%s2110_s1 + $0x360] ss:$8 sps:$4 sm:$0xff]   ;;  %v1497_v13 = vld [vmem:[%s2110_s1 + $0x354] ss:$8 sps:$4 sm:$0xff]  }
  0x1b   :  { %963 = vmatpush1.bf16.msra.mxu0 %v1418_v26  ;;  %v1492_v14 = vld [vmem:[%s2110_s1 + $0x250] ss:$8 sps:$4 sm:$0xff]   ;;  %v1500_v16 = vld [vmem:[%s2110_s1 + $0x244] ss:$8 sps:$4 sm:$0xff]   ;;  %v1498_v18 = vld [vmem:[%s2110_s1 + $0x240] ss:$8 sps:$4 sm:$0xff]  }
  0x1c   :  { %1006 = vmatpush1.bf16.msra.mxu1 %v1419_v27  ;;  %964 = vmatprep.subr.bf16.mxu0 %v1420_v28  ;;  %v1495_v15 = vld [vmem:[%s2110_s1 + $0x350] ss:$8 sps:$4 sm:$0xff]   ;;  %v1503_v17 = vld [vmem:[%s2110_s1 + $0x344] ss:$8 sps:$4 sm:$0xff]   ;;  %v1501_v19 = vld [vmem:[%s2110_s1 + $0x340] ss:$8 sps:$4 sm:$0xff]  }
  0x1d   :  { %1007 = vmatprep.subr.bf16.mxu1 %v1422_v29  ;;  %v1506_v20 = vld [vmem:[%s2110_s1 + $0x234] ss:$8 sps:$4 sm:$0xff]   ;;  %v1504_v22 = vld [vmem:[%s2110_s1 + $0x230] ss:$8 sps:$4 sm:$0xff]   ;;  %v1512_v24 = vld [vmem:[%s2110_s1 + $0x224] ss:$8 sps:$4 sm:$0xff]  }
  0x1e   :  { %v1509_v21 = vld [vmem:[%s2110_s1 + $0x334] ss:$8 sps:$4 sm:$0xff]   ;;  %v1507_v23 = vld [vmem:[%s2110_s1 + $0x330] ss:$8 sps:$4 sm:$0xff]   ;;  %v1515_v25 = vld [vmem:[%s2110_s1 + $0x324] ss:$8 sps:$4 sm:$0xff]  }
  0x1f   :  { %965 = vmatpush1.bf16.msra.mxu0 %v1424_v30  ;;  %v1510_v26 = vld [vmem:[%s2110_s1 + $0x220] ss:$8 sps:$4 sm:$0xff]   ;;  %v1518_v28 = vld [vmem:[%s2110_s1 + $0x214] ss:$8 sps:$4 sm:$0xff]   ;;  %v1516_v30 = vld [vmem:[%s2110_s1 + $0x210] ss:$8 sps:$4 sm:$0xff]  }
  0x20   :  { %1008 = vmatpush1.bf16.msra.mxu1 %v1425_v31  ;;  %966 = vmatprep.subr.bf16.mxu0 %v1426_v32  ;;  %v1513_v27 = vld [vmem:[%s2110_s1 + $0x320] ss:$8 sps:$4 sm:$0xff]   ;;  %v1521_v29 = vld [vmem:[%s2110_s1 + $0x314] ss:$8 sps:$4 sm:$0xff]   ;;  %v1519_v31 = vld [vmem:[%s2110_s1 + $0x310] ss:$8 sps:$4 sm:$0xff]  }
  0x21   :  { %1009 = vmatprep.subr.bf16.mxu1 %v1428_v33  ;;  %v1524_v32 = vld [vmem:[%s2110_s1 + $0x204] ss:$8 sps:$4 sm:$0xff]   ;;  %v1543_v49 = vld [vmem:[%s2110_s1 + $0x3d0] ss:$8 sps:$4 sm:$0xff]  }
  0x22   :  { %v1527_v33 = vld [vmem:[%s2110_s1 + $0x304] ss:$8 sps:$4 sm:$0xff]  }
  0x23   :  { %967 = vmatpush2.bf16.msra.mxu0 %v1430_v34  ;;  %v1578_v34 = vld [vmem:[%s2111_s0 + $0x14] ss:$36 sps:$4 sm:$0xff]   ;;  %v1551_v51 = vld [vmem:[%s2110_s1 + $0x3c4] ss:$8 sps:$4 sm:$0xff]  }
  0x24   :  { %1010 = vmatpush2.bf16.msra.mxu1 %v1431_v35  ;;  %968 = vmatprep.subr.bf16.mxu0 %v1432_v36  ;;  %v1522_v35 = vld [vmem:[%s2110_s1 + $0x200] ss:$8 sps:$4 sm:$0xff]  }
  0x25   :  { %1011 = vmatprep.subr.bf16.mxu1 %v1434_v37  ;;  %v1525_v36 = vld [vmem:[%s2110_s1 + $0x300] ss:$8 sps:$4 sm:$0xff]  }
  0x26   :  { %v1584_v37 = vld [vmem:[%s2111_s0 + $0x1c] ss:$36 sps:$4 sm:$0xff]  }
  0x27   :  { %969 = vmatpush2.bf16.msra.mxu0 %v1436_v38  ;;  %v1530_v38 = vld [vmem:[%s2110_s1 + $0x2f4] ss:$8 sps:$4 sm:$0xff]  }
  0x28   :  { %1012 = vmatpush2.bf16.msra.mxu1 %v1437_v39  ;;  %970 = vmatprep.subr.bf16.mxu0 %v1438_v40  ;;  %v1533_v39 = vld [vmem:[%s2110_s1 + $0x3f4] ss:$8 sps:$4 sm:$0xff]   ;;  %v1528_v40 = vld [vmem:[%s2110_s1 + $0x2f0] ss:$8 sps:$4 sm:$0xff]  }
  0x29   :  { %1013 = vmatprep.subr.bf16.mxu1 %v1440_v41  ;;  %v1531_v41 = vld [vmem:[%s2110_s1 + $0x3f0] ss:$8 sps:$4 sm:$0xff]  }
  0x2b   :  { %971 = vmatpush2.bf16.msra.mxu0 %v1442_v42  ;;  %v1536_v42 = vld [vmem:[%s2110_s1 + $0x2e4] ss:$8 sps:$4 sm:$0xff]  }
  0x2c   :  { %1014 = vmatpush2.bf16.msra.mxu1 %v1443_v43  ;;  %972 = vmatprep.subr.bf16.mxu0 %v1444_v44  ;;  %v1539_v43 = vld [vmem:[%s2110_s1 + $0x3e4] ss:$8 sps:$4 sm:$0xff]   ;;  %v1534_v44 = vld [vmem:[%s2110_s1 + $0x2e0] ss:$8 sps:$4 sm:$0xff]  }
  0x2d   :  { %1015 = vmatprep.subr.bf16.mxu1 %v1446_v45  ;;  %v1537_v45 = vld [vmem:[%s2110_s1 + $0x3e0] ss:$8 sps:$4 sm:$0xff]  }
  0x2f   :  { %973 = vmatpush2.bf16.msra.mxu0 %v1448_v46  ;;  %v1542_v46 = vld [vmem:[%s2110_s1 + $0x2d4] ss:$8 sps:$4 sm:$0xff]  }
  0x30   :  { %1016 = vmatpush2.bf16.msra.mxu1 %v1449_v47  ;;  %974 = vmatprep.subr.bf16.mxu0 %v1450_v48  ;;  %v1545_v47 = vld [vmem:[%s2110_s1 + $0x3d4] ss:$8 sps:$4 sm:$0xff]   ;;  %v1540_v48 = vld [vmem:[%s2110_s1 + $0x2d0] ss:$8 sps:$4 sm:$0xff]  }
  0x31   :  { %1017 = vmatprep.subr.bf16.mxu1 %v1452_v50  ;;  %v1548_v50 = vld [vmem:[%s2110_s1 + $0x2c4] ss:$8 sps:$4 sm:$0xff]  }
  0x33   :  { %975 = vmatpush2.bf16.msra.mxu0 %v1454_v52  ;;  %v1546_v52 = vld [vmem:[%s2110_s1 + $0x2c0] ss:$8 sps:$4 sm:$0xff]  }
  0x34   :  { %1018 = vmatpush2.bf16.msra.mxu1 %v1455_v53  ;;  %976 = vmatprep.subr.bf16.mxu0 %v1456_v54  ;;  %v1549_v53 = vld [vmem:[%s2110_s1 + $0x3c0] ss:$8 sps:$4 sm:$0xff]   ;;  %v1554_v54 = vld [vmem:[%s2110_s1 + $0x2b4] ss:$8 sps:$4 sm:$0xff]  }
  0x35   :  { %1019 = vmatprep.subr.bf16.mxu1 %v1458_v55  ;;  %v1557_v55 = vld [vmem:[%s2110_s1 + $0x3b4] ss:$8 sps:$4 sm:$0xff]  }
  0x37   :  { %977 = vmatpush2.bf16.msra.mxu0 %v1460_v56  ;;  %v1552_v56 = vld [vmem:[%s2110_s1 + $0x2b0] ss:$8 sps:$4 sm:$0xff]  }
  0x38   :  { %1020 = vmatpush2.bf16.msra.mxu1 %v1461_v57  ;;  %978 = vmatprep.subr.bf16.mxu0 %v1462_v58  ;;  %v1555_v57 = vld [vmem:[%s2110_s1 + $0x3b0] ss:$8 sps:$4 sm:$0xff]   ;;  %v1560_v58 = vld [vmem:[%s2110_s1 + $0x2a4] ss:$8 sps:$4 sm:$0xff]  }
  0x39   :  { %1021 = vmatprep.subr.bf16.mxu1 %v1464_v59  ;;  %v1563_v59 = vld [vmem:[%s2110_s1 + $0x3a4] ss:$8 sps:$4 sm:$0xff]  }
  0x3b   :  { %979 = vmatpush2.bf16.msra.mxu0 %v1466_v60  ;;  %v1558_v60 = vld [vmem:[%s2110_s1 + $0x2a0] ss:$8 sps:$4 sm:$0xff]  }
  0x3c   :  { %1022 = vmatpush2.bf16.msra.mxu1 %v1467_v61  ;;  %980 = vmatprep.subr.bf16.mxu0 %v1468_v62  ;;  %v1561_v61 = vld [vmem:[%s2110_s1 + $0x3a0] ss:$8 sps:$4 sm:$0xff]   ;;  %v1566_v62 = vld [vmem:[%s2110_s1 + $0x294] ss:$8 sps:$4 sm:$0xff]  }
  0x3d   :  { %1023 = vmatprep.subr.bf16.mxu1 %v1470_v63  ;;  %v1569_v63 = vld [vmem:[%s2110_s1 + $0x394] ss:$8 sps:$4 sm:$0xff]  }
  0x3f   :  { %981 = vmatpush2.bf16.msra.mxu0 %v1472_v0  ;;  %v1564_v0 = vld [vmem:[%s2110_s1 + $0x290] ss:$8 sps:$4 sm:$0xff]  }
  0x40   :  { %1024 = vmatpush2.bf16.msra.mxu1 %v1473_v1  ;;  %1036 = vmatprep.subr.bf16.mxu0 %v1482_v2  ;;  %v1567_v1 = vld [vmem:[%s2110_s1 + $0x390] ss:$8 sps:$4 sm:$0xff]   ;;  %v1572_v2 = vld [vmem:[%s2110_s1 + $0x284] ss:$8 sps:$4 sm:$0xff]  }
  0x41   :  { %1079 = vmatprep.subr.bf16.mxu1 %v1485_v3  ;;  %v1575_v3 = vld [vmem:[%s2110_s1 + $0x384] ss:$8 sps:$4 sm:$0xff]  }
  0x42   :  { %983 = vmatmul.mubr.bf16.vlgmr.msra.gmra.mxu0 %v1474_v4  ;;  %v1570_v4 = vld [vmem:[%s2110_s1 + $0x280] ss:$8 sps:$4 sm:$0xff]  }
  0x43   :  { %1026 = vmatmul.mubr.bf16.vlgmr.msra.gmra.mxu1 %v1477_v5  ;;  %1037 = vmatpush1.bf16.msra.mxu0 %v1480_v6  ;;  %v1573_v5 = vld [vmem:[%s2110_s1 + $0x380] ss:$8 sps:$4 sm:$0xff]   ;;  %v1581_v6 = vld [vmem:[%s2110_s1 + $0x474] ss:$8 sps:$4 sm:$0xff]  }
  0x44   :  { %1080 = vmatpush1.bf16.msra.mxu1 %v1483_v7  ;;  %1038 = vmatprep.subr.bf16.mxu0 %v1488_v8  ;;  %v1576_v7 = vld [vmem:[%s2111_s0 + $0x10] ss:$36 sps:$4 sm:$0xff]   ;;  %v1582_v8 = vld [vmem:[%s2111_s0 + $0x18] ss:$36 sps:$4 sm:$0xff]  }
  0x45   :  { %1081 = vmatprep.subr.bf16.mxu1 %v1491_v9  ;;  %1068 = vmatprep.mubr.bf16.mxu0 %v1578_v34  ;;  %v1579_v9 = vld [vmem:[%s2110_s1 + $0x470] ss:$8 sps:$4 sm:$0xff]   ;;  %v1182_v34 = vlaneseq }
  0x46   :  { %1111 = vmatprep.mubr.bf16.mxu1 %v1584_v37 }
  0x47   :  { %1039 = vmatpush1.bf16.msra.mxu0 %v1486_v10  ;;  %v1587_v10 = vld [vmem:[%s2110_s1 + $0x464] ss:$8 sps:$4 sm:$0xff]  }
  0x48   :  { %1082 = vmatpush1.bf16.msra.mxu1 %v1489_v11  ;;  %1040 = vmatprep.subr.bf16.mxu0 %v1494_v12  ;;  %v1585_v11 = vld [vmem:[%s2110_s1 + $0x460] ss:$8 sps:$4 sm:$0xff]   ;;  %v1607_v12 = vmov 0  }
  0x49   :  { %1083 = vmatprep.subr.bf16.mxu1 %v1497_v13  ;;  %v1590_v13 = vld [vmem:[%s2110_s1 + $0x454] ss:$8 sps:$4 sm:$0xff]  }
  0x4b   :  { %1041 = vmatpush1.bf16.msra.mxu0 %v1492_v14  ;;  %v1588_v14 = vld [vmem:[%s2110_s1 + $0x450] ss:$8 sps:$4 sm:$0xff]  }
  0x4c   :  { %1084 = vmatpush1.bf16.msra.mxu1 %v1495_v15  ;;  %1042 = vmatprep.subr.bf16.mxu0 %v1500_v16  ;;  %v1593_v15 = vld [vmem:[%s2110_s1 + $0x444] ss:$8 sps:$4 sm:$0xff]   ;;  %v1591_v16 = vld [vmem:[%s2110_s1 + $0x440] ss:$8 sps:$4 sm:$0xff]  }
  0x4d   :  { %1085 = vmatprep.subr.bf16.mxu1 %v1503_v17  ;;  %v1596_v17 = vld [vmem:[%s2110_s1 + $0x434] ss:$8 sps:$4 sm:$0xff]  }
  0x4f   :  { %1043 = vmatpush1.bf16.msra.mxu0 %v1498_v18  ;;  %v1594_v18 = vld [vmem:[%s2110_s1 + $0x430] ss:$8 sps:$4 sm:$0xff]  }
  0x50   :  { %1086 = vmatpush1.bf16.msra.mxu1 %v1501_v19  ;;  %1044 = vmatprep.subr.bf16.mxu0 %v1506_v20  ;;  %v1599_v19 = vld [vmem:[%s2110_s1 + $0x424] ss:$8 sps:$4 sm:$0xff]   ;;  %v1597_v20 = vld [vmem:[%s2110_s1 + $0x420] ss:$8 sps:$4 sm:$0xff]  }
  0x51   :  { %1087 = vmatprep.subr.bf16.mxu1 %v1509_v21  ;;  %v1602_v21 = vld [vmem:[%s2110_s1 + $0x414] ss:$8 sps:$4 sm:$0xff]  }
  0x53   :  { %1045 = vmatpush1.bf16.msra.mxu0 %v1504_v22  ;;  %v1600_v22 = vld [vmem:[%s2110_s1 + $0x410] ss:$8 sps:$4 sm:$0xff]  }
  0x54   :  { %1088 = vmatpush1.bf16.msra.mxu1 %v1507_v23  ;;  %1046 = vmatprep.subr.bf16.mxu0 %v1512_v24  ;;  %v1605_v23 = vld [vmem:[%s2110_s1 + $0x404] ss:$8 sps:$4 sm:$0xff]   ;;  %v1603_v24 = vld [vmem:[%s2110_s1 + $0x400] ss:$8 sps:$4 sm:$0xff]  }
  0x55   :  { %1089 = vmatprep.subr.bf16.mxu1 %v1515_v25  ;;  %v1606_v25 = vld [vmem:[%s2111_s0 + $0x20] ss:$36 sps:$4 sm:$0xff]  }
  0x57   :  { %1047 = vmatpush1.bf16.msra.mxu0 %v1510_v26 }
  0x58   :  { %1090 = vmatpush1.bf16.msra.mxu1 %v1513_v27  ;;  %1048 = vmatprep.subr.bf16.mxu0 %v1518_v28 }
  0x59   :  { %1091 = vmatprep.subr.bf16.mxu1 %v1521_v29 }
  0x5b   :  { %1049 = vmatpush1.bf16.msra.mxu0 %v1516_v30 }
  0x5c   :  { %1092 = vmatpush1.bf16.msra.mxu1 %v1519_v31  ;;  %1050 = vmatprep.subr.bf16.mxu0 %v1524_v32 }
  0x5d   :  { %1093 = vmatprep.subr.bf16.mxu1 %v1527_v33 }
  0x5f   :  { %1051 = vmatpush1.bf16.msra.mxu0 %v1522_v35 }
  0x60   :  { %1094 = vmatpush1.bf16.msra.mxu1 %v1525_v36  ;;  %1052 = vmatprep.subr.bf16.mxu0 %v1530_v38  ;;  %v1183_v38 = vshrl.u32 %v1182_v34, 7 }
  0x61   :  { %1095 = vmatprep.subr.bf16.mxu1 %v1533_v39 }
  0x63   :  { %1053 = vmatpush2.bf16.msra.mxu0 %v1528_v40 }
  0x64   :  { %1096 = vmatpush2.bf16.msra.mxu1 %v1531_v41  ;;  %1054 = vmatprep.subr.bf16.mxu0 %v1536_v42 }
  0x65   :  { %1097 = vmatprep.subr.bf16.mxu1 %v1539_v43 }
  0x67   :  { %1055 = vmatpush2.bf16.msra.mxu0 %v1534_v44  ;;  %v1184_v44 = vsub.s32 0, %v1183_v38 }
  0x68   :  { %1098 = vmatpush2.bf16.msra.mxu1 %v1537_v45  ;;  %1056 = vmatprep.subr.bf16.mxu0 %v1542_v46  ;;  %v1180_v45 = vld [vmem:[%s2112_s2] sm:$0x3] }
  0x69   :  { %1099 = vmatprep.subr.bf16.mxu1 %v1545_v47 }
  0x6b   :  { %1057 = vmatpush2.bf16.msra.mxu0 %v1540_v48  ;;  %v1196_v48 = vld [vmem:[%s2113_s3] sm:$0x3] }
  0x6c   :  { %1100 = vmatpush2.bf16.msra.mxu1 %v1543_v49  ;;  %1058 = vmatprep.subr.bf16.mxu0 %v1548_v50  ;;  %v1188_v49 = vsub.s32 1, %v1183_v38 }
  0x6d   :  { %1101 = vmatprep.subr.bf16.mxu1 %v1551_v51 }
  0x6f   :  { %1059 = vmatpush2.bf16.msra.mxu0 %v1546_v52 }
  0x70   :  { %1102 = vmatpush2.bf16.msra.mxu1 %v1549_v53  ;;  %1060 = vmatprep.subr.bf16.mxu0 %v1554_v54 }
  0x71   :  { %1103 = vmatprep.subr.bf16.mxu1 %v1557_v55  ;;  %v1185_v55 = vrot.slane %v1180_v45, %v1184_v44 }
  0x73   :  { %1061 = vmatpush2.bf16.msra.mxu0 %v1552_v56 }
  0x74   :  { %1104 = vmatpush2.bf16.msra.mxu1 %v1555_v57  ;;  %1062 = vmatprep.subr.bf16.mxu0 %v1560_v58  ;;  %v1201_v57 = vrot.slane %v1196_v48, %v1184_v44 }
  0x75   :  { %1105 = vmatprep.subr.bf16.mxu1 %v1563_v59 }
  0x77   :  { %1063 = vmatpush2.bf16.msra.mxu0 %v1558_v60 }
  0x78   :  { %1106 = vmatpush2.bf16.msra.mxu1 %v1561_v61  ;;  %1064 = vmatprep.subr.bf16.mxu0 %v1566_v62  ;;  %v1189_v61 = vrot.slane %v1180_v45, %v1188_v49 }
  0x79   :  { %1107 = vmatprep.subr.bf16.mxu1 %v1569_v63 }
  0x7b   :  { %1065 = vmatpush2.bf16.msra.mxu0 %v1564_v0 }
  0x7c   :  { %1108 = vmatpush2.bf16.msra.mxu1 %v1567_v1  ;;  %1066 = vmatprep.subr.bf16.mxu0 %v1572_v2 }
  0x7d   :  { %1109 = vmatprep.subr.bf16.mxu1 %v1575_v3  ;;  %v1205_v3 = vrot.slane %v1196_v48, %v1188_v49 }
  0x7f   :  { %1067 = vmatpush2.bf16.msra.mxu0 %v1570_v4 }
  0x80   :  { %1110 = vmatpush2.bf16.msra.mxu1 %v1573_v5  ;;  %1122 = vmatprep.subr.bf16.mxu0 %v1581_v6 }
  0x82   :  { %1069 = vmatmul.mubr.bf16.vlgmr.msra.gmra.mxu0 %v1576_v7 }
  0x83   :  { %1112 = vmatmul.mubr.bf16.vlgmr.msra.gmra.mxu1 %v1582_v8  ;;  %1123 = vmatpush1.bf16.msra.mxu0 %v1579_v9 }
  0x84   :  { %1154 = vmatprep.mubr.bf16.mxu0 %v1607_v12  ;;  %1124 = vmatprep.subr.bf16.mxu0 %v1587_v10 }
  0x87   :  { %1125 = vmatpush1.bf16.msra.mxu0 %v1585_v11 }
  0x88   :  { %1126 = vmatprep.subr.bf16.mxu0 %v1590_v13 }
  0x8b   :  { %1127 = vmatpush1.bf16.msra.mxu0 %v1588_v14 }
  0x8c   :  { %1128 = vmatprep.subr.bf16.mxu0 %v1593_v15 }
  0x8f   :  { %1129 = vmatpush1.bf16.msra.mxu0 %v1591_v16 }
  0x90   :  { %1130 = vmatprep.subr.bf16.mxu0 %v1596_v17 }
  0x93   :  { %1131 = vmatpush1.bf16.msra.mxu0 %v1594_v18 }
  0x94   :  { %1132 = vmatprep.subr.bf16.mxu0 %v1599_v19 }
  0x97   :  { %1133 = vmatpush1.bf16.msra.mxu0 %v1597_v20 }
  0x98   :  { %1134 = vmatprep.subr.bf16.mxu0 %v1602_v21 }
  0x9b   :  { %1135 = vmatpush1.bf16.msra.mxu0 %v1600_v22 }
  0x9c   :  { %1136 = vmatprep.subr.bf16.mxu0 %v1605_v23 }
  0x9f   :  { %1137 = vmatpush1.bf16.msra.mxu0 %v1603_v24 }
  0xa2   :  { %1155 = vmatmul.mubr.bf16.vlgmr.msra.gmra.mxu0 %v1606_v25 }
 0x102   :  { %v984_v26 = vpop.f32.mrf.mxu0 }
 0x103   :  { %v1027_v27 = vpop.f32.mrf.mxu1 }
 0x104   :  { %v986_v28 = vpop.f32.mrf.mxu0  ;;  %v1028_v39 = vadd.f32 %v1027_v27, %v984_v26 }
 0x105   :  { %v1029_v29 = vpop.f32.mrf.mxu1 }
 0x106   :  { %v988_v30 = vpop.f32.mrf.mxu0  ;;  %v1030_v42 = vadd.f32 %v1029_v29, %v986_v28 }
 0x107   :  { %v1031_v31 = vpop.f32.mrf.mxu1 }
 0x108   :  { %v990_v32 = vpop.f32.mrf.mxu0  ;;  %v1032_v46 = vadd.f32 %v1031_v31, %v988_v30 }
 0x109   :  { %v1033_v35 = vpop.f32.mrf.mxu1 }
 0x10a   :  { %v1034_v52 = vadd.f32 %v1033_v35, %v990_v32 }
 0x142   :  { %v1070_v33 = vpop.f32.mrf.mxu0 }
 0x143   :  { %v1113_v37 = vpop.f32.mrf.mxu1  ;;  %v1071_v43 = vadd.f32 %v1070_v33, %v1028_v39 }
 0x144   :  { %v1072_v36 = vpop.f32.mrf.mxu0 }
 0x145   :  { %v1115_v41 = vpop.f32.mrf.mxu1  ;;  %v1073_v47 = vadd.f32 %v1072_v36, %v1030_v42  ;;  %v1114_v53 = vadd.f32 %v1113_v37, %v1071_v43 }
 0x146   :  { %v1074_v40 = vpop.f32.mrf.mxu0 }
 0x147   :  { %v1117_v51 = vpop.f32.mrf.mxu1  ;;  %v1075_v54 = vadd.f32 %v1074_v40, %v1032_v46  ;;  %v1116_v58 = vadd.f32 %v1115_v41, %v1073_v47 }
 0x148   :  { %v1076_v50 = vpop.f32.mrf.mxu0 }
 0x149   :  { %v1077_v59 = vadd.f32 %v1076_v50, %v1034_v52  ;;  %v1119_v62 = vpop.f32.mrf.mxu1  ;;  %v1118_v0 = vadd.f32 %v1117_v51, %v1075_v54 }
 0x14b   :  { %v1120_v5 = vadd.f32 %v1119_v62, %v1077_v59 }
 0x162   :  { %v1156_v56 = vpop.f32.mrf.mxu0 }
 0x163   :  { %v1157_v60 = vadd.f32 %v1156_v56, %v1114_v53 }
 0x164   :  { %v1158_v63 = vpop.f32.mrf.mxu0 }
 0x165   :  { %v1192_v1 = vmul.f32 %v1185_v55, %v1157_v60  ;;  %v1159_v2 = vadd.f32 %v1158_v63, %v1116_v58 }
 0x166   :  { %v1160_v4 = vpop.f32.mrf.mxu0 }
 0x167   :  { %v1208_v6 = vadd.f32 %v1201_v57, %v1192_v1  ;;  %v1193_v7 = vmul.f32 %v1189_v61, %v1159_v2  ;;  %v1161_v8 = vadd.f32 %v1160_v4, %v1118_v0 }
 0x168   :  { %v1162_v9 = vpop.f32.mrf.mxu0 }
 0x169   :  { %v1212_v10 = vmax.f32 %v1208_v6, 0.0  ;;  %v1209_v11 = vadd.f32 %v1205_v3, %v1193_v7  ;;  %v1194_v12 = vmul.f32 %v1185_v55, %v1161_v8  ;;  %v1163_v13 = vadd.f32 %v1162_v9, %v1120_v5 }
 0x16b   :  { %1216 = vst [vmem:[%s2114_s4] sm:$0xff] %v1212_v10  ;;  %v1213_v14 = vmax.f32 %v1209_v11, 0.0  ;;  %v1210_v15 = vadd.f32 %v1201_v57, %v1194_v12  ;;  %v1195_v16 = vmul.f32 %v1189_v61, %v1163_v13 }
 0x16d   :  { %1217 = vst [vmem:[%s2114_s4 + $0x8] sm:$0xff] %v1213_v14  ;;  %v1214_v17 = vmax.f32 %v1210_v15, 0.0  ;;  %v1211_v18 = vadd.f32 %v1205_v3, %v1195_v16 }
 0x16f   :  { %1218 = vst [vmem:[%s2114_s4 + $0x10] sm:$0xff] %v1214_v17  ;;  %v1215_v19 = vmax.f32 %v1211_v18, 0.0 }
 0x171   :  { %1219 = vst [vmem:[%s2114_s4 + $0x18] sm:$0xff] %v1215_v19 }

// kernel: regressor_forward.33
= control target key start
LH: loop header
LB: loop body
LE: loop exit
PB: predicated region body
PF: predicated region fallthrough
CT: control target
= control target key end

     0   :  { %v275_v1 = vmov 0   ;;  %v194_v18 = vlaneseq  ;;  %s370_s1 = inlined_call_operand.vmem [shape: bf16[128,256], index: 1, kind: input, shape index: {}]   ;;  %s371_s0 = inlined_call_operand.vmem [shape: bf16[16,128], index: 0, kind: input, shape index: {}]   ;;  %s372_s2 = inlined_call_operand.vmem [shape: f32[1,256], index: 2, kind: input, shape index: {}]   ;;  %s373_s3 = inlined_call_operand.vmem [shape: f32[1,256], index: 3, kind: input, shape index: {}]   ;;  %s374_s4 = inlined_call_operand.vmem [shape: f32[16,256], index: 4, kind: output, shape index: {}]  }
   0x1   :  { %v250_v0 = vld [vmem:[%s370_s1 + $0x74] ss:$8 sps:$4 sm:$0xff]   ;;  %166 = vmatprep.mubr.bf16.mxu0 %v275_v1  ;;  %v252_v2 = vld [vmem:[%s370_s1 + $0x70] ss:$8 sps:$4 sm:$0xff]   ;;  %v253_v3 = vld [vmem:[%s370_s1 + $0x64] ss:$8 sps:$4 sm:$0xff]  }
   0x2   :  { %134 = vmatprep.subr.bf16.mxu0 %v250_v0  ;;  %v255_v4 = vld [vmem:[%s370_s1 + $0x60] ss:$8 sps:$4 sm:$0xff]   ;;  %v256_v5 = vld [vmem:[%s370_s1 + $0x54] ss:$8 sps:$4 sm:$0xff]   ;;  %v258_v6 = vld [vmem:[%s370_s1 + $0x50] ss:$8 sps:$4 sm:$0xff]  }
   0x3   :  { %135 = vmatpush1.bf16.msra.mxu0 %v252_v2  ;;  %v259_v7 = vld [vmem:[%s370_s1 + $0x44] ss:$8 sps:$4 sm:$0xff]   ;;  %v261_v8 = vld [vmem:[%s370_s1 + $0x40] ss:$8 sps:$4 sm:$0xff]   ;;  %v262_v9 = vld [vmem:[%s370_s1 + $0x34] ss:$8 sps:$4 sm:$0xff]  }
   0x4   :  { %136 = vmatprep.subr.bf16.mxu0 %v253_v3  ;;  %v264_v10 = vld [vmem:[%s370_s1 + $0x30] ss:$8 sps:$4 sm:$0xff]   ;;  %v265_v11 = vld [vmem:[%s370_s1 + $0x24] ss:$8 sps:$4 sm:$0xff]   ;;  %v267_v12 = vld [vmem:[%s370_s1 + $0x20] ss:$8 sps:$4 sm:$0xff]  }
   0x5   :  { %v268_v13 = vld [vmem:[%s370_s1 + $0x14] ss:$8 sps:$4 sm:$0xff]   ;;  %v270_v14 = vld [vmem:[%s370_s1 + $0x10] ss:$8 sps:$4 sm:$0xff]   ;;  %v271_v15 = vld [vmem:[%s370_s1 + $0x4] ss:$8 sps:$4 sm:$0xff]  }
   0x6   :  { %v273_v16 = vld [vmem:[%s370_s1] ss:$8 sps:$4 sm:$0xff]   ;;  %v195_v19 = vshrl.u32 %v194_v18, 7 }
   0x7   :  { %137 = vmatpush1.bf16.msra.mxu0 %v255_v4  ;;  %v274_v17 = vld [vmem:[%s371_s0] sm:$0xff]  }
   0x8   :  { %138 = vmatprep.subr.bf16.mxu0 %v256_v5  ;;  %v196_v20 = vsub.s32 0, %v195_v19  ;;  %v192_v21 = vld [vmem:[%s372_s2] sm:$0x3]  ;;  %v200_v22 = vsub.s32 1, %v195_v19 }
   0x9   :  { %v208_v23 = vld [vmem:[%s373_s3] sm:$0x3] }
   0xa   :  { %v197_v24 = vrot.slane %v192_v21, %v196_v20  ;;  %v213_v25 = vrot.slane %v208_v23, %v196_v20  ;;  %v201_v26 = vrot.slane %v192_v21, %v200_v22  ;;  %v217_v29 = vrot.slane %v208_v23, %v200_v22 }
   0xb   :  { %139 = vmatpush1.bf16.msra.mxu0 %v258_v6 }
   0xc   :  { %140 = vmatprep.subr.bf16.mxu0 %v259_v7 }
   0xf   :  { %141 = vmatpush1.bf16.msra.mxu0 %v261_v8 }
  0x10   :  { %142 = vmatprep.subr.bf16.mxu0 %v262_v9 }
  0x13   :  { %143 = vmatpush1.bf16.msra.mxu0 %v264_v10 }
  0x14   :  { %144 = vmatprep.subr.bf16.mxu0 %v265_v11 }
  0x17   :  { %145 = vmatpush1.bf16.msra.mxu0 %v267_v12 }
  0x18   :  { %146 = vmatprep.subr.bf16.mxu0 %v268_v13 }
  0x1b   :  { %147 = vmatpush1.bf16.msra.mxu0 %v270_v14 }
  0x1c   :  { %148 = vmatprep.subr.bf16.mxu0 %v271_v15 }
  0x1f   :  { %149 = vmatpush1.bf16.msra.mxu0 %v273_v16 }
  0x22   :  { %167 = vmatmul.mubr.bf16.vlgmr.msra.gmra.mxu0 %v274_v17 }
  0xe2   :  { %v168_v27 = vpop.f32.mrf.mxu0 }
  0xe3   :  { %v204_v28 = vmul.f32 %v197_v24, %v168_v27 }
  0xe4   :  { %v170_v30 = vpop.f32.mrf.mxu0 }
  0xe5   :  { %v220_v31 = vadd.f32 %v213_v25, %v204_v28  ;;  %v205_v32 = vmul.f32 %v201_v26, %v170_v30 }
  0xe6   :  { %v172_v33 = vpop.f32.mrf.mxu0 }
  0xe7   :  { %224 = vst [vmem:[%s374_s4] sm:$0xff] %v220_v31  ;;  %v221_v34 = vadd.f32 %v217_v29, %v205_v32  ;;  %v206_v35 = vmul.f32 %v197_v24, %v172_v33 }
  0xe8   :  { %v174_v36 = vpop.f32.mrf.mxu0 }
  0xe9   :  { %225 = vst [vmem:[%s374_s4 + $0x8] sm:$0xff] %v221_v34  ;;  %v222_v37 = vadd.f32 %v213_v25, %v206_v35  ;;  %v207_v38 = vmul.f32 %v201_v26, %v174_v36 }
  0xeb   :  { %226 = vst [vmem:[%s374_s4 + $0x10] sm:$0xff] %v222_v37  ;;  %v223_v39 = vadd.f32 %v217_v29, %v207_v38 }
  0xed   :  { %227 = vst [vmem:[%s374_s4 + $0x18] sm:$0xff] %v223_v39 }

// kernel: regressor_forward.35
= control target key start
LH: loop header
LB: loop body
LE: loop exit
PB: predicated region body
PF: predicated region fallthrough
CT: control target
= control target key end

     0   :  { %s1317_s18 = smov 0   ;;  %s1319_s19 = smov 0   ;;  %s1469_s0 = inlined_call_operand.vmem [shape: bf16[16,2304], index: 0, kind: input, shape index: {}]   ;;  %s1470_s1 = inlined_call_operand.vmem [shape: bf16[2304,256], index: 1, kind: input, shape index: {}]   ;;  %s1471_s2 = inlined_call_operand.vmem [shape: f32[1,256], index: 2, kind: input, shape index: {}]   ;;  %s1472_s3 = inlined_call_operand.vmem [shape: f32[1,256], index: 3, kind: input, shape index: {}]   ;;  %s1473_s4 = inlined_call_operand.vmem [shape: f32[16,256], index: 4, kind: input, shape index: {}]   ;;  %s1474_s5 = inlined_call_operand.vmem [shape: f32[16,256], index: 5, kind: output, shape index: {}]  }
   0x1   :  { %s1321_s20 = smov 0   ;;  %s1323_s21 = smov 0  }
   0x2   :  { %s1325_s22 = smov 0  }
   0x3 LB: > { %s27_s23 = sadd.s32 1, %s1279_s21  ;;  %p50_p1 = scmp.ne.s32.totalorder %s1271_s19, %s1267_s18  ;;  %s1283_s22 = sphi %s1325_s22, %s15_s22   ;;  %s1279_s21 = sphi %s1323_s21, %s1478_s21   ;;  %s1275_s20 = sphi %s1321_s20, %s1477_s20   ;;  %s1271_s19 = sphi %s1319_s19, %s1476_s19   ;;  %s1267_s18 = sphi %s1317_s18, %s1475_s18  }
   0x4   : > { %p28_p0 = scmp.ge.s32.totalorder %s27_s23, 6  ;;  %p51_p2 = scmp.eq.s32.totalorder %s1283_s22, 0 }
   0x5   : > { %s43_s25 = sadd.s32 1, %s1271_s19  ;;  %p1057_p5 = scmp.ge.s32.totalorder %s1283_s22, 6 }
   0x6   : > { %s1480_s23 = smov (%p28_p0, %s27_s23), 0  ;;  %p52_p3 = por %p51_p2, %p50_p1 }
   0x7   : > { %s39_s24 = ssub.s32 %s1279_s21, %s1480_s23  ;;  %243 = sbr.rel (%p1057_p5) target bundleno = 19 (0x13), region = 28 }
   0x8   : > { %p41_p4 = scmp.eq.s32.totalorder %s39_s24, 0 }
   0xa   : > { %s1352_s26 = scalar_select %p41_p4, %s1271_s19, %s43_s25  }
   0xc   : > { %246 = sbr.rel (!%p52_p3) target bundleno = 19 (0x13), region = 32  ;;  %s248_s27 = sand.u32 (%p52_p3), 1, %s1271_s19  }
   0xd   : > { %s1123_s28 = smul.u32 (%p52_p3), 12, %s1279_s21 }
   0xe   : > { %s1125_s29 = smul.u32 (%p52_p3), 24, %s248_s27 }
   0xf   : > { %s256_s7 = scalar_lea.vmem (%p52_p3), %s1469_s0, %s1123_s28 }
  0x10   : > { %v271_v0 = vld [vmem:[%s256_s7] sm:$0xff] (%p52_p3)  ;;  %v273_v1 = vld [vmem:[%s256_s7 + $0x48] sm:$0xff] (%p52_p3)  ;;  %s250_s8 = scalar_lea.vmem (%p52_p3), [#allocation3], %s1125_s29  ;;  %v1061_v3 = vld [vmem:[%s256_s7 + $0x50] sm:$0xf] (%p52_p3) }
  0x11   : > { %v1059_v2 = vld [vmem:[%s256_s7 + $0x8] sm:$0xf]  ;;  %272 = vst [vmem:[%s250_s8] sm:$0xff] %v271_v0  ;;  %274 = vst [vmem:[%s250_s8 + $0xc] sm:$0xff] %v273_v1 }
  0x12   : > { %1060 = vst [vmem:[%s250_s8 + $0x8] sm:$0xf] %v1059_v2  ;;  %1062 = vst [vmem:[%s250_s8 + $0x14] sm:$0xf] %v1061_v3 }
  0x13 PF: > { %p1063_p6 = scmp.ge.s32.totalorder %s1283_s22, 1  ;;  %p306_p7 = scmp.lt.s32.totalorder %s1283_s22, 7 }
  0x15   : > { %p307_p8 = pnand %p1063_p6, %p306_p7 }
  0x16   : > { %s313_s9 = sand.u32 (!%p307_p8), 1, %s1267_s18   ;;  %s375_s10 = smul.u32 (!%p307_p8), 48, %s1275_s20 }
  0x17   : > { %310 = sbr.rel (%p307_p8) target bundleno = 323 (0x143), region = 62  ;;  %p1066_p10 = scmp.ne.s32.totalorder (!%p307_p8), %s1275_s20, 0 }
  0x18   : > { %s1126_s11 = smul.u32 (!%p307_p8), 24, %s313_s9  ;;  %p377_p9 = scmp.lt.s32.totalorder (!%p307_p8), %s375_s10, 287 }
  0x1a   : > { %s1369_s16 = scalar_lea.vmem (!%p307_p8), [#allocation3], %s1126_s11 }
  0x1c   : > { %s1482_s10 = smov (!%p377_p9, %s375_s10), 287  ;;  %425 = sbr.rel (%p1066_p10) target bundleno = 36 (0x24), region = 70 }
  0x1d   : > { %s1124_s12 = sshll.u32 %s1482_s10, 3 }
  0x1e   : > { %s1367_s15 = scalar_lea.vmem %s1470_s1, %s1124_s12 }
  0x21   : > { %v1285_v4 = vmov 0.0  }
  0x22   : > { %426 = vst [vmem:[#allocation2 + $0x10] sm:$0xff] %v1285_v4  ;;  %427 = vst [vmem:[#allocation2] sm:$0xff] %v1285_v4 }
  0x23   : > { %428 = vst [vmem:[#allocation2 + $0x18] sm:$0xff] %v1285_v4  ;;  %429 = vst [vmem:[#allocation2 + $0x8] sm:$0xff] %v1285_v4 }
  0x24 PF: > { %v1169_v5 = vld [vmem:[%s1367_s15 + $0x74] ss:$8 sps:$4 sm:$0xff]   ;;  %v1171_v6 = vld [vmem:[%s1367_s15 + $0x70] ss:$8 sps:$4 sm:$0xff]   ;;  %v1286_v7 = vmov 0   ;;  %p1118_p11 = scmp.ne.s32.totalorder %s1275_s20, 5 }
  0x25   : > { %817 = vmatprep.mubr.bf16.mxu1 %v1286_v7  ;;  %742 = vmatprep.subr.bf16.mxu0 %v1169_v5  ;;  %v1172_v8 = vld [vmem:[%s1367_s15 + $0x64] ss:$8 sps:$4 sm:$0xff]   ;;  %v1174_v9 = vld [vmem:[%s1367_s15 + $0x60] ss:$8 sps:$4 sm:$0xff]   ;;  %v1175_v10 = vld [vmem:[%s1367_s15 + $0x54] ss:$8 sps:$4 sm:$0xff]  }
  0x26   : > { %743 = vmatpush1.bf16.msra.mxu0 %v1171_v6  ;;  %v1177_v11 = vld [vmem:[%s1367_s15 + $0x50] ss:$8 sps:$4 sm:$0xff]   ;;  %v1178_v12 = vld [vmem:[%s1367_s15 + $0x44] ss:$8 sps:$4 sm:$0xff]   ;;  %v1190_v13 = vld [vmem:[%s1367_s15 + $0x174] ss:$8 sps:$4 sm:$0xff]  }
  0x27   : > { %744 = vmatprep.subr.bf16.mxu0 %v1172_v8  ;;  %v1192_v14 = vld [vmem:[%s1367_s15 + $0x170] ss:$8 sps:$4 sm:$0xff]   ;;  %v1180_v15 = vld [vmem:[%s1367_s15 + $0x40] ss:$8 sps:$4 sm:$0xff]   ;;  %v1181_v16 = vld [vmem:[%s1367_s15 + $0x34] ss:$8 sps:$4 sm:$0xff]   ;;  %785 = vmatprep.subr.bf16.mxu1 %v1190_v13 }
  0x28   : > { %v1196_v17 = vld [vmem:[%s1367_s15 + $0x164] ss:$8 sps:$4 sm:$0xff]   ;;  %786 = vmatpush1.bf16.msra.mxu1 %v1192_v14  ;;  %v1198_v18 = vld [vmem:[%s1367_s15 + $0x160] ss:$8 sps:$4 sm:$0xff]   ;;  %v1183_v19 = vld [vmem:[%s1367_s15 + $0x30] ss:$8 sps:$4 sm:$0xff]  }
  0x29   : > { %787 = vmatprep.subr.bf16.mxu1 %v1196_v17  ;;  %v1202_v20 = vld [vmem:[%s1367_s15 + $0x154] ss:$8 sps:$4 sm:$0xff]   ;;  %v1184_v21 = vld [vmem:[%s1367_s15 + $0x24] ss:$8 sps:$4 sm:$0xff]   ;;  %v1204_v22 = vld [vmem:[%s1367_s15 + $0x150] ss:$8 sps:$4 sm:$0xff]  }
  0x2a   : > { %745 = vmatpush1.bf16.msra.mxu0 %v1174_v9  ;;  %v1208_v23 = vld [vmem:[%s1367_s15 + $0x144] ss:$8 sps:$4 sm:$0xff]   ;;  %v1186_v24 = vld [vmem:[%s1367_s15 + $0x20] ss:$8 sps:$4 sm:$0xff]   ;;  %v1187_v25 = vld [vmem:[%s1367_s15 + $0x14] ss:$8 sps:$4 sm:$0xff]  }
  0x2b   : > { %746 = vmatprep.subr.bf16.mxu0 %v1175_v10  ;;  %v1210_v26 = vld [vmem:[%s1367_s15 + $0x140] ss:$8 sps:$4 sm:$0xff]   ;;  %v1214_v27 = vld [vmem:[%s1367_s15 + $0x134] ss:$8 sps:$4 sm:$0xff]   ;;  %v1189_v28 = vld [vmem:[%s1367_s15 + $0x10] ss:$8 sps:$4 sm:$0xff]  }
  0x2c   : > { %788 = vmatpush1.bf16.msra.mxu1 %v1198_v18  ;;  %v1193_v29 = vld [vmem:[%s1367_s15 + $0x4] ss:$8 sps:$4 sm:$0xff]   ;;  %v1216_v30 = vld [vmem:[%s1367_s15 + $0x130] ss:$8 sps:$4 sm:$0xff]   ;;  %v1195_v32 = vld [vmem:[%s1367_s15] ss:$8 sps:$4 sm:$0xff]  }
  0x2d   : > { %789 = vmatprep.subr.bf16.mxu1 %v1202_v20  ;;  %v1220_v31 = vld [vmem:[%s1367_s15 + $0x124] ss:$8 sps:$4 sm:$0xff]   ;;  %v1199_v33 = vld [vmem:[%s1367_s15 + $0xf4] ss:$8 sps:$4 sm:$0xff]   ;;  %v1222_v34 = vld [vmem:[%s1367_s15 + $0x120] ss:$8 sps:$4 sm:$0xff]  }
  0x2e   : > { %747 = vmatpush1.bf16.msra.mxu0 %v1177_v11  ;;  %v1226_v35 = vld [vmem:[%s1367_s15 + $0x114] ss:$8 sps:$4 sm:$0xff]   ;;  %v1201_v36 = vld [vmem:[%s1367_s15 + $0xf0] ss:$8 sps:$4 sm:$0xff]   ;;  %v1205_v37 = vld [vmem:[%s1367_s15 + $0xe4] ss:$8 sps:$4 sm:$0xff]  }
  0x2f   : > { %748 = vmatprep.subr.bf16.mxu0 %v1178_v12  ;;  %v1228_v38 = vld [vmem:[%s1367_s15 + $0x110] ss:$8 sps:$4 sm:$0xff]   ;;  %v1232_v39 = vld [vmem:[%s1367_s15 + $0x104] ss:$8 sps:$4 sm:$0xff]   ;;  %v1207_v41 = vld [vmem:[%s1367_s15 + $0xe0] ss:$8 sps:$4 sm:$0xff]  }
  0x30   : > { %790 = vmatpush1.bf16.msra.mxu1 %v1204_v22  ;;  %v1244_v40 = vld [vmem:[%s1369_s16 + $0x4] ss:$12 sps:$4 sm:$0xff]   ;;  %v1238_v46 = vld [vmem:[%s1369_s16 + $0x8] ss:$12 sps:$4 sm:$0xff]   ;;  %v1242_v56 = vld [vmem:[%s1369_s16] ss:$12 sps:$4 sm:$0xff]  }
  0x31   : > { %791 = vmatprep.subr.bf16.mxu1 %v1208_v23  ;;  %v1211_v42 = vld [vmem:[%s1367_s15 + $0xd4] ss:$8 sps:$4 sm:$0xff]   ;;  %774 = vmatprep.mubr.bf16.mxu0 %v1244_v40  ;;  %v1234_v43 = vld [vmem:[%s1367_s15 + $0x100] ss:$8 sps:$4 sm:$0xff]   ;;  %v1213_v44 = vld [vmem:[%s1367_s15 + $0xd0] ss:$8 sps:$4 sm:$0xff]  }
  0x32   : > { %749 = vmatpush1.bf16.msra.mxu0 %v1180_v15  ;;  %v1217_v45 = vld [vmem:[%s1367_s15 + $0xc4] ss:$8 sps:$4 sm:$0xff]   ;;  %v1219_v47 = vld [vmem:[%s1367_s15 + $0xc0] ss:$8 sps:$4 sm:$0xff]   ;;  %v1223_v48 = vld [vmem:[%s1367_s15 + $0xb4] ss:$8 sps:$4 sm:$0xff]  }
  0x33   : > { %750 = vmatprep.subr.bf16.mxu0 %v1181_v16  ;;  %v1225_v49 = vld [vmem:[%s1367_s15 + $0xb0] ss:$8 sps:$4 sm:$0xff]   ;;  %v1229_v50 = vld [vmem:[%s1367_s15 + $0xa4] ss:$8 sps:$4 sm:$0xff]   ;;  %v1231_v51 = vld [vmem:[%s1367_s15 + $0xa0] ss:$8 sps:$4 sm:$0xff]  }
  0x34   : > { %792 = vmatpush1.bf16.msra.mxu1 %v1210_v26  ;;  %v1235_v52 = vld [vmem:[%s1367_s15 + $0x94] ss:$8 sps:$4 sm:$0xff]   ;;  %v1237_v53 = vld [vmem:[%s1367_s15 + $0x90] ss:$8 sps:$4 sm:$0xff]   ;;  %v1239_v54 = vld [vmem:[%s1367_s15 + $0x84] ss:$8 sps:$4 sm:$0xff]  }
  0x35   : > { %793 = vmatprep.subr.bf16.mxu1 %v1214_v27  ;;  %v1241_v55 = vld [vmem:[%s1367_s15 + $0x80] ss:$8 sps:$4 sm:$0xff]   ;;  %v430_v59 = vld [vmem:[#allocation2 + $0x10] sm:$0xff]  ;;  %v432_v3 = vld [vmem:[#allocation2 + $0x18] sm:$0xff] }
  0x36   : > { %751 = vmatpush1.bf16.msra.mxu0 %v1183_v19  ;;  %v431_v63 = vld [vmem:[#allocation2] sm:$0xff]  ;;  %v433_v8 = vld [vmem:[#allocation2 + $0x8] sm:$0xff] }
  0x37   : > { %752 = vmatprep.subr.bf16.mxu0 %v1184_v21 }
  0x38   : > { %794 = vmatpush1.bf16.msra.mxu1 %v1216_v30 }
  0x39   : > { %795 = vmatprep.subr.bf16.mxu1 %v1220_v31 }
  0x3a   : > { %753 = vmatpush1.bf16.msra.mxu0 %v1186_v24 }
  0x3b   : > { %754 = vmatprep.subr.bf16.mxu0 %v1187_v25 }
  0x3c   : > { %796 = vmatpush1.bf16.msra.mxu1 %v1222_v34 }
  0x3d   : > { %797 = vmatprep.subr.bf16.mxu1 %v1226_v35 }
  0x3e   : > { %755 = vmatpush1.bf16.msra.mxu0 %v1189_v28 }
  0x3f   : > { %756 = vmatprep.subr.bf16.mxu0 %v1193_v29 }
  0x40   : > { %798 = vmatpush1.bf16.msra.mxu1 %v1228_v38 }
  0x41   : > { %799 = vmatprep.subr.bf16.mxu1 %v1232_v39 }
  0x42   : > { %757 = vmatpush1.bf16.msra.mxu0 %v1195_v32 }
  0x43   : > { %758 = vmatprep.subr.bf16.mxu0 %v1199_v33 }
  0x44   : > { %800 = vmatpush1.bf16.msra.mxu1 %v1234_v43 }
  0x46   : > { %759 = vmatpush2.bf16.msra.mxu0 %v1201_v36 }
  0x47   : > { %760 = vmatprep.subr.bf16.mxu0 %v1205_v37  ;;  %818 = vmatmul.mubr.bf16.vlgmr.msra.gmra.mxu1 %v1238_v46 }
  0x4a   : > { %761 = vmatpush2.bf16.msra.mxu0 %v1207_v41 }
  0x4b   : > { %762 = vmatprep.subr.bf16.mxu0 %v1211_v42 }
  0x4e   : > { %763 = vmatpush2.bf16.msra.mxu0 %v1213_v44 }
  0x4f   : > { %764 = vmatprep.subr.bf16.mxu0 %v1217_v45 }
  0x52   : > { %765 = vmatpush2.bf16.msra.mxu0 %v1219_v47 }
  0x53   : > { %766 = vmatprep.subr.bf16.mxu0 %v1223_v48 }
  0x56   : > { %767 = vmatpush2.bf16.msra.mxu0 %v1225_v49 }
  0x57   : > { %768 = vmatprep.subr.bf16.mxu0 %v1229_v50 }
  0x5a   : > { %769 = vmatpush2.bf16.msra.mxu0 %v1231_v51 }
  0x5b   : > { %770 = vmatprep.subr.bf16.mxu0 %v1235_v52 }
  0x5e   : > { %771 = vmatpush2.bf16.msra.mxu0 %v1237_v53 }
  0x5f   : > { %772 = vmatprep.subr.bf16.mxu0 %v1239_v54 }
  0x62   : > { %773 = vmatpush2.bf16.msra.mxu0 %v1241_v55 }
  0x65   : > { %775 = vmatmul.mubr.bf16.vlgmr.msra.gmra.mxu0 %v1242_v56 }
 0x107   : > { %v819_v57 = vpop.f32.mrf.mxu1 }
 0x109   : > { %v821_v58 = vpop.f32.mrf.mxu1 }
 0x10b   : > { %v823_v62 = vpop.f32.mrf.mxu1 }
 0x10d   : > { %v825_v7 = vpop.f32.mrf.mxu1 }
 0x125   : > { %v776_v60 = vpop.f32.mrf.mxu0 }
 0x126   : > { %v820_v61 = vadd.f32 %v819_v57, %v776_v60 }
 0x127   : > { %v778_v0 = vpop.f32.mrf.mxu0 }
 0x128   : > { %v828_v1 = vadd.f32 %v820_v61, %v430_v59  ;;  %v822_v2 = vadd.f32 %v821_v58, %v778_v0 }
 0x129   : > { %v780_v4 = vpop.f32.mrf.mxu0 }
 0x12a   : > { %832 = vst [vmem:[#allocation2 + $0x10] sm:$0xff] %v828_v1  ;;  %v829_v5 = vadd.f32 %v822_v2, %v431_v63  ;;  %v824_v6 = vadd.f32 %v823_v62, %v780_v4 }
 0x12b   : > { %v782_v9 = vpop.f32.mrf.mxu0 }
 0x12c   : > { %833 = vst [vmem:[#allocation2] sm:$0xff] %v829_v5  ;;  %v830_v10 = vadd.f32 %v824_v6, %v432_v3  ;;  %v826_v11 = vadd.f32 %v825_v7, %v782_v9  ;;  %839 = sbr.rel (%p1118_p11) target bundleno = 323 (0x143), region = 74 }
 0x12e   : > { %834 = vst [vmem:[#allocation2 + $0x18] sm:$0xff] %v830_v10  ;;  %v831_v12 = vadd.f32 %v826_v11, %v433_v8 }
 0x130   : > { %835 = vst [vmem:[#allocation2 + $0x8] sm:$0xff] %v831_v12 }
 0x131   : > { %v850_v13 = vlaneseq  ;;  %v848_v15 = vld [vmem:[%s1471_s2] sm:$0x3]  ;;  %v840_v17 = vld [vmem:[#allocation2 + $0x10] sm:$0xff]  ;;  %v845_v32 = vld [vmem:[%s1473_s4 + $0x8] sm:$0xff] }
 0x132   : > { %v864_v16 = vld [vmem:[%s1472_s3] sm:$0x3]  ;;  %v846_v33 = vld [vmem:[%s1473_s4 + $0x10] sm:$0xff]  ;;  %v847_v34 = vld [vmem:[%s1473_s4 + $0x18] sm:$0xff] }
 0x133   : > { %v851_v14 = vshrl.u32 %v850_v13, 7  ;;  %v841_v20 = vld [vmem:[#allocation2] sm:$0xff] }
 0x134   : > { %v844_v27 = vld [vmem:[%s1473_s4] sm:$0xff] }
 0x135   : > { %v852_v18 = vsub.s32 0, %v851_v14  ;;  %v856_v19 = vsub.s32 1, %v851_v14  ;;  %v842_v21 = vld [vmem:[#allocation2 + $0x18] sm:$0xff] }
 0x137   : > { %v843_v22 = vld [vmem:[#allocation2 + $0x8] sm:$0xff]  ;;  %v853_v23 = vrot.slane %v848_v15, %v852_v18  ;;  %v869_v24 = vrot.slane %v864_v16, %v852_v18  ;;  %v857_v25 = vrot.slane %v848_v15, %v856_v19  ;;  %v873_v26 = vrot.slane %v864_v16, %v856_v19 }
 0x139   : > { %v860_v28 = vmul.f32 %v853_v23, %v840_v17  ;;  %v861_v29 = vmul.f32 %v857_v25, %v841_v20  ;;  %v862_v30 = vmul.f32 %v853_v23, %v842_v21  ;;  %v863_v31 = vmul.f32 %v857_v25, %v843_v22 }
 0x13b   : > { %v876_v35 = vadd.f32 %v869_v24, %v860_v28  ;;  %v877_v36 = vadd.f32 %v873_v26, %v861_v29  ;;  %v878_v37 = vadd.f32 %v869_v24, %v862_v30  ;;  %v879_v38 = vadd.f32 %v873_v26, %v863_v31 }
 0x13d   : > { %v880_v39 = vadd.f32 %v876_v35, %v844_v27  ;;  %v881_v40 = vadd.f32 %v877_v36, %v845_v32  ;;  %v882_v41 = vadd.f32 %v878_v37, %v846_v33  ;;  %v883_v42 = vadd.f32 %v879_v38, %v847_v34 }
 0x13f   : > { %v884_v43 = vmax.f32 %v880_v39, 0.0  ;;  %v885_v44 = vmax.f32 %v881_v40, 0.0  ;;  %v886_v45 = vmax.f32 %v882_v41, 0.0  ;;  %v887_v46 = vmax.f32 %v883_v42, 0.0 }
 0x141   : > { %888 = vst [vmem:[%s1474_s5] sm:$0xff] %v884_v43  ;;  %889 = vst [vmem:[%s1474_s5 + $0x8] sm:$0xff] %v885_v44 }
 0x142   : > { %890 = vst [vmem:[%s1474_s5 + $0x10] sm:$0xff] %v886_v45  ;;  %891 = vst [vmem:[%s1474_s5 + $0x18] sm:$0xff] %v887_v46 }
 0x143 PF: > { %s15_s22 = sadd.s32 1, %s1283_s22   ;;  %s1475_s18 = smov %s1271_s19 }
 0x144   : > { %p12_p12 = scmp.ge.s32.totalorder %s15_s22, 8   ;;  %s1476_s19 = smov %s1352_s26 }
 0x145   : > { %s1477_s20 = smov %s1279_s21  ;;  %s1478_s21 = smov %s1480_s23 }
 0x146   :  { %14 = sbr.rel (!%p12_p12) target bundleno = 3 (0x3), region = 127 }

// kernel: regressor_forward.36
= control target key start
LH: loop header
LB: loop body
LE: loop exit
PB: predicated region body
PF: predicated region fallthrough
CT: control target
= control target key end

     0   :  { %s1214_s15 = smov 0   ;;  %s1216_s16 = smov 0   ;;  %s1354_s0 = inlined_call_operand.vmem [shape: bf16[16,2304], index: 0, kind: input, shape index: {}]   ;;  %s1355_s1 = inlined_call_operand.vmem [shape: bf16[2304,256], index: 1, kind: input, shape index: {}]   ;;  %s1356_s2 = inlined_call_operand.vmem [shape: f32[1,256], index: 2, kind: input, shape index: {}]   ;;  %s1357_s3 = inlined_call_operand.vmem [shape: f32[1,256], index: 3, kind: input, shape index: {}]   ;;  %s1358_s4 = inlined_call_operand.vmem [shape: f32[16,256], index: 4, kind: output, shape index: {}]  }
   0x1   :  { %s1218_s17 = smov 0   ;;  %s1220_s18 = smov 0  }
   0x2   :  { %s1222_s19 = smov 0  }
   0x3 LB: > { %s26_s20 = sadd.s32 1, %s1181_s18  ;;  %p49_p1 = scmp.ne.s32.totalorder %s1173_s16, %s1169_s15  ;;  %s1185_s19 = sphi %s1222_s19, %s14_s19   ;;  %s1181_s18 = sphi %s1220_s18, %s1362_s18   ;;  %s1177_s17 = sphi %s1218_s17, %s1361_s17   ;;  %s1173_s16 = sphi %s1216_s16, %s1360_s16   ;;  %s1169_s15 = sphi %s1214_s15, %s1359_s15  }
   0x4   : > { %p27_p0 = scmp.ge.s32.totalorder %s26_s20, 6  ;;  %p50_p2 = scmp.eq.s32.totalorder %s1185_s19, 0 }
   0x5   : > { %s42_s22 = sadd.s32 1, %s1173_s16  ;;  %p959_p5 = scmp.ge.s32.totalorder %s1185_s19, 6 }
   0x6   : > { %s1364_s20 = smov (%p27_p0, %s26_s20), 0  ;;  %p51_p3 = por %p50_p2, %p49_p1 }
   0x7   : > { %s38_s21 = ssub.s32 %s1181_s18, %s1364_s20  ;;  %199 = sbr.rel (%p959_p5) target bundleno = 19 (0x13), region = 24 }
   0x8   : > { %p40_p4 = scmp.eq.s32.totalorder %s38_s21, 0 }
   0xa   : > { %s1249_s23 = scalar_select %p40_p4, %s1173_s16, %s42_s22  }
   0xc   : > { %202 = sbr.rel (!%p51_p3) target bundleno = 19 (0x13), region = 28  ;;  %s204_s24 = sand.u32 (%p51_p3), 1, %s1173_s16  }
   0xd   : > { %s1025_s25 = smul.u32 (%p51_p3), 12, %s1181_s18 }
   0xe   : > { %s1027_s26 = smul.u32 (%p51_p3), 24, %s204_s24 }
   0xf   : > { %s212_s29 = scalar_lea.vmem (%p51_p3), %s1354_s0, %s1025_s25 }
  0x10   : > { %v227_v0 = vld [vmem:[%s212_s29] sm:$0xff] (%p51_p3)  ;;  %v229_v1 = vld [vmem:[%s212_s29 + $0x48] sm:$0xff] (%p51_p3)  ;;  %s206_s30 = scalar_lea.vmem (%p51_p3), [#allocation3], %s1027_s26  ;;  %v963_v3 = vld [vmem:[%s212_s29 + $0x50] sm:$0xf] (%p51_p3) }
  0x11   : > { %v961_v2 = vld [vmem:[%s212_s29 + $0x8] sm:$0xf]  ;;  %228 = vst [vmem:[%s206_s30] sm:$0xff] %v227_v0  ;;  %230 = vst [vmem:[%s206_s30 + $0xc] sm:$0xff] %v229_v1 }
  0x12   : > { %962 = vst [vmem:[%s206_s30 + $0x8] sm:$0xf] %v961_v2  ;;  %964 = vst [vmem:[%s206_s30 + $0x14] sm:$0xf] %v963_v3 }
  0x13 PF: > { %p965_p6 = scmp.ge.s32.totalorder %s1185_s19, 1  ;;  %p262_p7 = scmp.lt.s32.totalorder %s1185_s19, 7 }
  0x15   : > { %p263_p8 = pnand %p965_p6, %p262_p7 }
  0x16   : > { %s269_s5 = sand.u32 (!%p263_p8), 1, %s1169_s15   ;;  %s319_s6 = smul.u32 (!%p263_p8), 48, %s1177_s17 }
  0x17   : > { %266 = sbr.rel (%p263_p8) target bundleno = 321 (0x141), region = 58  ;;  %p968_p10 = scmp.ne.s32.totalorder (!%p263_p8), %s1177_s17, 0 }
  0x18   : > { %s1028_s7 = smul.u32 (!%p263_p8), 24, %s269_s5  ;;  %p321_p9 = scmp.lt.s32.totalorder (!%p263_p8), %s319_s6, 287 }
  0x1a   : > { %s1266_s12 = scalar_lea.vmem (!%p263_p8), [#allocation3], %s1028_s7 }
  0x1c   : > { %s1366_s6 = smov (!%p321_p9, %s319_s6), 287  ;;  %357 = sbr.rel (%p968_p10) target bundleno = 36 (0x24), region = 66 }
  0x1d   : > { %s1026_s8 = sshll.u32 %s1366_s6, 3 }
  0x1e   : > { %s1264_s11 = scalar_lea.vmem %s1355_s1, %s1026_s8 }
  0x21   : > { %v1187_v4 = vmov 0.0  }
  0x22   : > { %358 = vst [vmem:[#allocation2 + $0x10] sm:$0xff] %v1187_v4  ;;  %359 = vst [vmem:[#allocation2] sm:$0xff] %v1187_v4 }
  0x23   : > { %360 = vst [vmem:[#allocation2 + $0x18] sm:$0xff] %v1187_v4  ;;  %361 = vst [vmem:[#allocation2 + $0x8] sm:$0xff] %v1187_v4 }
  0x24 PF: > { %v1071_v5 = vld [vmem:[%s1264_s11 + $0x74] ss:$8 sps:$4 sm:$0xff]   ;;  %v1073_v6 = vld [vmem:[%s1264_s11 + $0x70] ss:$8 sps:$4 sm:$0xff]   ;;  %v1188_v7 = vmov 0   ;;  %p1020_p11 = scmp.ne.s32.totalorder %s1177_s17, 5 }
  0x25   : > { %749 = vmatprep.mubr.bf16.mxu1 %v1188_v7  ;;  %674 = vmatprep.subr.bf16.mxu0 %v1071_v5  ;;  %v1074_v8 = vld [vmem:[%s1264_s11 + $0x64] ss:$8 sps:$4 sm:$0xff]   ;;  %v1076_v9 = vld [vmem:[%s1264_s11 + $0x60] ss:$8 sps:$4 sm:$0xff]   ;;  %v1077_v10 = vld [vmem:[%s1264_s11 + $0x54] ss:$8 sps:$4 sm:$0xff]  }
  0x26   : > { %675 = vmatpush1.bf16.msra.mxu0 %v1073_v6  ;;  %v1079_v11 = vld [vmem:[%s1264_s11 + $0x50] ss:$8 sps:$4 sm:$0xff]   ;;  %v1080_v12 = vld [vmem:[%s1264_s11 + $0x44] ss:$8 sps:$4 sm:$0xff]   ;;  %v1092_v13 = vld [vmem:[%s1264_s11 + $0x174] ss:$8 sps:$4 sm:$0xff]  }
  0x27   : > { %676 = vmatprep.subr.bf16.mxu0 %v1074_v8  ;;  %v1094_v14 = vld [vmem:[%s1264_s11 + $0x170] ss:$8 sps:$4 sm:$0xff]   ;;  %v1082_v15 = vld [vmem:[%s1264_s11 + $0x40] ss:$8 sps:$4 sm:$0xff]   ;;  %v1083_v16 = vld [vmem:[%s1264_s11 + $0x34] ss:$8 sps:$4 sm:$0xff]   ;;  %717 = vmatprep.subr.bf16.mxu1 %v1092_v13 }
  0x28   : > { %v1098_v17 = vld [vmem:[%s1264_s11 + $0x164] ss:$8 sps:$4 sm:$0xff]   ;;  %718 = vmatpush1.bf16.msra.mxu1 %v1094_v14  ;;  %v1100_v18 = vld [vmem:[%s1264_s11 + $0x160] ss:$8 sps:$4 sm:$0xff]   ;;  %v1085_v19 = vld [vmem:[%s1264_s11 + $0x30] ss:$8 sps:$4 sm:$0xff]  }
  0x29   : > { %719 = vmatprep.subr.bf16.mxu1 %v1098_v17  ;;  %v1104_v20 = vld [vmem:[%s1264_s11 + $0x154] ss:$8 sps:$4 sm:$0xff]   ;;  %v1086_v21 = vld [vmem:[%s1264_s11 + $0x24] ss:$8 sps:$4 sm:$0xff]   ;;  %v1106_v22 = vld [vmem:[%s1264_s11 + $0x150] ss:$8 sps:$4 sm:$0xff]  }
  0x2a   : > { %677 = vmatpush1.bf16.msra.mxu0 %v1076_v9  ;;  %v1110_v23 = vld [vmem:[%s1264_s11 + $0x144] ss:$8 sps:$4 sm:$0xff]   ;;  %v1088_v24 = vld [vmem:[%s1264_s11 + $0x20] ss:$8 sps:$4 sm:$0xff]   ;;  %v1089_v25 = vld [vmem:[%s1264_s11 + $0x14] ss:$8 sps:$4 sm:$0xff]  }
  0x2b   : > { %678 = vmatprep.subr.bf16.mxu0 %v1077_v10  ;;  %v1112_v26 = vld [vmem:[%s1264_s11 + $0x140] ss:$8 sps:$4 sm:$0xff]   ;;  %v1116_v27 = vld [vmem:[%s1264_s11 + $0x134] ss:$8 sps:$4 sm:$0xff]   ;;  %v1091_v28 = vld [vmem:[%s1264_s11 + $0x10] ss:$8 sps:$4 sm:$0xff]  }
  0x2c   : > { %720 = vmatpush1.bf16.msra.mxu1 %v1100_v18  ;;  %v1095_v29 = vld [vmem:[%s1264_s11 + $0x4] ss:$8 sps:$4 sm:$0xff]   ;;  %v1118_v30 = vld [vmem:[%s1264_s11 + $0x130] ss:$8 sps:$4 sm:$0xff]   ;;  %v1097_v32 = vld [vmem:[%s1264_s11] ss:$8 sps:$4 sm:$0xff]  }
  0x2d   : > { %721 = vmatprep.subr.bf16.mxu1 %v1104_v20  ;;  %v1122_v31 = vld [vmem:[%s1264_s11 + $0x124] ss:$8 sps:$4 sm:$0xff]   ;;  %v1101_v33 = vld [vmem:[%s1264_s11 + $0xf4] ss:$8 sps:$4 sm:$0xff]   ;;  %v1124_v34 = vld [vmem:[%s1264_s11 + $0x120] ss:$8 sps:$4 sm:$0xff]  }
  0x2e   : > { %679 = vmatpush1.bf16.msra.mxu0 %v1079_v11  ;;  %v1128_v35 = vld [vmem:[%s1264_s11 + $0x114] ss:$8 sps:$4 sm:$0xff]   ;;  %v1103_v36 = vld [vmem:[%s1264_s11 + $0xf0] ss:$8 sps:$4 sm:$0xff]   ;;  %v1107_v37 = vld [vmem:[%s1264_s11 + $0xe4] ss:$8 sps:$4 sm:$0xff]  }
  0x2f   : > { %680 = vmatprep.subr.bf16.mxu0 %v1080_v12  ;;  %v1130_v38 = vld [vmem:[%s1264_s11 + $0x110] ss:$8 sps:$4 sm:$0xff]   ;;  %v1134_v39 = vld [vmem:[%s1264_s11 + $0x104] ss:$8 sps:$4 sm:$0xff]   ;;  %v1109_v41 = vld [vmem:[%s1264_s11 + $0xe0] ss:$8 sps:$4 sm:$0xff]  }
  0x30   : > { %722 = vmatpush1.bf16.msra.mxu1 %v1106_v22  ;;  %v1146_v40 = vld [vmem:[%s1266_s12 + $0x4] ss:$12 sps:$4 sm:$0xff]   ;;  %v1140_v46 = vld [vmem:[%s1266_s12 + $0x8] ss:$12 sps:$4 sm:$0xff]   ;;  %v1144_v56 = vld [vmem:[%s1266_s12] ss:$12 sps:$4 sm:$0xff]  }
  0x31   : > { %723 = vmatprep.subr.bf16.mxu1 %v1110_v23  ;;  %v1113_v42 = vld [vmem:[%s1264_s11 + $0xd4] ss:$8 sps:$4 sm:$0xff]   ;;  %706 = vmatprep.mubr.bf16.mxu0 %v1146_v40  ;;  %v1136_v43 = vld [vmem:[%s1264_s11 + $0x100] ss:$8 sps:$4 sm:$0xff]   ;;  %v1115_v44 = vld [vmem:[%s1264_s11 + $0xd0] ss:$8 sps:$4 sm:$0xff]  }
  0x32   : > { %681 = vmatpush1.bf16.msra.mxu0 %v1082_v15  ;;  %v1119_v45 = vld [vmem:[%s1264_s11 + $0xc4] ss:$8 sps:$4 sm:$0xff]   ;;  %v1121_v47 = vld [vmem:[%s1264_s11 + $0xc0] ss:$8 sps:$4 sm:$0xff]   ;;  %v1125_v48 = vld [vmem:[%s1264_s11 + $0xb4] ss:$8 sps:$4 sm:$0xff]  }
  0x33   : > { %682 = vmatprep.subr.bf16.mxu0 %v1083_v16  ;;  %v1127_v49 = vld [vmem:[%s1264_s11 + $0xb0] ss:$8 sps:$4 sm:$0xff]   ;;  %v1131_v50 = vld [vmem:[%s1264_s11 + $0xa4] ss:$8 sps:$4 sm:$0xff]   ;;  %v1133_v51 = vld [vmem:[%s1264_s11 + $0xa0] ss:$8 sps:$4 sm:$0xff]  }
  0x34   : > { %724 = vmatpush1.bf16.msra.mxu1 %v1112_v26  ;;  %v1137_v52 = vld [vmem:[%s1264_s11 + $0x94] ss:$8 sps:$4 sm:$0xff]   ;;  %v1139_v53 = vld [vmem:[%s1264_s11 + $0x90] ss:$8 sps:$4 sm:$0xff]   ;;  %v1141_v54 = vld [vmem:[%s1264_s11 + $0x84] ss:$8 sps:$4 sm:$0xff]  }
  0x35   : > { %725 = vmatprep.subr.bf16.mxu1 %v1116_v27  ;;  %v1143_v55 = vld [vmem:[%s1264_s11 + $0x80] ss:$8 sps:$4 sm:$0xff]   ;;  %v362_v59 = vld [vmem:[#allocation2 + $0x10] sm:$0xff]  ;;  %v364_v3 = vld [vmem:[#allocation2 + $0x18] sm:$0xff] }
  0x36   : > { %683 = vmatpush1.bf16.msra.mxu0 %v1085_v19  ;;  %v363_v63 = vld [vmem:[#allocation2] sm:$0xff]  ;;  %v365_v8 = vld [vmem:[#allocation2 + $0x8] sm:$0xff] }
  0x37   : > { %684 = vmatprep.subr.bf16.mxu0 %v1086_v21 }
  0x38   : > { %726 = vmatpush1.bf16.msra.mxu1 %v1118_v30 }
  0x39   : > { %727 = vmatprep.subr.bf16.mxu1 %v1122_v31 }
  0x3a   : > { %685 = vmatpush1.bf16.msra.mxu0 %v1088_v24 }
  0x3b   : > { %686 = vmatprep.subr.bf16.mxu0 %v1089_v25 }
  0x3c   : > { %728 = vmatpush1.bf16.msra.mxu1 %v1124_v34 }
  0x3d   : > { %729 = vmatprep.subr.bf16.mxu1 %v1128_v35 }
  0x3e   : > { %687 = vmatpush1.bf16.msra.mxu0 %v1091_v28 }
  0x3f   : > { %688 = vmatprep.subr.bf16.mxu0 %v1095_v29 }
  0x40   : > { %730 = vmatpush1.bf16.msra.mxu1 %v1130_v38 }
  0x41   : > { %731 = vmatprep.subr.bf16.mxu1 %v1134_v39 }
  0x42   : > { %689 = vmatpush1.bf16.msra.mxu0 %v1097_v32 }
  0x43   : > { %690 = vmatprep.subr.bf16.mxu0 %v1101_v33 }
  0x44   : > { %732 = vmatpush1.bf16.msra.mxu1 %v1136_v43 }
  0x46   : > { %691 = vmatpush2.bf16.msra.mxu0 %v1103_v36 }
  0x47   : > { %692 = vmatprep.subr.bf16.mxu0 %v1107_v37  ;;  %750 = vmatmul.mubr.bf16.vlgmr.msra.gmra.mxu1 %v1140_v46 }
  0x4a   : > { %693 = vmatpush2.bf16.msra.mxu0 %v1109_v41 }
  0x4b   : > { %694 = vmatprep.subr.bf16.mxu0 %v1113_v42 }
  0x4e   : > { %695 = vmatpush2.bf16.msra.mxu0 %v1115_v44 }
  0x4f   : > { %696 = vmatprep.subr.bf16.mxu0 %v1119_v45 }
  0x52   : > { %697 = vmatpush2.bf16.msra.mxu0 %v1121_v47 }
  0x53   : > { %698 = vmatprep.subr.bf16.mxu0 %v1125_v48 }
  0x56   : > { %699 = vmatpush2.bf16.msra.mxu0 %v1127_v49 }
  0x57   : > { %700 = vmatprep.subr.bf16.mxu0 %v1131_v50 }
  0x5a   : > { %701 = vmatpush2.bf16.msra.mxu0 %v1133_v51 }
  0x5b   : > { %702 = vmatprep.subr.bf16.mxu0 %v1137_v52 }
  0x5e   : > { %703 = vmatpush2.bf16.msra.mxu0 %v1139_v53 }
  0x5f   : > { %704 = vmatprep.subr.bf16.mxu0 %v1141_v54 }
  0x62   : > { %705 = vmatpush2.bf16.msra.mxu0 %v1143_v55 }
  0x65   : > { %707 = vmatmul.mubr.bf16.vlgmr.msra.gmra.mxu0 %v1144_v56 }
 0x107   : > { %v751_v57 = vpop.f32.mrf.mxu1 }
 0x109   : > { %v753_v58 = vpop.f32.mrf.mxu1 }
 0x10b   : > { %v755_v62 = vpop.f32.mrf.mxu1 }
 0x10d   : > { %v757_v7 = vpop.f32.mrf.mxu1 }
 0x125   : > { %v708_v60 = vpop.f32.mrf.mxu0 }
 0x126   : > { %v752_v61 = vadd.f32 %v751_v57, %v708_v60 }
 0x127   : > { %v710_v0 = vpop.f32.mrf.mxu0 }
 0x128   : > { %v760_v1 = vadd.f32 %v752_v61, %v362_v59  ;;  %v754_v2 = vadd.f32 %v753_v58, %v710_v0 }
 0x129   : > { %v712_v4 = vpop.f32.mrf.mxu0 }
 0x12a   : > { %764 = vst [vmem:[#allocation2 + $0x10] sm:$0xff] %v760_v1  ;;  %v761_v5 = vadd.f32 %v754_v2, %v363_v63  ;;  %v756_v6 = vadd.f32 %v755_v62, %v712_v4 }
 0x12b   : > { %v714_v9 = vpop.f32.mrf.mxu0 }
 0x12c   : > { %765 = vst [vmem:[#allocation2] sm:$0xff] %v761_v5  ;;  %v762_v10 = vadd.f32 %v756_v6, %v364_v3  ;;  %v758_v11 = vadd.f32 %v757_v7, %v714_v9  ;;  %771 = sbr.rel (%p1020_p11) target bundleno = 321 (0x141), region = 70 }
 0x12e   : > { %766 = vst [vmem:[#allocation2 + $0x18] sm:$0xff] %v762_v10  ;;  %v763_v12 = vadd.f32 %v758_v11, %v365_v8 }
 0x130   : > { %767 = vst [vmem:[#allocation2 + $0x8] sm:$0xff] %v763_v12 }
 0x131   : > { %v778_v13 = vlaneseq  ;;  %v776_v15 = vld [vmem:[%s1356_s2] sm:$0x3]  ;;  %v772_v17 = vld [vmem:[#allocation2 + $0x10] sm:$0xff] }
 0x132   : > { %v792_v16 = vld [vmem:[%s1357_s3] sm:$0x3] }
 0x133   : > { %v779_v14 = vshrl.u32 %v778_v13, 7  ;;  %v773_v20 = vld [vmem:[#allocation2] sm:$0xff] }
 0x135   : > { %v780_v18 = vsub.s32 0, %v779_v14  ;;  %v784_v19 = vsub.s32 1, %v779_v14  ;;  %v774_v21 = vld [vmem:[#allocation2 + $0x18] sm:$0xff] }
 0x137   : > { %v775_v22 = vld [vmem:[#allocation2 + $0x8] sm:$0xff]  ;;  %v781_v23 = vrot.slane %v776_v15, %v780_v18  ;;  %v797_v24 = vrot.slane %v792_v16, %v780_v18  ;;  %v785_v25 = vrot.slane %v776_v15, %v784_v19  ;;  %v801_v26 = vrot.slane %v792_v16, %v784_v19 }
 0x139   : > { %v788_v27 = vmul.f32 %v781_v23, %v772_v17  ;;  %v789_v28 = vmul.f32 %v785_v25, %v773_v20  ;;  %v790_v29 = vmul.f32 %v781_v23, %v774_v21  ;;  %v791_v30 = vmul.f32 %v785_v25, %v775_v22 }
 0x13b   : > { %v804_v31 = vadd.f32 %v797_v24, %v788_v27  ;;  %v805_v32 = vadd.f32 %v801_v26, %v789_v28  ;;  %v806_v33 = vadd.f32 %v797_v24, %v790_v29  ;;  %v807_v34 = vadd.f32 %v801_v26, %v791_v30 }
 0x13d   : > { %v808_v35 = vmax.f32 %v804_v31, 0.0  ;;  %v809_v36 = vmax.f32 %v805_v32, 0.0  ;;  %v810_v37 = vmax.f32 %v806_v33, 0.0  ;;  %v811_v38 = vmax.f32 %v807_v34, 0.0 }
 0x13f   : > { %812 = vst [vmem:[%s1358_s4] sm:$0xff] %v808_v35  ;;  %813 = vst [vmem:[%s1358_s4 + $0x8] sm:$0xff] %v809_v36 }
 0x140   : > { %814 = vst [vmem:[%s1358_s4 + $0x10] sm:$0xff] %v810_v37  ;;  %815 = vst [vmem:[%s1358_s4 + $0x18] sm:$0xff] %v811_v38 }
 0x141 PF: > { %s14_s19 = sadd.s32 1, %s1185_s19   ;;  %s1359_s15 = smov %s1173_s16 }
 0x142   : > { %p11_p12 = scmp.ge.s32.totalorder %s14_s19, 8   ;;  %s1360_s16 = smov %s1249_s23 }
 0x143   : > { %s1361_s17 = smov %s1181_s18  ;;  %s1362_s18 = smov %s1364_s20 }
 0x144   :  { %13 = sbr.rel (!%p11_p12) target bundleno = 3 (0x3), region = 120 }

// kernel: regressor_forward.39
= control target key start
LH: loop header
LB: loop body
LE: loop exit
PB: predicated region body
PF: predicated region fallthrough
CT: control target
= control target key end

     0   :  { %s1874_s0 = inlined_call_operand.vmem [shape: bf16[16,2304], index: 0, kind: input, shape index: {}]   ;;  %s1875_s1 = inlined_call_operand.vmem [shape: bf16[2304,512], index: 1, kind: input, shape index: {}]   ;;  %s1876_s2 = inlined_call_operand.vmem [shape: f32[1,512], index: 2, kind: input, shape index: {}]   ;;  %s1877_s3 = inlined_call_operand.vmem [shape: f32[1,512], index: 3, kind: input, shape index: {}]   ;;  %s1878_s4 = inlined_call_operand.vmem [shape: f32[16,512], index: 4, kind: output, shape index: {}]  }
   0x1   :  { %1881 = sst [smem:[#allocation8_spill]] %s1874_s0 }
   0x2   :  { %1882 = sst [smem:[#allocation9_spill]] %s1875_s1 }
   0x3   :  { %s1528_s15 = smov 0   ;;  %s1530_s16 = smov 0  }
   0x4   :  { %s1532_s17 = smov 0   ;;  %s1534_s18 = smov 0  }
   0x5   :  { %s1536_s19 = smov 0   ;;  %s1538_s20 = smov 0  }
   0x6   :  { %s1540_s21 = smov 0   ;;  %s1542_s22 = smov 0  }
   0x7   :  { %s1544_s23 = smov 0   ;;  %s1546_s24 = smov 0  }
   0x8   :  { %s1548_s25 = smov 0  }
   0x9 LB: > { %s1166_s26 = sadd.s32 4294967295, %s1499_s25   ;;  %s26_s27 = sadd.s32 1, %s1491_s23  ;;  %s1499_s25 = sphi %s1548_s25, %s14_s25   ;;  %s1495_s24 = sphi %s1546_s24, %s1901_s24   ;;  %s1491_s23 = sphi %s1544_s23, %s1900_s23   ;;  %s1487_s22 = sphi %s1542_s22, %s1899_s22   ;;  %s1483_s21 = sphi %s1540_s21, %s1898_s21   ;;  %s1479_s20 = sphi %s1538_s20, %s1897_s20   ;;  %s1475_s19 = sphi %s1536_s19, %s1896_s19   ;;  %s1471_s18 = sphi %s1534_s18, %s1895_s18   ;;  %s1467_s17 = sphi %s1532_s17, %s1894_s17   ;;  %s1463_s16 = sphi %s1530_s16, %s1893_s16   ;;  %s1459_s15 = sphi %s1528_s15, %s1892_s15  }
   0xa   : > { %p27_p0 = scmp.ge.s32.totalorder %s26_s27, 6  ;;  %s29_s28 = sadd.s32 1, %s1495_s24 }
   0xb   : > { %s42_s29 = sadd.s32 1, %s1479_s20  ;;  %p49_p1 = scmp.ne.s32.totalorder %s1479_s20, %s1475_s19 }
   0xc   : > { %s1903_s27 = smov (%p27_p0, %s26_s27), 0  ;;  %s1905_s28 = smov (!%p27_p0, %s29_s28), %s1495_s24 }
   0xd   : > { %1883 = sst [smem:[#allocation6_spill]] %s1903_s27  ;;  %s38_s30 = ssub.s32 %s1491_s23, %s1903_s27 }
   0xe   : > { %p50_p2 = scmp.eq.s32.totalorder %s1499_s25, 0  ;;  %p31_p3 = scmp.ge.s32.totalorder %s1905_s28, 2 }
   0xf   : > { %p40_p4 = scmp.eq.s32.totalorder %s38_s30, 0  ;;  %s70_s6 = sadd.s32 1, %s1471_s18 }
  0x10   : > { %p1595_p5 = por %p50_p2, %p49_p1  ;;  %s1907_s28 = smov (%p31_p3, %s1905_s28), 0 }
  0x11   : > { %1885 = sst [smem:[#allocation7_spill]] %s1907_s28  ;;  %s66_s8 = ssub.s32 %s1495_s24, %s1907_s28 }
  0x12   : > { %s1603_s7 = scalar_select %p40_p4, %s1479_s20, %s42_s29  }
  0x13   : > { %p77_p6 = scmp.ne.s32.totalorder %s1471_s18, %s1467_s17  ;;  %s67_s9 = sor.u32 %s66_s8, %s38_s30 }
  0x14   : > { %p148_p7 = scmp.eq.s32.totalorder %s66_s8, 0  ;;  %p68_p8 = scmp.eq.s32.totalorder %s67_s9, 0 }
  0x15   : > { %p1609_p9 = por %p77_p6, %p50_p2  ;;  %s150_s11 = sadd.s32 1, %s1463_s16 }
  0x16   : > { %p160_p10 = scmp.ne.s32.totalorder %s1463_s16, %s1459_s15  ;;  %p161_p11 = scmp.eq.s32.totalorder %s1166_s26, 11 }
  0x17   : > { %s1617_s12 = scalar_select %p68_p8, %s1471_s18, %s70_s6  }
  0x18   : > { %s1620_s13 = scalar_select %p148_p7, %s1463_s16, %s150_s11  }
  0x19   : > { %p1622_p12 = por %p161_p11, %p160_p10  ;;  %p1169_p13 = scmp.ge.s32.totalorder %s1499_s25, 12 }
  0x1b   : > { %183 = sbr.rel (%p1169_p13) target bundleno = 77 (0x4d), region = 16 }
  0x20   : > { %186 = sbr.rel (!%p1595_p5) target bundleno = 43 (0x2b), region = 20  ;;  %s188_s29 = sand.u32 (%p1595_p5), 1, %s1479_s20  }
  0x21   : > { %s1240_s30 = smul.u32 (%p1595_p5), 12, %s1491_s23  ;;  %s1888_s0 = sld [smem:[#allocation8_spill]] (%p1595_p5) }
  0x22   : > { %s1243_s8 = smul.u32 (%p1595_p5), 24, %s188_s29 }
  0x24   : > { %s190_s26 = scalar_lea.vmem (%p1595_p5), [#allocation3], %s1243_s8 }
  0x27   : > { %s196_s11 = scalar_lea.vmem %s1888_s0, %s1240_s30 }
  0x28   : > { %v211_v0 = vld [vmem:[%s196_s11] sm:$0xff]  ;;  %v213_v1 = vld [vmem:[%s196_s11 + $0x48] sm:$0xff]  ;;  %v1173_v3 = vld [vmem:[%s196_s11 + $0x50] sm:$0xf] }
  0x29   : > { %v1171_v2 = vld [vmem:[%s196_s11 + $0x8] sm:$0xf]  ;;  %212 = vst [vmem:[%s190_s26] sm:$0xff] %v211_v0  ;;  %214 = vst [vmem:[%s190_s26 + $0xc] sm:$0xff] %v213_v1 }
  0x2a   : > { %1172 = vst [vmem:[%s190_s26 + $0x8] sm:$0xf] %v1171_v2  ;;  %1174 = vst [vmem:[%s190_s26 + $0x14] sm:$0xf] %v1173_v3 }
  0x2b PF: > { %232 = sbr.rel (!%p1609_p9) target bundleno = 77 (0x4d), region = 46  ;;  %s234_s5 = sand.u32 (%p1609_p9), 1, %s1471_s18  }
  0x2c   : > { %s1244_s29 = smul.u32 (%p1609_p9), 384, %s234_s5  ;;  %s1175_s6 = sshll.u32 (%p1609_p9), %s1495_s24, 1 }
  0x2d   : > { %s1241_s30 = smul.u32 (%p1609_p9), 192, %s1491_s23  ;;  %s1889_s1 = sld [smem:[#allocation9_spill]] (%p1609_p9) }
  0x2e   : > { %s1647_s10 = scalar_lea.vmem (%p1609_p9), [#allocation4], %s1244_s29 }
  0x2f   : > { %s240_s9 = sadd.s32 (%p1609_p9), %s1241_s30, %s1175_s6 }
  0x30   : > { %s1177_s0 = sshll.u32 %s240_s9, 2 }
  0x33   : > { %s1642_s27 = scalar_lea.vmem %s1889_s1, %s1177_s0 }
  0x34   : > { %v365_v4 = vld [vmem:[%s1642_s27] sm:$0xff]  ;;  %v367_v5 = vld [vmem:[%s1642_s27 + $0x10] sm:$0xff] }
  0x35   : > { %v369_v6 = vld [vmem:[%s1642_s27 + $0x20] sm:$0xff]  ;;  %366 = vst [vmem:[%s1647_s10] sm:$0xff] %v365_v4  ;;  %368 = vst [vmem:[%s1647_s10 + $0x8] sm:$0xff] %v367_v5  ;;  %v371_v7 = vld [vmem:[%s1642_s27 + $0x30] sm:$0xff] }
  0x36   : > { %370 = vst [vmem:[%s1647_s10 + $0x10] sm:$0xff] %v369_v6  ;;  %v373_v8 = vld [vmem:[%s1642_s27 + $0x40] sm:$0xff]  ;;  %v375_v9 = vld [vmem:[%s1642_s27 + $0x50] sm:$0xff]  ;;  %372 = vst [vmem:[%s1647_s10 + $0x18] sm:$0xff] %v371_v7 }
  0x37   : > { %374 = vst [vmem:[%s1647_s10 + $0x20] sm:$0xff] %v373_v8  ;;  %376 = vst [vmem:[%s1647_s10 + $0x28] sm:$0xff] %v375_v9  ;;  %v377_v10 = vld [vmem:[%s1642_s27 + $0x60] sm:$0xff]  ;;  %v379_v11 = vld [vmem:[%s1642_s27 + $0x70] sm:$0xff] }
  0x38   : > { %v381_v12 = vld [vmem:[%s1642_s27 + $0x80] sm:$0xff]  ;;  %378 = vst [vmem:[%s1647_s10 + $0x30] sm:$0xff] %v377_v10  ;;  %380 = vst [vmem:[%s1647_s10 + $0x38] sm:$0xff] %v379_v11  ;;  %v383_v13 = vld [vmem:[%s1642_s27 + $0x90] sm:$0xff] }
  0x39   : > { %382 = vst [vmem:[%s1647_s10 + $0x40] sm:$0xff] %v381_v12  ;;  %v385_v14 = vld [vmem:[%s1642_s27 + $0xa0] sm:$0xff]  ;;  %v387_v15 = vld [vmem:[%s1642_s27 + $0xb0] sm:$0xff]  ;;  %384 = vst [vmem:[%s1647_s10 + $0x48] sm:$0xff] %v383_v13 }
  0x3a   : > { %386 = vst [vmem:[%s1647_s10 + $0x50] sm:$0xff] %v385_v14  ;;  %388 = vst [vmem:[%s1647_s10 + $0x58] sm:$0xff] %v387_v15  ;;  %v389_v16 = vld [vmem:[%s1642_s27 + $0xc0] sm:$0xff]  ;;  %v391_v17 = vld [vmem:[%s1642_s27 + $0xd0] sm:$0xff] }
  0x3b   : > { %v393_v18 = vld [vmem:[%s1642_s27 + $0xe0] sm:$0xff]  ;;  %390 = vst [vmem:[%s1647_s10 + $0x60] sm:$0xff] %v389_v16  ;;  %392 = vst [vmem:[%s1647_s10 + $0x68] sm:$0xff] %v391_v17  ;;  %v395_v19 = vld [vmem:[%s1642_s27 + $0xf0] sm:$0xff] }
  0x3c   : > { %394 = vst [vmem:[%s1647_s10 + $0x70] sm:$0xff] %v393_v18  ;;  %v397_v20 = vld [vmem:[%s1642_s27 + $0x100] sm:$0xff]  ;;  %v399_v21 = vld [vmem:[%s1642_s27 + $0x110] sm:$0xff]  ;;  %396 = vst [vmem:[%s1647_s10 + $0x78] sm:$0xff] %v395_v19 }
  0x3d   : > { %398 = vst [vmem:[%s1647_s10 + $0x80] sm:$0xff] %v397_v20  ;;  %400 = vst [vmem:[%s1647_s10 + $0x88] sm:$0xff] %v399_v21  ;;  %v401_v22 = vld [vmem:[%s1642_s27 + $0x120] sm:$0xff]  ;;  %v403_v23 = vld [vmem:[%s1642_s27 + $0x130] sm:$0xff] }
  0x3e   : > { %v405_v24 = vld [vmem:[%s1642_s27 + $0x140] sm:$0xff]  ;;  %402 = vst [vmem:[%s1647_s10 + $0x90] sm:$0xff] %v401_v22  ;;  %404 = vst [vmem:[%s1647_s10 + $0x98] sm:$0xff] %v403_v23  ;;  %v407_v25 = vld [vmem:[%s1642_s27 + $0x150] sm:$0xff] }
  0x3f   : > { %406 = vst [vmem:[%s1647_s10 + $0xa0] sm:$0xff] %v405_v24  ;;  %v409_v26 = vld [vmem:[%s1642_s27 + $0x160] sm:$0xff]  ;;  %v411_v27 = vld [vmem:[%s1642_s27 + $0x170] sm:$0xff]  ;;  %408 = vst [vmem:[%s1647_s10 + $0xa8] sm:$0xff] %v407_v25 }
  0x40   : > { %410 = vst [vmem:[%s1647_s10 + $0xb0] sm:$0xff] %v409_v26  ;;  %412 = vst [vmem:[%s1647_s10 + $0xb8] sm:$0xff] %v411_v27  ;;  %v413_v28 = vld [vmem:[%s1642_s27 + $0x180] sm:$0xff]  ;;  %v415_v29 = vld [vmem:[%s1642_s27 + $0x190] sm:$0xff] }
  0x41   : > { %v417_v30 = vld [vmem:[%s1642_s27 + $0x1a0] sm:$0xff]  ;;  %414 = vst [vmem:[%s1647_s10 + $0xc0] sm:$0xff] %v413_v28  ;;  %416 = vst [vmem:[%s1647_s10 + $0xc8] sm:$0xff] %v415_v29  ;;  %v419_v31 = vld [vmem:[%s1642_s27 + $0x1b0] sm:$0xff] }
  0x42   : > { %418 = vst [vmem:[%s1647_s10 + $0xd0] sm:$0xff] %v417_v30  ;;  %v421_v32 = vld [vmem:[%s1642_s27 + $0x1c0] sm:$0xff]  ;;  %v423_v33 = vld [vmem:[%s1642_s27 + $0x1d0] sm:$0xff]  ;;  %420 = vst [vmem:[%s1647_s10 + $0xd8] sm:$0xff] %v419_v31 }
  0x43   : > { %422 = vst [vmem:[%s1647_s10 + $0xe0] sm:$0xff] %v421_v32  ;;  %424 = vst [vmem:[%s1647_s10 + $0xe8] sm:$0xff] %v423_v33  ;;  %v425_v34 = vld [vmem:[%s1642_s27 + $0x1e0] sm:$0xff]  ;;  %v427_v35 = vld [vmem:[%s1642_s27 + $0x1f0] sm:$0xff] }
  0x44   : > { %v429_v36 = vld [vmem:[%s1642_s27 + $0x200] sm:$0xff]  ;;  %426 = vst [vmem:[%s1647_s10 + $0xf0] sm:$0xff] %v425_v34  ;;  %428 = vst [vmem:[%s1647_s10 + $0xf8] sm:$0xff] %v427_v35  ;;  %v431_v37 = vld [vmem:[%s1642_s27 + $0x210] sm:$0xff] }
  0x45   : > { %430 = vst [vmem:[%s1647_s10 + $0x100] sm:$0xff] %v429_v36  ;;  %v433_v38 = vld [vmem:[%s1642_s27 + $0x220] sm:$0xff]  ;;  %v435_v39 = vld [vmem:[%s1642_s27 + $0x230] sm:$0xff]  ;;  %432 = vst [vmem:[%s1647_s10 + $0x108] sm:$0xff] %v431_v37 }
  0x46   : > { %434 = vst [vmem:[%s1647_s10 + $0x110] sm:$0xff] %v433_v38  ;;  %436 = vst [vmem:[%s1647_s10 + $0x118] sm:$0xff] %v435_v39  ;;  %v437_v40 = vld [vmem:[%s1642_s27 + $0x240] sm:$0xff]  ;;  %v439_v41 = vld [vmem:[%s1642_s27 + $0x250] sm:$0xff] }
  0x47   : > { %v441_v42 = vld [vmem:[%s1642_s27 + $0x260] sm:$0xff]  ;;  %438 = vst [vmem:[%s1647_s10 + $0x120] sm:$0xff] %v437_v40  ;;  %440 = vst [vmem:[%s1647_s10 + $0x128] sm:$0xff] %v439_v41  ;;  %v443_v43 = vld [vmem:[%s1642_s27 + $0x270] sm:$0xff] }
  0x48   : > { %442 = vst [vmem:[%s1647_s10 + $0x130] sm:$0xff] %v441_v42  ;;  %v445_v44 = vld [vmem:[%s1642_s27 + $0x280] sm:$0xff]  ;;  %v447_v45 = vld [vmem:[%s1642_s27 + $0x290] sm:$0xff]  ;;  %444 = vst [vmem:[%s1647_s10 + $0x138] sm:$0xff] %v443_v43 }
  0x49   : > { %446 = vst [vmem:[%s1647_s10 + $0x140] sm:$0xff] %v445_v44  ;;  %448 = vst [vmem:[%s1647_s10 + $0x148] sm:$0xff] %v447_v45  ;;  %v449_v46 = vld [vmem:[%s1642_s27 + $0x2a0] sm:$0xff]  ;;  %v451_v47 = vld [vmem:[%s1642_s27 + $0x2b0] sm:$0xff] }
  0x4a   : > { %v453_v48 = vld [vmem:[%s1642_s27 + $0x2c0] sm:$0xff]  ;;  %450 = vst [vmem:[%s1647_s10 + $0x150] sm:$0xff] %v449_v46  ;;  %452 = vst [vmem:[%s1647_s10 + $0x158] sm:$0xff] %v451_v47  ;;  %v455_v49 = vld [vmem:[%s1642_s27 + $0x2d0] sm:$0xff] }
  0x4b   : > { %454 = vst [vmem:[%s1647_s10 + $0x160] sm:$0xff] %v453_v48  ;;  %v457_v50 = vld [vmem:[%s1642_s27 + $0x2e0] sm:$0xff]  ;;  %v459_v51 = vld [vmem:[%s1642_s27 + $0x2f0] sm:$0xff]  ;;  %456 = vst [vmem:[%s1647_s10 + $0x168] sm:$0xff] %v455_v49 }
  0x4c   : > { %458 = vst [vmem:[%s1647_s10 + $0x170] sm:$0xff] %v457_v50  ;;  %460 = vst [vmem:[%s1647_s10 + $0x178] sm:$0xff] %v459_v51 }
  0x4d PF: > { %p1178_p0 = scmp.ge.s32.totalorder %s1499_s25, 1  ;;  %p481_p1 = scmp.lt.s32.totalorder %s1499_s25, 13 }
  0x4f   : > { %p482_p2 = pnand %p1178_p0, %p481_p1 }
  0x50   : > { %s488_s0 = sand.u32 (!%p482_p2), 1, %s1475_s19   ;;  %s495_s28 = sand.u32 (!%p482_p2), 1, %s1467_s17  }
  0x51   : > { %485 = sbr.rel (%p482_p2) target bundleno = 389 (0x185), region = 92  ;;  %s528_s26 = sand.u32 (!%p482_p2), 1, %s1459_s15  }
  0x52   : > { %s1245_s11 = smul.u32 (!%p482_p2), 24, %s488_s0  ;;  %s1179_s5 = sshll.u32 (!%p482_p2), %s528_s26, 5 }
  0x53   : > { %s1246_s27 = smul.u32 (!%p482_p2), 384, %s495_s28  ;;  %s1180_s29 = sshll.u32 (!%p482_p2), %s1487_s22, 1 }
  0x54   : > { %p536_p3 = scmp.lt.s32.totalorder (!%p482_p2), %s1180_s29, 3  ;;  %s1758_s19 = scalar_lea.vmem (!%p482_p2), [#allocation3], %s1245_s11 }
  0x55   : > { %s1760_s17 = scalar_lea.vmem (!%p482_p2), [#allocation4], %s1246_s27  ;;  %s1762_s15 = scalar_lea.vmem (!%p482_p2), [#allocation5], %s1179_s5 }
  0x56   : > { %s1909_s29 = smov (!%p536_p3, %s1180_s29), 3  ;;  %p1182_p4 = scmp.ne.s32.totalorder %s1483_s21, 0 }
  0x57   : > { %s538_s9 = scalar_lea.vmem %s1876_s2, %s1909_s29  ;;  %s543_s1 = scalar_lea.vmem %s1877_s3, %s1909_s29 }
  0x58   : > { %551 = sbr.rel (%p1182_p4) target bundleno = 96 (0x60), region = 104 }
  0x5d   : > { %v1501_v52 = vmov 0.0  }
  0x5e   : > { %552 = vst [vmem:[#allocation2 + $0x10] sm:$0xff] %v1501_v52  ;;  %553 = vst [vmem:[#allocation2] sm:$0xff] %v1501_v52 }
  0x5f   : > { %554 = vst [vmem:[#allocation2 + $0x18] sm:$0xff] %v1501_v52  ;;  %555 = vst [vmem:[#allocation2 + $0x8] sm:$0xff] %v1501_v52 }
  0x60 PF: > { %v1337_v53 = vld [vmem:[%s1760_s17 + $0x74] ss:$8 sps:$4 sm:$0xff]   ;;  %v1339_v54 = vld [vmem:[%s1760_s17 + $0x70] ss:$8 sps:$4 sm:$0xff]   ;;  %v1502_v55 = vmov 0   ;;  %p1234_p5 = scmp.ne.s32.totalorder %s1483_s21, 5 }
  0x61   : > { %943 = vmatprep.mubr.bf16.mxu1 %v1502_v55  ;;  %868 = vmatprep.subr.bf16.mxu0 %v1337_v53  ;;  %v1340_v56 = vld [vmem:[%s1760_s17 + $0x64] ss:$8 sps:$4 sm:$0xff]   ;;  %v1342_v57 = vld [vmem:[%s1760_s17 + $0x60] ss:$8 sps:$4 sm:$0xff]   ;;  %v1343_v58 = vld [vmem:[%s1760_s17 + $0x54] ss:$8 sps:$4 sm:$0xff]  }
  0x62   : > { %869 = vmatpush1.bf16.msra.mxu0 %v1339_v54  ;;  %v1345_v59 = vld [vmem:[%s1760_s17 + $0x50] ss:$8 sps:$4 sm:$0xff]   ;;  %v1346_v60 = vld [vmem:[%s1760_s17 + $0x44] ss:$8 sps:$4 sm:$0xff]   ;;  %v1358_v61 = vld [vmem:[%s1760_s17 + $0x174] ss:$8 sps:$4 sm:$0xff]  }
  0x63   : > { %870 = vmatprep.subr.bf16.mxu0 %v1340_v56  ;;  %v1360_v62 = vld [vmem:[%s1760_s17 + $0x170] ss:$8 sps:$4 sm:$0xff]   ;;  %v1348_v63 = vld [vmem:[%s1760_s17 + $0x40] ss:$8 sps:$4 sm:$0xff]   ;;  %v1349_v0 = vld [vmem:[%s1760_s17 + $0x34] ss:$8 sps:$4 sm:$0xff]   ;;  %911 = vmatprep.subr.bf16.mxu1 %v1358_v61 }
  0x64   : > { %v1364_v1 = vld [vmem:[%s1760_s17 + $0x164] ss:$8 sps:$4 sm:$0xff]   ;;  %912 = vmatpush1.bf16.msra.mxu1 %v1360_v62  ;;  %v1366_v2 = vld [vmem:[%s1760_s17 + $0x160] ss:$8 sps:$4 sm:$0xff]   ;;  %v1351_v3 = vld [vmem:[%s1760_s17 + $0x30] ss:$8 sps:$4 sm:$0xff]  }
  0x65   : > { %913 = vmatprep.subr.bf16.mxu1 %v1364_v1  ;;  %v1370_v4 = vld [vmem:[%s1760_s17 + $0x154] ss:$8 sps:$4 sm:$0xff]   ;;  %v1352_v5 = vld [vmem:[%s1760_s17 + $0x24] ss:$8 sps:$4 sm:$0xff]   ;;  %v1372_v6 = vld [vmem:[%s1760_s17 + $0x150] ss:$8 sps:$4 sm:$0xff]  }
  0x66   : > { %871 = vmatpush1.bf16.msra.mxu0 %v1342_v57  ;;  %v1376_v7 = vld [vmem:[%s1760_s17 + $0x144] ss:$8 sps:$4 sm:$0xff]   ;;  %v1354_v8 = vld [vmem:[%s1760_s17 + $0x20] ss:$8 sps:$4 sm:$0xff]   ;;  %v1355_v9 = vld [vmem:[%s1760_s17 + $0x14] ss:$8 sps:$4 sm:$0xff]  }
  0x67   : > { %872 = vmatprep.subr.bf16.mxu0 %v1343_v58  ;;  %v1378_v10 = vld [vmem:[%s1760_s17 + $0x140] ss:$8 sps:$4 sm:$0xff]   ;;  %v1382_v11 = vld [vmem:[%s1760_s17 + $0x134] ss:$8 sps:$4 sm:$0xff]   ;;  %v1357_v12 = vld [vmem:[%s1760_s17 + $0x10] ss:$8 sps:$4 sm:$0xff]  }
  0x68   : > { %914 = vmatpush1.bf16.msra.mxu1 %v1366_v2  ;;  %v1361_v13 = vld [vmem:[%s1760_s17 + $0x4] ss:$8 sps:$4 sm:$0xff]   ;;  %v1384_v14 = vld [vmem:[%s1760_s17 + $0x130] ss:$8 sps:$4 sm:$0xff]   ;;  %v1363_v16 = vld [vmem:[%s1760_s17] ss:$8 sps:$4 sm:$0xff]  }
  0x69   : > { %915 = vmatprep.subr.bf16.mxu1 %v1370_v4  ;;  %v1388_v15 = vld [vmem:[%s1760_s17 + $0x124] ss:$8 sps:$4 sm:$0xff]   ;;  %v1367_v17 = vld [vmem:[%s1760_s17 + $0xf4] ss:$8 sps:$4 sm:$0xff]   ;;  %v1390_v18 = vld [vmem:[%s1760_s17 + $0x120] ss:$8 sps:$4 sm:$0xff]  }
  0x6a   : > { %873 = vmatpush1.bf16.msra.mxu0 %v1345_v59  ;;  %v1394_v19 = vld [vmem:[%s1760_s17 + $0x114] ss:$8 sps:$4 sm:$0xff]   ;;  %v1369_v20 = vld [vmem:[%s1760_s17 + $0xf0] ss:$8 sps:$4 sm:$0xff]   ;;  %v1373_v21 = vld [vmem:[%s1760_s17 + $0xe4] ss:$8 sps:$4 sm:$0xff]  }
  0x6b   : > { %874 = vmatprep.subr.bf16.mxu0 %v1346_v60  ;;  %v1396_v22 = vld [vmem:[%s1760_s17 + $0x110] ss:$8 sps:$4 sm:$0xff]   ;;  %v1400_v23 = vld [vmem:[%s1760_s17 + $0x104] ss:$8 sps:$4 sm:$0xff]   ;;  %v1375_v25 = vld [vmem:[%s1760_s17 + $0xe0] ss:$8 sps:$4 sm:$0xff]  }
  0x6c   : > { %916 = vmatpush1.bf16.msra.mxu1 %v1372_v6  ;;  %v1412_v24 = vld [vmem:[%s1758_s19 + $0x4] ss:$12 sps:$4 sm:$0xff]   ;;  %v1406_v30 = vld [vmem:[%s1758_s19 + $0x8] ss:$12 sps:$4 sm:$0xff]   ;;  %v1410_v40 = vld [vmem:[%s1758_s19] ss:$12 sps:$4 sm:$0xff]  }
  0x6d   : > { %917 = vmatprep.subr.bf16.mxu1 %v1376_v7  ;;  %v1379_v26 = vld [vmem:[%s1760_s17 + $0xd4] ss:$8 sps:$4 sm:$0xff]   ;;  %900 = vmatprep.mubr.bf16.mxu0 %v1412_v24  ;;  %v1402_v27 = vld [vmem:[%s1760_s17 + $0x100] ss:$8 sps:$4 sm:$0xff]   ;;  %v1381_v28 = vld [vmem:[%s1760_s17 + $0xd0] ss:$8 sps:$4 sm:$0xff]  }
  0x6e   : > { %875 = vmatpush1.bf16.msra.mxu0 %v1348_v63  ;;  %v1385_v29 = vld [vmem:[%s1760_s17 + $0xc4] ss:$8 sps:$4 sm:$0xff]   ;;  %v1387_v31 = vld [vmem:[%s1760_s17 + $0xc0] ss:$8 sps:$4 sm:$0xff]   ;;  %v1391_v32 = vld [vmem:[%s1760_s17 + $0xb4] ss:$8 sps:$4 sm:$0xff]  }
  0x6f   : > { %876 = vmatprep.subr.bf16.mxu0 %v1349_v0  ;;  %v1393_v33 = vld [vmem:[%s1760_s17 + $0xb0] ss:$8 sps:$4 sm:$0xff]   ;;  %v1397_v34 = vld [vmem:[%s1760_s17 + $0xa4] ss:$8 sps:$4 sm:$0xff]   ;;  %v1399_v35 = vld [vmem:[%s1760_s17 + $0xa0] ss:$8 sps:$4 sm:$0xff]  }
  0x70   : > { %918 = vmatpush1.bf16.msra.mxu1 %v1378_v10  ;;  %v1403_v36 = vld [vmem:[%s1760_s17 + $0x94] ss:$8 sps:$4 sm:$0xff]   ;;  %v1405_v37 = vld [vmem:[%s1760_s17 + $0x90] ss:$8 sps:$4 sm:$0xff]   ;;  %v1407_v38 = vld [vmem:[%s1760_s17 + $0x84] ss:$8 sps:$4 sm:$0xff]  }
  0x71   : > { %919 = vmatprep.subr.bf16.mxu1 %v1382_v11  ;;  %v1409_v39 = vld [vmem:[%s1760_s17 + $0x80] ss:$8 sps:$4 sm:$0xff]   ;;  %v557_v47 = vld [vmem:[#allocation2] sm:$0xff]  ;;  %v559_v56 = vld [vmem:[#allocation2 + $0x8] sm:$0xff] }
  0x72   : > { %877 = vmatpush1.bf16.msra.mxu0 %v1351_v3  ;;  %v556_v43 = vld [vmem:[#allocation2 + $0x10] sm:$0xff]  ;;  %v558_v51 = vld [vmem:[#allocation2 + $0x18] sm:$0xff] }
  0x73   : > { %878 = vmatprep.subr.bf16.mxu0 %v1352_v5 }
  0x74   : > { %920 = vmatpush1.bf16.msra.mxu1 %v1384_v14 }
  0x75   : > { %921 = vmatprep.subr.bf16.mxu1 %v1388_v15 }
  0x76   : > { %879 = vmatpush1.bf16.msra.mxu0 %v1354_v8 }
  0x77   : > { %880 = vmatprep.subr.bf16.mxu0 %v1355_v9 }
  0x78   : > { %922 = vmatpush1.bf16.msra.mxu1 %v1390_v18 }
  0x79   : > { %923 = vmatprep.subr.bf16.mxu1 %v1394_v19 }
  0x7a   : > { %881 = vmatpush1.bf16.msra.mxu0 %v1357_v12 }
  0x7b   : > { %882 = vmatprep.subr.bf16.mxu0 %v1361_v13 }
  0x7c   : > { %924 = vmatpush1.bf16.msra.mxu1 %v1396_v22 }
  0x7d   : > { %925 = vmatprep.subr.bf16.mxu1 %v1400_v23 }
  0x7e   : > { %883 = vmatpush1.bf16.msra.mxu0 %v1363_v16 }
  0x7f   : > { %884 = vmatprep.subr.bf16.mxu0 %v1367_v17 }
  0x80   : > { %926 = vmatpush1.bf16.msra.mxu1 %v1402_v27 }
  0x82   : > { %885 = vmatpush2.bf16.msra.mxu0 %v1369_v20 }
  0x83   : > { %886 = vmatprep.subr.bf16.mxu0 %v1373_v21  ;;  %944 = vmatmul.mubr.bf16.vlgmr.msra.gmra.mxu1 %v1406_v30 }
  0x86   : > { %887 = vmatpush2.bf16.msra.mxu0 %v1375_v25 }
  0x87   : > { %888 = vmatprep.subr.bf16.mxu0 %v1379_v26 }
  0x8a   : > { %889 = vmatpush2.bf16.msra.mxu0 %v1381_v28 }
  0x8b   : > { %890 = vmatprep.subr.bf16.mxu0 %v1385_v29 }
  0x8e   : > { %891 = vmatpush2.bf16.msra.mxu0 %v1387_v31 }
  0x8f   : > { %892 = vmatprep.subr.bf16.mxu0 %v1391_v32 }
  0x92   : > { %893 = vmatpush2.bf16.msra.mxu0 %v1393_v33 }
  0x93   : > { %894 = vmatprep.subr.bf16.mxu0 %v1397_v34 }
  0x96   : > { %895 = vmatpush2.bf16.msra.mxu0 %v1399_v35 }
  0x97   : > { %896 = vmatprep.subr.bf16.mxu0 %v1403_v36 }
  0x9a   : > { %897 = vmatpush2.bf16.msra.mxu0 %v1405_v37 }
  0x9b   : > { %898 = vmatprep.subr.bf16.mxu0 %v1407_v38 }
  0x9e   : > { %899 = vmatpush2.bf16.msra.mxu0 %v1409_v39 }
  0xa1   : > { %901 = vmatmul.mubr.bf16.vlgmr.msra.gmra.mxu0 %v1410_v40 }
 0x143   : > { %v945_v41 = vpop.f32.mrf.mxu1 }
 0x145   : > { %v947_v42 = vpop.f32.mrf.mxu1 }
 0x147   : > { %v949_v46 = vpop.f32.mrf.mxu1 }
 0x149   : > { %v951_v55 = vpop.f32.mrf.mxu1 }
 0x161   : > { %v902_v44 = vpop.f32.mrf.mxu0 }
 0x162   : > { %v946_v45 = vadd.f32 %v945_v41, %v902_v44 }
 0x163   : > { %v904_v48 = vpop.f32.mrf.mxu0 }
 0x164   : > { %v954_v49 = vadd.f32 %v946_v45, %v556_v43  ;;  %v948_v50 = vadd.f32 %v947_v42, %v904_v48 }
 0x165   : > { %v906_v52 = vpop.f32.mrf.mxu0 }
 0x166   : > { %958 = vst [vmem:[#allocation2 + $0x10] sm:$0xff] %v954_v49  ;;  %v955_v53 = vadd.f32 %v948_v50, %v557_v47  ;;  %v950_v54 = vadd.f32 %v949_v46, %v906_v52 }
 0x167   : > { %v908_v57 = vpop.f32.mrf.mxu0 }
 0x168   : > { %959 = vst [vmem:[#allocation2] sm:$0xff] %v955_v53  ;;  %v956_v58 = vadd.f32 %v950_v54, %v558_v51  ;;  %v952_v59 = vadd.f32 %v951_v55, %v908_v57  ;;  %965 = sbr.rel (%p1234_p5) target bundleno = 381 (0x17d), region = 108 }
 0x16a   : > { %960 = vst [vmem:[#allocation2 + $0x18] sm:$0xff] %v956_v58  ;;  %v957_v60 = vadd.f32 %v952_v59, %v559_v56 }
 0x16c   : > { %961 = vst [vmem:[#allocation2 + $0x8] sm:$0xff] %v957_v60 }
 0x16d   : > { %v972_v61 = vlaneseq  ;;  %v970_v63 = vld [vmem:[%s538_s9] sm:$0x3]  ;;  %v966_v1 = vld [vmem:[#allocation2 + $0x10] sm:$0xff] }
 0x16e   : > { %v986_v0 = vld [vmem:[%s543_s1] sm:$0x3] }
 0x16f   : > { %v973_v62 = vshrl.u32 %v972_v61, 7  ;;  %v967_v4 = vld [vmem:[#allocation2] sm:$0xff] }
 0x171   : > { %v974_v2 = vsub.s32 0, %v973_v62  ;;  %v978_v3 = vsub.s32 1, %v973_v62  ;;  %v968_v5 = vld [vmem:[#allocation2 + $0x18] sm:$0xff] }
 0x173   : > { %v969_v6 = vld [vmem:[#allocation2 + $0x8] sm:$0xff]  ;;  %v975_v7 = vrot.slane %v970_v63, %v974_v2  ;;  %v991_v8 = vrot.slane %v986_v0, %v974_v2  ;;  %v979_v9 = vrot.slane %v970_v63, %v978_v3  ;;  %v995_v10 = vrot.slane %v986_v0, %v978_v3 }
 0x175   : > { %v982_v11 = vmul.f32 %v975_v7, %v966_v1  ;;  %v983_v12 = vmul.f32 %v979_v9, %v967_v4  ;;  %v984_v13 = vmul.f32 %v975_v7, %v968_v5  ;;  %v985_v14 = vmul.f32 %v979_v9, %v969_v6 }
 0x177   : > { %v998_v15 = vadd.f32 %v991_v8, %v982_v11  ;;  %v999_v16 = vadd.f32 %v995_v10, %v983_v12  ;;  %v1000_v17 = vadd.f32 %v991_v8, %v984_v13  ;;  %v1001_v18 = vadd.f32 %v995_v10, %v985_v14 }
 0x179   : > { %v1002_v19 = vmax.f32 %v998_v15, 0.0  ;;  %v1003_v20 = vmax.f32 %v999_v16, 0.0  ;;  %v1004_v21 = vmax.f32 %v1000_v17, 0.0  ;;  %v1005_v22 = vmax.f32 %v1001_v18, 0.0 }
 0x17b   : > { %1006 = vst [vmem:[%s1762_s15] sm:$0xff] %v1002_v19  ;;  %1007 = vst [vmem:[%s1762_s15 + $0x8] sm:$0xff] %v1003_v20 }
 0x17c   : > { %1008 = vst [vmem:[%s1762_s15 + $0x10] sm:$0xff] %v1004_v21  ;;  %1009 = vst [vmem:[%s1762_s15 + $0x18] sm:$0xff] %v1005_v22 }
 0x17d PF: > { %1016 = sbr.rel (!%p1622_p12) target bundleno = 389 (0x185), region = 112  ;;  %s1242_s1 = sshll.u32 (%p1622_p12), %s1487_s22, 4 }
 0x17e   : > { %s1022_s5 = scalar_lea.vmem (%p1622_p12), %s1878_s4, %s1242_s1 }
 0x182   : > { %v1035_v23 = vld [vmem:[%s1762_s15] sm:$0xff]  ;;  %v1037_v24 = vld [vmem:[%s1762_s15 + $0x8] sm:$0xff] }
 0x183   : > { %v1039_v25 = vld [vmem:[%s1762_s15 + $0x10] sm:$0xff]  ;;  %v1041_v26 = vld [vmem:[%s1762_s15 + $0x18] sm:$0xff]  ;;  %1036 = vst [vmem:[%s1022_s5] sm:$0xff] %v1035_v23  ;;  %1038 = vst [vmem:[%s1022_s5 + $0x8] sm:$0xff] %v1037_v24 }
 0x184   : > { %1040 = vst [vmem:[%s1022_s5 + $0x20] sm:$0xff] %v1039_v25  ;;  %1042 = vst [vmem:[%s1022_s5 + $0x28] sm:$0xff] %v1041_v26 }
 0x185 PF: > { %s14_s25 = sadd.s32 1, %s1499_s25   ;;  %s1890_s14 = sld [smem:[#allocation6_spill]] }
 0x186   : > { %p11_p6 = scmp.ge.s32.totalorder %s14_s25, 14   ;;  %s1891_s29 = sld [smem:[#allocation7_spill]] }
 0x187   : > { %s1892_s15 = smov %s1463_s16  ;;  %s1893_s16 = smov %s1620_s13 }
 0x188   : > { %s1894_s17 = smov %s1471_s18  ;;  %s1895_s18 = smov %s1617_s12 }
 0x189   : > { %s1896_s19 = smov %s1479_s20  ;;  %s1897_s20 = smov %s1603_s7 }
 0x18a   : > { %s1898_s21 = smov %s1491_s23  ;;  %s1899_s22 = smov %s1495_s24 }
 0x18b   : > { %s1900_s23 = smov %s1890_s14  ;;  %13 = sbr.rel (!%p11_p6) target bundleno = 9 (0x9), region = 186 }
 0x18c   : > { %s1901_s24 = smov %s1891_s29 }

// kernel: regressor_forward.38
= control target key start
LH: loop header
LB: loop body
LE: loop exit
PB: predicated region body
PF: predicated region fallthrough
CT: control target
= control target key end

     0   :  { %s1130_s15 = smov 0   ;;  %s1132_s16 = smov 0   ;;  %s1321_s0 = inlined_call_operand.vmem [shape: bf16[16,256], index: 0, kind: input, shape index: {}]   ;;  %s1322_s1 = inlined_call_operand.vmem [shape: bf16[256,512], index: 1, kind: input, shape index: {}]   ;;  %s1323_s2 = inlined_call_operand.vmem [shape: f32[1,512], index: 2, kind: input, shape index: {}]   ;;  %s1324_s3 = inlined_call_operand.vmem [shape: f32[1,512], index: 3, kind: input, shape index: {}]   ;;  %s1325_s4 = inlined_call_operand.vmem [shape: f32[16,512], index: 4, kind: output, shape index: {}]  }
   0x1   :  { %s1134_s17 = smov 0   ;;  %s1136_s18 = smov 0  }
   0x2   :  { %s1138_s19 = smov 0  }
   0x3 LB: > { %s29_s20 = sadd.s32 1, %s1099_s18  ;;  %s920_s21 = sadd.s32 4294967295, %s1103_s19   ;;  %s1103_s19 = sphi %s1138_s19, %s14_s19   ;;  %s1099_s18 = sphi %s1136_s18, %s1330_s18   ;;  %s1095_s17 = sphi %s1134_s17, %s1329_s17   ;;  %s1091_s16 = sphi %s1132_s16, %s1328_s16   ;;  %s1087_s15 = sphi %s1130_s15, %s1327_s15  }
   0x4   : > { %p31_p0 = scmp.ge.s32.totalorder %s29_s20, 2  ;;  %p77_p1 = scmp.ne.s32.totalorder %s1091_s16, %s1087_s15 }
   0x5   : > { %p78_p2 = scmp.eq.s32.totalorder %s1103_s19, 0  ;;  %p161_p4 = scmp.eq.s32.totalorder %s920_s21, 1 }
   0x6   : > { %s1332_s20 = smov (%p31_p0, %s29_s20), 0  ;;  %s70_s23 = sadd.s32 1, %s1091_s16 }
   0x7   : > { %p79_p3 = por %p78_p2, %p77_p1  ;;  %s66_s22 = ssub.s32 %s1099_s18, %s1332_s20 }
   0x8   : > { %p68_p5 = scmp.eq.s32.totalorder %s66_s22, 0  ;;  %p1165_p6 = por %p161_p4, %p77_p1 }
   0x9   : > { %p924_p7 = scmp.ge.s32.totalorder %s1103_s19, 2 }
   0xa   : > { %s1170_s25 = scalar_select %p68_p5, %s1091_s16, %s70_s23  }
   0xb   : > { %198 = sbr.rel (%p924_p7) target bundleno = 36 (0x24), region = 20 }
  0x10   : > { %201 = sbr.rel (!%p79_p3) target bundleno = 36 (0x24), region = 24  ;;  %s203_s26 = sand.u32 (%p79_p3), 1, %s1091_s16  }
  0x11   : > { %s972_s27 = sshll.u32 (%p79_p3), %s1099_s18, 3  ;;  %s925_s28 = sshll.u32 (%p79_p3), %s203_s26, 8 }
  0x12   : > { %s1178_s5 = scalar_lea.vmem (%p79_p3), %s1322_s1, %s972_s27  ;;  %s1183_s6 = scalar_lea.vmem (%p79_p3), [#allocation3], %s925_s28 }
  0x13   : > { %v302_v0 = vld [vmem:[%s1178_s5] sm:$0xff] (%p79_p3)  ;;  %v304_v1 = vld [vmem:[%s1178_s5 + $0x10] sm:$0xff] (%p79_p3) }
  0x14   : > { %v306_v2 = vld [vmem:[%s1178_s5 + $0x20] sm:$0xff] (%p79_p3)  ;;  %303 = vst [vmem:[%s1183_s6] sm:$0xff] (%p79_p3), %v302_v0  ;;  %305 = vst [vmem:[%s1183_s6 + $0x8] sm:$0xff] (%p79_p3), %v304_v1  ;;  %v308_v3 = vld [vmem:[%s1178_s5 + $0x30] sm:$0xff] (%p79_p3) }
  0x15   : > { %307 = vst [vmem:[%s1183_s6 + $0x10] sm:$0xff] %v306_v2  ;;  %v310_v4 = vld [vmem:[%s1178_s5 + $0x40] sm:$0xff]  ;;  %v312_v5 = vld [vmem:[%s1178_s5 + $0x50] sm:$0xff]  ;;  %309 = vst [vmem:[%s1183_s6 + $0x18] sm:$0xff] %v308_v3 }
  0x16   : > { %311 = vst [vmem:[%s1183_s6 + $0x20] sm:$0xff] %v310_v4  ;;  %313 = vst [vmem:[%s1183_s6 + $0x28] sm:$0xff] %v312_v5  ;;  %v314_v6 = vld [vmem:[%s1178_s5 + $0x60] sm:$0xff]  ;;  %v316_v7 = vld [vmem:[%s1178_s5 + $0x70] sm:$0xff] }
  0x17   : > { %v318_v8 = vld [vmem:[%s1178_s5 + $0x80] sm:$0xff]  ;;  %315 = vst [vmem:[%s1183_s6 + $0x30] sm:$0xff] %v314_v6  ;;  %317 = vst [vmem:[%s1183_s6 + $0x38] sm:$0xff] %v316_v7  ;;  %v320_v9 = vld [vmem:[%s1178_s5 + $0x90] sm:$0xff] }
  0x18   : > { %319 = vst [vmem:[%s1183_s6 + $0x40] sm:$0xff] %v318_v8  ;;  %v322_v10 = vld [vmem:[%s1178_s5 + $0xa0] sm:$0xff]  ;;  %v324_v11 = vld [vmem:[%s1178_s5 + $0xb0] sm:$0xff]  ;;  %321 = vst [vmem:[%s1183_s6 + $0x48] sm:$0xff] %v320_v9 }
  0x19   : > { %323 = vst [vmem:[%s1183_s6 + $0x50] sm:$0xff] %v322_v10  ;;  %325 = vst [vmem:[%s1183_s6 + $0x58] sm:$0xff] %v324_v11  ;;  %v326_v12 = vld [vmem:[%s1178_s5 + $0xc0] sm:$0xff]  ;;  %v328_v13 = vld [vmem:[%s1178_s5 + $0xd0] sm:$0xff] }
  0x1a   : > { %v330_v14 = vld [vmem:[%s1178_s5 + $0xe0] sm:$0xff]  ;;  %327 = vst [vmem:[%s1183_s6 + $0x60] sm:$0xff] %v326_v12  ;;  %329 = vst [vmem:[%s1183_s6 + $0x68] sm:$0xff] %v328_v13  ;;  %v332_v15 = vld [vmem:[%s1178_s5 + $0xf0] sm:$0xff] }
  0x1b   : > { %331 = vst [vmem:[%s1183_s6 + $0x70] sm:$0xff] %v330_v14  ;;  %v334_v16 = vld [vmem:[%s1178_s5 + $0x100] sm:$0xff]  ;;  %v336_v17 = vld [vmem:[%s1178_s5 + $0x110] sm:$0xff]  ;;  %333 = vst [vmem:[%s1183_s6 + $0x78] sm:$0xff] %v332_v15 }
  0x1c   : > { %335 = vst [vmem:[%s1183_s6 + $0x80] sm:$0xff] %v334_v16  ;;  %337 = vst [vmem:[%s1183_s6 + $0x88] sm:$0xff] %v336_v17  ;;  %v338_v18 = vld [vmem:[%s1178_s5 + $0x120] sm:$0xff]  ;;  %v340_v19 = vld [vmem:[%s1178_s5 + $0x130] sm:$0xff] }
  0x1d   : > { %v342_v20 = vld [vmem:[%s1178_s5 + $0x140] sm:$0xff]  ;;  %339 = vst [vmem:[%s1183_s6 + $0x90] sm:$0xff] %v338_v18  ;;  %341 = vst [vmem:[%s1183_s6 + $0x98] sm:$0xff] %v340_v19  ;;  %v344_v21 = vld [vmem:[%s1178_s5 + $0x150] sm:$0xff] }
  0x1e   : > { %343 = vst [vmem:[%s1183_s6 + $0xa0] sm:$0xff] %v342_v20  ;;  %v346_v22 = vld [vmem:[%s1178_s5 + $0x160] sm:$0xff]  ;;  %v348_v23 = vld [vmem:[%s1178_s5 + $0x170] sm:$0xff]  ;;  %345 = vst [vmem:[%s1183_s6 + $0xa8] sm:$0xff] %v344_v21 }
  0x1f   : > { %347 = vst [vmem:[%s1183_s6 + $0xb0] sm:$0xff] %v346_v22  ;;  %349 = vst [vmem:[%s1183_s6 + $0xb8] sm:$0xff] %v348_v23  ;;  %v350_v24 = vld [vmem:[%s1178_s5 + $0x180] sm:$0xff]  ;;  %v352_v25 = vld [vmem:[%s1178_s5 + $0x190] sm:$0xff] }
  0x20   : > { %v354_v26 = vld [vmem:[%s1178_s5 + $0x1a0] sm:$0xff]  ;;  %351 = vst [vmem:[%s1183_s6 + $0xc0] sm:$0xff] %v350_v24  ;;  %353 = vst [vmem:[%s1183_s6 + $0xc8] sm:$0xff] %v352_v25  ;;  %v356_v27 = vld [vmem:[%s1178_s5 + $0x1b0] sm:$0xff] }
  0x21   : > { %355 = vst [vmem:[%s1183_s6 + $0xd0] sm:$0xff] %v354_v26  ;;  %v358_v28 = vld [vmem:[%s1178_s5 + $0x1c0] sm:$0xff]  ;;  %v360_v29 = vld [vmem:[%s1178_s5 + $0x1d0] sm:$0xff]  ;;  %357 = vst [vmem:[%s1183_s6 + $0xd8] sm:$0xff] %v356_v27 }
  0x22   : > { %359 = vst [vmem:[%s1183_s6 + $0xe0] sm:$0xff] %v358_v28  ;;  %361 = vst [vmem:[%s1183_s6 + $0xe8] sm:$0xff] %v360_v29  ;;  %v362_v30 = vld [vmem:[%s1178_s5 + $0x1e0] sm:$0xff]  ;;  %v364_v31 = vld [vmem:[%s1178_s5 + $0x1f0] sm:$0xff] }
  0x23   : > { %363 = vst [vmem:[%s1183_s6 + $0xf0] sm:$0xff] %v362_v30  ;;  %365 = vst [vmem:[%s1183_s6 + $0xf8] sm:$0xff] %v364_v31 }
  0x24 PF: > { %p928_p8 = scmp.ge.s32.totalorder %s1103_s19, 1  ;;  %p386_p9 = scmp.lt.s32.totalorder %s1103_s19, 3 }
  0x26   : > { %p387_p10 = pnand %p928_p8, %p386_p9 }
  0x27   : > { %s393_s7 = sand.u32 (!%p387_p10), 1, %s1087_s15   ;;  %s931_s14 = sshll.u32 (!%p387_p10), %s1095_s17, 1 }
  0x28   : > { %390 = sbr.rel (%p387_p10) target bundleno = 322 (0x142), region = 70  ;;  %s929_s8 = sshll.u32 (!%p387_p10), %s393_s7, 8 }
  0x29   : > { %s1254_s11 = scalar_lea.vmem (!%p387_p10), [#allocation3], %s929_s8  ;;  %p450_p11 = scmp.lt.s32.totalorder (!%p387_p10), %s931_s14, 3 }
  0x2a   : > { %s930_s29 = sshll.u32 (!%p387_p10), %s393_s7, 5 }
  0x2b   : > { %s434_s30 = scalar_lea.vmem (!%p387_p10), [#allocation4], %s930_s29 }
  0x2d   : > { %v1064_v32 = vld [vmem:[%s1321_s0 + $0x4] ss:$8 sps:$4 sm:$0xff]   ;;  %v1014_v33 = vld [vmem:[%s1254_s11 + $0x74] ss:$8 sps:$4 sm:$0xff]   ;;  %v1016_v34 = vld [vmem:[%s1254_s11 + $0x70] ss:$8 sps:$4 sm:$0xff]   ;;  %v737_v2 = vlaneseq }
  0x2e   : > { %709 = vmatprep.mubr.bf16.mxu0 %v1064_v32  ;;  %677 = vmatprep.subr.bf16.mxu0 %v1014_v33  ;;  %v1017_v35 = vld [vmem:[%s1254_s11 + $0x64] ss:$8 sps:$4 sm:$0xff]   ;;  %v1019_v36 = vld [vmem:[%s1254_s11 + $0x60] ss:$8 sps:$4 sm:$0xff]   ;;  %v1020_v37 = vld [vmem:[%s1254_s11 + $0x54] ss:$8 sps:$4 sm:$0xff]  }
  0x2f   : > { %678 = vmatpush1.bf16.msra.mxu0 %v1016_v34  ;;  %v1022_v38 = vld [vmem:[%s1254_s11 + $0x50] ss:$8 sps:$4 sm:$0xff]   ;;  %v1023_v39 = vld [vmem:[%s1254_s11 + $0x44] ss:$8 sps:$4 sm:$0xff]   ;;  %v1025_v40 = vld [vmem:[%s1254_s11 + $0x40] ss:$8 sps:$4 sm:$0xff]  }
  0x30   : > { %679 = vmatprep.subr.bf16.mxu0 %v1017_v35  ;;  %v1026_v41 = vld [vmem:[%s1254_s11 + $0x34] ss:$8 sps:$4 sm:$0xff]   ;;  %v1028_v42 = vld [vmem:[%s1254_s11 + $0x30] ss:$8 sps:$4 sm:$0xff]   ;;  %v1029_v43 = vld [vmem:[%s1254_s11 + $0x24] ss:$8 sps:$4 sm:$0xff]  }
  0x31   : > { %v1031_v44 = vld [vmem:[%s1254_s11 + $0x20] ss:$8 sps:$4 sm:$0xff]   ;;  %v1032_v45 = vld [vmem:[%s1254_s11 + $0x14] ss:$8 sps:$4 sm:$0xff]   ;;  %v1034_v46 = vld [vmem:[%s1254_s11 + $0x10] ss:$8 sps:$4 sm:$0xff]  }
  0x32   : > { %v1035_v47 = vld [vmem:[%s1254_s11 + $0x4] ss:$8 sps:$4 sm:$0xff]   ;;  %v1037_v48 = vld [vmem:[%s1254_s11] ss:$8 sps:$4 sm:$0xff]   ;;  %v1038_v49 = vld [vmem:[%s1254_s11 + $0xf4] ss:$8 sps:$4 sm:$0xff]  }
  0x33   : > { %680 = vmatpush1.bf16.msra.mxu0 %v1019_v36  ;;  %v1040_v50 = vld [vmem:[%s1254_s11 + $0xf0] ss:$8 sps:$4 sm:$0xff]   ;;  %v1041_v51 = vld [vmem:[%s1254_s11 + $0xe4] ss:$8 sps:$4 sm:$0xff]   ;;  %v1043_v52 = vld [vmem:[%s1254_s11 + $0xe0] ss:$8 sps:$4 sm:$0xff]  }
  0x34   : > { %681 = vmatprep.subr.bf16.mxu0 %v1020_v37  ;;  %v1044_v53 = vld [vmem:[%s1254_s11 + $0xd4] ss:$8 sps:$4 sm:$0xff]   ;;  %v1046_v54 = vld [vmem:[%s1254_s11 + $0xd0] ss:$8 sps:$4 sm:$0xff]   ;;  %v1047_v55 = vld [vmem:[%s1254_s11 + $0xc4] ss:$8 sps:$4 sm:$0xff]  }
  0x35   : > { %v1049_v56 = vld [vmem:[%s1254_s11 + $0xc0] ss:$8 sps:$4 sm:$0xff]   ;;  %v1050_v57 = vld [vmem:[%s1254_s11 + $0xb4] ss:$8 sps:$4 sm:$0xff]   ;;  %v1052_v58 = vld [vmem:[%s1254_s11 + $0xb0] ss:$8 sps:$4 sm:$0xff]  }
  0x36   : > { %v1053_v59 = vld [vmem:[%s1254_s11 + $0xa4] ss:$8 sps:$4 sm:$0xff]   ;;  %v1055_v60 = vld [vmem:[%s1254_s11 + $0xa0] ss:$8 sps:$4 sm:$0xff]   ;;  %v1056_v61 = vld [vmem:[%s1254_s11 + $0x94] ss:$8 sps:$4 sm:$0xff]  }
  0x37   : > { %682 = vmatpush1.bf16.msra.mxu0 %v1022_v38  ;;  %v1058_v62 = vld [vmem:[%s1254_s11 + $0x90] ss:$8 sps:$4 sm:$0xff]   ;;  %v1059_v63 = vld [vmem:[%s1254_s11 + $0x84] ss:$8 sps:$4 sm:$0xff]   ;;  %v1061_v0 = vld [vmem:[%s1254_s11 + $0x80] ss:$8 sps:$4 sm:$0xff]  }
  0x38   : > { %683 = vmatprep.subr.bf16.mxu0 %v1023_v39  ;;  %v1062_v1 = vld [vmem:[%s1321_s0] ss:$8 sps:$4 sm:$0xff]   ;;  %s1334_s14 = smov (!%p450_p11, %s931_s14), 3  ;;  %v738_v3 = vshrl.u32 %v737_v2, 7  ;;  %s973_s15 = sshll.u32 (%p1165_p6), %s1095_s17, 4 }
  0x39   : > { %s452_s23 = scalar_lea.vmem %s1323_s2, %s1334_s14  ;;  %s457_s28 = scalar_lea.vmem %s1324_s3, %s1334_s14 }
  0x3a   : > { %v739_v4 = vsub.s32 0, %v738_v3  ;;  %v735_v5 = vld [vmem:[%s452_s23] sm:$0x3]  ;;  %v743_v6 = vsub.s32 1, %v738_v3  ;;  %s783_s7 = scalar_lea.vmem (%p1165_p6), %s1325_s4, %s973_s15 }
  0x3b   : > { %684 = vmatpush1.bf16.msra.mxu0 %v1025_v40  ;;  %v751_v7 = vld [vmem:[%s457_s28] sm:$0x3] }
  0x3c   : > { %685 = vmatprep.subr.bf16.mxu0 %v1026_v41  ;;  %v740_v8 = vrot.slane %v735_v5, %v739_v4  ;;  %v756_v9 = vrot.slane %v751_v7, %v739_v4  ;;  %v744_v10 = vrot.slane %v735_v5, %v743_v6  ;;  %v760_v13 = vrot.slane %v751_v7, %v743_v6 }
  0x3f   : > { %686 = vmatpush1.bf16.msra.mxu0 %v1028_v42 }
  0x40   : > { %687 = vmatprep.subr.bf16.mxu0 %v1029_v43 }
  0x43   : > { %688 = vmatpush1.bf16.msra.mxu0 %v1031_v44 }
  0x44   : > { %689 = vmatprep.subr.bf16.mxu0 %v1032_v45 }
  0x47   : > { %690 = vmatpush1.bf16.msra.mxu0 %v1034_v46 }
  0x48   : > { %691 = vmatprep.subr.bf16.mxu0 %v1035_v47 }
  0x4b   : > { %692 = vmatpush1.bf16.msra.mxu0 %v1037_v48 }
  0x4c   : > { %693 = vmatprep.subr.bf16.mxu0 %v1038_v49 }
  0x4f   : > { %694 = vmatpush2.bf16.msra.mxu0 %v1040_v50 }
  0x50   : > { %695 = vmatprep.subr.bf16.mxu0 %v1041_v51 }
  0x53   : > { %696 = vmatpush2.bf16.msra.mxu0 %v1043_v52 }
  0x54   : > { %697 = vmatprep.subr.bf16.mxu0 %v1044_v53 }
  0x57   : > { %698 = vmatpush2.bf16.msra.mxu0 %v1046_v54 }
  0x58   : > { %699 = vmatprep.subr.bf16.mxu0 %v1047_v55 }
  0x5b   : > { %700 = vmatpush2.bf16.msra.mxu0 %v1049_v56 }
  0x5c   : > { %701 = vmatprep.subr.bf16.mxu0 %v1050_v57 }
  0x5f   : > { %702 = vmatpush2.bf16.msra.mxu0 %v1052_v58 }
  0x60   : > { %703 = vmatprep.subr.bf16.mxu0 %v1053_v59 }
  0x63   : > { %704 = vmatpush2.bf16.msra.mxu0 %v1055_v60 }
  0x64   : > { %705 = vmatprep.subr.bf16.mxu0 %v1056_v61 }
  0x67   : > { %706 = vmatpush2.bf16.msra.mxu0 %v1058_v62 }
  0x68   : > { %707 = vmatprep.subr.bf16.mxu0 %v1059_v63 }
  0x6b   : > { %708 = vmatpush2.bf16.msra.mxu0 %v1061_v0 }
  0x6e   : > { %710 = vmatmul.mubr.bf16.vlgmr.msra.gmra.mxu0 %v1062_v1 }
 0x12e   : > { %v711_v11 = vpop.f32.mrf.mxu0 }
 0x12f   : > { %v747_v12 = vmul.f32 %v740_v8, %v711_v11 }
 0x130   : > { %v713_v14 = vpop.f32.mrf.mxu0 }
 0x131   : > { %v763_v15 = vadd.f32 %v756_v9, %v747_v12  ;;  %v748_v16 = vmul.f32 %v744_v10, %v713_v14 }
 0x132   : > { %v715_v17 = vpop.f32.mrf.mxu0 }
 0x133   : > { %767 = vst [vmem:[%s434_s30] sm:$0xff] %v763_v15  ;;  %v764_v18 = vadd.f32 %v760_v13, %v748_v16  ;;  %v749_v19 = vmul.f32 %v740_v8, %v715_v17 }
 0x134   : > { %v717_v20 = vpop.f32.mrf.mxu0 }
 0x135   : > { %768 = vst [vmem:[%s434_s30 + $0x8] sm:$0xff] %v764_v18  ;;  %v765_v21 = vadd.f32 %v756_v9, %v749_v19  ;;  %v750_v22 = vmul.f32 %v744_v10, %v717_v20  ;;  %777 = sbr.rel (!%p1165_p6) target bundleno = 322 (0x142), region = 86 }
 0x137   : > { %769 = vst [vmem:[%s434_s30 + $0x10] sm:$0xff] %v765_v21  ;;  %v766_v23 = vadd.f32 %v760_v13, %v750_v22 }
 0x139   : > { %770 = vst [vmem:[%s434_s30 + $0x18] sm:$0xff] %v766_v23 }
 0x13a   : > { %v796_v24 = vld [vmem:[%s434_s30] sm:$0xff] }
 0x13b   : > { %797 = vst [vmem:[%s783_s7] sm:$0xff] %v796_v24 }
 0x13c   : > { %v798_v25 = vld [vmem:[%s434_s30 + $0x8] sm:$0xff] }
 0x13d   : > { %799 = vst [vmem:[%s783_s7 + $0x8] sm:$0xff] %v798_v25 }
 0x13e   : > { %v800_v26 = vld [vmem:[%s434_s30 + $0x10] sm:$0xff] }
 0x13f   : > { %801 = vst [vmem:[%s783_s7 + $0x20] sm:$0xff] %v800_v26 }
 0x140   : > { %v802_v27 = vld [vmem:[%s434_s30 + $0x18] sm:$0xff] }
 0x141   : > { %803 = vst [vmem:[%s783_s7 + $0x28] sm:$0xff] %v802_v27 }
 0x142 PF: > { %s14_s19 = sadd.s32 1, %s1103_s19   ;;  %s1327_s15 = smov %s1091_s16 }
 0x143   : > { %p11_p12 = scmp.ge.s32.totalorder %s14_s19, 4   ;;  %s1328_s16 = smov %s1170_s25 }
 0x144   : > { %s1329_s17 = smov %s1099_s18  ;;  %s1330_s18 = smov %s1332_s20 }
 0x145   :  { %13 = sbr.rel (!%p11_p12) target bundleno = 3 (0x3), region = 149 }

// kernel: regressor_forward.40
= control target key start
LH: loop header
LB: loop body
LE: loop exit
PB: predicated region body
PF: predicated region fallthrough
CT: control target
= control target key end

     0   :  { %s2253_s0 = inlined_call_operand.vmem [shape: bf16[16,4608], index: 0, kind: input, shape index: {}]   ;;  %s2254_s1 = inlined_call_operand.vmem [shape: bf16[4608,512], index: 1, kind: input, shape index: {}]   ;;  %s2255_s2 = inlined_call_operand.vmem [shape: f32[1,512], index: 2, kind: input, shape index: {}]   ;;  %s2256_s3 = inlined_call_operand.vmem [shape: f32[1,512], index: 3, kind: input, shape index: {}]   ;;  %s2257_s4 = inlined_call_operand.vmem [shape: f32[16,512], index: 4, kind: input, shape index: {}]   ;;  %s2258_s5 = inlined_call_operand.vmem [shape: f32[16,512], index: 5, kind: output, shape index: {}]  }
   0x1   :  { %2262 = sst [smem:[#allocation11_spill]] %s2253_s0 }
   0x2   :  { %s1835_s18 = smov 0   ;;  %s1837_s19 = smov 0  }
   0x3   :  { %s1839_s20 = smov 0   ;;  %s1841_s21 = smov 0  }
   0x4   :  { %s1843_s22 = smov 0   ;;  %s1845_s23 = smov 0  }
   0x5   :  { %s1847_s24 = smov 0   ;;  %s1849_s25 = smov 0  }
   0x6   :  { %s1851_s26 = smov 0   ;;  %s1853_s27 = smov 0  }
   0x7   :  { %s1855_s28 = smov 0  }
   0x8 LB: > { %2263 = sst [smem:[#allocation7_spill]] %s1782_s23  ;;  %s1424_s29 = sadd.s32 4294967295, %s1802_s28   ;;  %s1802_s28 = sphi %s1855_s28, %s15_s28   ;;  %s1798_s27 = sphi %s1853_s27, %s2283_s27   ;;  %s1794_s26 = sphi %s1851_s26, %s2282_s26   ;;  %s1790_s25 = sphi %s1849_s25, %s2281_s25   ;;  %s1786_s24 = sphi %s1847_s24, %s2280_s24   ;;  %s1782_s23 = sphi %s1845_s23, %s2273_s23   ;;  %s1778_s22 = sphi %s1843_s22, %s2272_s22   ;;  %s1774_s21 = sphi %s1841_s21, %s2279_s21   ;;  %s1770_s20 = sphi %s1839_s20, %s2278_s20   ;;  %s1766_s19 = sphi %s1837_s19, %s2277_s19   ;;  %s1762_s18 = sphi %s1835_s18, %s2276_s18  }
   0x9   : > { %s27_s30 = sadd.s32 1, %s1794_s26  ;;  %s30_s6 = sadd.s32 1, %s1798_s27 }
   0xa   : > { %p28_p0 = scmp.ge.s32.totalorder %s27_s30, 9  ;;  %s43_s7 = sadd.s32 1, %s1782_s23 }
   0xb   : > { %p50_p1 = scmp.ne.s32.totalorder %s1782_s23, %s1778_s22  ;;  %p51_p2 = scmp.eq.s32.totalorder %s1802_s28, 0 }
   0xc   : > { %s2285_s30 = smov (%p28_p0, %s27_s30), 0  ;;  %s2287_s6 = smov (!%p28_p0, %s30_s6), %s1798_s27 }
   0xd   : > { %2264 = sst [smem:[#allocation8_spill]] %s2285_s30  ;;  %s39_s8 = ssub.s32 %s1794_s26, %s2285_s30 }
   0xe   : > { %p32_p3 = scmp.ge.s32.totalorder %s2287_s6, 2  ;;  %p41_p4 = scmp.eq.s32.totalorder %s39_s8, 0 }
   0xf   : > { %p1904_p5 = por %p51_p2, %p50_p1  ;;  %s71_s10 = sadd.s32 1, %s1774_s21 }
  0x10   : > { %s2289_s6 = smov (%p32_p3, %s2287_s6), 0  ;;  %p78_p6 = scmp.ne.s32.totalorder %s1774_s21, %s1770_s20 }
  0x11   : > { %2266 = sst [smem:[#allocation9_spill]] %s2289_s6  ;;  %s67_s12 = ssub.s32 %s1798_s27, %s2289_s6 }
  0x12   : > { %s1912_s11 = scalar_select %p41_p4, %s1782_s23, %s43_s7  }
  0x13   : > { %s68_s13 = sor.u32 %s67_s12, %s39_s8  ;;  %p149_p7 = scmp.eq.s32.totalorder %s67_s12, 0 }
  0x14   : > { %2267 = sst [smem:[#allocation10_spill]] %s1912_s11  ;;  %p69_p8 = scmp.eq.s32.totalorder %s68_s13, 0 }
  0x15   : > { %p1920_p9 = por %p78_p6, %p51_p2  ;;  %s151_s15 = sadd.s32 1, %s1766_s19 }
  0x16   : > { %p158_p10 = scmp.ne.s32.totalorder %s1766_s19, %s1762_s18  ;;  %p190_p12 = scmp.eq.s32.totalorder %s1424_s29, 17 }
  0x17   : > { %s1928_s16 = scalar_select %p69_p8, %s1774_s21, %s71_s10  }
  0x18   : > { %s1931_s17 = scalar_select %p149_p7, %s1766_s19, %s151_s15  }
  0x19   : > { %p1935_p11 = por %p158_p10, %p51_p2  ;;  %p1939_p13 = por %p190_p12, %p158_p10 }
  0x1a   : > { %p1427_p0 = scmp.ge.s32.totalorder %s1802_s28, 18 }
  0x1c   : > { %212 = sbr.rel (%p1427_p0) target bundleno = 90 (0x5a), region = 16 }
  0x21   : > { %215 = sbr.rel (!%p1904_p5) target bundleno = 45 (0x2d), region = 20  ;;  %s217_s10 = sand.u32 (%p1904_p5), 1, %s1782_s23  }
  0x22   : > { %s1521_s12 = sshll.u32 (%p1904_p5), %s1794_s26, 4  ;;  %s1428_s13 = sshll.u32 (%p1904_p5), %s217_s10, 5 }
  0x23   : > { %s2271_s0 = sld [smem:[#allocation11_spill]] (%p1904_p5)  ;;  %s219_s29 = scalar_lea.vmem (%p1904_p5), [#allocation3], %s1428_s13 }
  0x29   : > { %s225_s30 = scalar_lea.vmem %s2271_s0, %s1521_s12 }
  0x2a   : > { %v238_v0 = vld [vmem:[%s225_s30] sm:$0xff]  ;;  %v240_v1 = vld [vmem:[%s225_s30 + $0x8] sm:$0xff]  ;;  %v242_v2 = vld [vmem:[%s225_s30 + $0x90] sm:$0xff] }
  0x2b   : > { %239 = vst [vmem:[%s219_s29] sm:$0xff] %v238_v0  ;;  %241 = vst [vmem:[%s219_s29 + $0x8] sm:$0xff] %v240_v1  ;;  %v244_v3 = vld [vmem:[%s225_s30 + $0x98] sm:$0xff] }
  0x2c   : > { %243 = vst [vmem:[%s219_s29 + $0x10] sm:$0xff] %v242_v2  ;;  %245 = vst [vmem:[%s219_s29 + $0x18] sm:$0xff] %v244_v3 }
  0x2d PF: > { %251 = sbr.rel (!%p1920_p9) target bundleno = 84 (0x54), region = 43  ;;  %s253_s9 = sand.u32 (%p1920_p9), 1, %s1774_s21  }
  0x2e   : > { %s1433_s10 = sshll.u32 (%p1920_p9), %s1798_s27, 1  ;;  %s1431_s6 = sshll.u32 (%p1920_p9), %s253_s9, 9 }
  0x2f   : > { %s1522_s12 = sshll.u32 (%p1920_p9), %s1794_s26, 8  ;;  %s1964_s30 = scalar_lea.vmem (%p1920_p9), [#allocation4], %s1431_s6 }
  0x30   : > { %s259_s15 = sadd.s32 (%p1920_p9), %s1522_s12, %s1433_s10 }
  0x31   : > { %s1435_s0 = sshll.u32 (%p1920_p9), %s259_s15, 2 }
  0x32   : > { %s1959_s23 = scalar_lea.vmem %s2254_s1, %s1435_s0 }
  0x33   : > { %v416_v4 = vld [vmem:[%s1959_s23] sm:$0xff]  ;;  %v418_v5 = vld [vmem:[%s1959_s23 + $0x10] sm:$0xff] }
  0x34   : > { %v420_v6 = vld [vmem:[%s1959_s23 + $0x20] sm:$0xff]  ;;  %417 = vst [vmem:[%s1964_s30] sm:$0xff] %v416_v4  ;;  %419 = vst [vmem:[%s1964_s30 + $0x8] sm:$0xff] %v418_v5  ;;  %v422_v7 = vld [vmem:[%s1959_s23 + $0x30] sm:$0xff] }
  0x35   : > { %421 = vst [vmem:[%s1964_s30 + $0x10] sm:$0xff] %v420_v6  ;;  %v424_v8 = vld [vmem:[%s1959_s23 + $0x40] sm:$0xff]  ;;  %v426_v9 = vld [vmem:[%s1959_s23 + $0x50] sm:$0xff]  ;;  %423 = vst [vmem:[%s1964_s30 + $0x18] sm:$0xff] %v422_v7 }
  0x36   : > { %425 = vst [vmem:[%s1964_s30 + $0x20] sm:$0xff] %v424_v8  ;;  %427 = vst [vmem:[%s1964_s30 + $0x28] sm:$0xff] %v426_v9  ;;  %v428_v10 = vld [vmem:[%s1959_s23 + $0x60] sm:$0xff]  ;;  %v430_v11 = vld [vmem:[%s1959_s23 + $0x70] sm:$0xff] }
  0x37   : > { %v432_v12 = vld [vmem:[%s1959_s23 + $0x80] sm:$0xff]  ;;  %429 = vst [vmem:[%s1964_s30 + $0x30] sm:$0xff] %v428_v10  ;;  %431 = vst [vmem:[%s1964_s30 + $0x38] sm:$0xff] %v430_v11  ;;  %v434_v13 = vld [vmem:[%s1959_s23 + $0x90] sm:$0xff] }
  0x38   : > { %433 = vst [vmem:[%s1964_s30 + $0x40] sm:$0xff] %v432_v12  ;;  %v436_v14 = vld [vmem:[%s1959_s23 + $0xa0] sm:$0xff]  ;;  %v438_v15 = vld [vmem:[%s1959_s23 + $0xb0] sm:$0xff]  ;;  %435 = vst [vmem:[%s1964_s30 + $0x48] sm:$0xff] %v434_v13 }
  0x39   : > { %437 = vst [vmem:[%s1964_s30 + $0x50] sm:$0xff] %v436_v14  ;;  %439 = vst [vmem:[%s1964_s30 + $0x58] sm:$0xff] %v438_v15  ;;  %v440_v16 = vld [vmem:[%s1959_s23 + $0xc0] sm:$0xff]  ;;  %v442_v17 = vld [vmem:[%s1959_s23 + $0xd0] sm:$0xff] }
  0x3a   : > { %v444_v18 = vld [vmem:[%s1959_s23 + $0xe0] sm:$0xff]  ;;  %441 = vst [vmem:[%s1964_s30 + $0x60] sm:$0xff] %v440_v16  ;;  %443 = vst [vmem:[%s1964_s30 + $0x68] sm:$0xff] %v442_v17  ;;  %v446_v19 = vld [vmem:[%s1959_s23 + $0xf0] sm:$0xff] }
  0x3b   : > { %445 = vst [vmem:[%s1964_s30 + $0x70] sm:$0xff] %v444_v18  ;;  %v448_v20 = vld [vmem:[%s1959_s23 + $0x100] sm:$0xff]  ;;  %v450_v21 = vld [vmem:[%s1959_s23 + $0x110] sm:$0xff]  ;;  %447 = vst [vmem:[%s1964_s30 + $0x78] sm:$0xff] %v446_v19 }
  0x3c   : > { %449 = vst [vmem:[%s1964_s30 + $0x80] sm:$0xff] %v448_v20  ;;  %451 = vst [vmem:[%s1964_s30 + $0x88] sm:$0xff] %v450_v21  ;;  %v452_v22 = vld [vmem:[%s1959_s23 + $0x120] sm:$0xff]  ;;  %v454_v23 = vld [vmem:[%s1959_s23 + $0x130] sm:$0xff] }
  0x3d   : > { %v456_v24 = vld [vmem:[%s1959_s23 + $0x140] sm:$0xff]  ;;  %453 = vst [vmem:[%s1964_s30 + $0x90] sm:$0xff] %v452_v22  ;;  %455 = vst [vmem:[%s1964_s30 + $0x98] sm:$0xff] %v454_v23  ;;  %v458_v25 = vld [vmem:[%s1959_s23 + $0x150] sm:$0xff] }
  0x3e   : > { %457 = vst [vmem:[%s1964_s30 + $0xa0] sm:$0xff] %v456_v24  ;;  %v460_v26 = vld [vmem:[%s1959_s23 + $0x160] sm:$0xff]  ;;  %v462_v27 = vld [vmem:[%s1959_s23 + $0x170] sm:$0xff]  ;;  %459 = vst [vmem:[%s1964_s30 + $0xa8] sm:$0xff] %v458_v25 }
  0x3f   : > { %461 = vst [vmem:[%s1964_s30 + $0xb0] sm:$0xff] %v460_v26  ;;  %463 = vst [vmem:[%s1964_s30 + $0xb8] sm:$0xff] %v462_v27  ;;  %v464_v28 = vld [vmem:[%s1959_s23 + $0x180] sm:$0xff]  ;;  %v466_v29 = vld [vmem:[%s1959_s23 + $0x190] sm:$0xff] }
  0x40   : > { %v468_v30 = vld [vmem:[%s1959_s23 + $0x1a0] sm:$0xff]  ;;  %465 = vst [vmem:[%s1964_s30 + $0xc0] sm:$0xff] %v464_v28  ;;  %467 = vst [vmem:[%s1964_s30 + $0xc8] sm:$0xff] %v466_v29  ;;  %v470_v31 = vld [vmem:[%s1959_s23 + $0x1b0] sm:$0xff] }
  0x41   : > { %469 = vst [vmem:[%s1964_s30 + $0xd0] sm:$0xff] %v468_v30  ;;  %v472_v32 = vld [vmem:[%s1959_s23 + $0x1c0] sm:$0xff]  ;;  %v474_v33 = vld [vmem:[%s1959_s23 + $0x1d0] sm:$0xff]  ;;  %471 = vst [vmem:[%s1964_s30 + $0xd8] sm:$0xff] %v470_v31 }
  0x42   : > { %473 = vst [vmem:[%s1964_s30 + $0xe0] sm:$0xff] %v472_v32  ;;  %475 = vst [vmem:[%s1964_s30 + $0xe8] sm:$0xff] %v474_v33  ;;  %v476_v34 = vld [vmem:[%s1959_s23 + $0x1e0] sm:$0xff]  ;;  %v478_v35 = vld [vmem:[%s1959_s23 + $0x1f0] sm:$0xff] }
  0x43   : > { %v480_v36 = vld [vmem:[%s1959_s23 + $0x200] sm:$0xff]  ;;  %477 = vst [vmem:[%s1964_s30 + $0xf0] sm:$0xff] %v476_v34  ;;  %479 = vst [vmem:[%s1964_s30 + $0xf8] sm:$0xff] %v478_v35  ;;  %v482_v37 = vld [vmem:[%s1959_s23 + $0x210] sm:$0xff] }
  0x44   : > { %481 = vst [vmem:[%s1964_s30 + $0x100] sm:$0xff] %v480_v36  ;;  %v484_v38 = vld [vmem:[%s1959_s23 + $0x220] sm:$0xff]  ;;  %v486_v39 = vld [vmem:[%s1959_s23 + $0x230] sm:$0xff]  ;;  %483 = vst [vmem:[%s1964_s30 + $0x108] sm:$0xff] %v482_v37 }
  0x45   : > { %485 = vst [vmem:[%s1964_s30 + $0x110] sm:$0xff] %v484_v38  ;;  %487 = vst [vmem:[%s1964_s30 + $0x118] sm:$0xff] %v486_v39  ;;  %v488_v40 = vld [vmem:[%s1959_s23 + $0x240] sm:$0xff]  ;;  %v490_v41 = vld [vmem:[%s1959_s23 + $0x250] sm:$0xff] }
  0x46   : > { %v492_v42 = vld [vmem:[%s1959_s23 + $0x260] sm:$0xff]  ;;  %489 = vst [vmem:[%s1964_s30 + $0x120] sm:$0xff] %v488_v40  ;;  %491 = vst [vmem:[%s1964_s30 + $0x128] sm:$0xff] %v490_v41  ;;  %v494_v43 = vld [vmem:[%s1959_s23 + $0x270] sm:$0xff] }
  0x47   : > { %493 = vst [vmem:[%s1964_s30 + $0x130] sm:$0xff] %v492_v42  ;;  %v496_v44 = vld [vmem:[%s1959_s23 + $0x280] sm:$0xff]  ;;  %v498_v45 = vld [vmem:[%s1959_s23 + $0x290] sm:$0xff]  ;;  %495 = vst [vmem:[%s1964_s30 + $0x138] sm:$0xff] %v494_v43 }
  0x48   : > { %497 = vst [vmem:[%s1964_s30 + $0x140] sm:$0xff] %v496_v44  ;;  %499 = vst [vmem:[%s1964_s30 + $0x148] sm:$0xff] %v498_v45  ;;  %v500_v46 = vld [vmem:[%s1959_s23 + $0x2a0] sm:$0xff]  ;;  %v502_v47 = vld [vmem:[%s1959_s23 + $0x2b0] sm:$0xff] }
  0x49   : > { %v504_v48 = vld [vmem:[%s1959_s23 + $0x2c0] sm:$0xff]  ;;  %501 = vst [vmem:[%s1964_s30 + $0x150] sm:$0xff] %v500_v46  ;;  %503 = vst [vmem:[%s1964_s30 + $0x158] sm:$0xff] %v502_v47  ;;  %v506_v49 = vld [vmem:[%s1959_s23 + $0x2d0] sm:$0xff] }
  0x4a   : > { %505 = vst [vmem:[%s1964_s30 + $0x160] sm:$0xff] %v504_v48  ;;  %v508_v50 = vld [vmem:[%s1959_s23 + $0x2e0] sm:$0xff]  ;;  %v510_v51 = vld [vmem:[%s1959_s23 + $0x2f0] sm:$0xff]  ;;  %507 = vst [vmem:[%s1964_s30 + $0x168] sm:$0xff] %v506_v49 }
  0x4b   : > { %509 = vst [vmem:[%s1964_s30 + $0x170] sm:$0xff] %v508_v50  ;;  %511 = vst [vmem:[%s1964_s30 + $0x178] sm:$0xff] %v510_v51  ;;  %v512_v52 = vld [vmem:[%s1959_s23 + $0x300] sm:$0xff]  ;;  %v514_v53 = vld [vmem:[%s1959_s23 + $0x310] sm:$0xff] }
  0x4c   : > { %v516_v54 = vld [vmem:[%s1959_s23 + $0x320] sm:$0xff]  ;;  %513 = vst [vmem:[%s1964_s30 + $0x180] sm:$0xff] %v512_v52  ;;  %515 = vst [vmem:[%s1964_s30 + $0x188] sm:$0xff] %v514_v53  ;;  %v518_v55 = vld [vmem:[%s1959_s23 + $0x330] sm:$0xff] }
  0x4d   : > { %517 = vst [vmem:[%s1964_s30 + $0x190] sm:$0xff] %v516_v54  ;;  %v520_v56 = vld [vmem:[%s1959_s23 + $0x340] sm:$0xff]  ;;  %v522_v57 = vld [vmem:[%s1959_s23 + $0x350] sm:$0xff]  ;;  %519 = vst [vmem:[%s1964_s30 + $0x198] sm:$0xff] %v518_v55 }
  0x4e   : > { %521 = vst [vmem:[%s1964_s30 + $0x1a0] sm:$0xff] %v520_v56  ;;  %523 = vst [vmem:[%s1964_s30 + $0x1a8] sm:$0xff] %v522_v57  ;;  %v524_v58 = vld [vmem:[%s1959_s23 + $0x360] sm:$0xff]  ;;  %v526_v59 = vld [vmem:[%s1959_s23 + $0x370] sm:$0xff] }
  0x4f   : > { %v528_v60 = vld [vmem:[%s1959_s23 + $0x380] sm:$0xff]  ;;  %525 = vst [vmem:[%s1964_s30 + $0x1b0] sm:$0xff] %v524_v58  ;;  %527 = vst [vmem:[%s1964_s30 + $0x1b8] sm:$0xff] %v526_v59  ;;  %v530_v61 = vld [vmem:[%s1959_s23 + $0x390] sm:$0xff] }
  0x50   : > { %529 = vst [vmem:[%s1964_s30 + $0x1c0] sm:$0xff] %v528_v60  ;;  %v532_v62 = vld [vmem:[%s1959_s23 + $0x3a0] sm:$0xff]  ;;  %v534_v63 = vld [vmem:[%s1959_s23 + $0x3b0] sm:$0xff]  ;;  %531 = vst [vmem:[%s1964_s30 + $0x1c8] sm:$0xff] %v530_v61 }
  0x51   : > { %533 = vst [vmem:[%s1964_s30 + $0x1d0] sm:$0xff] %v532_v62  ;;  %535 = vst [vmem:[%s1964_s30 + $0x1d8] sm:$0xff] %v534_v63  ;;  %v536_v0 = vld [vmem:[%s1959_s23 + $0x3c0] sm:$0xff]  ;;  %v538_v1 = vld [vmem:[%s1959_s23 + $0x3d0] sm:$0xff] }
  0x52   : > { %v540_v2 = vld [vmem:[%s1959_s23 + $0x3e0] sm:$0xff]  ;;  %537 = vst [vmem:[%s1964_s30 + $0x1e0] sm:$0xff] %v536_v0  ;;  %539 = vst [vmem:[%s1964_s30 + $0x1e8] sm:$0xff] %v538_v1  ;;  %v542_v3 = vld [vmem:[%s1959_s23 + $0x3f0] sm:$0xff] }
  0x53   : > { %541 = vst [vmem:[%s1964_s30 + $0x1f0] sm:$0xff] %v540_v2  ;;  %543 = vst [vmem:[%s1964_s30 + $0x1f8] sm:$0xff] %v542_v3 }
  0x54 PF: > { %565 = sbr.rel (!%p1935_p11) target bundleno = 90 (0x5a), region = 89  ;;  %s567_s0 = sand.u32 (%p1935_p11), 1, %s1766_s19  }
  0x55   : > { %s1523_s11 = sshll.u32 (%p1935_p11), %s1798_s27, 4  ;;  %s1436_s14 = sshll.u32 (%p1935_p11), %s567_s0, 5 }
  0x56   : > { %s575_s10 = scalar_lea.vmem (%p1935_p11), %s2257_s4, %s1523_s11  ;;  %s569_s6 = scalar_lea.vmem (%p1935_p11), [#allocation5], %s1436_s14 }
  0x57   : > { %v588_v4 = vld [vmem:[%s575_s10] sm:$0xff] (%p1935_p11)  ;;  %v590_v5 = vld [vmem:[%s575_s10 + $0x8] sm:$0xff] (%p1935_p11) }
  0x58   : > { %v592_v6 = vld [vmem:[%s575_s10 + $0x20] sm:$0xff] (%p1935_p11)  ;;  %589 = vst [vmem:[%s569_s6] sm:$0xff] (%p1935_p11), %v588_v4  ;;  %591 = vst [vmem:[%s569_s6 + $0x8] sm:$0xff] (%p1935_p11), %v590_v5  ;;  %v594_v7 = vld [vmem:[%s575_s10 + $0x28] sm:$0xff] (%p1935_p11) }
  0x59   : > { %593 = vst [vmem:[%s569_s6 + $0x10] sm:$0xff] %v592_v6  ;;  %595 = vst [vmem:[%s569_s6 + $0x18] sm:$0xff] %v594_v7 }
  0x5a PF: > { %p1439_p1 = scmp.ge.s32.totalorder %s1802_s28, 1  ;;  %p600_p2 = scmp.lt.s32.totalorder %s1802_s28, 19 }
  0x5c   : > { %p601_p3 = pnand %p1439_p1, %p600_p2 }
  0x5d   : > { %s607_s23 = sand.u32 (!%p601_p3), 1, %s1778_s22   ;;  %s614_s7 = sand.u32 (!%p601_p3), 1, %s1770_s20  }
  0x5e   : > { %604 = sbr.rel (%p601_p3) target bundleno = 407 (0x197), region = 112  ;;  %s1440_s12 = sshll.u32 (!%p601_p3), %s607_s23, 5 }
  0x5f   : > { %s1441_s15 = sshll.u32 (!%p601_p3), %s614_s7, 9  ;;  %s621_s13 = sand.u32 (!%p601_p3), 1, %s1762_s18  }
  0x60   : > { %s1444_s30 = sshll.u32 (!%p601_p3), %s1790_s25, 1  ;;  %s1442_s0 = sshll.u32 (!%p601_p3), %s621_s13, 5 }
  0x61   : > { %p668_p4 = scmp.lt.s32.totalorder (!%p601_p3), %s1444_s30, 3  ;;  %s2114_s22 = scalar_lea.vmem (!%p601_p3), [#allocation3], %s1440_s12 }
  0x62   : > { %s2116_s20 = scalar_lea.vmem (!%p601_p3), [#allocation4], %s1441_s15  ;;  %s2118_s18 = scalar_lea.vmem (!%p601_p3), [#allocation5], %s1442_s0 }
  0x63   : > { %s2291_s30 = smov (!%p668_p4, %s1444_s30), 3  ;;  %s2120_s23 = scalar_lea.vmem [#allocation6], %s1442_s0 }
  0x64   : > { %s670_s29 = scalar_lea.vmem %s2255_s2, %s2291_s30  ;;  %s675_s6 = scalar_lea.vmem %s2256_s3, %s2291_s30 }
  0x65   : > { %p1446_p5 = scmp.ne.s32.totalorder %s1786_s24, 0 }
  0x67   : > { %684 = sbr.rel (%p1446_p5) target bundleno = 111 (0x6f), region = 128 }
  0x6c   : > { %v1804_v8 = vmov 0.0  }
  0x6d   : > { %685 = vst [vmem:[#allocation2 + $0x10] sm:$0xff] %v1804_v8  ;;  %686 = vst [vmem:[#allocation2] sm:$0xff] %v1804_v8 }
  0x6e   : > { %687 = vst [vmem:[#allocation2 + $0x18] sm:$0xff] %v1804_v8  ;;  %688 = vst [vmem:[#allocation2 + $0x8] sm:$0xff] %v1804_v8 }
  0x6f PF: > { %v1614_v9 = vld [vmem:[%s2116_s20 + $0x74] ss:$8 sps:$4 sm:$0xff]   ;;  %v1618_v11 = vld [vmem:[%s2116_s20 + $0x70] ss:$8 sps:$4 sm:$0xff]   ;;  %v1620_v13 = vld [vmem:[%s2116_s20 + $0x64] ss:$8 sps:$4 sm:$0xff]  }
  0x70   : > { %v1616_v10 = vld [vmem:[%s2116_s20 + $0x174] ss:$8 sps:$4 sm:$0xff]   ;;  %1101 = vmatprep.subr.bf16.mxu0 %v1614_v9  ;;  %v1619_v12 = vld [vmem:[%s2116_s20 + $0x170] ss:$8 sps:$4 sm:$0xff]   ;;  %v1622_v14 = vld [vmem:[%s2116_s20 + $0x164] ss:$8 sps:$4 sm:$0xff]  }
  0x71   : > { %1144 = vmatprep.subr.bf16.mxu1 %v1616_v10  ;;  %1102 = vmatpush1.bf16.msra.mxu0 %v1618_v11  ;;  %v1624_v15 = vld [vmem:[%s2116_s20 + $0x60] ss:$8 sps:$4 sm:$0xff]   ;;  %v1626_v17 = vld [vmem:[%s2116_s20 + $0x54] ss:$8 sps:$4 sm:$0xff]   ;;  %v1630_v19 = vld [vmem:[%s2116_s20 + $0x50] ss:$8 sps:$4 sm:$0xff]  }
  0x72   : > { %1145 = vmatpush1.bf16.msra.mxu1 %v1619_v12  ;;  %1103 = vmatprep.subr.bf16.mxu0 %v1620_v13  ;;  %v1625_v16 = vld [vmem:[%s2116_s20 + $0x160] ss:$8 sps:$4 sm:$0xff]   ;;  %v1628_v18 = vld [vmem:[%s2116_s20 + $0x154] ss:$8 sps:$4 sm:$0xff]   ;;  %v1631_v20 = vld [vmem:[%s2116_s20 + $0x150] ss:$8 sps:$4 sm:$0xff]  }
  0x73   : > { %1146 = vmatprep.subr.bf16.mxu1 %v1622_v14  ;;  %v1632_v21 = vld [vmem:[%s2116_s20 + $0x44] ss:$8 sps:$4 sm:$0xff]   ;;  %v1636_v23 = vld [vmem:[%s2116_s20 + $0x40] ss:$8 sps:$4 sm:$0xff]   ;;  %v1638_v25 = vld [vmem:[%s2116_s20 + $0x34] ss:$8 sps:$4 sm:$0xff]  }
  0x74   : > { %v1634_v22 = vld [vmem:[%s2116_s20 + $0x144] ss:$8 sps:$4 sm:$0xff]   ;;  %v1637_v24 = vld [vmem:[%s2116_s20 + $0x140] ss:$8 sps:$4 sm:$0xff]   ;;  %v1640_v26 = vld [vmem:[%s2116_s20 + $0x134] ss:$8 sps:$4 sm:$0xff]  }
  0x75   : > { %1104 = vmatpush1.bf16.msra.mxu0 %v1624_v15  ;;  %v1642_v27 = vld [vmem:[%s2116_s20 + $0x30] ss:$8 sps:$4 sm:$0xff]   ;;  %v1644_v29 = vld [vmem:[%s2116_s20 + $0x24] ss:$8 sps:$4 sm:$0xff]   ;;  %v1648_v31 = vld [vmem:[%s2116_s20 + $0x20] ss:$8 sps:$4 sm:$0xff]  }
  0x76   : > { %1147 = vmatpush1.bf16.msra.mxu1 %v1625_v16  ;;  %1105 = vmatprep.subr.bf16.mxu0 %v1626_v17  ;;  %v1643_v28 = vld [vmem:[%s2116_s20 + $0x130] ss:$8 sps:$4 sm:$0xff]   ;;  %v1646_v30 = vld [vmem:[%s2116_s20 + $0x124] ss:$8 sps:$4 sm:$0xff]   ;;  %v1649_v32 = vld [vmem:[%s2116_s20 + $0x120] ss:$8 sps:$4 sm:$0xff]  }
  0x77   : > { %1148 = vmatprep.subr.bf16.mxu1 %v1628_v18  ;;  %v1650_v33 = vld [vmem:[%s2116_s20 + $0x14] ss:$8 sps:$4 sm:$0xff]   ;;  %v1654_v35 = vld [vmem:[%s2116_s20 + $0x10] ss:$8 sps:$4 sm:$0xff]   ;;  %v1656_v37 = vld [vmem:[%s2116_s20 + $0x4] ss:$8 sps:$4 sm:$0xff]  }
  0x78   : > { %v1652_v34 = vld [vmem:[%s2116_s20 + $0x114] ss:$8 sps:$4 sm:$0xff]   ;;  %v1655_v36 = vld [vmem:[%s2116_s20 + $0x110] ss:$8 sps:$4 sm:$0xff]   ;;  %v1658_v38 = vld [vmem:[%s2116_s20 + $0x104] ss:$8 sps:$4 sm:$0xff]  }
  0x79   : > { %1106 = vmatpush1.bf16.msra.mxu0 %v1630_v19  ;;  %v1660_v39 = vld [vmem:[%s2116_s20] ss:$8 sps:$4 sm:$0xff]   ;;  %v1662_v41 = vld [vmem:[%s2116_s20 + $0xf4] ss:$8 sps:$4 sm:$0xff]   ;;  %v1666_v43 = vld [vmem:[%s2116_s20 + $0xf0] ss:$8 sps:$4 sm:$0xff]  }
  0x7a   : > { %1149 = vmatpush1.bf16.msra.mxu1 %v1631_v20  ;;  %1107 = vmatprep.subr.bf16.mxu0 %v1632_v21  ;;  %v1661_v40 = vld [vmem:[%s2116_s20 + $0x100] ss:$8 sps:$4 sm:$0xff]   ;;  %v1664_v42 = vld [vmem:[%s2116_s20 + $0x1f4] ss:$8 sps:$4 sm:$0xff]   ;;  %v1667_v44 = vld [vmem:[%s2116_s20 + $0x1f0] ss:$8 sps:$4 sm:$0xff]  }
  0x7b   : > { %1150 = vmatprep.subr.bf16.mxu1 %v1634_v22  ;;  %v1668_v45 = vld [vmem:[%s2116_s20 + $0xe4] ss:$8 sps:$4 sm:$0xff]   ;;  %v1672_v47 = vld [vmem:[%s2116_s20 + $0xe0] ss:$8 sps:$4 sm:$0xff]   ;;  %v1674_v49 = vld [vmem:[%s2116_s20 + $0xd4] ss:$8 sps:$4 sm:$0xff]  }
  0x7c   : > { %v1670_v46 = vld [vmem:[%s2116_s20 + $0x1e4] ss:$8 sps:$4 sm:$0xff]   ;;  %v1673_v48 = vld [vmem:[%s2116_s20 + $0x1e0] ss:$8 sps:$4 sm:$0xff]   ;;  %v1676_v50 = vld [vmem:[%s2116_s20 + $0x1d4] ss:$8 sps:$4 sm:$0xff]  }
  0x7d   : > { %1108 = vmatpush1.bf16.msra.mxu0 %v1636_v23  ;;  %v1678_v51 = vld [vmem:[%s2116_s20 + $0xd0] ss:$8 sps:$4 sm:$0xff]   ;;  %v1680_v53 = vld [vmem:[%s2116_s20 + $0xc4] ss:$8 sps:$4 sm:$0xff]   ;;  %v1684_v55 = vld [vmem:[%s2116_s20 + $0xc0] ss:$8 sps:$4 sm:$0xff]  }
  0x7e   : > { %1151 = vmatpush1.bf16.msra.mxu1 %v1637_v24  ;;  %1109 = vmatprep.subr.bf16.mxu0 %v1638_v25  ;;  %v1679_v52 = vld [vmem:[%s2116_s20 + $0x1d0] ss:$8 sps:$4 sm:$0xff]   ;;  %v1682_v54 = vld [vmem:[%s2116_s20 + $0x1c4] ss:$8 sps:$4 sm:$0xff]   ;;  %v1685_v57 = vld [vmem:[%s2116_s20 + $0x1c0] ss:$8 sps:$4 sm:$0xff]  }
  0x7f   : > { %1152 = vmatprep.subr.bf16.mxu1 %v1640_v26  ;;  %v1712_v56 = vld [vmem:[%s2114_s22 + $0x4] ss:$16 sps:$4 sm:$0xff]   ;;  %v1715_v60 = vld [vmem:[%s2114_s22 + $0xc] ss:$16 sps:$4 sm:$0xff]   ;;  %v1690_v61 = vld [vmem:[%s2116_s20 + $0xb0] ss:$8 sps:$4 sm:$0xff]  }
  0x80   : > { %v1686_v58 = vld [vmem:[%s2116_s20 + $0xb4] ss:$8 sps:$4 sm:$0xff]   ;;  %1133 = vmatprep.mubr.bf16.mxu0 %v1712_v56  ;;  %1176 = vmatprep.mubr.bf16.mxu1 %v1715_v60  ;;  %v1691_v62 = vld [vmem:[%s2116_s20 + $0x1b0] ss:$8 sps:$4 sm:$0xff]   ;;  %v1692_v63 = vld [vmem:[%s2116_s20 + $0xa4] ss:$8 sps:$4 sm:$0xff]  }
  0x81   : > { %1110 = vmatpush1.bf16.msra.mxu0 %v1642_v27  ;;  %v1688_v59 = vld [vmem:[%s2116_s20 + $0x1b4] ss:$8 sps:$4 sm:$0xff]   ;;  %v1694_v0 = vld [vmem:[%s2116_s20 + $0x1a4] ss:$8 sps:$4 sm:$0xff]   ;;  %v1696_v1 = vld [vmem:[%s2116_s20 + $0xa0] ss:$8 sps:$4 sm:$0xff]  }
  0x82   : > { %1153 = vmatpush1.bf16.msra.mxu1 %v1643_v28  ;;  %1111 = vmatprep.subr.bf16.mxu0 %v1644_v29  ;;  %v1697_v2 = vld [vmem:[%s2116_s20 + $0x1a0] ss:$8 sps:$4 sm:$0xff]   ;;  %v1698_v3 = vld [vmem:[%s2116_s20 + $0x94] ss:$8 sps:$4 sm:$0xff]   ;;  %v1702_v5 = vld [vmem:[%s2116_s20 + $0x90] ss:$8 sps:$4 sm:$0xff]  }
  0x83   : > { %1154 = vmatprep.subr.bf16.mxu1 %v1646_v30  ;;  %v1700_v4 = vld [vmem:[%s2116_s20 + $0x194] ss:$8 sps:$4 sm:$0xff]   ;;  %v1703_v6 = vld [vmem:[%s2116_s20 + $0x190] ss:$8 sps:$4 sm:$0xff]   ;;  %v1704_v7 = vld [vmem:[%s2116_s20 + $0x84] ss:$8 sps:$4 sm:$0xff]  }
  0x84   : > { %v1706_v8 = vld [vmem:[%s2116_s20 + $0x184] ss:$8 sps:$4 sm:$0xff]   ;;  %v1708_v9 = vld [vmem:[%s2116_s20 + $0x80] ss:$8 sps:$4 sm:$0xff]   ;;  %v689_v14 = vld [vmem:[#allocation2 + $0x10] sm:$0xff]  ;;  %p1515_p6 = scmp.ne.s32.totalorder %s1786_s24, 8 }
  0x85   : > { %1112 = vmatpush1.bf16.msra.mxu0 %v1648_v31  ;;  %v1709_v10 = vld [vmem:[%s2116_s20 + $0x180] ss:$8 sps:$4 sm:$0xff]   ;;  %v691_v23 = vld [vmem:[#allocation2 + $0x18] sm:$0xff] }
  0x86   : > { %1155 = vmatpush1.bf16.msra.mxu1 %v1649_v32  ;;  %1113 = vmatprep.subr.bf16.mxu0 %v1650_v33  ;;  %v1710_v11 = vld [vmem:[%s2114_s22] ss:$16 sps:$4 sm:$0xff]   ;;  %v1713_v12 = vld [vmem:[%s2114_s22 + $0x8] ss:$16 sps:$4 sm:$0xff]  }
  0x87   : > { %1156 = vmatprep.subr.bf16.mxu1 %v1652_v34  ;;  %v690_v18 = vld [vmem:[#allocation2] sm:$0xff]  ;;  %v692_v28 = vld [vmem:[#allocation2 + $0x8] sm:$0xff] }
  0x89   : > { %1114 = vmatpush1.bf16.msra.mxu0 %v1654_v35 }
  0x8a   : > { %1157 = vmatpush1.bf16.msra.mxu1 %v1655_v36  ;;  %1115 = vmatprep.subr.bf16.mxu0 %v1656_v37 }
  0x8b   : > { %1158 = vmatprep.subr.bf16.mxu1 %v1658_v38 }
  0x8d   : > { %1116 = vmatpush1.bf16.msra.mxu0 %v1660_v39 }
  0x8e   : > { %1159 = vmatpush1.bf16.msra.mxu1 %v1661_v40  ;;  %1117 = vmatprep.subr.bf16.mxu0 %v1662_v41 }
  0x8f   : > { %1160 = vmatprep.subr.bf16.mxu1 %v1664_v42 }
  0x91   : > { %1118 = vmatpush2.bf16.msra.mxu0 %v1666_v43 }
  0x92   : > { %1161 = vmatpush2.bf16.msra.mxu1 %v1667_v44  ;;  %1119 = vmatprep.subr.bf16.mxu0 %v1668_v45 }
  0x93   : > { %1162 = vmatprep.subr.bf16.mxu1 %v1670_v46 }
  0x95   : > { %1120 = vmatpush2.bf16.msra.mxu0 %v1672_v47 }
  0x96   : > { %1163 = vmatpush2.bf16.msra.mxu1 %v1673_v48  ;;  %1121 = vmatprep.subr.bf16.mxu0 %v1674_v49 }
  0x97   : > { %1164 = vmatprep.subr.bf16.mxu1 %v1676_v50 }
  0x99   : > { %1122 = vmatpush2.bf16.msra.mxu0 %v1678_v51 }
  0x9a   : > { %1165 = vmatpush2.bf16.msra.mxu1 %v1679_v52  ;;  %1123 = vmatprep.subr.bf16.mxu0 %v1680_v53 }
  0x9b   : > { %1166 = vmatprep.subr.bf16.mxu1 %v1682_v54 }
  0x9d   : > { %1124 = vmatpush2.bf16.msra.mxu0 %v1684_v55 }
  0x9e   : > { %1167 = vmatpush2.bf16.msra.mxu1 %v1685_v57  ;;  %1125 = vmatprep.subr.bf16.mxu0 %v1686_v58 }
  0x9f   : > { %1168 = vmatprep.subr.bf16.mxu1 %v1688_v59 }
  0xa1   : > { %1126 = vmatpush2.bf16.msra.mxu0 %v1690_v61 }
  0xa2   : > { %1169 = vmatpush2.bf16.msra.mxu1 %v1691_v62  ;;  %1127 = vmatprep.subr.bf16.mxu0 %v1692_v63 }
  0xa3   : > { %1170 = vmatprep.subr.bf16.mxu1 %v1694_v0 }
  0xa5   : > { %1128 = vmatpush2.bf16.msra.mxu0 %v1696_v1 }
  0xa6   : > { %1171 = vmatpush2.bf16.msra.mxu1 %v1697_v2  ;;  %1129 = vmatprep.subr.bf16.mxu0 %v1698_v3 }
  0xa7   : > { %1172 = vmatprep.subr.bf16.mxu1 %v1700_v4 }
  0xa9   : > { %1130 = vmatpush2.bf16.msra.mxu0 %v1702_v5 }
  0xaa   : > { %1173 = vmatpush2.bf16.msra.mxu1 %v1703_v6  ;;  %1131 = vmatprep.subr.bf16.mxu0 %v1704_v7 }
  0xab   : > { %1174 = vmatprep.subr.bf16.mxu1 %v1706_v8 }
  0xad   : > { %1132 = vmatpush2.bf16.msra.mxu0 %v1708_v9 }
  0xae   : > { %1175 = vmatpush2.bf16.msra.mxu1 %v1709_v10 }
  0xb0   : > { %1134 = vmatmul.mubr.bf16.vlgmr.msra.gmra.mxu0 %v1710_v11 }
  0xb1   : > { %1177 = vmatmul.mubr.bf16.vlgmr.msra.gmra.mxu1 %v1713_v12 }
 0x170   : > { %v1135_v13 = vpop.f32.mrf.mxu0 }
 0x171   : > { %v1178_v15 = vpop.f32.mrf.mxu1 }
 0x172   : > { %v1179_v16 = vadd.f32 %v1178_v15, %v1135_v13  ;;  %v1137_v17 = vpop.f32.mrf.mxu0 }
 0x173   : > { %v1180_v19 = vpop.f32.mrf.mxu1 }
 0x174   : > { %v1187_v20 = vadd.f32 %v1179_v16, %v689_v14  ;;  %v1181_v21 = vadd.f32 %v1180_v19, %v1137_v17  ;;  %v1139_v22 = vpop.f32.mrf.mxu0 }
 0x175   : > { %v1182_v24 = vpop.f32.mrf.mxu1 }
 0x176   : > { %1191 = vst [vmem:[#allocation2 + $0x10] sm:$0xff] %v1187_v20  ;;  %v1188_v25 = vadd.f32 %v1181_v21, %v690_v18  ;;  %v1183_v26 = vadd.f32 %v1182_v24, %v1139_v22  ;;  %v1141_v27 = vpop.f32.mrf.mxu0 }
 0x177   : > { %v1184_v29 = vpop.f32.mrf.mxu1 }
 0x178   : > { %1192 = vst [vmem:[#allocation2] sm:$0xff] %v1188_v25  ;;  %v1189_v30 = vadd.f32 %v1183_v26, %v691_v23  ;;  %v1185_v31 = vadd.f32 %v1184_v29, %v1141_v27  ;;  %1198 = sbr.rel (%p1515_p6) target bundleno = 399 (0x18f), region = 132 }
 0x17a   : > { %1193 = vst [vmem:[#allocation2 + $0x18] sm:$0xff] %v1189_v30  ;;  %v1190_v32 = vadd.f32 %v1185_v31, %v692_v28 }
 0x17c   : > { %1194 = vst [vmem:[#allocation2 + $0x8] sm:$0xff] %v1190_v32 }
 0x17d   : > { %v1209_v33 = vlaneseq  ;;  %v1207_v35 = vld [vmem:[%s670_s29] sm:$0x3]  ;;  %v1199_v37 = vld [vmem:[#allocation2 + $0x10] sm:$0xff]  ;;  %v1204_v52 = vld [vmem:[%s2118_s18 + $0x8] sm:$0xff] }
 0x17e   : > { %v1223_v36 = vld [vmem:[%s675_s6] sm:$0x3]  ;;  %v1205_v53 = vld [vmem:[%s2118_s18 + $0x10] sm:$0xff]  ;;  %v1206_v54 = vld [vmem:[%s2118_s18 + $0x18] sm:$0xff] }
 0x17f   : > { %v1210_v34 = vshrl.u32 %v1209_v33, 7  ;;  %v1200_v40 = vld [vmem:[#allocation2] sm:$0xff] }
 0x180   : > { %v1203_v47 = vld [vmem:[%s2118_s18] sm:$0xff] }
 0x181   : > { %v1211_v38 = vsub.s32 0, %v1210_v34  ;;  %v1215_v39 = vsub.s32 1, %v1210_v34  ;;  %v1201_v41 = vld [vmem:[#allocation2 + $0x18] sm:$0xff] }
 0x183   : > { %v1202_v42 = vld [vmem:[#allocation2 + $0x8] sm:$0xff]  ;;  %v1212_v43 = vrot.slane %v1207_v35, %v1211_v38  ;;  %v1228_v44 = vrot.slane %v1223_v36, %v1211_v38  ;;  %v1216_v45 = vrot.slane %v1207_v35, %v1215_v39  ;;  %v1232_v46 = vrot.slane %v1223_v36, %v1215_v39 }
 0x185   : > { %v1219_v48 = vmul.f32 %v1212_v43, %v1199_v37  ;;  %v1220_v49 = vmul.f32 %v1216_v45, %v1200_v40  ;;  %v1221_v50 = vmul.f32 %v1212_v43, %v1201_v41  ;;  %v1222_v51 = vmul.f32 %v1216_v45, %v1202_v42 }
 0x187   : > { %v1235_v55 = vadd.f32 %v1228_v44, %v1219_v48  ;;  %v1236_v56 = vadd.f32 %v1232_v46, %v1220_v49  ;;  %v1237_v57 = vadd.f32 %v1228_v44, %v1221_v50  ;;  %v1238_v58 = vadd.f32 %v1232_v46, %v1222_v51 }
 0x189   : > { %v1239_v59 = vadd.f32 %v1235_v55, %v1203_v47  ;;  %v1240_v60 = vadd.f32 %v1236_v56, %v1204_v52  ;;  %v1241_v61 = vadd.f32 %v1237_v57, %v1205_v53  ;;  %v1242_v62 = vadd.f32 %v1238_v58, %v1206_v54 }
 0x18b   : > { %v1243_v63 = vmax.f32 %v1239_v59, 0.0  ;;  %v1244_v0 = vmax.f32 %v1240_v60, 0.0  ;;  %v1245_v1 = vmax.f32 %v1241_v61, 0.0  ;;  %v1246_v2 = vmax.f32 %v1242_v62, 0.0 }
 0x18d   : > { %1247 = vst [vmem:[%s2120_s23] sm:$0xff] %v1243_v63  ;;  %1248 = vst [vmem:[%s2120_s23 + $0x8] sm:$0xff] %v1244_v0 }
 0x18e   : > { %1249 = vst [vmem:[%s2120_s23 + $0x10] sm:$0xff] %v1245_v1  ;;  %1250 = vst [vmem:[%s2120_s23 + $0x18] sm:$0xff] %v1246_v2 }
 0x18f PF: > { %1257 = sbr.rel (!%p1939_p13) target bundleno = 407 (0x197), region = 136  ;;  %s1524_s24 = sshll.u32 (%p1939_p13), %s1790_s25, 4 }
 0x190   : > { %s1263_s11 = scalar_lea.vmem (%p1939_p13), %s2258_s5, %s1524_s24 }
 0x194   : > { %v1276_v3 = vld [vmem:[%s2120_s23] sm:$0xff]  ;;  %v1278_v4 = vld [vmem:[%s2120_s23 + $0x8] sm:$0xff] }
 0x195   : > { %v1280_v5 = vld [vmem:[%s2120_s23 + $0x10] sm:$0xff]  ;;  %v1282_v6 = vld [vmem:[%s2120_s23 + $0x18] sm:$0xff]  ;;  %1277 = vst [vmem:[%s1263_s11] sm:$0xff] %v1276_v3  ;;  %1279 = vst [vmem:[%s1263_s11 + $0x8] sm:$0xff] %v1278_v4 }
 0x196   : > { %1281 = vst [vmem:[%s1263_s11 + $0x20] sm:$0xff] %v1280_v5  ;;  %1283 = vst [vmem:[%s1263_s11 + $0x28] sm:$0xff] %v1282_v6 }
 0x197 PF: > { %s15_s28 = sadd.s32 1, %s1802_s28   ;;  %s2272_s22 = sld [smem:[#allocation7_spill]] }
 0x198   : > { %p12_p7 = scmp.ge.s32.totalorder %s15_s28, 20   ;;  %s2273_s23 = sld [smem:[#allocation10_spill]] }
 0x199   : > { %s2274_s8 = sld [smem:[#allocation8_spill]]  ;;  %s2276_s18 = smov %s1766_s19 }
 0x19a   : > { %s2275_s14 = sld [smem:[#allocation9_spill]]  ;;  %s2277_s19 = smov %s1931_s17 }
 0x19b   : > { %s2278_s20 = smov %s1774_s21  ;;  %s2279_s21 = smov %s1928_s16 }
 0x19c   : > { %s2280_s24 = smov %s1794_s26  ;;  %s2281_s25 = smov %s1798_s27 }
 0x19d   :  { %14 = sbr.rel (!%p12_p7) target bundleno = 8 (0x8), region = 212 }
 0x19f   : > { %s2282_s26 = smov %s2274_s8 }
 0x1a0   : > { %s2283_s27 = smov %s2275_s14 }

// kernel: regressor_forward.41
= control target key start
LH: loop header
LB: loop body
LE: loop exit
PB: predicated region body
PF: predicated region fallthrough
CT: control target
= control target key end

     0   :  { %s2111_s0 = inlined_call_operand.vmem [shape: bf16[16,4608], index: 0, kind: input, shape index: {}]   ;;  %s2112_s1 = inlined_call_operand.vmem [shape: bf16[4608,512], index: 1, kind: input, shape index: {}]   ;;  %s2113_s2 = inlined_call_operand.vmem [shape: f32[1,512], index: 2, kind: input, shape index: {}]   ;;  %s2114_s3 = inlined_call_operand.vmem [shape: f32[1,512], index: 3, kind: input, shape index: {}]   ;;  %s2115_s4 = inlined_call_operand.vmem [shape: f32[16,512], index: 4, kind: output, shape index: {}]  }
   0x1   :  { %2118 = sst [smem:[#allocation8_spill]] %s2111_s0 }
   0x2   :  { %2119 = sst [smem:[#allocation9_spill]] %s2112_s1 }
   0x3   :  { %s1716_s15 = smov 0   ;;  %s1718_s16 = smov 0  }
   0x4   :  { %s1720_s17 = smov 0   ;;  %s1722_s18 = smov 0  }
   0x5   :  { %s1724_s19 = smov 0   ;;  %s1726_s20 = smov 0  }
   0x6   :  { %s1728_s21 = smov 0   ;;  %s1730_s22 = smov 0  }
   0x7   :  { %s1732_s23 = smov 0   ;;  %s1734_s24 = smov 0  }
   0x8   :  { %s1736_s25 = smov 0  }
   0x9 LB: > { %s1315_s26 = sadd.s32 4294967295, %s1688_s25   ;;  %s26_s27 = sadd.s32 1, %s1680_s23  ;;  %s1688_s25 = sphi %s1736_s25, %s14_s25   ;;  %s1684_s24 = sphi %s1734_s24, %s2138_s24   ;;  %s1680_s23 = sphi %s1732_s23, %s2137_s23   ;;  %s1676_s22 = sphi %s1730_s22, %s2136_s22   ;;  %s1672_s21 = sphi %s1728_s21, %s2135_s21   ;;  %s1668_s20 = sphi %s1726_s20, %s2134_s20   ;;  %s1664_s19 = sphi %s1724_s19, %s2133_s19   ;;  %s1660_s18 = sphi %s1722_s18, %s2132_s18   ;;  %s1656_s17 = sphi %s1720_s17, %s2131_s17   ;;  %s1652_s16 = sphi %s1718_s16, %s2130_s16   ;;  %s1648_s15 = sphi %s1716_s15, %s2129_s15  }
   0xa   : > { %p27_p0 = scmp.ge.s32.totalorder %s26_s27, 9  ;;  %s29_s28 = sadd.s32 1, %s1684_s24 }
   0xb   : > { %s42_s29 = sadd.s32 1, %s1668_s20  ;;  %p49_p1 = scmp.ne.s32.totalorder %s1668_s20, %s1664_s19 }
   0xc   : > { %s2140_s27 = smov (%p27_p0, %s26_s27), 0  ;;  %s2142_s28 = smov (!%p27_p0, %s29_s28), %s1684_s24 }
   0xd   : > { %2120 = sst [smem:[#allocation6_spill]] %s2140_s27  ;;  %s38_s30 = ssub.s32 %s1680_s23, %s2140_s27 }
   0xe   : > { %p50_p2 = scmp.eq.s32.totalorder %s1688_s25, 0  ;;  %p31_p3 = scmp.ge.s32.totalorder %s2142_s28, 2 }
   0xf   : > { %p40_p4 = scmp.eq.s32.totalorder %s38_s30, 0  ;;  %s70_s6 = sadd.s32 1, %s1660_s18 }
  0x10   : > { %p1783_p5 = por %p50_p2, %p49_p1  ;;  %s2144_s28 = smov (%p31_p3, %s2142_s28), 0 }
  0x11   : > { %2122 = sst [smem:[#allocation7_spill]] %s2144_s28  ;;  %s66_s8 = ssub.s32 %s1684_s24, %s2144_s28 }
  0x12   : > { %s1791_s7 = scalar_select %p40_p4, %s1668_s20, %s42_s29  }
  0x13   : > { %p77_p6 = scmp.ne.s32.totalorder %s1660_s18, %s1656_s17  ;;  %s67_s9 = sor.u32 %s66_s8, %s38_s30 }
  0x14   : > { %p148_p7 = scmp.eq.s32.totalorder %s66_s8, 0  ;;  %p68_p8 = scmp.eq.s32.totalorder %s67_s9, 0 }
  0x15   : > { %p1797_p9 = por %p77_p6, %p50_p2  ;;  %s150_s11 = sadd.s32 1, %s1652_s16 }
  0x16   : > { %p160_p10 = scmp.ne.s32.totalorder %s1652_s16, %s1648_s15  ;;  %p161_p11 = scmp.eq.s32.totalorder %s1315_s26, 17 }
  0x17   : > { %s1805_s12 = scalar_select %p68_p8, %s1660_s18, %s70_s6  }
  0x18   : > { %s1808_s13 = scalar_select %p148_p7, %s1652_s16, %s150_s11  }
  0x19   : > { %p1810_p12 = por %p161_p11, %p160_p10  ;;  %p1318_p13 = scmp.ge.s32.totalorder %s1688_s25, 18 }
  0x1b   : > { %183 = sbr.rel (%p1318_p13) target bundleno = 86 (0x56), region = 16 }
  0x20   : > { %186 = sbr.rel (!%p1783_p5) target bundleno = 44 (0x2c), region = 20  ;;  %s188_s29 = sand.u32 (%p1783_p5), 1, %s1668_s20  }
  0x21   : > { %s1408_s30 = sshll.u32 (%p1783_p5), %s1680_s23, 4  ;;  %s1319_s8 = sshll.u32 (%p1783_p5), %s188_s29, 5 }
  0x22   : > { %s2125_s0 = sld [smem:[#allocation8_spill]] (%p1783_p5)  ;;  %s190_s26 = scalar_lea.vmem (%p1783_p5), [#allocation3], %s1319_s8 }
  0x28   : > { %s196_s11 = scalar_lea.vmem %s2125_s0, %s1408_s30 }
  0x29   : > { %v209_v0 = vld [vmem:[%s196_s11] sm:$0xff]  ;;  %v211_v1 = vld [vmem:[%s196_s11 + $0x8] sm:$0xff]  ;;  %v213_v2 = vld [vmem:[%s196_s11 + $0x90] sm:$0xff] }
  0x2a   : > { %210 = vst [vmem:[%s190_s26] sm:$0xff] %v209_v0  ;;  %212 = vst [vmem:[%s190_s26 + $0x8] sm:$0xff] %v211_v1  ;;  %v215_v3 = vld [vmem:[%s196_s11 + $0x98] sm:$0xff] }
  0x2b   : > { %214 = vst [vmem:[%s190_s26 + $0x10] sm:$0xff] %v213_v2  ;;  %216 = vst [vmem:[%s190_s26 + $0x18] sm:$0xff] %v215_v3 }
  0x2c PF: > { %222 = sbr.rel (!%p1797_p9) target bundleno = 86 (0x56), region = 43  ;;  %s224_s5 = sand.u32 (%p1797_p9), 1, %s1660_s18  }
  0x2d   : > { %s1324_s29 = sshll.u32 (%p1797_p9), %s1684_s24, 1  ;;  %s1322_s6 = sshll.u32 (%p1797_p9), %s224_s5, 9 }
  0x2e   : > { %s1409_s30 = sshll.u32 (%p1797_p9), %s1680_s23, 8  ;;  %s2126_s1 = sld [smem:[#allocation9_spill]] (%p1797_p9) }
  0x2f   : > { %s230_s9 = sadd.s32 (%p1797_p9), %s1409_s30, %s1324_s29  ;;  %s1835_s10 = scalar_lea.vmem (%p1797_p9), [#allocation4], %s1322_s6 }
  0x30   : > { %s1326_s0 = sshll.u32 (%p1797_p9), %s230_s9, 2 }
  0x34   : > { %s1830_s27 = scalar_lea.vmem %s2126_s1, %s1326_s0 }
  0x35   : > { %v387_v4 = vld [vmem:[%s1830_s27] sm:$0xff]  ;;  %v389_v5 = vld [vmem:[%s1830_s27 + $0x10] sm:$0xff] }
  0x36   : > { %v391_v6 = vld [vmem:[%s1830_s27 + $0x20] sm:$0xff]  ;;  %388 = vst [vmem:[%s1835_s10] sm:$0xff] %v387_v4  ;;  %390 = vst [vmem:[%s1835_s10 + $0x8] sm:$0xff] %v389_v5  ;;  %v393_v7 = vld [vmem:[%s1830_s27 + $0x30] sm:$0xff] }
  0x37   : > { %392 = vst [vmem:[%s1835_s10 + $0x10] sm:$0xff] %v391_v6  ;;  %v395_v8 = vld [vmem:[%s1830_s27 + $0x40] sm:$0xff]  ;;  %v397_v9 = vld [vmem:[%s1830_s27 + $0x50] sm:$0xff]  ;;  %394 = vst [vmem:[%s1835_s10 + $0x18] sm:$0xff] %v393_v7 }
  0x38   : > { %396 = vst [vmem:[%s1835_s10 + $0x20] sm:$0xff] %v395_v8  ;;  %398 = vst [vmem:[%s1835_s10 + $0x28] sm:$0xff] %v397_v9  ;;  %v399_v10 = vld [vmem:[%s1830_s27 + $0x60] sm:$0xff]  ;;  %v401_v11 = vld [vmem:[%s1830_s27 + $0x70] sm:$0xff] }
  0x39   : > { %v403_v12 = vld [vmem:[%s1830_s27 + $0x80] sm:$0xff]  ;;  %400 = vst [vmem:[%s1835_s10 + $0x30] sm:$0xff] %v399_v10  ;;  %402 = vst [vmem:[%s1835_s10 + $0x38] sm:$0xff] %v401_v11  ;;  %v405_v13 = vld [vmem:[%s1830_s27 + $0x90] sm:$0xff] }
  0x3a   : > { %404 = vst [vmem:[%s1835_s10 + $0x40] sm:$0xff] %v403_v12  ;;  %v407_v14 = vld [vmem:[%s1830_s27 + $0xa0] sm:$0xff]  ;;  %v409_v15 = vld [vmem:[%s1830_s27 + $0xb0] sm:$0xff]  ;;  %406 = vst [vmem:[%s1835_s10 + $0x48] sm:$0xff] %v405_v13 }
  0x3b   : > { %408 = vst [vmem:[%s1835_s10 + $0x50] sm:$0xff] %v407_v14  ;;  %410 = vst [vmem:[%s1835_s10 + $0x58] sm:$0xff] %v409_v15  ;;  %v411_v16 = vld [vmem:[%s1830_s27 + $0xc0] sm:$0xff]  ;;  %v413_v17 = vld [vmem:[%s1830_s27 + $0xd0] sm:$0xff] }
  0x3c   : > { %v415_v18 = vld [vmem:[%s1830_s27 + $0xe0] sm:$0xff]  ;;  %412 = vst [vmem:[%s1835_s10 + $0x60] sm:$0xff] %v411_v16  ;;  %414 = vst [vmem:[%s1835_s10 + $0x68] sm:$0xff] %v413_v17  ;;  %v417_v19 = vld [vmem:[%s1830_s27 + $0xf0] sm:$0xff] }
  0x3d   : > { %416 = vst [vmem:[%s1835_s10 + $0x70] sm:$0xff] %v415_v18  ;;  %v419_v20 = vld [vmem:[%s1830_s27 + $0x100] sm:$0xff]  ;;  %v421_v21 = vld [vmem:[%s1830_s27 + $0x110] sm:$0xff]  ;;  %418 = vst [vmem:[%s1835_s10 + $0x78] sm:$0xff] %v417_v19 }
  0x3e   : > { %420 = vst [vmem:[%s1835_s10 + $0x80] sm:$0xff] %v419_v20  ;;  %422 = vst [vmem:[%s1835_s10 + $0x88] sm:$0xff] %v421_v21  ;;  %v423_v22 = vld [vmem:[%s1830_s27 + $0x120] sm:$0xff]  ;;  %v425_v23 = vld [vmem:[%s1830_s27 + $0x130] sm:$0xff] }
  0x3f   : > { %v427_v24 = vld [vmem:[%s1830_s27 + $0x140] sm:$0xff]  ;;  %424 = vst [vmem:[%s1835_s10 + $0x90] sm:$0xff] %v423_v22  ;;  %426 = vst [vmem:[%s1835_s10 + $0x98] sm:$0xff] %v425_v23  ;;  %v429_v25 = vld [vmem:[%s1830_s27 + $0x150] sm:$0xff] }
  0x40   : > { %428 = vst [vmem:[%s1835_s10 + $0xa0] sm:$0xff] %v427_v24  ;;  %v431_v26 = vld [vmem:[%s1830_s27 + $0x160] sm:$0xff]  ;;  %v433_v27 = vld [vmem:[%s1830_s27 + $0x170] sm:$0xff]  ;;  %430 = vst [vmem:[%s1835_s10 + $0xa8] sm:$0xff] %v429_v25 }
  0x41   : > { %432 = vst [vmem:[%s1835_s10 + $0xb0] sm:$0xff] %v431_v26  ;;  %434 = vst [vmem:[%s1835_s10 + $0xb8] sm:$0xff] %v433_v27  ;;  %v435_v28 = vld [vmem:[%s1830_s27 + $0x180] sm:$0xff]  ;;  %v437_v29 = vld [vmem:[%s1830_s27 + $0x190] sm:$0xff] }
  0x42   : > { %v439_v30 = vld [vmem:[%s1830_s27 + $0x1a0] sm:$0xff]  ;;  %436 = vst [vmem:[%s1835_s10 + $0xc0] sm:$0xff] %v435_v28  ;;  %438 = vst [vmem:[%s1835_s10 + $0xc8] sm:$0xff] %v437_v29  ;;  %v441_v31 = vld [vmem:[%s1830_s27 + $0x1b0] sm:$0xff] }
  0x43   : > { %440 = vst [vmem:[%s1835_s10 + $0xd0] sm:$0xff] %v439_v30  ;;  %v443_v32 = vld [vmem:[%s1830_s27 + $0x1c0] sm:$0xff]  ;;  %v445_v33 = vld [vmem:[%s1830_s27 + $0x1d0] sm:$0xff]  ;;  %442 = vst [vmem:[%s1835_s10 + $0xd8] sm:$0xff] %v441_v31 }
  0x44   : > { %444 = vst [vmem:[%s1835_s10 + $0xe0] sm:$0xff] %v443_v32  ;;  %446 = vst [vmem:[%s1835_s10 + $0xe8] sm:$0xff] %v445_v33  ;;  %v447_v34 = vld [vmem:[%s1830_s27 + $0x1e0] sm:$0xff]  ;;  %v449_v35 = vld [vmem:[%s1830_s27 + $0x1f0] sm:$0xff] }
  0x45   : > { %v451_v36 = vld [vmem:[%s1830_s27 + $0x200] sm:$0xff]  ;;  %448 = vst [vmem:[%s1835_s10 + $0xf0] sm:$0xff] %v447_v34  ;;  %450 = vst [vmem:[%s1835_s10 + $0xf8] sm:$0xff] %v449_v35  ;;  %v453_v37 = vld [vmem:[%s1830_s27 + $0x210] sm:$0xff] }
  0x46   : > { %452 = vst [vmem:[%s1835_s10 + $0x100] sm:$0xff] %v451_v36  ;;  %v455_v38 = vld [vmem:[%s1830_s27 + $0x220] sm:$0xff]  ;;  %v457_v39 = vld [vmem:[%s1830_s27 + $0x230] sm:$0xff]  ;;  %454 = vst [vmem:[%s1835_s10 + $0x108] sm:$0xff] %v453_v37 }
  0x47   : > { %456 = vst [vmem:[%s1835_s10 + $0x110] sm:$0xff] %v455_v38  ;;  %458 = vst [vmem:[%s1835_s10 + $0x118] sm:$0xff] %v457_v39  ;;  %v459_v40 = vld [vmem:[%s1830_s27 + $0x240] sm:$0xff]  ;;  %v461_v41 = vld [vmem:[%s1830_s27 + $0x250] sm:$0xff] }
  0x48   : > { %v463_v42 = vld [vmem:[%s1830_s27 + $0x260] sm:$0xff]  ;;  %460 = vst [vmem:[%s1835_s10 + $0x120] sm:$0xff] %v459_v40  ;;  %462 = vst [vmem:[%s1835_s10 + $0x128] sm:$0xff] %v461_v41  ;;  %v465_v43 = vld [vmem:[%s1830_s27 + $0x270] sm:$0xff] }
  0x49   : > { %464 = vst [vmem:[%s1835_s10 + $0x130] sm:$0xff] %v463_v42  ;;  %v467_v44 = vld [vmem:[%s1830_s27 + $0x280] sm:$0xff]  ;;  %v469_v45 = vld [vmem:[%s1830_s27 + $0x290] sm:$0xff]  ;;  %466 = vst [vmem:[%s1835_s10 + $0x138] sm:$0xff] %v465_v43 }
  0x4a   : > { %468 = vst [vmem:[%s1835_s10 + $0x140] sm:$0xff] %v467_v44  ;;  %470 = vst [vmem:[%s1835_s10 + $0x148] sm:$0xff] %v469_v45  ;;  %v471_v46 = vld [vmem:[%s1830_s27 + $0x2a0] sm:$0xff]  ;;  %v473_v47 = vld [vmem:[%s1830_s27 + $0x2b0] sm:$0xff] }
  0x4b   : > { %v475_v48 = vld [vmem:[%s1830_s27 + $0x2c0] sm:$0xff]  ;;  %472 = vst [vmem:[%s1835_s10 + $0x150] sm:$0xff] %v471_v46  ;;  %474 = vst [vmem:[%s1835_s10 + $0x158] sm:$0xff] %v473_v47  ;;  %v477_v49 = vld [vmem:[%s1830_s27 + $0x2d0] sm:$0xff] }
  0x4c   : > { %476 = vst [vmem:[%s1835_s10 + $0x160] sm:$0xff] %v475_v48  ;;  %v479_v50 = vld [vmem:[%s1830_s27 + $0x2e0] sm:$0xff]  ;;  %v481_v51 = vld [vmem:[%s1830_s27 + $0x2f0] sm:$0xff]  ;;  %478 = vst [vmem:[%s1835_s10 + $0x168] sm:$0xff] %v477_v49 }
  0x4d   : > { %480 = vst [vmem:[%s1835_s10 + $0x170] sm:$0xff] %v479_v50  ;;  %482 = vst [vmem:[%s1835_s10 + $0x178] sm:$0xff] %v481_v51  ;;  %v483_v52 = vld [vmem:[%s1830_s27 + $0x300] sm:$0xff]  ;;  %v485_v53 = vld [vmem:[%s1830_s27 + $0x310] sm:$0xff] }
  0x4e   : > { %v487_v54 = vld [vmem:[%s1830_s27 + $0x320] sm:$0xff]  ;;  %484 = vst [vmem:[%s1835_s10 + $0x180] sm:$0xff] %v483_v52  ;;  %486 = vst [vmem:[%s1835_s10 + $0x188] sm:$0xff] %v485_v53  ;;  %v489_v55 = vld [vmem:[%s1830_s27 + $0x330] sm:$0xff] }
  0x4f   : > { %488 = vst [vmem:[%s1835_s10 + $0x190] sm:$0xff] %v487_v54  ;;  %v491_v56 = vld [vmem:[%s1830_s27 + $0x340] sm:$0xff]  ;;  %v493_v57 = vld [vmem:[%s1830_s27 + $0x350] sm:$0xff]  ;;  %490 = vst [vmem:[%s1835_s10 + $0x198] sm:$0xff] %v489_v55 }
  0x50   : > { %492 = vst [vmem:[%s1835_s10 + $0x1a0] sm:$0xff] %v491_v56  ;;  %494 = vst [vmem:[%s1835_s10 + $0x1a8] sm:$0xff] %v493_v57  ;;  %v495_v58 = vld [vmem:[%s1830_s27 + $0x360] sm:$0xff]  ;;  %v497_v59 = vld [vmem:[%s1830_s27 + $0x370] sm:$0xff] }
  0x51   : > { %v499_v60 = vld [vmem:[%s1830_s27 + $0x380] sm:$0xff]  ;;  %496 = vst [vmem:[%s1835_s10 + $0x1b0] sm:$0xff] %v495_v58  ;;  %498 = vst [vmem:[%s1835_s10 + $0x1b8] sm:$0xff] %v497_v59  ;;  %v501_v61 = vld [vmem:[%s1830_s27 + $0x390] sm:$0xff] }
  0x52   : > { %500 = vst [vmem:[%s1835_s10 + $0x1c0] sm:$0xff] %v499_v60  ;;  %v503_v62 = vld [vmem:[%s1830_s27 + $0x3a0] sm:$0xff]  ;;  %v505_v63 = vld [vmem:[%s1830_s27 + $0x3b0] sm:$0xff]  ;;  %502 = vst [vmem:[%s1835_s10 + $0x1c8] sm:$0xff] %v501_v61 }
  0x53   : > { %504 = vst [vmem:[%s1835_s10 + $0x1d0] sm:$0xff] %v503_v62  ;;  %506 = vst [vmem:[%s1835_s10 + $0x1d8] sm:$0xff] %v505_v63  ;;  %v507_v0 = vld [vmem:[%s1830_s27 + $0x3c0] sm:$0xff]  ;;  %v509_v1 = vld [vmem:[%s1830_s27 + $0x3d0] sm:$0xff] }
  0x54   : > { %v511_v2 = vld [vmem:[%s1830_s27 + $0x3e0] sm:$0xff]  ;;  %508 = vst [vmem:[%s1835_s10 + $0x1e0] sm:$0xff] %v507_v0  ;;  %510 = vst [vmem:[%s1835_s10 + $0x1e8] sm:$0xff] %v509_v1  ;;  %v513_v3 = vld [vmem:[%s1830_s27 + $0x3f0] sm:$0xff] }
  0x55   : > { %512 = vst [vmem:[%s1835_s10 + $0x1f0] sm:$0xff] %v511_v2  ;;  %514 = vst [vmem:[%s1835_s10 + $0x1f8] sm:$0xff] %v513_v3 }
  0x56 PF: > { %p1327_p0 = scmp.ge.s32.totalorder %s1688_s25, 1  ;;  %p535_p1 = scmp.lt.s32.totalorder %s1688_s25, 19 }
  0x58   : > { %p536_p2 = pnand %p1327_p0, %p535_p1 }
  0x59   : > { %s542_s0 = sand.u32 (!%p536_p2), 1, %s1664_s19   ;;  %s549_s28 = sand.u32 (!%p536_p2), 1, %s1656_s17  }
  0x5a   : > { %539 = sbr.rel (%p536_p2) target bundleno = 399 (0x18f), region = 89  ;;  %s1328_s11 = sshll.u32 (!%p536_p2), %s542_s0, 5 }
  0x5b   : > { %s1329_s26 = sshll.u32 (!%p536_p2), %s549_s28, 9  ;;  %s582_s5 = sand.u32 (!%p536_p2), 1, %s1648_s15  }
  0x5c   : > { %s1331_s29 = sshll.u32 (!%p536_p2), %s1676_s22, 1  ;;  %s1330_s27 = sshll.u32 (!%p536_p2), %s582_s5, 5 }
  0x5d   : > { %p590_p3 = scmp.lt.s32.totalorder (!%p536_p2), %s1331_s29, 3  ;;  %s1978_s19 = scalar_lea.vmem (!%p536_p2), [#allocation3], %s1328_s11 }
  0x5e   : > { %s1980_s17 = scalar_lea.vmem (!%p536_p2), [#allocation4], %s1329_s26  ;;  %s1982_s15 = scalar_lea.vmem (!%p536_p2), [#allocation5], %s1330_s27 }
  0x5f   : > { %s2146_s29 = smov (!%p590_p3, %s1331_s29), 3  ;;  %p1333_p4 = scmp.ne.s32.totalorder %s1672_s21, 0 }
  0x60   : > { %s592_s9 = scalar_lea.vmem %s2113_s2, %s2146_s29  ;;  %s597_s1 = scalar_lea.vmem %s2114_s3, %s2146_s29 }
  0x61   : > { %604 = sbr.rel (%p1333_p4) target bundleno = 105 (0x69), region = 101 }
  0x66   : > { %v1690_v4 = vmov 0.0  }
  0x67   : > { %605 = vst [vmem:[#allocation2 + $0x10] sm:$0xff] %v1690_v4  ;;  %606 = vst [vmem:[#allocation2] sm:$0xff] %v1690_v4 }
  0x68   : > { %607 = vst [vmem:[#allocation2 + $0x18] sm:$0xff] %v1690_v4  ;;  %608 = vst [vmem:[#allocation2 + $0x8] sm:$0xff] %v1690_v4 }
  0x69 PF: > { %v1500_v5 = vld [vmem:[%s1980_s17 + $0x74] ss:$8 sps:$4 sm:$0xff]   ;;  %v1504_v7 = vld [vmem:[%s1980_s17 + $0x70] ss:$8 sps:$4 sm:$0xff]   ;;  %v1506_v9 = vld [vmem:[%s1980_s17 + $0x64] ss:$8 sps:$4 sm:$0xff]  }
  0x6a   : > { %v1502_v6 = vld [vmem:[%s1980_s17 + $0x174] ss:$8 sps:$4 sm:$0xff]   ;;  %1021 = vmatprep.subr.bf16.mxu0 %v1500_v5  ;;  %v1505_v8 = vld [vmem:[%s1980_s17 + $0x170] ss:$8 sps:$4 sm:$0xff]   ;;  %v1508_v10 = vld [vmem:[%s1980_s17 + $0x164] ss:$8 sps:$4 sm:$0xff]  }
  0x6b   : > { %1064 = vmatprep.subr.bf16.mxu1 %v1502_v6  ;;  %1022 = vmatpush1.bf16.msra.mxu0 %v1504_v7  ;;  %v1510_v11 = vld [vmem:[%s1980_s17 + $0x60] ss:$8 sps:$4 sm:$0xff]   ;;  %v1512_v13 = vld [vmem:[%s1980_s17 + $0x54] ss:$8 sps:$4 sm:$0xff]   ;;  %v1516_v15 = vld [vmem:[%s1980_s17 + $0x50] ss:$8 sps:$4 sm:$0xff]  }
  0x6c   : > { %1065 = vmatpush1.bf16.msra.mxu1 %v1505_v8  ;;  %1023 = vmatprep.subr.bf16.mxu0 %v1506_v9  ;;  %v1511_v12 = vld [vmem:[%s1980_s17 + $0x160] ss:$8 sps:$4 sm:$0xff]   ;;  %v1514_v14 = vld [vmem:[%s1980_s17 + $0x154] ss:$8 sps:$4 sm:$0xff]   ;;  %v1517_v16 = vld [vmem:[%s1980_s17 + $0x150] ss:$8 sps:$4 sm:$0xff]  }
  0x6d   : > { %1066 = vmatprep.subr.bf16.mxu1 %v1508_v10  ;;  %v1518_v17 = vld [vmem:[%s1980_s17 + $0x44] ss:$8 sps:$4 sm:$0xff]   ;;  %v1522_v19 = vld [vmem:[%s1980_s17 + $0x40] ss:$8 sps:$4 sm:$0xff]   ;;  %v1524_v21 = vld [vmem:[%s1980_s17 + $0x34] ss:$8 sps:$4 sm:$0xff]  }
  0x6e   : > { %v1520_v18 = vld [vmem:[%s1980_s17 + $0x144] ss:$8 sps:$4 sm:$0xff]   ;;  %v1523_v20 = vld [vmem:[%s1980_s17 + $0x140] ss:$8 sps:$4 sm:$0xff]   ;;  %v1526_v22 = vld [vmem:[%s1980_s17 + $0x134] ss:$8 sps:$4 sm:$0xff]  }
  0x6f   : > { %1024 = vmatpush1.bf16.msra.mxu0 %v1510_v11  ;;  %v1528_v23 = vld [vmem:[%s1980_s17 + $0x30] ss:$8 sps:$4 sm:$0xff]   ;;  %v1530_v25 = vld [vmem:[%s1980_s17 + $0x24] ss:$8 sps:$4 sm:$0xff]   ;;  %v1534_v27 = vld [vmem:[%s1980_s17 + $0x20] ss:$8 sps:$4 sm:$0xff]  }
  0x70   : > { %1067 = vmatpush1.bf16.msra.mxu1 %v1511_v12  ;;  %1025 = vmatprep.subr.bf16.mxu0 %v1512_v13  ;;  %v1529_v24 = vld [vmem:[%s1980_s17 + $0x130] ss:$8 sps:$4 sm:$0xff]   ;;  %v1532_v26 = vld [vmem:[%s1980_s17 + $0x124] ss:$8 sps:$4 sm:$0xff]   ;;  %v1535_v28 = vld [vmem:[%s1980_s17 + $0x120] ss:$8 sps:$4 sm:$0xff]  }
  0x71   : > { %1068 = vmatprep.subr.bf16.mxu1 %v1514_v14  ;;  %v1536_v29 = vld [vmem:[%s1980_s17 + $0x14] ss:$8 sps:$4 sm:$0xff]   ;;  %v1540_v31 = vld [vmem:[%s1980_s17 + $0x10] ss:$8 sps:$4 sm:$0xff]   ;;  %v1542_v33 = vld [vmem:[%s1980_s17 + $0x4] ss:$8 sps:$4 sm:$0xff]  }
  0x72   : > { %v1538_v30 = vld [vmem:[%s1980_s17 + $0x114] ss:$8 sps:$4 sm:$0xff]   ;;  %v1541_v32 = vld [vmem:[%s1980_s17 + $0x110] ss:$8 sps:$4 sm:$0xff]   ;;  %v1544_v34 = vld [vmem:[%s1980_s17 + $0x104] ss:$8 sps:$4 sm:$0xff]  }
  0x73   : > { %1026 = vmatpush1.bf16.msra.mxu0 %v1516_v15  ;;  %v1546_v35 = vld [vmem:[%s1980_s17] ss:$8 sps:$4 sm:$0xff]   ;;  %v1548_v37 = vld [vmem:[%s1980_s17 + $0xf4] ss:$8 sps:$4 sm:$0xff]   ;;  %v1552_v39 = vld [vmem:[%s1980_s17 + $0xf0] ss:$8 sps:$4 sm:$0xff]  }
  0x74   : > { %1069 = vmatpush1.bf16.msra.mxu1 %v1517_v16  ;;  %1027 = vmatprep.subr.bf16.mxu0 %v1518_v17  ;;  %v1547_v36 = vld [vmem:[%s1980_s17 + $0x100] ss:$8 sps:$4 sm:$0xff]   ;;  %v1550_v38 = vld [vmem:[%s1980_s17 + $0x1f4] ss:$8 sps:$4 sm:$0xff]   ;;  %v1553_v40 = vld [vmem:[%s1980_s17 + $0x1f0] ss:$8 sps:$4 sm:$0xff]  }
  0x75   : > { %1070 = vmatprep.subr.bf16.mxu1 %v1520_v18  ;;  %v1554_v41 = vld [vmem:[%s1980_s17 + $0xe4] ss:$8 sps:$4 sm:$0xff]   ;;  %v1558_v43 = vld [vmem:[%s1980_s17 + $0xe0] ss:$8 sps:$4 sm:$0xff]   ;;  %v1560_v45 = vld [vmem:[%s1980_s17 + $0xd4] ss:$8 sps:$4 sm:$0xff]  }
  0x76   : > { %v1556_v42 = vld [vmem:[%s1980_s17 + $0x1e4] ss:$8 sps:$4 sm:$0xff]   ;;  %v1559_v44 = vld [vmem:[%s1980_s17 + $0x1e0] ss:$8 sps:$4 sm:$0xff]   ;;  %v1562_v46 = vld [vmem:[%s1980_s17 + $0x1d4] ss:$8 sps:$4 sm:$0xff]  }
  0x77   : > { %1028 = vmatpush1.bf16.msra.mxu0 %v1522_v19  ;;  %v1564_v47 = vld [vmem:[%s1980_s17 + $0xd0] ss:$8 sps:$4 sm:$0xff]   ;;  %v1566_v49 = vld [vmem:[%s1980_s17 + $0xc4] ss:$8 sps:$4 sm:$0xff]   ;;  %v1570_v51 = vld [vmem:[%s1980_s17 + $0xc0] ss:$8 sps:$4 sm:$0xff]  }
  0x78   : > { %1071 = vmatpush1.bf16.msra.mxu1 %v1523_v20  ;;  %1029 = vmatprep.subr.bf16.mxu0 %v1524_v21  ;;  %v1565_v48 = vld [vmem:[%s1980_s17 + $0x1d0] ss:$8 sps:$4 sm:$0xff]   ;;  %v1568_v50 = vld [vmem:[%s1980_s17 + $0x1c4] ss:$8 sps:$4 sm:$0xff]   ;;  %v1571_v53 = vld [vmem:[%s1980_s17 + $0x1c0] ss:$8 sps:$4 sm:$0xff]  }
  0x79   : > { %1072 = vmatprep.subr.bf16.mxu1 %v1526_v22  ;;  %v1598_v52 = vld [vmem:[%s1978_s19 + $0x4] ss:$16 sps:$4 sm:$0xff]   ;;  %v1601_v56 = vld [vmem:[%s1978_s19 + $0xc] ss:$16 sps:$4 sm:$0xff]   ;;  %v1576_v57 = vld [vmem:[%s1980_s17 + $0xb0] ss:$8 sps:$4 sm:$0xff]  }
  0x7a   : > { %v1572_v54 = vld [vmem:[%s1980_s17 + $0xb4] ss:$8 sps:$4 sm:$0xff]   ;;  %1053 = vmatprep.mubr.bf16.mxu0 %v1598_v52  ;;  %1096 = vmatprep.mubr.bf16.mxu1 %v1601_v56  ;;  %v1577_v58 = vld [vmem:[%s1980_s17 + $0x1b0] ss:$8 sps:$4 sm:$0xff]   ;;  %v1578_v59 = vld [vmem:[%s1980_s17 + $0xa4] ss:$8 sps:$4 sm:$0xff]  }
  0x7b   : > { %1030 = vmatpush1.bf16.msra.mxu0 %v1528_v23  ;;  %v1574_v55 = vld [vmem:[%s1980_s17 + $0x1b4] ss:$8 sps:$4 sm:$0xff]   ;;  %v1580_v60 = vld [vmem:[%s1980_s17 + $0x1a4] ss:$8 sps:$4 sm:$0xff]   ;;  %v1582_v61 = vld [vmem:[%s1980_s17 + $0xa0] ss:$8 sps:$4 sm:$0xff]  }
  0x7c   : > { %1073 = vmatpush1.bf16.msra.mxu1 %v1529_v24  ;;  %1031 = vmatprep.subr.bf16.mxu0 %v1530_v25  ;;  %v1583_v62 = vld [vmem:[%s1980_s17 + $0x1a0] ss:$8 sps:$4 sm:$0xff]   ;;  %v1584_v63 = vld [vmem:[%s1980_s17 + $0x94] ss:$8 sps:$4 sm:$0xff]   ;;  %v1588_v1 = vld [vmem:[%s1980_s17 + $0x90] ss:$8 sps:$4 sm:$0xff]  }
  0x7d   : > { %1074 = vmatprep.subr.bf16.mxu1 %v1532_v26  ;;  %v1586_v0 = vld [vmem:[%s1980_s17 + $0x194] ss:$8 sps:$4 sm:$0xff]   ;;  %v1589_v2 = vld [vmem:[%s1980_s17 + $0x190] ss:$8 sps:$4 sm:$0xff]   ;;  %v1590_v3 = vld [vmem:[%s1980_s17 + $0x84] ss:$8 sps:$4 sm:$0xff]  }
  0x7e   : > { %v1592_v4 = vld [vmem:[%s1980_s17 + $0x184] ss:$8 sps:$4 sm:$0xff]   ;;  %v1594_v5 = vld [vmem:[%s1980_s17 + $0x80] ss:$8 sps:$4 sm:$0xff]   ;;  %v609_v10 = vld [vmem:[#allocation2 + $0x10] sm:$0xff]  ;;  %p1402_p5 = scmp.ne.s32.totalorder %s1672_s21, 8 }
  0x7f   : > { %1032 = vmatpush1.bf16.msra.mxu0 %v1534_v27  ;;  %v1595_v6 = vld [vmem:[%s1980_s17 + $0x180] ss:$8 sps:$4 sm:$0xff]   ;;  %v611_v19 = vld [vmem:[#allocation2 + $0x18] sm:$0xff] }
  0x80   : > { %1075 = vmatpush1.bf16.msra.mxu1 %v1535_v28  ;;  %1033 = vmatprep.subr.bf16.mxu0 %v1536_v29  ;;  %v1596_v7 = vld [vmem:[%s1978_s19] ss:$16 sps:$4 sm:$0xff]   ;;  %v1599_v8 = vld [vmem:[%s1978_s19 + $0x8] ss:$16 sps:$4 sm:$0xff]  }
  0x81   : > { %1076 = vmatprep.subr.bf16.mxu1 %v1538_v30  ;;  %v610_v14 = vld [vmem:[#allocation2] sm:$0xff]  ;;  %v612_v24 = vld [vmem:[#allocation2 + $0x8] sm:$0xff] }
  0x83   : > { %1034 = vmatpush1.bf16.msra.mxu0 %v1540_v31 }
  0x84   : > { %1077 = vmatpush1.bf16.msra.mxu1 %v1541_v32  ;;  %1035 = vmatprep.subr.bf16.mxu0 %v1542_v33 }
  0x85   : > { %1078 = vmatprep.subr.bf16.mxu1 %v1544_v34 }
  0x87   : > { %1036 = vmatpush1.bf16.msra.mxu0 %v1546_v35 }
  0x88   : > { %1079 = vmatpush1.bf16.msra.mxu1 %v1547_v36  ;;  %1037 = vmatprep.subr.bf16.mxu0 %v1548_v37 }
  0x89   : > { %1080 = vmatprep.subr.bf16.mxu1 %v1550_v38 }
  0x8b   : > { %1038 = vmatpush2.bf16.msra.mxu0 %v1552_v39 }
  0x8c   : > { %1081 = vmatpush2.bf16.msra.mxu1 %v1553_v40  ;;  %1039 = vmatprep.subr.bf16.mxu0 %v1554_v41 }
  0x8d   : > { %1082 = vmatprep.subr.bf16.mxu1 %v1556_v42 }
  0x8f   : > { %1040 = vmatpush2.bf16.msra.mxu0 %v1558_v43 }
  0x90   : > { %1083 = vmatpush2.bf16.msra.mxu1 %v1559_v44  ;;  %1041 = vmatprep.subr.bf16.mxu0 %v1560_v45 }
  0x91   : > { %1084 = vmatprep.subr.bf16.mxu1 %v1562_v46 }
  0x93   : > { %1042 = vmatpush2.bf16.msra.mxu0 %v1564_v47 }
  0x94   : > { %1085 = vmatpush2.bf16.msra.mxu1 %v1565_v48  ;;  %1043 = vmatprep.subr.bf16.mxu0 %v1566_v49 }
  0x95   : > { %1086 = vmatprep.subr.bf16.mxu1 %v1568_v50 }
  0x97   : > { %1044 = vmatpush2.bf16.msra.mxu0 %v1570_v51 }
  0x98   : > { %1087 = vmatpush2.bf16.msra.mxu1 %v1571_v53  ;;  %1045 = vmatprep.subr.bf16.mxu0 %v1572_v54 }
  0x99   : > { %1088 = vmatprep.subr.bf16.mxu1 %v1574_v55 }
  0x9b   : > { %1046 = vmatpush2.bf16.msra.mxu0 %v1576_v57 }
  0x9c   : > { %1089 = vmatpush2.bf16.msra.mxu1 %v1577_v58  ;;  %1047 = vmatprep.subr.bf16.mxu0 %v1578_v59 }
  0x9d   : > { %1090 = vmatprep.subr.bf16.mxu1 %v1580_v60 }
  0x9f   : > { %1048 = vmatpush2.bf16.msra.mxu0 %v1582_v61 }
  0xa0   : > { %1091 = vmatpush2.bf16.msra.mxu1 %v1583_v62  ;;  %1049 = vmatprep.subr.bf16.mxu0 %v1584_v63 }
  0xa1   : > { %1092 = vmatprep.subr.bf16.mxu1 %v1586_v0 }
  0xa3   : > { %1050 = vmatpush2.bf16.msra.mxu0 %v1588_v1 }
  0xa4   : > { %1093 = vmatpush2.bf16.msra.mxu1 %v1589_v2  ;;  %1051 = vmatprep.subr.bf16.mxu0 %v1590_v3 }
  0xa5   : > { %1094 = vmatprep.subr.bf16.mxu1 %v1592_v4 }
  0xa7   : > { %1052 = vmatpush2.bf16.msra.mxu0 %v1594_v5 }
  0xa8   : > { %1095 = vmatpush2.bf16.msra.mxu1 %v1595_v6 }
  0xaa   : > { %1054 = vmatmul.mubr.bf16.vlgmr.msra.gmra.mxu0 %v1596_v7 }
  0xab   : > { %1097 = vmatmul.mubr.bf16.vlgmr.msra.gmra.mxu1 %v1599_v8 }
 0x16a   : > { %v1055_v9 = vpop.f32.mrf.mxu0 }
 0x16b   : > { %v1098_v11 = vpop.f32.mrf.mxu1 }
 0x16c   : > { %v1099_v12 = vadd.f32 %v1098_v11, %v1055_v9  ;;  %v1057_v13 = vpop.f32.mrf.mxu0 }
 0x16d   : > { %v1100_v15 = vpop.f32.mrf.mxu1 }
 0x16e   : > { %v1107_v16 = vadd.f32 %v1099_v12, %v609_v10  ;;  %v1101_v17 = vadd.f32 %v1100_v15, %v1057_v13  ;;  %v1059_v18 = vpop.f32.mrf.mxu0 }
 0x16f   : > { %v1102_v20 = vpop.f32.mrf.mxu1 }
 0x170   : > { %1111 = vst [vmem:[#allocation2 + $0x10] sm:$0xff] %v1107_v16  ;;  %v1108_v21 = vadd.f32 %v1101_v17, %v610_v14  ;;  %v1103_v22 = vadd.f32 %v1102_v20, %v1059_v18  ;;  %v1061_v23 = vpop.f32.mrf.mxu0 }
 0x171   : > { %v1104_v25 = vpop.f32.mrf.mxu1 }
 0x172   : > { %1112 = vst [vmem:[#allocation2] sm:$0xff] %v1108_v21  ;;  %v1109_v26 = vadd.f32 %v1103_v22, %v611_v19  ;;  %v1105_v27 = vadd.f32 %v1104_v25, %v1061_v23  ;;  %1118 = sbr.rel (%p1402_p5) target bundleno = 391 (0x187), region = 105 }
 0x174   : > { %1113 = vst [vmem:[#allocation2 + $0x18] sm:$0xff] %v1109_v26  ;;  %v1110_v28 = vadd.f32 %v1105_v27, %v612_v24 }
 0x176   : > { %1114 = vst [vmem:[#allocation2 + $0x8] sm:$0xff] %v1110_v28 }
 0x177   : > { %v1125_v29 = vlaneseq  ;;  %v1123_v31 = vld [vmem:[%s592_s9] sm:$0x3]  ;;  %v1119_v33 = vld [vmem:[#allocation2 + $0x10] sm:$0xff] }
 0x178   : > { %v1139_v32 = vld [vmem:[%s597_s1] sm:$0x3] }
 0x179   : > { %v1126_v30 = vshrl.u32 %v1125_v29, 7  ;;  %v1120_v36 = vld [vmem:[#allocation2] sm:$0xff] }
 0x17b   : > { %v1127_v34 = vsub.s32 0, %v1126_v30  ;;  %v1131_v35 = vsub.s32 1, %v1126_v30  ;;  %v1121_v37 = vld [vmem:[#allocation2 + $0x18] sm:$0xff] }
 0x17d   : > { %v1122_v38 = vld [vmem:[#allocation2 + $0x8] sm:$0xff]  ;;  %v1128_v39 = vrot.slane %v1123_v31, %v1127_v34  ;;  %v1144_v40 = vrot.slane %v1139_v32, %v1127_v34  ;;  %v1132_v41 = vrot.slane %v1123_v31, %v1131_v35  ;;  %v1148_v42 = vrot.slane %v1139_v32, %v1131_v35 }
 0x17f   : > { %v1135_v43 = vmul.f32 %v1128_v39, %v1119_v33  ;;  %v1136_v44 = vmul.f32 %v1132_v41, %v1120_v36  ;;  %v1137_v45 = vmul.f32 %v1128_v39, %v1121_v37  ;;  %v1138_v46 = vmul.f32 %v1132_v41, %v1122_v38 }
 0x181   : > { %v1151_v47 = vadd.f32 %v1144_v40, %v1135_v43  ;;  %v1152_v48 = vadd.f32 %v1148_v42, %v1136_v44  ;;  %v1153_v49 = vadd.f32 %v1144_v40, %v1137_v45  ;;  %v1154_v50 = vadd.f32 %v1148_v42, %v1138_v46 }
 0x183   : > { %v1155_v51 = vmax.f32 %v1151_v47, 0.0  ;;  %v1156_v52 = vmax.f32 %v1152_v48, 0.0  ;;  %v1157_v53 = vmax.f32 %v1153_v49, 0.0  ;;  %v1158_v54 = vmax.f32 %v1154_v50, 0.0 }
 0x185   : > { %1159 = vst [vmem:[%s1982_s15] sm:$0xff] %v1155_v51  ;;  %1160 = vst [vmem:[%s1982_s15 + $0x8] sm:$0xff] %v1156_v52 }
 0x186   : > { %1161 = vst [vmem:[%s1982_s15 + $0x10] sm:$0xff] %v1157_v53  ;;  %1162 = vst [vmem:[%s1982_s15 + $0x18] sm:$0xff] %v1158_v54 }
 0x187 PF: > { %1169 = sbr.rel (!%p1810_p12) target bundleno = 399 (0x18f), region = 109  ;;  %s1410_s1 = sshll.u32 (%p1810_p12), %s1676_s22, 4 }
 0x188   : > { %s1175_s29 = scalar_lea.vmem (%p1810_p12), %s2115_s4, %s1410_s1 }
 0x18c   : > { %v1188_v55 = vld [vmem:[%s1982_s15] sm:$0xff]  ;;  %v1190_v56 = vld [vmem:[%s1982_s15 + $0x8] sm:$0xff] }
 0x18d   : > { %v1192_v57 = vld [vmem:[%s1982_s15 + $0x10] sm:$0xff]  ;;  %v1194_v58 = vld [vmem:[%s1982_s15 + $0x18] sm:$0xff]  ;;  %1189 = vst [vmem:[%s1175_s29] sm:$0xff] %v1188_v55  ;;  %1191 = vst [vmem:[%s1175_s29 + $0x8] sm:$0xff] %v1190_v56 }
 0x18e   : > { %1193 = vst [vmem:[%s1175_s29 + $0x20] sm:$0xff] %v1192_v57  ;;  %1195 = vst [vmem:[%s1175_s29 + $0x28] sm:$0xff] %v1194_v58 }
 0x18f PF: > { %s14_s25 = sadd.s32 1, %s1688_s25   ;;  %s2127_s14 = sld [smem:[#allocation6_spill]] }
 0x190   : > { %p11_p6 = scmp.ge.s32.totalorder %s14_s25, 20   ;;  %s2128_s27 = sld [smem:[#allocation7_spill]] }
 0x191   : > { %s2129_s15 = smov %s1652_s16  ;;  %s2130_s16 = smov %s1808_s13 }
 0x192   : > { %s2131_s17 = smov %s1660_s18  ;;  %s2132_s18 = smov %s1805_s12 }
 0x193   : > { %s2133_s19 = smov %s1668_s20  ;;  %s2134_s20 = smov %s1791_s7 }
 0x194   : > { %s2135_s21 = smov %s1680_s23  ;;  %s2136_s22 = smov %s1684_s24 }
 0x195   : > { %s2137_s23 = smov %s2127_s14  ;;  %13 = sbr.rel (!%p11_p6) target bundleno = 9 (0x9), region = 177 }
 0x196   : > { %s2138_s24 = smov %s2128_s27 }

// kernel: regressor_forward.43
= control target key start
LH: loop header
LB: loop body
LE: loop exit
PB: predicated region body
PF: predicated region fallthrough
CT: control target
= control target key end

     0   :  { %v406_v32 = vmov 1966171168   ;;  %v116_v34 = vlaneseq  ;;  %s637_s1 = inlined_call_operand.vmem [shape: f32[512,128], index: 1, kind: input, shape index: {}]   ;;  %s638_s0 = inlined_call_operand.vmem [shape: f32[8,1,512], index: 0, kind: input, shape index: {}]   ;;  %s639_s2 = inlined_call_operand.vmem [shape: f32[1,128], index: 2, kind: input, shape index: {}]   ;;  %s640_s3 = inlined_call_operand.vmem [shape: f32[8,128], index: 3, kind: output, shape index: {}]  }
   0x1   :  { %v61_v0 = vld [vmem:[%s637_s1 + $0xf8] sm:$0xff]  ;;  %v60_v4 = vld [vmem:[%s637_s1 + $0xf0] sm:$0xff]  ;;  %v59_v8 = vld [vmem:[%s637_s1 + $0xe8] sm:$0xff]  ;;  %v114_v33 = vunpack.c.l.s4 %v406_v32 }
   0x2   :  { %v93_v1 = vld [vmem:[%s637_s1 + $0x1f8] sm:$0xff]  ;;  %327 = vmatprep.subr.mxu0 %v61_v0  ;;  %v92_v5 = vld [vmem:[%s637_s1 + $0x1f0] sm:$0xff]  ;;  %v91_v9 = vld [vmem:[%s637_s1 + $0x1e8] sm:$0xff]  ;;  %v117_v45 = vshrl.u32 %v116_v34, 7 }
   0x3   :  { %v45_v2 = vld [vmem:[%s637_s1 + $0x78] sm:$0xff]  ;;  %362 = vmatprep.subr.mxu1 %v93_v1  ;;  %v44_v6 = vld [vmem:[%s637_s1 + $0x70] sm:$0xff]  ;;  %v43_v10 = vld [vmem:[%s637_s1 + $0x68] sm:$0xff]  ;;  %v115_v44 = vunpack.c.0.s8 %v114_v33 }
   0x4   :  { %v77_v3 = vld [vmem:[%s637_s1 + $0x178] sm:$0xff]  ;;  %328 = vmatpush3.msra.mxu0 %v45_v2  ;;  %v76_v7 = vld [vmem:[%s637_s1 + $0x170] sm:$0xff]  ;;  %v75_v11 = vld [vmem:[%s637_s1 + $0x168] sm:$0xff] }
   0x5   :  { %363 = vmatpush3.msra.mxu1 %v77_v3  ;;  %329 = vmatprep.subr.mxu0 %v60_v4  ;;  %v58_v12 = vld [vmem:[%s637_s1 + $0xe0] sm:$0xff]  ;;  %v57_v16 = vld [vmem:[%s637_s1 + $0xd8] sm:$0xff]  ;;  %v56_v20 = vld [vmem:[%s637_s1 + $0xd0] sm:$0xff]  ;;  %v118_v57 = vsub.s32 %v115_v44, %v117_v45 }
   0x6   :  { %364 = vmatprep.subr.mxu1 %v92_v5  ;;  %330 = vmatpush3.msra.mxu0 %v44_v6  ;;  %v90_v13 = vld [vmem:[%s637_s1 + $0x1e0] sm:$0xff]  ;;  %v89_v17 = vld [vmem:[%s637_s1 + $0x1d8] sm:$0xff]  ;;  %v88_v21 = vld [vmem:[%s637_s1 + $0x1d0] sm:$0xff] }
   0x7   :  { %365 = vmatpush3.msra.mxu1 %v76_v7  ;;  %331 = vmatprep.subr.mxu0 %v59_v8  ;;  %v42_v14 = vld [vmem:[%s637_s1 + $0x60] sm:$0xff]  ;;  %v41_v18 = vld [vmem:[%s637_s1 + $0x58] sm:$0xff]  ;;  %v40_v22 = vld [vmem:[%s637_s1 + $0x50] sm:$0xff] }
   0x8   :  { %366 = vmatprep.subr.mxu1 %v91_v9  ;;  %v74_v15 = vld [vmem:[%s637_s1 + $0x160] sm:$0xff]  ;;  %332 = vmatpush3.msra.mxu0 %v43_v10  ;;  %v73_v19 = vld [vmem:[%s637_s1 + $0x158] sm:$0xff]  ;;  %v72_v23 = vld [vmem:[%s637_s1 + $0x150] sm:$0xff] }
   0x9   :  { %367 = vmatpush3.msra.mxu1 %v75_v11  ;;  %333 = vmatprep.subr.mxu0 %v58_v12  ;;  %v55_v24 = vld [vmem:[%s637_s1 + $0xc8] sm:$0xff]  ;;  %v54_v28 = vld [vmem:[%s637_s1 + $0xc0] sm:$0xff]  ;;  %v53_v35 = vld [vmem:[%s637_s1 + $0xb8] sm:$0xff] }
   0xa   :  { %368 = vmatprep.subr.mxu1 %v90_v13  ;;  %334 = vmatpush3.msra.mxu0 %v42_v14  ;;  %v87_v25 = vld [vmem:[%s637_s1 + $0x1c8] sm:$0xff]  ;;  %v86_v29 = vld [vmem:[%s637_s1 + $0x1c0] sm:$0xff]  ;;  %v85_v36 = vld [vmem:[%s637_s1 + $0x1b8] sm:$0xff] }
   0xb   :  { %369 = vmatpush3.msra.mxu1 %v74_v15  ;;  %335 = vmatprep.subr.mxu0 %v57_v16  ;;  %v39_v26 = vld [vmem:[%s637_s1 + $0x48] sm:$0xff]  ;;  %v38_v30 = vld [vmem:[%s637_s1 + $0x40] sm:$0xff]  ;;  %v37_v37 = vld [vmem:[%s637_s1 + $0x38] sm:$0xff] }
   0xc   :  { %370 = vmatprep.subr.mxu1 %v89_v17  ;;  %336 = vmatpush3.msra.mxu0 %v41_v18  ;;  %v71_v27 = vld [vmem:[%s637_s1 + $0x148] sm:$0xff]  ;;  %v70_v31 = vld [vmem:[%s637_s1 + $0x140] sm:$0xff]  ;;  %v69_v38 = vld [vmem:[%s637_s1 + $0x138] sm:$0xff] }
   0xd   :  { %371 = vmatpush3.msra.mxu1 %v73_v19  ;;  %337 = vmatprep.subr.mxu0 %v56_v20  ;;  %v52_v39 = vld [vmem:[%s637_s1 + $0xb0] sm:$0xff]  ;;  %v51_v43 = vld [vmem:[%s637_s1 + $0xa8] sm:$0xff]  ;;  %v50_v49 = vld [vmem:[%s637_s1 + $0xa0] sm:$0xff] }
   0xe   :  { %372 = vmatprep.subr.mxu1 %v88_v21  ;;  %338 = vmatpush3.msra.mxu0 %v40_v22  ;;  %v84_v40 = vld [vmem:[%s637_s1 + $0x1b0] sm:$0xff]  ;;  %v83_v46 = vld [vmem:[%s637_s1 + $0x1a8] sm:$0xff]  ;;  %v82_v50 = vld [vmem:[%s637_s1 + $0x1a0] sm:$0xff] }
   0xf   :  { %373 = vmatpush3.msra.mxu1 %v72_v23  ;;  %339 = vmatprep.subr.mxu0 %v55_v24  ;;  %v36_v41 = vld [vmem:[%s637_s1 + $0x30] sm:$0xff]  ;;  %v35_v47 = vld [vmem:[%s637_s1 + $0x28] sm:$0xff]  ;;  %v34_v51 = vld [vmem:[%s637_s1 + $0x20] sm:$0xff] }
  0x10   :  { %374 = vmatprep.subr.mxu1 %v87_v25  ;;  %340 = vmatpush3.msra.mxu0 %v39_v26  ;;  %v68_v42 = vld [vmem:[%s637_s1 + $0x130] sm:$0xff]  ;;  %v67_v48 = vld [vmem:[%s637_s1 + $0x128] sm:$0xff]  ;;  %v66_v52 = vld [vmem:[%s637_s1 + $0x120] sm:$0xff] }
  0x11   :  { %375 = vmatpush3.msra.mxu1 %v71_v27  ;;  %341 = vmatprep.subr.mxu0 %v54_v28  ;;  %v49_v53 = vld [vmem:[%s637_s1 + $0x98] sm:$0xff]  ;;  %v48_v58 = vld [vmem:[%s637_s1 + $0x90] sm:$0xff]  ;;  %v402_v60 = vld.sshfl [vmem:[%s638_s0] sm:$0xff pattern:$0x75316420] }
  0x12   :  { %376 = vmatprep.subr.mxu1 %v86_v29  ;;  %342 = vmatpush3.msra.mxu0 %v38_v30  ;;  %v81_v54 = vld [vmem:[%s637_s1 + $0x198] sm:$0xff]  ;;  %v80_v59 = vld [vmem:[%s637_s1 + $0x190] sm:$0xff]  ;;  %v403_v61 = vld.sshfl [vmem:[%s638_s0 + $0x8] sm:$0xff pattern:$0x75316420] }
  0x13   :  { %377 = vmatpush3.msra.mxu1 %v70_v31  ;;  %343 = vmatprep.subr.mxu0 %v53_v35  ;;  %v33_v55 = vld [vmem:[%s637_s1 + $0x18] sm:$0xff]  ;;  %v404_v62 = vld.sshfl [vmem:[%s638_s0 + $0x10] sm:$0xff pattern:$0x75316420]  ;;  %v47_v2 = vld [vmem:[%s637_s1 + $0x88] sm:$0xff]  ;;  %v142_v8 = vcombine.high %v402_v60, %v403_v61  ;;  %v141_v10 = vcombine.low %v402_v60, %v403_v61 }
  0x14   :  { %378 = vmatprep.subr.mxu1 %v85_v36  ;;  %344 = vmatpush3.msra.mxu0 %v37_v37  ;;  %v65_v56 = vld [vmem:[%s637_s1 + $0x118] sm:$0xff]  ;;  %v32_v0 = vld [vmem:[%s637_s1 + $0x10] sm:$0xff]  ;;  %v79_v3 = vld [vmem:[%s637_s1 + $0x188] sm:$0xff] }
  0x15   :  { %379 = vmatpush3.msra.mxu1 %v69_v38  ;;  %345 = vmatprep.subr.mxu0 %v52_v39  ;;  %v405_v63 = vld.sshfl [vmem:[%s638_s0 + $0x18] sm:$0xff pattern:$0x75316420]  ;;  %v64_v1 = vld [vmem:[%s637_s1 + $0x110] sm:$0xff]  ;;  %v31_v4 = vld [vmem:[%s637_s1 + $0x8] sm:$0xff]  ;;  %v158_v14 = vrot.slane %v142_v8, %v118_v57  ;;  %v151_v16 = vrot.slane %v141_v10, %v118_v57 }
  0x16   :  { %380 = vmatprep.subr.mxu1 %v84_v40  ;;  %346 = vmatpush3.msra.mxu0 %v36_v41  ;;  %v63_v5 = vld [vmem:[%s637_s1 + $0x108] sm:$0xff]  ;;  %v46_v6 = vld [vmem:[%s637_s1 + $0x80] sm:$0xff]  ;;  %v144_v9 = vcombine.high %v404_v62, %v405_v63  ;;  %v143_v13 = vcombine.low %v404_v62, %v405_v63 }
  0x17   :  { %381 = vmatpush3.msra.mxu1 %v68_v42  ;;  %347 = vmatprep.subr.mxu0 %v51_v43  ;;  %v78_v7 = vld [vmem:[%s637_s1 + $0x180] sm:$0xff] }
  0x18   :  { %382 = vmatprep.subr.mxu1 %v83_v46  ;;  %348 = vmatpush3.msra.mxu0 %v35_v47  ;;  %v30_v11 = vld [vmem:[%s637_s1] sm:$0xff]  ;;  %v172_v15 = vrot.slane %v144_v9, %v118_v57  ;;  %v165_v17 = vrot.slane %v143_v13, %v118_v57 }
  0x19   :  { %383 = vmatpush3.msra.mxu1 %v67_v48  ;;  %349 = vmatprep.subr.mxu0 %v50_v49  ;;  %v62_v12 = vld [vmem:[%s637_s1 + $0x100] sm:$0xff] }
  0x1a   :  { %384 = vmatprep.subr.mxu1 %v82_v50  ;;  %350 = vmatpush3.msra.mxu0 %v34_v51  ;;  %v175_v18 = vcombine.low %v158_v14, %v172_v15  ;;  %v176_v19 = vcombine.high %v158_v14, %v172_v15  ;;  %v173_v20 = vcombine.low %v151_v16, %v165_v17  ;;  %v326_v24 = vld [vmem:[%s639_s2] ss:$0 sm:$0xff] }
  0x1b   :  { %385 = vmatpush3.msra.mxu1 %v66_v52  ;;  %351 = vmatprep.subr.mxu0 %v49_v53  ;;  %v174_v21 = vcombine.high %v151_v16, %v165_v17 }
  0x1c   :  { %386 = vmatprep.subr.mxu1 %v81_v54  ;;  %352 = vmatpush3.msra.mxu0 %v33_v55 }
  0x1d   :  { %387 = vmatpush3.msra.mxu1 %v65_v56  ;;  %353 = vmatprep.subr.mxu0 %v48_v58 }
  0x1e   :  { %388 = vmatprep.subr.mxu1 %v80_v59  ;;  %354 = vmatpush3.msra.mxu0 %v32_v0 }
  0x1f   :  { %389 = vmatpush3.msra.mxu1 %v64_v1  ;;  %355 = vmatprep.subr.mxu0 %v47_v2 }
  0x20   :  { %390 = vmatprep.subr.mxu1 %v79_v3  ;;  %356 = vmatpush3.msra.mxu0 %v31_v4 }
  0x21   :  { %391 = vmatpush3.msra.mxu1 %v63_v5  ;;  %357 = vmatprep.subr.mxu0 %v46_v6 }
  0x22   :  { %392 = vmatprep.subr.mxu1 %v78_v7  ;;  %358 = vmatpush3.msra.mxu0 %v30_v11 }
  0x23   :  { %393 = vmatpush3.msra.mxu1 %v62_v12  ;;  %245 = vmatprep.mubr.f32.mxu0 %v175_v18 }
  0x24   :  { %315 = vmatprep.mubr.f32.mxu1 %v176_v19  ;;  %246 = vmatmul.mubr.f32.vlgmr.msra.gmra.mxu0 %v173_v20 }
  0x25   :  { %316 = vmatmul.mubr.f32.vlgmr.msra.gmra.mxu1 %v174_v21 }
  0xe4   :  { %v359_v22 = vpop.f32.mrf.mxu0 }
  0xe5   :  { %v394_v23 = vpop.f32.mrf.mxu1 }
  0xe6   :  { %v360_v25 = vpop.f32.mrf.mxu0 }
  0xe7   :  { %v395_v26 = vpop.f32.mrf.mxu1  ;;  %v361_v27 = vadd.f32 %v360_v25, %v359_v22 }
  0xe8   :  { %v396_v29 = vadd.f32 %v395_v26, %v394_v23 }
  0xe9   :  { %v248_v28 = vadd.f32 %v361_v27, %v326_v24 }
  0xeb   :  { %v318_v30 = vadd.f32 %v396_v29, %v248_v28 }
  0xed   :  { %321 = vst [vmem:[%s640_s3] sm:$0xff] %v318_v30 }

</bundles_post_ra>
